<compile_context>
chip_gen: v6e
topology: v6e:2x2x1
jax: 0.10.0
libtpu: 0.0.40
codegen_flags: <defaults>
</compile_context>

<pallas_src>
import functools

import jax
import jax.numpy as jnp
from jax.experimental import pallas as pl
from jax.experimental.pallas import tpu as pltpu

EPS = 1e-5                       # nn.BatchNorm3d default eps
COMPUTE_DTYPE = jnp.bfloat16     # storage + MXU-operand dtype for x / y1 / y2
VMEM_LIMIT_BYTES = 48 * 1024 * 1024   # > default scoped limit, < v7x physical (64 MiB)


# ---------------------------------------------------------------------------
# Pallas kernels
# ---------------------------------------------------------------------------
def _conv1_stats_kernel(x_ref, w_ref, maskc_ref, y_ref, s_ref, ss_ref, *, rows, guard, offs):
    """3x3x3 conv (pad=1) of one whole sample + masked per-channel sum/sumsq for BN1."""
    cout = w_ref.shape[1]
    acc = jnp.zeros((cout, rows), jnp.float32)
    for t, off in enumerate(offs):                    # 27 static row-shifted windows
        acc = acc + jnp.dot(w_ref[t], x_ref[0, :, guard + off: guard + off + rows],
                            preferred_element_type=jnp.float32)
    # raw conv1 output (bias dropped: cancelled by BN1's mean subtraction)
    y_ref[0] = acc.astype(y_ref.dtype)
    # BN1 batch statistics over valid voxels only, as MXU matmuls against the 0/1 mask.
    m = maskc_ref[...]                                # (rows, 1)
    s_ref[0] = jnp.dot(acc, m, preferred_element_type=jnp.float32)
    ss_ref[0] = jnp.dot(acc * acc, m, preferred_element_type=jnp.float32)


def _conv2_stats_kernel(y1_ref, w_ref, sc1_ref, sh1_ref, maskr_ref, maskc_ref,
                        y2_ref, s_ref, ss_ref, act_ref, *, rows, guard, offs):
    """Fused BN1+ReLU of raw conv1 output, then 3x3x3 conv2, + masked sum/sumsq for BN2."""
    cout = w_ref.shape[1]
    act = jnp.maximum(y1_ref[0].astype(jnp.float32) * sc1_ref[...] + sh1_ref[...], 0.0)
    act = jnp.where(maskr_ref[...] != 0.0, act, 0.0)  # zero padded-border rows (conv2's padding)
    # Rebuild the guard-padded window in VMEM scratch (guards never touch HBM).
    act_ref[:, :guard] = jnp.zeros((cout, guard), act_ref.dtype)
    act_ref[:, guard + rows:] = jnp.zeros((cout, guard), act_ref.dtype)
    act_ref[:, guard:guard + rows] = act.astype(act_ref.dtype)

    acc = jnp.zeros((cout, rows), jnp.float32)
    for t, off in enumerate(offs):
        acc = acc + jnp.dot(w_ref[t], act_ref[:, guard + off: guard + off + rows],
                            preferred_element_type=jnp.float32)
    y2_ref[0] = acc.astype(y2_ref.dtype)
    m = maskc_ref[...]
    s_ref[0] = jnp.dot(acc, m, preferred_element_type=jnp.float32)
    ss_ref[0] = jnp.dot(acc * acc, m, preferred_element_type=jnp.float32)


def _bn2_res_relu_kernel(y2_ref, x_ref, wres_ref, bres_ref, sc2_ref, sh2_ref, o_ref,
                         *, rows, guard):
    """Fused BN2 + residual 1x1x1 conv (recomputed from x) + add + ReLU."""
    res = jnp.dot(wres_ref[...], x_ref[0, :, guard:guard + rows],
                  preferred_element_type=jnp.float32) + bres_ref[...]
    out = jnp.maximum(y2_ref[0].astype(jnp.float32) * sc2_ref[...] + sh2_ref[...] + res, 0.0)
    o_ref[0] = out.astype(o_ref.dtype)


# ---------------------------------------------------------------------------
# Wrapper
# ---------------------------------------------------------------------------
def residual_block_forward(x, params):
    """x: (N, Cin, D, H, W) float32 (PyTorch NCDHW).  Returns (N, Cout, D, H, W) float32."""
    n, cin, dd, h, w = x.shape
    cout = params["w1"].shape[0]
    dp, hp, wp = dd + 2, h + 2, w + 2
    hpwp = hp * wp
    rows = dp * hpwp                                       # flattened zero-padded volume
    guard = ((hpwp + wp + 1 + 127) // 128) * 128           # lane-aligned guard >= max |tap shift|
    rows_g = rows + 2 * guard
    cnt = float(n * dd * h * w)
    offs = [(kd - 1) * hpwp + (kh - 1) * wp + (kw - 1)
            for kd in range(3) for kh in range(3) for kw in range(3)]

    # glue (cheap XLA): keep NCDHW, zero-pad D/H/W, flatten spatial onto lanes, add guards, bf16.
    x_pad = jnp.pad(x, ((0, 0), (0, 0), (1, 1), (1, 1), (1, 1)))        # (N, Cin, Dp, Hp, Wp)
    x_flat = jnp.pad(x_pad.reshape(n, cin, rows), ((0, 0), (0, 0), (guard, guard)))
    x_flat = x_flat.astype(COMPUTE_DTYPE)                               # (N, Cin, rows_g)

    # tap-major weights, (Cout, Cin) per tap (channels on sublanes).
    w1 = jnp.transpose(params["w1"], (2, 3, 4, 0, 1)).reshape(27, cout, cin).astype(COMPUTE_DTYPE)
    w2 = jnp.transpose(params["w2"], (2, 3, 4, 0, 1)).reshape(27, cout, cout).astype(COMPUTE_DTYPE)
    wres = params["wres"].reshape(cout, cin).astype(COMPUTE_DTYPE)
    bres = params["bres"].reshape(cout, 1)
    g1, beta1 = params["g1"].reshape(cout, 1), params["beta1"].reshape(cout, 1)
    g2, beta2 = params["g2"].reshape(cout, 1), params["beta2"].reshape(cout, 1)
    # NOTE: params["b1"] / params["b2"] intentionally unused: a conv bias is exactly cancelled by
    # the following batch-stat BatchNorm's mean subtraction (only valid in training-stat mode).

    # valid-voxel masks over flattened padded rows.
    r = jnp.arange(rows)
    dpad, hpad, wpad = r // hpwp, (r % hpwp) // wp, r % wp
    valid = ((dpad >= 1) & (dpad <= dd) & (hpad >= 1) & (hpad <= h)
             & (wpad >= 1) & (wpad <= w)).astype(jnp.float32)
    mask_col = valid.reshape(rows, 1)                      # stats matmul RHS
    mask_row = valid.reshape(1, rows)                      # conv2-input zeroing mask

    grid = (n,)
    cparams = pltpu.CompilerParams(dimension_semantics=("parallel",),
                                   vmem_limit_bytes=VMEM_LIMIT_BYTES)
    stats_spec = pl.BlockSpec((1, cout, 1), lambda ni: (ni, 0, 0))
    stats_shape = jax.ShapeDtypeStruct((n, cout, 1), jnp.float32)

    def full(shape):
        nd = len(shape)
        return pl.BlockSpec(shape, lambda ni: (0,) * nd)

    # ---- pass 1: conv1 + BN1 statistics -------------------------------------------------
    y1, s1, ss1 = pl.pallas_call(
        functools.partial(_conv1_stats_kernel, rows=rows, guard=guard, offs=offs),
        grid=grid,
        in_specs=[pl.BlockSpec((1, cin, rows_g), lambda ni: (ni, 0, 0)),
                  full((27, cout, cin)), full((rows, 1))],
        out_specs=(pl.BlockSpec((1, cout, rows), lambda ni: (ni, 0, 0)),
                   stats_spec, stats_spec),
        out_shape=(jax.ShapeDtypeStruct((n, cout, rows), COMPUTE_DTYPE),
                   stats_shape, stats_shape),
        compiler_params=cparams,
    )(x_flat, w1, mask_col)

    mean1 = jnp.sum(s1, axis=0) / cnt
    # TODO(synk): E[x^2]-E[x]^2 in f32 can cancel for huge voxel counts; Welford if it ever bites.
    var1 = jnp.sum(ss1, axis=0) / cnt - mean1 * mean1
    scale1 = g1 * jax.lax.rsqrt(var1 + EPS)
    shift1 = beta1 - mean1 * scale1

    # ---- pass 2: fused BN1 + ReLU -> conv2 + BN2 statistics ------------------------------
    y2, s2, ss2 = pl.pallas_call(
        functools.partial(_conv2_stats_kernel, rows=rows, guard=guard, offs=offs),
        grid=grid,
        in_specs=[pl.BlockSpec((1, cout, rows), lambda ni: (ni, 0, 0)),
                  full((27, cout, cout)), full((cout, 1)), full((cout, 1)),
                  full((1, rows)), full((rows, 1))],
        out_specs=(pl.BlockSpec((1, cout, rows), lambda ni: (ni, 0, 0)),
                   stats_spec, stats_spec),
        out_shape=(jax.ShapeDtypeStruct((n, cout, rows), COMPUTE_DTYPE),
                   stats_shape, stats_shape),
        scratch_shapes=[pltpu.VMEM((cout, rows_g), COMPUTE_DTYPE)],
        compiler_params=cparams,
    )(y1, w2, scale1, shift1, mask_row, mask_col)

    mean2 = jnp.sum(s2, axis=0) / cnt
    var2 = jnp.sum(ss2, axis=0) / cnt - mean2 * mean2
    scale2 = g2 * jax.lax.rsqrt(var2 + EPS)
    shift2 = beta2 - mean2 * scale2

    # ---- pass 3: fused BN2 + residual (1x1x1 conv of x) + add + ReLU ----------------------
    out_rows = pl.pallas_call(
        functools.partial(_bn2_res_relu_kernel, rows=rows, guard=guard),
        grid=grid,
        in_specs=[pl.BlockSpec((1, cout, rows), lambda ni: (ni, 0, 0)),
                  pl.BlockSpec((1, cin, rows_g), lambda ni: (ni, 0, 0)),
                  full((cout, cin)), full((cout, 1)), full((cout, 1)), full((cout, 1))],
        out_specs=pl.BlockSpec((1, cout, rows), lambda ni: (ni, 0, 0)),
        out_shape=jax.ShapeDtypeStruct((n, cout, rows), jnp.float32),
        compiler_params=cparams,
    )(y2, x_flat, wres, bres, scale2, shift2)

    # output is already channel-major (NC, rows): just drop the padding border -- no transpose.
    return out_rows.reshape(n, cout, dp, hp, wp)[:, :, 1:1 + dd, 1:1 + h, 1:1 + w]


# ---------------------------------------------------------------------------
# Pure-JAX reference (validation)
# ---------------------------------------------------------------------------
def residual_block_reference(x, params):
    dn = ("NCDHW", "OIDHW", "NCDHW")
    conv = functools.partial(jax.lax.conv_general_dilated,
                             window_strides=(1, 1, 1),
                             dimension_numbers=dn,
                             precision=jax.lax.Precision.HIGHEST)

    def bcast(v):
        return v[None, :, None, None, None]

    def bn(y, g, b):
        mean = jnp.mean(y, axis=(0, 2, 3, 4), keepdims=True)
        var = jnp.mean((y - mean) ** 2, axis=(0, 2, 3, 4), keepdims=True)
        return (y - mean) * jax.lax.rsqrt(var + EPS) * bcast(g) + bcast(b)

    res = conv(x, params["wres"], padding="VALID") + bcast(params["bres"])
    y = conv(x, params["w1"], padding=((1, 1), (1, 1), (1, 1))) + bcast(params["b1"])
    y = jnp.maximum(bn(y, params["g1"], params["beta1"]), 0.0)
    y = conv(y, params["w2"], padding=((1, 1), (1, 1), (1, 1))) + bcast(params["b2"])
    y = bn(y, params["g2"], params["beta2"]) + res
    return jnp.maximum(y, 0.0)


# ---------------------------------------------------------------------------
# Main
# ---------------------------------------------------------------------------
if __name__ == "__main__":
    N, CIN, COUT, D, H, W = 2, 4, 8, 8, 8, 8

    key = jax.random.PRNGKey(0)
    keys = jax.random.split(key, 11)
    params = {
        "wres": 0.2 * jax.random.normal(keys[0], (COUT, CIN, 1, 1, 1), jnp.float32),
        "bres": 0.1 * jax.random.normal(keys[1], (COUT,), jnp.float32),
        "w1":   0.2 * jax.random.normal(keys[2], (COUT, CIN, 3, 3, 3), jnp.float32),
        "b1":   0.1 * jax.random.normal(keys[3], (COUT,), jnp.float32),
        "g1":   1.0 + 0.1 * jax.random.normal(keys[4], (COUT,), jnp.float32),
        "beta1": 0.1 * jax.random.normal(keys[5], (COUT,), jnp.float32),
        "w2":   0.2 * jax.random.normal(keys[6], (COUT, COUT, 3, 3, 3), jnp.float32),
        "b2":   0.1 * jax.random.normal(keys[7], (COUT,), jnp.float32),
        "g2":   1.0 + 0.1 * jax.random.normal(keys[8], (COUT,), jnp.float32),
        "beta2": 0.1 * jax.random.normal(keys[9], (COUT,), jnp.float32),
    }
    x = jax.random.normal(keys[10], (N, CIN, D, H, W), jnp.float32)

    out = jax.block_until_ready(jax.jit(residual_block_forward)(x, params))
    ref = jax.block_until_ready(residual_block_reference(x, params))

    assert out.shape == (N, COUT, D, H, W), out.shape
    tol = 2e-3 if COMPUTE_DTYPE == jnp.float32 else 3e-2
    if not jnp.allclose(out, ref, atol=tol, rtol=tol):
        max_err = float(jnp.max(jnp.abs(out - ref)))
        raise AssertionError(f"mismatch vs reference, max abs err = {max_err}")

    print("KERNEL_OK")
</pallas_src>

<mosaic_0001>
module attributes {stable_mosaic.version = 11 : i64} {
  func.func @_conv1_stats_kernel(%arg0: i32, %arg1: memref<1x4x1256xbf16, #tpu.memory_space<vmem>>, %arg2: memref<27x8x4xbf16, #tpu.memory_space<vmem>>, %arg3: memref<1000x1xf32, #tpu.memory_space<vmem>>, %arg4: memref<1x8x1000xbf16, #tpu.memory_space<vmem>>, %arg5: memref<1x8x1xf32, #tpu.memory_space<vmem>>, %arg6: memref<1x8x1xf32, #tpu.memory_space<vmem>>) attributes {dimension_semantics = [#tpu.dimension_semantics<parallel>], iteration_bounds = array<i64: 2>, scalar_prefetch = 0 : i64, scratch_operands = 0 : i64, tpu.core_type = #tpu.core_type<tc>, window_params = [{transform_indices = @transform_0, window_bounds = array<i64: 1, 4, 1256>}, {pipeline_mode = #tpu.pipeline_mode<synchronous>, transform_indices = @transform_1, window_bounds = array<i64: 27, 8, 4>}, {pipeline_mode = #tpu.pipeline_mode<synchronous>, transform_indices = @transform_2, window_bounds = array<i64: 1000, 1>}, {transform_indices = @transform_3, window_bounds = array<i64: 1, 8, 1000>}, {transform_indices = @transform_4, window_bounds = array<i64: 1, 8, 1>}, {transform_indices = @transform_5, window_bounds = array<i64: 1, 8, 1>}]} {
    %cst = arith.constant 0.000000e+00 : f32
    %0 = vector.broadcast %cst : f32 to vector<8x1000xf32>
    %c0 = arith.constant 0 : index
    %c0_0 = arith.constant 0 : index
    %c0_1 = arith.constant 0 : index
    %1 = vector.load %arg2[%c0, %c0_0, %c0_1] : memref<27x8x4xbf16, #tpu.memory_space<vmem>>, vector<1x8x4xbf16>
    %2 = vector.shape_cast %1 : vector<1x8x4xbf16> to vector<8x4xbf16>
    %c0_2 = arith.constant 0 : index
    %c0_3 = arith.constant 0 : index
    %c17 = arith.constant 17 : index
    %3 = vector.load %arg1[%c0_2, %c0_3, %c17] : memref<1x4x1256xbf16, #tpu.memory_space<vmem>>, vector<1x4x1000xbf16>
    %4 = vector.shape_cast %3 : vector<1x4x1000xbf16> to vector<4x1000xbf16>
    %cst_4 = arith.constant dense<0.000000e+00> : vector<8x1000xf32>
    %5 = tpu.matmul %2, %4, %cst_4 {dimension_numbers = #tpu.dot_dimension_numbers<[1], [0], [0], [1], [0, 0, 1, 1], [], []>} : vector<8x4xbf16>, vector<4x1000xbf16>, vector<8x1000xf32> -> vector<8x1000xf32>
    %6 = arith.addf %0, %5 : vector<8x1000xf32>
    %c1 = arith.constant 1 : index
    %c0_5 = arith.constant 0 : index
    %c0_6 = arith.constant 0 : index
    %7 = vector.load %arg2[%c1, %c0_5, %c0_6] : memref<27x8x4xbf16, #tpu.memory_space<vmem>>, vector<1x8x4xbf16>
    %8 = vector.shape_cast %7 : vector<1x8x4xbf16> to vector<8x4xbf16>
    %c0_7 = arith.constant 0 : index
    %c0_8 = arith.constant 0 : index
    %c18 = arith.constant 18 : index
    %9 = vector.load %arg1[%c0_7, %c0_8, %c18] : memref<1x4x1256xbf16, #tpu.memory_space<vmem>>, vector<1x4x1000xbf16>
    %10 = vector.shape_cast %9 : vector<1x4x1000xbf16> to vector<4x1000xbf16>
    %cst_9 = arith.constant dense<0.000000e+00> : vector<8x1000xf32>
    %11 = tpu.matmul %8, %10, %cst_9 {dimension_numbers = #tpu.dot_dimension_numbers<[1], [0], [0], [1], [0, 0, 1, 1], [], []>} : vector<8x4xbf16>, vector<4x1000xbf16>, vector<8x1000xf32> -> vector<8x1000xf32>
    %12 = arith.addf %6, %11 : vector<8x1000xf32>
    %c2 = arith.constant 2 : index
    %c0_10 = arith.constant 0 : index
    %c0_11 = arith.constant 0 : index
    %13 = vector.load %arg2[%c2, %c0_10, %c0_11] : memref<27x8x4xbf16, #tpu.memory_space<vmem>>, vector<1x8x4xbf16>
    %14 = vector.shape_cast %13 : vector<1x8x4xbf16> to vector<8x4xbf16>
    %c0_12 = arith.constant 0 : index
    %c0_13 = arith.constant 0 : index
    %c19 = arith.constant 19 : index
    %15 = vector.load %arg1[%c0_12, %c0_13, %c19] : memref<1x4x1256xbf16, #tpu.memory_space<vmem>>, vector<1x4x1000xbf16>
    %16 = vector.shape_cast %15 : vector<1x4x1000xbf16> to vector<4x1000xbf16>
    %cst_14 = arith.constant dense<0.000000e+00> : vector<8x1000xf32>
    %17 = tpu.matmul %14, %16, %cst_14 {dimension_numbers = #tpu.dot_dimension_numbers<[1], [0], [0], [1], [0, 0, 1, 1], [], []>} : vector<8x4xbf16>, vector<4x1000xbf16>, vector<8x1000xf32> -> vector<8x1000xf32>
    %18 = arith.addf %12, %17 : vector<8x1000xf32>
    %c3 = arith.constant 3 : index
    %c0_15 = arith.constant 0 : index
    %c0_16 = arith.constant 0 : index
    %19 = vector.load %arg2[%c3, %c0_15, %c0_16] : memref<27x8x4xbf16, #tpu.memory_space<vmem>>, vector<1x8x4xbf16>
    %20 = vector.shape_cast %19 : vector<1x8x4xbf16> to vector<8x4xbf16>
    %c0_17 = arith.constant 0 : index
    %c0_18 = arith.constant 0 : index
    %c27 = arith.constant 27 : index
    %21 = vector.load %arg1[%c0_17, %c0_18, %c27] : memref<1x4x1256xbf16, #tpu.memory_space<vmem>>, vector<1x4x1000xbf16>
    %22 = vector.shape_cast %21 : vector<1x4x1000xbf16> to vector<4x1000xbf16>
    %cst_19 = arith.constant dense<0.000000e+00> : vector<8x1000xf32>
    %23 = tpu.matmul %20, %22, %cst_19 {dimension_numbers = #tpu.dot_dimension_numbers<[1], [0], [0], [1], [0, 0, 1, 1], [], []>} : vector<8x4xbf16>, vector<4x1000xbf16>, vector<8x1000xf32> -> vector<8x1000xf32>
    %24 = arith.addf %18, %23 : vector<8x1000xf32>
    %c4 = arith.constant 4 : index
    %c0_20 = arith.constant 0 : index
    %c0_21 = arith.constant 0 : index
    %25 = vector.load %arg2[%c4, %c0_20, %c0_21] : memref<27x8x4xbf16, #tpu.memory_space<vmem>>, vector<1x8x4xbf16>
    %26 = vector.shape_cast %25 : vector<1x8x4xbf16> to vector<8x4xbf16>
    %c0_22 = arith.constant 0 : index
    %c0_23 = arith.constant 0 : index
    %c28 = arith.constant 28 : index
    %27 = vector.load %arg1[%c0_22, %c0_23, %c28] : memref<1x4x1256xbf16, #tpu.memory_space<vmem>>, vector<1x4x1000xbf16>
    %28 = vector.shape_cast %27 : vector<1x4x1000xbf16> to vector<4x1000xbf16>
    %cst_24 = arith.constant dense<0.000000e+00> : vector<8x1000xf32>
    %29 = tpu.matmul %26, %28, %cst_24 {dimension_numbers = #tpu.dot_dimension_numbers<[1], [0], [0], [1], [0, 0, 1, 1], [], []>} : vector<8x4xbf16>, vector<4x1000xbf16>, vector<8x1000xf32> -> vector<8x1000xf32>
    %30 = arith.addf %24, %29 : vector<8x1000xf32>
    %c5 = arith.constant 5 : index
    %c0_25 = arith.constant 0 : index
    %c0_26 = arith.constant 0 : index
    %31 = vector.load %arg2[%c5, %c0_25, %c0_26] : memref<27x8x4xbf16, #tpu.memory_space<vmem>>, vector<1x8x4xbf16>
    %32 = vector.shape_cast %31 : vector<1x8x4xbf16> to vector<8x4xbf16>
    %c0_27 = arith.constant 0 : index
    %c0_28 = arith.constant 0 : index
    %c29 = arith.constant 29 : index
    %33 = vector.load %arg1[%c0_27, %c0_28, %c29] : memref<1x4x1256xbf16, #tpu.memory_space<vmem>>, vector<1x4x1000xbf16>
    %34 = vector.shape_cast %33 : vector<1x4x1000xbf16> to vector<4x1000xbf16>
    %cst_29 = arith.constant dense<0.000000e+00> : vector<8x1000xf32>
    %35 = tpu.matmul %32, %34, %cst_29 {dimension_numbers = #tpu.dot_dimension_numbers<[1], [0], [0], [1], [0, 0, 1, 1], [], []>} : vector<8x4xbf16>, vector<4x1000xbf16>, vector<8x1000xf32> -> vector<8x1000xf32>
    %36 = arith.addf %30, %35 : vector<8x1000xf32>
    %c6 = arith.constant 6 : index
    %c0_30 = arith.constant 0 : index
    %c0_31 = arith.constant 0 : index
    %37 = vector.load %arg2[%c6, %c0_30, %c0_31] : memref<27x8x4xbf16, #tpu.memory_space<vmem>>, vector<1x8x4xbf16>
    %38 = vector.shape_cast %37 : vector<1x8x4xbf16> to vector<8x4xbf16>
    %c0_32 = arith.constant 0 : index
    %c0_33 = arith.constant 0 : index
    %c37 = arith.constant 37 : index
    %39 = vector.load %arg1[%c0_32, %c0_33, %c37] : memref<1x4x1256xbf16, #tpu.memory_space<vmem>>, vector<1x4x1000xbf16>
    %40 = vector.shape_cast %39 : vector<1x4x1000xbf16> to vector<4x1000xbf16>
    %cst_34 = arith.constant dense<0.000000e+00> : vector<8x1000xf32>
    %41 = tpu.matmul %38, %40, %cst_34 {dimension_numbers = #tpu.dot_dimension_numbers<[1], [0], [0], [1], [0, 0, 1, 1], [], []>} : vector<8x4xbf16>, vector<4x1000xbf16>, vector<8x1000xf32> -> vector<8x1000xf32>
    %42 = arith.addf %36, %41 : vector<8x1000xf32>
    %c7 = arith.constant 7 : index
    %c0_35 = arith.constant 0 : index
    %c0_36 = arith.constant 0 : index
    %43 = vector.load %arg2[%c7, %c0_35, %c0_36] : memref<27x8x4xbf16, #tpu.memory_space<vmem>>, vector<1x8x4xbf16>
    %44 = vector.shape_cast %43 : vector<1x8x4xbf16> to vector<8x4xbf16>
    %c0_37 = arith.constant 0 : index
    %c0_38 = arith.constant 0 : index
    %c38 = arith.constant 38 : index
    %45 = vector.load %arg1[%c0_37, %c0_38, %c38] : memref<1x4x1256xbf16, #tpu.memory_space<vmem>>, vector<1x4x1000xbf16>
    %46 = vector.shape_cast %45 : vector<1x4x1000xbf16> to vector<4x1000xbf16>
    %cst_39 = arith.constant dense<0.000000e+00> : vector<8x1000xf32>
    %47 = tpu.matmul %44, %46, %cst_39 {dimension_numbers = #tpu.dot_dimension_numbers<[1], [0], [0], [1], [0, 0, 1, 1], [], []>} : vector<8x4xbf16>, vector<4x1000xbf16>, vector<8x1000xf32> -> vector<8x1000xf32>
    %48 = arith.addf %42, %47 : vector<8x1000xf32>
    %c8 = arith.constant 8 : index
    %c0_40 = arith.constant 0 : index
    %c0_41 = arith.constant 0 : index
    %49 = vector.load %arg2[%c8, %c0_40, %c0_41] : memref<27x8x4xbf16, #tpu.memory_space<vmem>>, vector<1x8x4xbf16>
    %50 = vector.shape_cast %49 : vector<1x8x4xbf16> to vector<8x4xbf16>
    %c0_42 = arith.constant 0 : index
    %c0_43 = arith.constant 0 : index
    %c39 = arith.constant 39 : index
    %51 = vector.load %arg1[%c0_42, %c0_43, %c39] : memref<1x4x1256xbf16, #tpu.memory_space<vmem>>, vector<1x4x1000xbf16>
    %52 = vector.shape_cast %51 : vector<1x4x1000xbf16> to vector<4x1000xbf16>
    %cst_44 = arith.constant dense<0.000000e+00> : vector<8x1000xf32>
    %53 = tpu.matmul %50, %52, %cst_44 {dimension_numbers = #tpu.dot_dimension_numbers<[1], [0], [0], [1], [0, 0, 1, 1], [], []>} : vector<8x4xbf16>, vector<4x1000xbf16>, vector<8x1000xf32> -> vector<8x1000xf32>
    %54 = arith.addf %48, %53 : vector<8x1000xf32>
    %c9 = arith.constant 9 : index
    %c0_45 = arith.constant 0 : index
    %c0_46 = arith.constant 0 : index
    %55 = vector.load %arg2[%c9, %c0_45, %c0_46] : memref<27x8x4xbf16, #tpu.memory_space<vmem>>, vector<1x8x4xbf16>
    %56 = vector.shape_cast %55 : vector<1x8x4xbf16> to vector<8x4xbf16>
    %c0_47 = arith.constant 0 : index
    %c0_48 = arith.constant 0 : index
    %c117 = arith.constant 117 : index
    %57 = vector.load %arg1[%c0_47, %c0_48, %c117] : memref<1x4x1256xbf16, #tpu.memory_space<vmem>>, vector<1x4x1000xbf16>
    %58 = vector.shape_cast %57 : vector<1x4x1000xbf16> to vector<4x1000xbf16>
    %cst_49 = arith.constant dense<0.000000e+00> : vector<8x1000xf32>
    %59 = tpu.matmul %56, %58, %cst_49 {dimension_numbers = #tpu.dot_dimension_numbers<[1], [0], [0], [1], [0, 0, 1, 1], [], []>} : vector<8x4xbf16>, vector<4x1000xbf16>, vector<8x1000xf32> -> vector<8x1000xf32>
    %60 = arith.addf %54, %59 : vector<8x1000xf32>
    %c10 = arith.constant 10 : index
    %c0_50 = arith.constant 0 : index
    %c0_51 = arith.constant 0 : index
    %61 = vector.load %arg2[%c10, %c0_50, %c0_51] : memref<27x8x4xbf16, #tpu.memory_space<vmem>>, vector<1x8x4xbf16>
    %62 = vector.shape_cast %61 : vector<1x8x4xbf16> to vector<8x4xbf16>
    %c0_52 = arith.constant 0 : index
    %c0_53 = arith.constant 0 : index
    %c118 = arith.constant 118 : index
    %63 = vector.load %arg1[%c0_52, %c0_53, %c118] : memref<1x4x1256xbf16, #tpu.memory_space<vmem>>, vector<1x4x1000xbf16>
    %64 = vector.shape_cast %63 : vector<1x4x1000xbf16> to vector<4x1000xbf16>
    %cst_54 = arith.constant dense<0.000000e+00> : vector<8x1000xf32>
    %65 = tpu.matmul %62, %64, %cst_54 {dimension_numbers = #tpu.dot_dimension_numbers<[1], [0], [0], [1], [0, 0, 1, 1], [], []>} : vector<8x4xbf16>, vector<4x1000xbf16>, vector<8x1000xf32> -> vector<8x1000xf32>
    %66 = arith.addf %60, %65 : vector<8x1000xf32>
    %c11 = arith.constant 11 : index
    %c0_55 = arith.constant 0 : index
    %c0_56 = arith.constant 0 : index
    %67 = vector.load %arg2[%c11, %c0_55, %c0_56] : memref<27x8x4xbf16, #tpu.memory_space<vmem>>, vector<1x8x4xbf16>
    %68 = vector.shape_cast %67 : vector<1x8x4xbf16> to vector<8x4xbf16>
    %c0_57 = arith.constant 0 : index
    %c0_58 = arith.constant 0 : index
    %c119 = arith.constant 119 : index
    %69 = vector.load %arg1[%c0_57, %c0_58, %c119] : memref<1x4x1256xbf16, #tpu.memory_space<vmem>>, vector<1x4x1000xbf16>
    %70 = vector.shape_cast %69 : vector<1x4x1000xbf16> to vector<4x1000xbf16>
    %cst_59 = arith.constant dense<0.000000e+00> : vector<8x1000xf32>
    %71 = tpu.matmul %68, %70, %cst_59 {dimension_numbers = #tpu.dot_dimension_numbers<[1], [0], [0], [1], [0, 0, 1, 1], [], []>} : vector<8x4xbf16>, vector<4x1000xbf16>, vector<8x1000xf32> -> vector<8x1000xf32>
    %72 = arith.addf %66, %71 : vector<8x1000xf32>
    %c12 = arith.constant 12 : index
    %c0_60 = arith.constant 0 : index
    %c0_61 = arith.constant 0 : index
    %73 = vector.load %arg2[%c12, %c0_60, %c0_61] : memref<27x8x4xbf16, #tpu.memory_space<vmem>>, vector<1x8x4xbf16>
    %74 = vector.shape_cast %73 : vector<1x8x4xbf16> to vector<8x4xbf16>
    %c0_62 = arith.constant 0 : index
    %c0_63 = arith.constant 0 : index
    %c127 = arith.constant 127 : index
    %75 = vector.load %arg1[%c0_62, %c0_63, %c127] : memref<1x4x1256xbf16, #tpu.memory_space<vmem>>, vector<1x4x1000xbf16>
    %76 = vector.shape_cast %75 : vector<1x4x1000xbf16> to vector<4x1000xbf16>
    %cst_64 = arith.constant dense<0.000000e+00> : vector<8x1000xf32>
    %77 = tpu.matmul %74, %76, %cst_64 {dimension_numbers = #tpu.dot_dimension_numbers<[1], [0], [0], [1], [0, 0, 1, 1], [], []>} : vector<8x4xbf16>, vector<4x1000xbf16>, vector<8x1000xf32> -> vector<8x1000xf32>
    %78 = arith.addf %72, %77 : vector<8x1000xf32>
    %c13 = arith.constant 13 : index
    %c0_65 = arith.constant 0 : index
    %c0_66 = arith.constant 0 : index
    %79 = vector.load %arg2[%c13, %c0_65, %c0_66] : memref<27x8x4xbf16, #tpu.memory_space<vmem>>, vector<1x8x4xbf16>
    %80 = vector.shape_cast %79 : vector<1x8x4xbf16> to vector<8x4xbf16>
    %c0_67 = arith.constant 0 : index
    %c0_68 = arith.constant 0 : index
    %c128 = arith.constant 128 : index
    %81 = vector.load %arg1[%c0_67, %c0_68, %c128] : memref<1x4x1256xbf16, #tpu.memory_space<vmem>>, vector<1x4x1000xbf16>
    %82 = vector.shape_cast %81 : vector<1x4x1000xbf16> to vector<4x1000xbf16>
    %cst_69 = arith.constant dense<0.000000e+00> : vector<8x1000xf32>
    %83 = tpu.matmul %80, %82, %cst_69 {dimension_numbers = #tpu.dot_dimension_numbers<[1], [0], [0], [1], [0, 0, 1, 1], [], []>} : vector<8x4xbf16>, vector<4x1000xbf16>, vector<8x1000xf32> -> vector<8x1000xf32>
    %84 = arith.addf %78, %83 : vector<8x1000xf32>
    %c14 = arith.constant 14 : index
    %c0_70 = arith.constant 0 : index
    %c0_71 = arith.constant 0 : index
    %85 = vector.load %arg2[%c14, %c0_70, %c0_71] : memref<27x8x4xbf16, #tpu.memory_space<vmem>>, vector<1x8x4xbf16>
    %86 = vector.shape_cast %85 : vector<1x8x4xbf16> to vector<8x4xbf16>
    %c0_72 = arith.constant 0 : index
    %c0_73 = arith.constant 0 : index
    %c129 = arith.constant 129 : index
    %87 = vector.load %arg1[%c0_72, %c0_73, %c129] : memref<1x4x1256xbf16, #tpu.memory_space<vmem>>, vector<1x4x1000xbf16>
    %88 = vector.shape_cast %87 : vector<1x4x1000xbf16> to vector<4x1000xbf16>
    %cst_74 = arith.constant dense<0.000000e+00> : vector<8x1000xf32>
    %89 = tpu.matmul %86, %88, %cst_74 {dimension_numbers = #tpu.dot_dimension_numbers<[1], [0], [0], [1], [0, 0, 1, 1], [], []>} : vector<8x4xbf16>, vector<4x1000xbf16>, vector<8x1000xf32> -> vector<8x1000xf32>
    %90 = arith.addf %84, %89 : vector<8x1000xf32>
    %c15 = arith.constant 15 : index
    %c0_75 = arith.constant 0 : index
    %c0_76 = arith.constant 0 : index
    %91 = vector.load %arg2[%c15, %c0_75, %c0_76] : memref<27x8x4xbf16, #tpu.memory_space<vmem>>, vector<1x8x4xbf16>
    %92 = vector.shape_cast %91 : vector<1x8x4xbf16> to vector<8x4xbf16>
    %c0_77 = arith.constant 0 : index
    %c0_78 = arith.constant 0 : index
    %c137 = arith.constant 137 : index
    %93 = vector.load %arg1[%c0_77, %c0_78, %c137] : memref<1x4x1256xbf16, #tpu.memory_space<vmem>>, vector<1x4x1000xbf16>
    %94 = vector.shape_cast %93 : vector<1x4x1000xbf16> to vector<4x1000xbf16>
    %cst_79 = arith.constant dense<0.000000e+00> : vector<8x1000xf32>
    %95 = tpu.matmul %92, %94, %cst_79 {dimension_numbers = #tpu.dot_dimension_numbers<[1], [0], [0], [1], [0, 0, 1, 1], [], []>} : vector<8x4xbf16>, vector<4x1000xbf16>, vector<8x1000xf32> -> vector<8x1000xf32>
    %96 = arith.addf %90, %95 : vector<8x1000xf32>
    %c16 = arith.constant 16 : index
    %c0_80 = arith.constant 0 : index
    %c0_81 = arith.constant 0 : index
    %97 = vector.load %arg2[%c16, %c0_80, %c0_81] : memref<27x8x4xbf16, #tpu.memory_space<vmem>>, vector<1x8x4xbf16>
    %98 = vector.shape_cast %97 : vector<1x8x4xbf16> to vector<8x4xbf16>
    %c0_82 = arith.constant 0 : index
    %c0_83 = arith.constant 0 : index
    %c138 = arith.constant 138 : index
    %99 = vector.load %arg1[%c0_82, %c0_83, %c138] : memref<1x4x1256xbf16, #tpu.memory_space<vmem>>, vector<1x4x1000xbf16>
    %100 = vector.shape_cast %99 : vector<1x4x1000xbf16> to vector<4x1000xbf16>
    %cst_84 = arith.constant dense<0.000000e+00> : vector<8x1000xf32>
    %101 = tpu.matmul %98, %100, %cst_84 {dimension_numbers = #tpu.dot_dimension_numbers<[1], [0], [0], [1], [0, 0, 1, 1], [], []>} : vector<8x4xbf16>, vector<4x1000xbf16>, vector<8x1000xf32> -> vector<8x1000xf32>
    %102 = arith.addf %96, %101 : vector<8x1000xf32>
    %c17_85 = arith.constant 17 : index
    %c0_86 = arith.constant 0 : index
    %c0_87 = arith.constant 0 : index
    %103 = vector.load %arg2[%c17_85, %c0_86, %c0_87] : memref<27x8x4xbf16, #tpu.memory_space<vmem>>, vector<1x8x4xbf16>
    %104 = vector.shape_cast %103 : vector<1x8x4xbf16> to vector<8x4xbf16>
    %c0_88 = arith.constant 0 : index
    %c0_89 = arith.constant 0 : index
    %c139 = arith.constant 139 : index
    %105 = vector.load %arg1[%c0_88, %c0_89, %c139] : memref<1x4x1256xbf16, #tpu.memory_space<vmem>>, vector<1x4x1000xbf16>
    %106 = vector.shape_cast %105 : vector<1x4x1000xbf16> to vector<4x1000xbf16>
    %cst_90 = arith.constant dense<0.000000e+00> : vector<8x1000xf32>
    %107 = tpu.matmul %104, %106, %cst_90 {dimension_numbers = #tpu.dot_dimension_numbers<[1], [0], [0], [1], [0, 0, 1, 1], [], []>} : vector<8x4xbf16>, vector<4x1000xbf16>, vector<8x1000xf32> -> vector<8x1000xf32>
    %108 = arith.addf %102, %107 : vector<8x1000xf32>
    %c18_91 = arith.constant 18 : index
    %c0_92 = arith.constant 0 : index
    %c0_93 = arith.constant 0 : index
    %109 = vector.load %arg2[%c18_91, %c0_92, %c0_93] : memref<27x8x4xbf16, #tpu.memory_space<vmem>>, vector<1x8x4xbf16>
    %110 = vector.shape_cast %109 : vector<1x8x4xbf16> to vector<8x4xbf16>
    %c0_94 = arith.constant 0 : index
    %c0_95 = arith.constant 0 : index
    %c217 = arith.constant 217 : index
    %111 = vector.load %arg1[%c0_94, %c0_95, %c217] : memref<1x4x1256xbf16, #tpu.memory_space<vmem>>, vector<1x4x1000xbf16>
    %112 = vector.shape_cast %111 : vector<1x4x1000xbf16> to vector<4x1000xbf16>
    %cst_96 = arith.constant dense<0.000000e+00> : vector<8x1000xf32>
    %113 = tpu.matmul %110, %112, %cst_96 {dimension_numbers = #tpu.dot_dimension_numbers<[1], [0], [0], [1], [0, 0, 1, 1], [], []>} : vector<8x4xbf16>, vector<4x1000xbf16>, vector<8x1000xf32> -> vector<8x1000xf32>
    %114 = arith.addf %108, %113 : vector<8x1000xf32>
    %c19_97 = arith.constant 19 : index
    %c0_98 = arith.constant 0 : index
    %c0_99 = arith.constant 0 : index
    %115 = vector.load %arg2[%c19_97, %c0_98, %c0_99] : memref<27x8x4xbf16, #tpu.memory_space<vmem>>, vector<1x8x4xbf16>
    %116 = vector.shape_cast %115 : vector<1x8x4xbf16> to vector<8x4xbf16>
    %c0_100 = arith.constant 0 : index
    %c0_101 = arith.constant 0 : index
    %c218 = arith.constant 218 : index
    %117 = vector.load %arg1[%c0_100, %c0_101, %c218] : memref<1x4x1256xbf16, #tpu.memory_space<vmem>>, vector<1x4x1000xbf16>
    %118 = vector.shape_cast %117 : vector<1x4x1000xbf16> to vector<4x1000xbf16>
    %cst_102 = arith.constant dense<0.000000e+00> : vector<8x1000xf32>
    %119 = tpu.matmul %116, %118, %cst_102 {dimension_numbers = #tpu.dot_dimension_numbers<[1], [0], [0], [1], [0, 0, 1, 1], [], []>} : vector<8x4xbf16>, vector<4x1000xbf16>, vector<8x1000xf32> -> vector<8x1000xf32>
    %120 = arith.addf %114, %119 : vector<8x1000xf32>
    %c20 = arith.constant 20 : index
    %c0_103 = arith.constant 0 : index
    %c0_104 = arith.constant 0 : index
    %121 = vector.load %arg2[%c20, %c0_103, %c0_104] : memref<27x8x4xbf16, #tpu.memory_space<vmem>>, vector<1x8x4xbf16>
    %122 = vector.shape_cast %121 : vector<1x8x4xbf16> to vector<8x4xbf16>
    %c0_105 = arith.constant 0 : index
    %c0_106 = arith.constant 0 : index
    %c219 = arith.constant 219 : index
    %123 = vector.load %arg1[%c0_105, %c0_106, %c219] : memref<1x4x1256xbf16, #tpu.memory_space<vmem>>, vector<1x4x1000xbf16>
    %124 = vector.shape_cast %123 : vector<1x4x1000xbf16> to vector<4x1000xbf16>
    %cst_107 = arith.constant dense<0.000000e+00> : vector<8x1000xf32>
    %125 = tpu.matmul %122, %124, %cst_107 {dimension_numbers = #tpu.dot_dimension_numbers<[1], [0], [0], [1], [0, 0, 1, 1], [], []>} : vector<8x4xbf16>, vector<4x1000xbf16>, vector<8x1000xf32> -> vector<8x1000xf32>
    %126 = arith.addf %120, %125 : vector<8x1000xf32>
    %c21 = arith.constant 21 : index
    %c0_108 = arith.constant 0 : index
    %c0_109 = arith.constant 0 : index
    %127 = vector.load %arg2[%c21, %c0_108, %c0_109] : memref<27x8x4xbf16, #tpu.memory_space<vmem>>, vector<1x8x4xbf16>
    %128 = vector.shape_cast %127 : vector<1x8x4xbf16> to vector<8x4xbf16>
    %c0_110 = arith.constant 0 : index
    %c0_111 = arith.constant 0 : index
    %c227 = arith.constant 227 : index
    %129 = vector.load %arg1[%c0_110, %c0_111, %c227] : memref<1x4x1256xbf16, #tpu.memory_space<vmem>>, vector<1x4x1000xbf16>
    %130 = vector.shape_cast %129 : vector<1x4x1000xbf16> to vector<4x1000xbf16>
    %cst_112 = arith.constant dense<0.000000e+00> : vector<8x1000xf32>
    %131 = tpu.matmul %128, %130, %cst_112 {dimension_numbers = #tpu.dot_dimension_numbers<[1], [0], [0], [1], [0, 0, 1, 1], [], []>} : vector<8x4xbf16>, vector<4x1000xbf16>, vector<8x1000xf32> -> vector<8x1000xf32>
    %132 = arith.addf %126, %131 : vector<8x1000xf32>
    %c22 = arith.constant 22 : index
    %c0_113 = arith.constant 0 : index
    %c0_114 = arith.constant 0 : index
    %133 = vector.load %arg2[%c22, %c0_113, %c0_114] : memref<27x8x4xbf16, #tpu.memory_space<vmem>>, vector<1x8x4xbf16>
    %134 = vector.shape_cast %133 : vector<1x8x4xbf16> to vector<8x4xbf16>
    %c0_115 = arith.constant 0 : index
    %c0_116 = arith.constant 0 : index
    %c228 = arith.constant 228 : index
    %135 = vector.load %arg1[%c0_115, %c0_116, %c228] : memref<1x4x1256xbf16, #tpu.memory_space<vmem>>, vector<1x4x1000xbf16>
    %136 = vector.shape_cast %135 : vector<1x4x1000xbf16> to vector<4x1000xbf16>
    %cst_117 = arith.constant dense<0.000000e+00> : vector<8x1000xf32>
    %137 = tpu.matmul %134, %136, %cst_117 {dimension_numbers = #tpu.dot_dimension_numbers<[1], [0], [0], [1], [0, 0, 1, 1], [], []>} : vector<8x4xbf16>, vector<4x1000xbf16>, vector<8x1000xf32> -> vector<8x1000xf32>
    %138 = arith.addf %132, %137 : vector<8x1000xf32>
    %c23 = arith.constant 23 : index
    %c0_118 = arith.constant 0 : index
    %c0_119 = arith.constant 0 : index
    %139 = vector.load %arg2[%c23, %c0_118, %c0_119] : memref<27x8x4xbf16, #tpu.memory_space<vmem>>, vector<1x8x4xbf16>
    %140 = vector.shape_cast %139 : vector<1x8x4xbf16> to vector<8x4xbf16>
    %c0_120 = arith.constant 0 : index
    %c0_121 = arith.constant 0 : index
    %c229 = arith.constant 229 : index
    %141 = vector.load %arg1[%c0_120, %c0_121, %c229] : memref<1x4x1256xbf16, #tpu.memory_space<vmem>>, vector<1x4x1000xbf16>
    %142 = vector.shape_cast %141 : vector<1x4x1000xbf16> to vector<4x1000xbf16>
    %cst_122 = arith.constant dense<0.000000e+00> : vector<8x1000xf32>
    %143 = tpu.matmul %140, %142, %cst_122 {dimension_numbers = #tpu.dot_dimension_numbers<[1], [0], [0], [1], [0, 0, 1, 1], [], []>} : vector<8x4xbf16>, vector<4x1000xbf16>, vector<8x1000xf32> -> vector<8x1000xf32>
    %144 = arith.addf %138, %143 : vector<8x1000xf32>
    %c24 = arith.constant 24 : index
    %c0_123 = arith.constant 0 : index
    %c0_124 = arith.constant 0 : index
    %145 = vector.load %arg2[%c24, %c0_123, %c0_124] : memref<27x8x4xbf16, #tpu.memory_space<vmem>>, vector<1x8x4xbf16>
    %146 = vector.shape_cast %145 : vector<1x8x4xbf16> to vector<8x4xbf16>
    %c0_125 = arith.constant 0 : index
    %c0_126 = arith.constant 0 : index
    %c237 = arith.constant 237 : index
    %147 = vector.load %arg1[%c0_125, %c0_126, %c237] : memref<1x4x1256xbf16, #tpu.memory_space<vmem>>, vector<1x4x1000xbf16>
    %148 = vector.shape_cast %147 : vector<1x4x1000xbf16> to vector<4x1000xbf16>
    %cst_127 = arith.constant dense<0.000000e+00> : vector<8x1000xf32>
    %149 = tpu.matmul %146, %148, %cst_127 {dimension_numbers = #tpu.dot_dimension_numbers<[1], [0], [0], [1], [0, 0, 1, 1], [], []>} : vector<8x4xbf16>, vector<4x1000xbf16>, vector<8x1000xf32> -> vector<8x1000xf32>
    %150 = arith.addf %144, %149 : vector<8x1000xf32>
    %c25 = arith.constant 25 : index
    %c0_128 = arith.constant 0 : index
    %c0_129 = arith.constant 0 : index
    %151 = vector.load %arg2[%c25, %c0_128, %c0_129] : memref<27x8x4xbf16, #tpu.memory_space<vmem>>, vector<1x8x4xbf16>
    %152 = vector.shape_cast %151 : vector<1x8x4xbf16> to vector<8x4xbf16>
    %c0_130 = arith.constant 0 : index
    %c0_131 = arith.constant 0 : index
    %c238 = arith.constant 238 : index
    %153 = vector.load %arg1[%c0_130, %c0_131, %c238] : memref<1x4x1256xbf16, #tpu.memory_space<vmem>>, vector<1x4x1000xbf16>
    %154 = vector.shape_cast %153 : vector<1x4x1000xbf16> to vector<4x1000xbf16>
    %cst_132 = arith.constant dense<0.000000e+00> : vector<8x1000xf32>
    %155 = tpu.matmul %152, %154, %cst_132 {dimension_numbers = #tpu.dot_dimension_numbers<[1], [0], [0], [1], [0, 0, 1, 1], [], []>} : vector<8x4xbf16>, vector<4x1000xbf16>, vector<8x1000xf32> -> vector<8x1000xf32>
    %156 = arith.addf %150, %155 : vector<8x1000xf32>
    %c26 = arith.constant 26 : index
    %c0_133 = arith.constant 0 : index
    %c0_134 = arith.constant 0 : index
    %157 = vector.load %arg2[%c26, %c0_133, %c0_134] : memref<27x8x4xbf16, #tpu.memory_space<vmem>>, vector<1x8x4xbf16>
    %158 = vector.shape_cast %157 : vector<1x8x4xbf16> to vector<8x4xbf16>
    %c0_135 = arith.constant 0 : index
    %c0_136 = arith.constant 0 : index
    %c239 = arith.constant 239 : index
    %159 = vector.load %arg1[%c0_135, %c0_136, %c239] : memref<1x4x1256xbf16, #tpu.memory_space<vmem>>, vector<1x4x1000xbf16>
    %160 = vector.shape_cast %159 : vector<1x4x1000xbf16> to vector<4x1000xbf16>
    %cst_137 = arith.constant dense<0.000000e+00> : vector<8x1000xf32>
    %161 = tpu.matmul %158, %160, %cst_137 {dimension_numbers = #tpu.dot_dimension_numbers<[1], [0], [0], [1], [0, 0, 1, 1], [], []>} : vector<8x4xbf16>, vector<4x1000xbf16>, vector<8x1000xf32> -> vector<8x1000xf32>
    %162 = arith.addf %156, %161 : vector<8x1000xf32>
    %163 = arith.truncf %162 : vector<8x1000xf32> to vector<8x1000xbf16>
    %c0_138 = arith.constant 0 : index
    %c0_139 = arith.constant 0 : index
    %c0_140 = arith.constant 0 : index
    %164 = vector.load %arg4[%c0_138, %c0_139, %c0_140] : memref<1x8x1000xbf16, #tpu.memory_space<vmem>>, vector<1x8x1000xbf16>
    %165 = vector.shape_cast %164 : vector<1x8x1000xbf16> to vector<8x1000xbf16>
    %166 = vector.shape_cast %163 : vector<8x1000xbf16> to vector<1x8x1000xbf16>
    tpu.vector_store %arg4[%c0_138, %c0_139, %c0_140], %166 {strides = array<i32>} : memref<1x8x1000xbf16, #tpu.memory_space<vmem>>, vector<1x8x1000xbf16>,
    %c0_141 = arith.constant 0 : index
    %c0_142 = arith.constant 0 : index
    %167 = vector.load %arg3[%c0_141, %c0_142] : memref<1000x1xf32, #tpu.memory_space<vmem>>, vector<1000x1xf32>
    %cst_143 = arith.constant dense<0.000000e+00> : vector<8x1xf32>
    %168 = tpu.matmul %162, %167, %cst_143 {dimension_numbers = #tpu.dot_dimension_numbers<[1], [0], [0], [1], [0, 0, 1, 1], [], []>} : vector<8x1000xf32>, vector<1000x1xf32>, vector<8x1xf32> -> vector<8x1xf32>
    %c0_144 = arith.constant 0 : index
    %c0_145 = arith.constant 0 : index
    %c0_146 = arith.constant 0 : index
    %169 = vector.load %arg5[%c0_144, %c0_145, %c0_146] : memref<1x8x1xf32, #tpu.memory_space<vmem>>, vector<1x8x1xf32>
    %170 = vector.shape_cast %169 : vector<1x8x1xf32> to vector<8x1xf32>
    %171 = vector.shape_cast %168 : vector<8x1xf32> to vector<1x8x1xf32>
    tpu.vector_store %arg5[%c0_144, %c0_145, %c0_146], %171 {strides = array<i32>} : memref<1x8x1xf32, #tpu.memory_space<vmem>>, vector<1x8x1xf32>,
    %172 = arith.mulf %162, %162 : vector<8x1000xf32>
    %cst_147 = arith.constant dense<0.000000e+00> : vector<8x1xf32>
    %173 = tpu.matmul %172, %167, %cst_147 {dimension_numbers = #tpu.dot_dimension_numbers<[1], [0], [0], [1], [0, 0, 1, 1], [], []>} : vector<8x1000xf32>, vector<1000x1xf32>, vector<8x1xf32> -> vector<8x1xf32>
    %c0_148 = arith.constant 0 : index
    %c0_149 = arith.constant 0 : index
    %c0_150 = arith.constant 0 : index
    %174 = vector.load %arg6[%c0_148, %c0_149, %c0_150] : memref<1x8x1xf32, #tpu.memory_space<vmem>>, vector<1x8x1xf32>
    %175 = vector.shape_cast %174 : vector<1x8x1xf32> to vector<8x1xf32>
    %176 = vector.shape_cast %173 : vector<8x1xf32> to vector<1x8x1xf32>
    tpu.vector_store %arg6[%c0_148, %c0_149, %c0_150], %176 {strides = array<i32>} : memref<1x8x1xf32, #tpu.memory_space<vmem>>, vector<1x8x1xf32>,
    return
  }
  func.func @transform_0(%arg0: i32) -> (i32, i32, i32) {
    %c0_i32 = arith.constant 0 : i32
    %c0_i32_0 = arith.constant 0 : i32
    %c0_i32_1 = arith.constant 0 : i32
    return %arg0, %c0_i32, %c0_i32_0 : i32, i32, i32
  }
  func.func @transform_1(%arg0: i32) -> (i32, i32, i32) {
    %c0_i32 = arith.constant 0 : i32
    %c0_i32_0 = arith.constant 0 : i32
    %c0_i32_1 = arith.constant 0 : i32
    %c0_i32_2 = arith.constant 0 : i32
    return %c0_i32, %c0_i32_0, %c0_i32_1 : i32, i32, i32
  }
  func.func @transform_2(%arg0: i32) -> (i32, i32) {
    %c0_i32 = arith.constant 0 : i32
    %c0_i32_0 = arith.constant 0 : i32
    %c0_i32_1 = arith.constant 0 : i32
    return %c0_i32, %c0_i32_0 : i32, i32
  }
  func.func @transform_3(%arg0: i32) -> (i32, i32, i32) {
    %c0_i32 = arith.constant 0 : i32
    %c0_i32_0 = arith.constant 0 : i32
    %c0_i32_1 = arith.constant 0 : i32
    return %arg0, %c0_i32, %c0_i32_0 : i32, i32, i32
  }
  func.func @transform_4(%arg0: i32) -> (i32, i32, i32) {
    %c0_i32 = arith.constant 0 : i32
    %c0_i32_0 = arith.constant 0 : i32
    %c0_i32_1 = arith.constant 0 : i32
    return %arg0, %c0_i32, %c0_i32_0 : i32, i32, i32
  }
  func.func @transform_5(%arg0: i32) -> (i32, i32, i32) {
    %c0_i32 = arith.constant 0 : i32
    %c0_i32_0 = arith.constant 0 : i32
    %c0_i32_1 = arith.constant 0 : i32
    return %arg0, %c0_i32, %c0_i32_0 : i32, i32, i32
  }
}

module attributes {stable_mosaic.version = 11 : i64} {
  func.func @_bn2_res_relu_kernel(%arg0: i32, %arg1: memref<1x8x1000xbf16, #tpu.memory_space<vmem>>, %arg2: memref<1x4x1256xbf16, #tpu.memory_space<vmem>>, %arg3: memref<8x4xbf16, #tpu.memory_space<vmem>>, %arg4: memref<8x1xf32, #tpu.memory_space<vmem>>, %arg5: memref<8x1xf32, #tpu.memory_space<vmem>>, %arg6: memref<8x1xf32, #tpu.memory_space<vmem>>, %arg7: memref<1x8x1000xf32, #tpu.memory_space<vmem>>) attributes {dimension_semantics = [#tpu.dimension_semantics<parallel>], iteration_bounds = array<i64: 2>, scalar_prefetch = 0 : i64, scratch_operands = 0 : i64, tpu.core_type = #tpu.core_type<tc>, window_params = [{transform_indices = @transform_0, window_bounds = array<i64: 1, 8, 1000>}, {transform_indices = @transform_1, window_bounds = array<i64: 1, 4, 1256>}, {pipeline_mode = #tpu.pipeline_mode<synchronous>, transform_indices = @transform_2, window_bounds = array<i64: 8, 4>}, {pipeline_mode = #tpu.pipeline_mode<synchronous>, transform_indices = @transform_3, window_bounds = array<i64: 8, 1>}, {pipeline_mode = #tpu.pipeline_mode<synchronous>, transform_indices = @transform_4, window_bounds = array<i64: 8, 1>}, {pipeline_mode = #tpu.pipeline_mode<synchronous>, transform_indices = @transform_5, window_bounds = array<i64: 8, 1>}, {transform_indices = @transform_6, window_bounds = array<i64: 1, 8, 1000>}]} {
    %c0 = arith.constant 0 : index
    %c0_0 = arith.constant 0 : index
    %0 = vector.load %arg3[%c0, %c0_0] : memref<8x4xbf16, #tpu.memory_space<vmem>>, vector<8x4xbf16>
    %c0_1 = arith.constant 0 : index
    %c0_2 = arith.constant 0 : index
    %c128 = arith.constant 128 : index
    %1 = vector.load %arg2[%c0_1, %c0_2, %c128] : memref<1x4x1256xbf16, #tpu.memory_space<vmem>>, vector<1x4x1000xbf16>
    %2 = vector.shape_cast %1 : vector<1x4x1000xbf16> to vector<4x1000xbf16>
    %cst = arith.constant dense<0.000000e+00> : vector<8x1000xf32>
    %3 = tpu.matmul %0, %2, %cst {dimension_numbers = #tpu.dot_dimension_numbers<[1], [0], [0], [1], [0, 0, 1, 1], [], []>} : vector<8x4xbf16>, vector<4x1000xbf16>, vector<8x1000xf32> -> vector<8x1000xf32>
    %c0_3 = arith.constant 0 : index
    %c0_4 = arith.constant 0 : index
    %4 = vector.load %arg4[%c0_3, %c0_4] : memref<8x1xf32, #tpu.memory_space<vmem>>, vector<8x1xf32>
    %5 = vector.broadcast %4 : vector<8x1xf32> to vector<8x1000xf32>
    %6 = arith.addf %3, %5 : vector<8x1000xf32>
    %c0_5 = arith.constant 0 : index
    %c0_6 = arith.constant 0 : index
    %c0_7 = arith.constant 0 : index
    %7 = vector.load %arg1[%c0_5, %c0_6, %c0_7] : memref<1x8x1000xbf16, #tpu.memory_space<vmem>>, vector<1x8x1000xbf16>
    %8 = vector.shape_cast %7 : vector<1x8x1000xbf16> to vector<8x1000xbf16>
    %9 = arith.extf %8 : vector<8x1000xbf16> to vector<8x1000xf32>
    %c0_8 = arith.constant 0 : index
    %c0_9 = arith.constant 0 : index
    %10 = vector.load %arg5[%c0_8, %c0_9] : memref<8x1xf32, #tpu.memory_space<vmem>>, vector<8x1xf32>
    %11 = vector.broadcast %10 : vector<8x1xf32> to vector<8x1000xf32>
    %12 = arith.mulf %9, %11 : vector<8x1000xf32>
    %c0_10 = arith.constant 0 : index
    %c0_11 = arith.constant 0 : index
    %13 = vector.load %arg6[%c0_10, %c0_11] : memref<8x1xf32, #tpu.memory_space<vmem>>, vector<8x1xf32>
    %14 = vector.broadcast %13 : vector<8x1xf32> to vector<8x1000xf32>
    %15 = arith.addf %12, %14 : vector<8x1000xf32>
    %16 = arith.addf %15, %6 : vector<8x1000xf32>
    %cst_12 = arith.constant 0.000000e+00 : f32
    %17 = vector.broadcast %cst_12 : f32 to vector<8x1000xf32>
    %18 = arith.maximumf %16, %17 : vector<8x1000xf32>
    %c0_13 = arith.constant 0 : index
    %c0_14 = arith.constant 0 : index
    %c0_15 = arith.constant 0 : index
    %19 = vector.load %arg7[%c0_13, %c0_14, %c0_15] : memref<1x8x1000xf32, #tpu.memory_space<vmem>>, vector<1x8x1000xf32>
    %20 = vector.shape_cast %19 : vector<1x8x1000xf32> to vector<8x1000xf32>
    %21 = vector.shape_cast %18 : vector<8x1000xf32> to vector<1x8x1000xf32>
    tpu.vector_store %arg7[%c0_13, %c0_14, %c0_15], %21 {strides = array<i32>} : memref<1x8x1000xf32, #tpu.memory_space<vmem>>, vector<1x8x1000xf32>,
    return
  }
  func.func @transform_0(%arg0: i32) -> (i32, i32, i32) {
    %c0_i32 = arith.constant 0 : i32
    %c0_i32_0 = arith.constant 0 : i32
    %c0_i32_1 = arith.constant 0 : i32
    return %arg0, %c0_i32, %c0_i32_0 : i32, i32, i32
  }
  func.func @transform_1(%arg0: i32) -> (i32, i32, i32) {
    %c0_i32 = arith.constant 0 : i32
    %c0_i32_0 = arith.constant 0 : i32
    %c0_i32_1 = arith.constant 0 : i32
    return %arg0, %c0_i32, %c0_i32_0 : i32, i32, i32
  }
  func.func @transform_2(%arg0: i32) -> (i32, i32) {
    %c0_i32 = arith.constant 0 : i32
    %c0_i32_0 = arith.constant 0 : i32
    %c0_i32_1 = arith.constant 0 : i32
    return %c0_i32, %c0_i32_0 : i32, i32
  }
  func.func @transform_3(%arg0: i32) -> (i32, i32) {
    %c0_i32 = arith.constant 0 : i32
    %c0_i32_0 = arith.constant 0 : i32
    %c0_i32_1 = arith.constant 0 : i32
    return %c0_i32, %c0_i32_0 : i32, i32
  }
  func.func @transform_4(%arg0: i32) -> (i32, i32) {
    %c0_i32 = arith.constant 0 : i32
    %c0_i32_0 = arith.constant 0 : i32
    %c0_i32_1 = arith.constant 0 : i32
    return %c0_i32, %c0_i32_0 : i32, i32
  }
  func.func @transform_5(%arg0: i32) -> (i32, i32) {
    %c0_i32 = arith.constant 0 : i32
    %c0_i32_0 = arith.constant 0 : i32
    %c0_i32_1 = arith.constant 0 : i32
    return %c0_i32, %c0_i32_0 : i32, i32
  }
  func.func @transform_6(%arg0: i32) -> (i32, i32, i32) {
    %c0_i32 = arith.constant 0 : i32
    %c0_i32_0 = arith.constant 0 : i32
    %c0_i32_1 = arith.constant 0 : i32
    return %arg0, %c0_i32, %c0_i32_0 : i32, i32, i32
  }
}

module attributes {stable_mosaic.version = 11 : i64} {
  func.func @_conv2_stats_kernel(%arg0: i32, %arg1: memref<1x8x1000xbf16, #tpu.memory_space<vmem>>, %arg2: memref<27x8x8xbf16, #tpu.memory_space<vmem>>, %arg3: memref<8x1xf32, #tpu.memory_space<vmem>>, %arg4: memref<8x1xf32, #tpu.memory_space<vmem>>, %arg5: memref<1x1000xf32, #tpu.memory_space<vmem>>, %arg6: memref<1000x1xf32, #tpu.memory_space<vmem>>, %arg7: memref<1x8x1000xbf16, #tpu.memory_space<vmem>>, %arg8: memref<1x8x1xf32, #tpu.memory_space<vmem>>, %arg9: memref<1x8x1xf32, #tpu.memory_space<vmem>>, %arg10: memref<8x1256xbf16, #tpu.memory_space<vmem>>) attributes {dimension_semantics = [#tpu.dimension_semantics<parallel>], iteration_bounds = array<i64: 2>, scalar_prefetch = 0 : i64, scratch_operands = 1 : i64, tpu.core_type = #tpu.core_type<tc>, window_params = [{transform_indices = @transform_0, window_bounds = array<i64: 1, 8, 1000>}, {pipeline_mode = #tpu.pipeline_mode<synchronous>, transform_indices = @transform_1, window_bounds = array<i64: 27, 8, 8>}, {pipeline_mode = #tpu.pipeline_mode<synchronous>, transform_indices = @transform_2, window_bounds = array<i64: 8, 1>}, {pipeline_mode = #tpu.pipeline_mode<synchronous>, transform_indices = @transform_3, window_bounds = array<i64: 8, 1>}, {pipeline_mode = #tpu.pipeline_mode<synchronous>, transform_indices = @transform_4, window_bounds = array<i64: 1, 1000>}, {pipeline_mode = #tpu.pipeline_mode<synchronous>, transform_indices = @transform_5, window_bounds = array<i64: 1000, 1>}, {transform_indices = @transform_6, window_bounds = array<i64: 1, 8, 1000>}, {transform_indices = @transform_7, window_bounds = array<i64: 1, 8, 1>}, {transform_indices = @transform_8, window_bounds = array<i64: 1, 8, 1>}]} {
    %c0 = arith.constant 0 : index
    %c0_0 = arith.constant 0 : index
    %c0_1 = arith.constant 0 : index
    %0 = vector.load %arg1[%c0, %c0_0, %c0_1] : memref<1x8x1000xbf16, #tpu.memory_space<vmem>>, vector<1x8x1000xbf16>
    %1 = vector.shape_cast %0 : vector<1x8x1000xbf16> to vector<8x1000xbf16>
    %2 = arith.extf %1 : vector<8x1000xbf16> to vector<8x1000xf32>
    %c0_2 = arith.constant 0 : index
    %c0_3 = arith.constant 0 : index
    %3 = vector.load %arg3[%c0_2, %c0_3] : memref<8x1xf32, #tpu.memory_space<vmem>>, vector<8x1xf32>
    %4 = vector.broadcast %3 : vector<8x1xf32> to vector<8x1000xf32>
    %5 = arith.mulf %2, %4 : vector<8x1000xf32>
    %c0_4 = arith.constant 0 : index
    %c0_5 = arith.constant 0 : index
    %6 = vector.load %arg4[%c0_4, %c0_5] : memref<8x1xf32, #tpu.memory_space<vmem>>, vector<8x1xf32>
    %7 = vector.broadcast %6 : vector<8x1xf32> to vector<8x1000xf32>
    %8 = arith.addf %5, %7 : vector<8x1000xf32>
    %cst = arith.constant 0.000000e+00 : f32
    %9 = vector.broadcast %cst : f32 to vector<8x1000xf32>
    %10 = arith.maximumf %8, %9 : vector<8x1000xf32>
    %c0_6 = arith.constant 0 : index
    %c0_7 = arith.constant 0 : index
    %11 = vector.load %arg5[%c0_6, %c0_7] : memref<1x1000xf32, #tpu.memory_space<vmem>>, vector<1x1000xf32>
    %cst_8 = arith.constant 0.000000e+00 : f32
    %12 = vector.broadcast %cst_8 : f32 to vector<1x1000xf32>
    %13 = arith.cmpf one, %11, %12 : vector<1x1000xf32>
    %cst_9 = arith.constant 0.000000e+00 : f32
    %14 = vector.shape_cast %13 : vector<1x1000xi1> to vector<1x1000xi1>
    %15 = vector.broadcast %14 : vector<1x1000xi1> to vector<8x1000xi1>
    %16 = vector.broadcast %cst_9 : f32 to vector<8x1000xf32>
    %17 = arith.select %15, %10, %16 : vector<8x1000xi1>, vector<8x1000xf32>
    %cst_10 = arith.constant 0.000000e+00 : bf16
    %18 = vector.broadcast %cst_10 : bf16 to vector<8x128xbf16>
    %c0_11 = arith.constant 0 : index
    %c0_12 = arith.constant 0 : index
    %19 = vector.load %arg10[%c0_11, %c0_12] : memref<8x1256xbf16, #tpu.memory_space<vmem>>, vector<8x128xbf16>
    tpu.vector_store %arg10[%c0_11, %c0_12], %18 {strides = array<i32>} : memref<8x1256xbf16, #tpu.memory_space<vmem>>, vector<8x128xbf16>,
    %cst_13 = arith.constant 0.000000e+00 : bf16
    %20 = vector.broadcast %cst_13 : bf16 to vector<8x128xbf16>
    %c0_14 = arith.constant 0 : index
    %c1128 = arith.constant 1128 : index
    %21 = vector.load %arg10[%c0_14, %c1128] : memref<8x1256xbf16, #tpu.memory_space<vmem>>, vector<8x128xbf16>
    tpu.vector_store %arg10[%c0_14, %c1128], %20 {strides = array<i32>} : memref<8x1256xbf16, #tpu.memory_space<vmem>>, vector<8x128xbf16>,
    %22 = arith.truncf %17 : vector<8x1000xf32> to vector<8x1000xbf16>
    %c0_15 = arith.constant 0 : index
    %c128 = arith.constant 128 : index
    %23 = vector.load %arg10[%c0_15, %c128] : memref<8x1256xbf16, #tpu.memory_space<vmem>>, vector<8x1000xbf16>
    tpu.vector_store %arg10[%c0_15, %c128], %22 {strides = array<i32>} : memref<8x1256xbf16, #tpu.memory_space<vmem>>, vector<8x1000xbf16>,
    %cst_16 = arith.constant 0.000000e+00 : f32
    %24 = vector.broadcast %cst_16 : f32 to vector<8x1000xf32>
    %c0_17 = arith.constant 0 : index
    %c0_18 = arith.constant 0 : index
    %c0_19 = arith.constant 0 : index
    %25 = vector.load %arg2[%c0_17, %c0_18, %c0_19] : memref<27x8x8xbf16, #tpu.memory_space<vmem>>, vector<1x8x8xbf16>
    %26 = vector.shape_cast %25 : vector<1x8x8xbf16> to vector<8x8xbf16>
    %c0_20 = arith.constant 0 : index
    %c17 = arith.constant 17 : index
    %27 = vector.load %arg10[%c0_20, %c17] : memref<8x1256xbf16, #tpu.memory_space<vmem>>, vector<8x1000xbf16>
    %cst_21 = arith.constant dense<0.000000e+00> : vector<8x1000xf32>
    %28 = tpu.matmul %26, %27, %cst_21 {dimension_numbers = #tpu.dot_dimension_numbers<[1], [0], [0], [1], [0, 0, 1, 1], [], []>} : vector<8x8xbf16>, vector<8x1000xbf16>, vector<8x1000xf32> -> vector<8x1000xf32>
    %29 = arith.addf %24, %28 : vector<8x1000xf32>
    %c1 = arith.constant 1 : index
    %c0_22 = arith.constant 0 : index
    %c0_23 = arith.constant 0 : index
    %30 = vector.load %arg2[%c1, %c0_22, %c0_23] : memref<27x8x8xbf16, #tpu.memory_space<vmem>>, vector<1x8x8xbf16>
    %31 = vector.shape_cast %30 : vector<1x8x8xbf16> to vector<8x8xbf16>
    %c0_24 = arith.constant 0 : index
    %c18 = arith.constant 18 : index
    %32 = vector.load %arg10[%c0_24, %c18] : memref<8x1256xbf16, #tpu.memory_space<vmem>>, vector<8x1000xbf16>
    %cst_25 = arith.constant dense<0.000000e+00> : vector<8x1000xf32>
    %33 = tpu.matmul %31, %32, %cst_25 {dimension_numbers = #tpu.dot_dimension_numbers<[1], [0], [0], [1], [0, 0, 1, 1], [], []>} : vector<8x8xbf16>, vector<8x1000xbf16>, vector<8x1000xf32> -> vector<8x1000xf32>
    %34 = arith.addf %29, %33 : vector<8x1000xf32>
    %c2 = arith.constant 2 : index
    %c0_26 = arith.constant 0 : index
    %c0_27 = arith.constant 0 : index
    %35 = vector.load %arg2[%c2, %c0_26, %c0_27] : memref<27x8x8xbf16, #tpu.memory_space<vmem>>, vector<1x8x8xbf16>
    %36 = vector.shape_cast %35 : vector<1x8x8xbf16> to vector<8x8xbf16>
    %c0_28 = arith.constant 0 : index
    %c19 = arith.constant 19 : index
    %37 = vector.load %arg10[%c0_28, %c19] : memref<8x1256xbf16, #tpu.memory_space<vmem>>, vector<8x1000xbf16>
    %cst_29 = arith.constant dense<0.000000e+00> : vector<8x1000xf32>
    %38 = tpu.matmul %36, %37, %cst_29 {dimension_numbers = #tpu.dot_dimension_numbers<[1], [0], [0], [1], [0, 0, 1, 1], [], []>} : vector<8x8xbf16>, vector<8x1000xbf16>, vector<8x1000xf32> -> vector<8x1000xf32>
    %39 = arith.addf %34, %38 : vector<8x1000xf32>
    %c3 = arith.constant 3 : index
    %c0_30 = arith.constant 0 : index
    %c0_31 = arith.constant 0 : index
    %40 = vector.load %arg2[%c3, %c0_30, %c0_31] : memref<27x8x8xbf16, #tpu.memory_space<vmem>>, vector<1x8x8xbf16>
    %41 = vector.shape_cast %40 : vector<1x8x8xbf16> to vector<8x8xbf16>
    %c0_32 = arith.constant 0 : index
    %c27 = arith.constant 27 : index
    %42 = vector.load %arg10[%c0_32, %c27] : memref<8x1256xbf16, #tpu.memory_space<vmem>>, vector<8x1000xbf16>
    %cst_33 = arith.constant dense<0.000000e+00> : vector<8x1000xf32>
    %43 = tpu.matmul %41, %42, %cst_33 {dimension_numbers = #tpu.dot_dimension_numbers<[1], [0], [0], [1], [0, 0, 1, 1], [], []>} : vector<8x8xbf16>, vector<8x1000xbf16>, vector<8x1000xf32> -> vector<8x1000xf32>
    %44 = arith.addf %39, %43 : vector<8x1000xf32>
    %c4 = arith.constant 4 : index
    %c0_34 = arith.constant 0 : index
    %c0_35 = arith.constant 0 : index
    %45 = vector.load %arg2[%c4, %c0_34, %c0_35] : memref<27x8x8xbf16, #tpu.memory_space<vmem>>, vector<1x8x8xbf16>
    %46 = vector.shape_cast %45 : vector<1x8x8xbf16> to vector<8x8xbf16>
    %c0_36 = arith.constant 0 : index
    %c28 = arith.constant 28 : index
    %47 = vector.load %arg10[%c0_36, %c28] : memref<8x1256xbf16, #tpu.memory_space<vmem>>, vector<8x1000xbf16>
    %cst_37 = arith.constant dense<0.000000e+00> : vector<8x1000xf32>
    %48 = tpu.matmul %46, %47, %cst_37 {dimension_numbers = #tpu.dot_dimension_numbers<[1], [0], [0], [1], [0, 0, 1, 1], [], []>} : vector<8x8xbf16>, vector<8x1000xbf16>, vector<8x1000xf32> -> vector<8x1000xf32>
    %49 = arith.addf %44, %48 : vector<8x1000xf32>
    %c5 = arith.constant 5 : index
    %c0_38 = arith.constant 0 : index
    %c0_39 = arith.constant 0 : index
    %50 = vector.load %arg2[%c5, %c0_38, %c0_39] : memref<27x8x8xbf16, #tpu.memory_space<vmem>>, vector<1x8x8xbf16>
    %51 = vector.shape_cast %50 : vector<1x8x8xbf16> to vector<8x8xbf16>
    %c0_40 = arith.constant 0 : index
    %c29 = arith.constant 29 : index
    %52 = vector.load %arg10[%c0_40, %c29] : memref<8x1256xbf16, #tpu.memory_space<vmem>>, vector<8x1000xbf16>
    %cst_41 = arith.constant dense<0.000000e+00> : vector<8x1000xf32>
    %53 = tpu.matmul %51, %52, %cst_41 {dimension_numbers = #tpu.dot_dimension_numbers<[1], [0], [0], [1], [0, 0, 1, 1], [], []>} : vector<8x8xbf16>, vector<8x1000xbf16>, vector<8x1000xf32> -> vector<8x1000xf32>
    %54 = arith.addf %49, %53 : vector<8x1000xf32>
    %c6 = arith.constant 6 : index
    %c0_42 = arith.constant 0 : index
    %c0_43 = arith.constant 0 : index
    %55 = vector.load %arg2[%c6, %c0_42, %c0_43] : memref<27x8x8xbf16, #tpu.memory_space<vmem>>, vector<1x8x8xbf16>
    %56 = vector.shape_cast %55 : vector<1x8x8xbf16> to vector<8x8xbf16>
    %c0_44 = arith.constant 0 : index
    %c37 = arith.constant 37 : index
    %57 = vector.load %arg10[%c0_44, %c37] : memref<8x1256xbf16, #tpu.memory_space<vmem>>, vector<8x1000xbf16>
    %cst_45 = arith.constant dense<0.000000e+00> : vector<8x1000xf32>
    %58 = tpu.matmul %56, %57, %cst_45 {dimension_numbers = #tpu.dot_dimension_numbers<[1], [0], [0], [1], [0, 0, 1, 1], [], []>} : vector<8x8xbf16>, vector<8x1000xbf16>, vector<8x1000xf32> -> vector<8x1000xf32>
    %59 = arith.addf %54, %58 : vector<8x1000xf32>
    %c7 = arith.constant 7 : index
    %c0_46 = arith.constant 0 : index
    %c0_47 = arith.constant 0 : index
    %60 = vector.load %arg2[%c7, %c0_46, %c0_47] : memref<27x8x8xbf16, #tpu.memory_space<vmem>>, vector<1x8x8xbf16>
    %61 = vector.shape_cast %60 : vector<1x8x8xbf16> to vector<8x8xbf16>
    %c0_48 = arith.constant 0 : index
    %c38 = arith.constant 38 : index
    %62 = vector.load %arg10[%c0_48, %c38] : memref<8x1256xbf16, #tpu.memory_space<vmem>>, vector<8x1000xbf16>
    %cst_49 = arith.constant dense<0.000000e+00> : vector<8x1000xf32>
    %63 = tpu.matmul %61, %62, %cst_49 {dimension_numbers = #tpu.dot_dimension_numbers<[1], [0], [0], [1], [0, 0, 1, 1], [], []>} : vector<8x8xbf16>, vector<8x1000xbf16>, vector<8x1000xf32> -> vector<8x1000xf32>
    %64 = arith.addf %59, %63 : vector<8x1000xf32>
    %c8 = arith.constant 8 : index
    %c0_50 = arith.constant 0 : index
    %c0_51 = arith.constant 0 : index
    %65 = vector.load %arg2[%c8, %c0_50, %c0_51] : memref<27x8x8xbf16, #tpu.memory_space<vmem>>, vector<1x8x8xbf16>
    %66 = vector.shape_cast %65 : vector<1x8x8xbf16> to vector<8x8xbf16>
    %c0_52 = arith.constant 0 : index
    %c39 = arith.constant 39 : index
    %67 = vector.load %arg10[%c0_52, %c39] : memref<8x1256xbf16, #tpu.memory_space<vmem>>, vector<8x1000xbf16>
    %cst_53 = arith.constant dense<0.000000e+00> : vector<8x1000xf32>
    %68 = tpu.matmul %66, %67, %cst_53 {dimension_numbers = #tpu.dot_dimension_numbers<[1], [0], [0], [1], [0, 0, 1, 1], [], []>} : vector<8x8xbf16>, vector<8x1000xbf16>, vector<8x1000xf32> -> vector<8x1000xf32>
    %69 = arith.addf %64, %68 : vector<8x1000xf32>
    %c9 = arith.constant 9 : index
    %c0_54 = arith.constant 0 : index
    %c0_55 = arith.constant 0 : index
    %70 = vector.load %arg2[%c9, %c0_54, %c0_55] : memref<27x8x8xbf16, #tpu.memory_space<vmem>>, vector<1x8x8xbf16>
    %71 = vector.shape_cast %70 : vector<1x8x8xbf16> to vector<8x8xbf16>
    %c0_56 = arith.constant 0 : index
    %c117 = arith.constant 117 : index
    %72 = vector.load %arg10[%c0_56, %c117] : memref<8x1256xbf16, #tpu.memory_space<vmem>>, vector<8x1000xbf16>
    %cst_57 = arith.constant dense<0.000000e+00> : vector<8x1000xf32>
    %73 = tpu.matmul %71, %72, %cst_57 {dimension_numbers = #tpu.dot_dimension_numbers<[1], [0], [0], [1], [0, 0, 1, 1], [], []>} : vector<8x8xbf16>, vector<8x1000xbf16>, vector<8x1000xf32> -> vector<8x1000xf32>
    %74 = arith.addf %69, %73 : vector<8x1000xf32>
    %c10 = arith.constant 10 : index
    %c0_58 = arith.constant 0 : index
    %c0_59 = arith.constant 0 : index
    %75 = vector.load %arg2[%c10, %c0_58, %c0_59] : memref<27x8x8xbf16, #tpu.memory_space<vmem>>, vector<1x8x8xbf16>
    %76 = vector.shape_cast %75 : vector<1x8x8xbf16> to vector<8x8xbf16>
    %c0_60 = arith.constant 0 : index
    %c118 = arith.constant 118 : index
    %77 = vector.load %arg10[%c0_60, %c118] : memref<8x1256xbf16, #tpu.memory_space<vmem>>, vector<8x1000xbf16>
    %cst_61 = arith.constant dense<0.000000e+00> : vector<8x1000xf32>
    %78 = tpu.matmul %76, %77, %cst_61 {dimension_numbers = #tpu.dot_dimension_numbers<[1], [0], [0], [1], [0, 0, 1, 1], [], []>} : vector<8x8xbf16>, vector<8x1000xbf16>, vector<8x1000xf32> -> vector<8x1000xf32>
    %79 = arith.addf %74, %78 : vector<8x1000xf32>
    %c11 = arith.constant 11 : index
    %c0_62 = arith.constant 0 : index
    %c0_63 = arith.constant 0 : index
    %80 = vector.load %arg2[%c11, %c0_62, %c0_63] : memref<27x8x8xbf16, #tpu.memory_space<vmem>>, vector<1x8x8xbf16>
    %81 = vector.shape_cast %80 : vector<1x8x8xbf16> to vector<8x8xbf16>
    %c0_64 = arith.constant 0 : index
    %c119 = arith.constant 119 : index
    %82 = vector.load %arg10[%c0_64, %c119] : memref<8x1256xbf16, #tpu.memory_space<vmem>>, vector<8x1000xbf16>
    %cst_65 = arith.constant dense<0.000000e+00> : vector<8x1000xf32>
    %83 = tpu.matmul %81, %82, %cst_65 {dimension_numbers = #tpu.dot_dimension_numbers<[1], [0], [0], [1], [0, 0, 1, 1], [], []>} : vector<8x8xbf16>, vector<8x1000xbf16>, vector<8x1000xf32> -> vector<8x1000xf32>
    %84 = arith.addf %79, %83 : vector<8x1000xf32>
    %c12 = arith.constant 12 : index
    %c0_66 = arith.constant 0 : index
    %c0_67 = arith.constant 0 : index
    %85 = vector.load %arg2[%c12, %c0_66, %c0_67] : memref<27x8x8xbf16, #tpu.memory_space<vmem>>, vector<1x8x8xbf16>
    %86 = vector.shape_cast %85 : vector<1x8x8xbf16> to vector<8x8xbf16>
    %c0_68 = arith.constant 0 : index
    %c127 = arith.constant 127 : index
    %87 = vector.load %arg10[%c0_68, %c127] : memref<8x1256xbf16, #tpu.memory_space<vmem>>, vector<8x1000xbf16>
    %cst_69 = arith.constant dense<0.000000e+00> : vector<8x1000xf32>
    %88 = tpu.matmul %86, %87, %cst_69 {dimension_numbers = #tpu.dot_dimension_numbers<[1], [0], [0], [1], [0, 0, 1, 1], [], []>} : vector<8x8xbf16>, vector<8x1000xbf16>, vector<8x1000xf32> -> vector<8x1000xf32>
    %89 = arith.addf %84, %88 : vector<8x1000xf32>
    %c13 = arith.constant 13 : index
    %c0_70 = arith.constant 0 : index
    %c0_71 = arith.constant 0 : index
    %90 = vector.load %arg2[%c13, %c0_70, %c0_71] : memref<27x8x8xbf16, #tpu.memory_space<vmem>>, vector<1x8x8xbf16>
    %91 = vector.shape_cast %90 : vector<1x8x8xbf16> to vector<8x8xbf16>
    %c0_72 = arith.constant 0 : index
    %c128_73 = arith.constant 128 : index
    %92 = vector.load %arg10[%c0_72, %c128_73] : memref<8x1256xbf16, #tpu.memory_space<vmem>>, vector<8x1000xbf16>
    %cst_74 = arith.constant dense<0.000000e+00> : vector<8x1000xf32>
    %93 = tpu.matmul %91, %92, %cst_74 {dimension_numbers = #tpu.dot_dimension_numbers<[1], [0], [0], [1], [0, 0, 1, 1], [], []>} : vector<8x8xbf16>, vector<8x1000xbf16>, vector<8x1000xf32> -> vector<8x1000xf32>
    %94 = arith.addf %89, %93 : vector<8x1000xf32>
    %c14 = arith.constant 14 : index
    %c0_75 = arith.constant 0 : index
    %c0_76 = arith.constant 0 : index
    %95 = vector.load %arg2[%c14, %c0_75, %c0_76] : memref<27x8x8xbf16, #tpu.memory_space<vmem>>, vector<1x8x8xbf16>
    %96 = vector.shape_cast %95 : vector<1x8x8xbf16> to vector<8x8xbf16>
    %c0_77 = arith.constant 0 : index
    %c129 = arith.constant 129 : index
    %97 = vector.load %arg10[%c0_77, %c129] : memref<8x1256xbf16, #tpu.memory_space<vmem>>, vector<8x1000xbf16>
    %cst_78 = arith.constant dense<0.000000e+00> : vector<8x1000xf32>
    %98 = tpu.matmul %96, %97, %cst_78 {dimension_numbers = #tpu.dot_dimension_numbers<[1], [0], [0], [1], [0, 0, 1, 1], [], []>} : vector<8x8xbf16>, vector<8x1000xbf16>, vector<8x1000xf32> -> vector<8x1000xf32>
    %99 = arith.addf %94, %98 : vector<8x1000xf32>
    %c15 = arith.constant 15 : index
    %c0_79 = arith.constant 0 : index
    %c0_80 = arith.constant 0 : index
    %100 = vector.load %arg2[%c15, %c0_79, %c0_80] : memref<27x8x8xbf16, #tpu.memory_space<vmem>>, vector<1x8x8xbf16>
    %101 = vector.shape_cast %100 : vector<1x8x8xbf16> to vector<8x8xbf16>
    %c0_81 = arith.constant 0 : index
    %c137 = arith.constant 137 : index
    %102 = vector.load %arg10[%c0_81, %c137] : memref<8x1256xbf16, #tpu.memory_space<vmem>>, vector<8x1000xbf16>
    %cst_82 = arith.constant dense<0.000000e+00> : vector<8x1000xf32>
    %103 = tpu.matmul %101, %102, %cst_82 {dimension_numbers = #tpu.dot_dimension_numbers<[1], [0], [0], [1], [0, 0, 1, 1], [], []>} : vector<8x8xbf16>, vector<8x1000xbf16>, vector<8x1000xf32> -> vector<8x1000xf32>
    %104 = arith.addf %99, %103 : vector<8x1000xf32>
    %c16 = arith.constant 16 : index
    %c0_83 = arith.constant 0 : index
    %c0_84 = arith.constant 0 : index
    %105 = vector.load %arg2[%c16, %c0_83, %c0_84] : memref<27x8x8xbf16, #tpu.memory_space<vmem>>, vector<1x8x8xbf16>
    %106 = vector.shape_cast %105 : vector<1x8x8xbf16> to vector<8x8xbf16>
    %c0_85 = arith.constant 0 : index
    %c138 = arith.constant 138 : index
    %107 = vector.load %arg10[%c0_85, %c138] : memref<8x1256xbf16, #tpu.memory_space<vmem>>, vector<8x1000xbf16>
    %cst_86 = arith.constant dense<0.000000e+00> : vector<8x1000xf32>
    %108 = tpu.matmul %106, %107, %cst_86 {dimension_numbers = #tpu.dot_dimension_numbers<[1], [0], [0], [1], [0, 0, 1, 1], [], []>} : vector<8x8xbf16>, vector<8x1000xbf16>, vector<8x1000xf32> -> vector<8x1000xf32>
    %109 = arith.addf %104, %108 : vector<8x1000xf32>
    %c17_87 = arith.constant 17 : index
    %c0_88 = arith.constant 0 : index
    %c0_89 = arith.constant 0 : index
    %110 = vector.load %arg2[%c17_87, %c0_88, %c0_89] : memref<27x8x8xbf16, #tpu.memory_space<vmem>>, vector<1x8x8xbf16>
    %111 = vector.shape_cast %110 : vector<1x8x8xbf16> to vector<8x8xbf16>
    %c0_90 = arith.constant 0 : index
    %c139 = arith.constant 139 : index
    %112 = vector.load %arg10[%c0_90, %c139] : memref<8x1256xbf16, #tpu.memory_space<vmem>>, vector<8x1000xbf16>
    %cst_91 = arith.constant dense<0.000000e+00> : vector<8x1000xf32>
    %113 = tpu.matmul %111, %112, %cst_91 {dimension_numbers = #tpu.dot_dimension_numbers<[1], [0], [0], [1], [0, 0, 1, 1], [], []>} : vector<8x8xbf16>, vector<8x1000xbf16>, vector<8x1000xf32> -> vector<8x1000xf32>
    %114 = arith.addf %109, %113 : vector<8x1000xf32>
    %c18_92 = arith.constant 18 : index
    %c0_93 = arith.constant 0 : index
    %c0_94 = arith.constant 0 : index
    %115 = vector.load %arg2[%c18_92, %c0_93, %c0_94] : memref<27x8x8xbf16, #tpu.memory_space<vmem>>, vector<1x8x8xbf16>
    %116 = vector.shape_cast %115 : vector<1x8x8xbf16> to vector<8x8xbf16>
    %c0_95 = arith.constant 0 : index
    %c217 = arith.constant 217 : index
    %117 = vector.load %arg10[%c0_95, %c217] : memref<8x1256xbf16, #tpu.memory_space<vmem>>, vector<8x1000xbf16>
    %cst_96 = arith.constant dense<0.000000e+00> : vector<8x1000xf32>
    %118 = tpu.matmul %116, %117, %cst_96 {dimension_numbers = #tpu.dot_dimension_numbers<[1], [0], [0], [1], [0, 0, 1, 1], [], []>} : vector<8x8xbf16>, vector<8x1000xbf16>, vector<8x1000xf32> -> vector<8x1000xf32>
    %119 = arith.addf %114, %118 : vector<8x1000xf32>
    %c19_97 = arith.constant 19 : index
    %c0_98 = arith.constant 0 : index
    %c0_99 = arith.constant 0 : index
    %120 = vector.load %arg2[%c19_97, %c0_98, %c0_99] : memref<27x8x8xbf16, #tpu.memory_space<vmem>>, vector<1x8x8xbf16>
    %121 = vector.shape_cast %120 : vector<1x8x8xbf16> to vector<8x8xbf16>
    %c0_100 = arith.constant 0 : index
    %c218 = arith.constant 218 : index
    %122 = vector.load %arg10[%c0_100, %c218] : memref<8x1256xbf16, #tpu.memory_space<vmem>>, vector<8x1000xbf16>
    %cst_101 = arith.constant dense<0.000000e+00> : vector<8x1000xf32>
    %123 = tpu.matmul %121, %122, %cst_101 {dimension_numbers = #tpu.dot_dimension_numbers<[1], [0], [0], [1], [0, 0, 1, 1], [], []>} : vector<8x8xbf16>, vector<8x1000xbf16>, vector<8x1000xf32> -> vector<8x1000xf32>
    %124 = arith.addf %119, %123 : vector<8x1000xf32>
    %c20 = arith.constant 20 : index
    %c0_102 = arith.constant 0 : index
    %c0_103 = arith.constant 0 : index
    %125 = vector.load %arg2[%c20, %c0_102, %c0_103] : memref<27x8x8xbf16, #tpu.memory_space<vmem>>, vector<1x8x8xbf16>
    %126 = vector.shape_cast %125 : vector<1x8x8xbf16> to vector<8x8xbf16>
    %c0_104 = arith.constant 0 : index
    %c219 = arith.constant 219 : index
    %127 = vector.load %arg10[%c0_104, %c219] : memref<8x1256xbf16, #tpu.memory_space<vmem>>, vector<8x1000xbf16>
    %cst_105 = arith.constant dense<0.000000e+00> : vector<8x1000xf32>
    %128 = tpu.matmul %126, %127, %cst_105 {dimension_numbers = #tpu.dot_dimension_numbers<[1], [0], [0], [1], [0, 0, 1, 1], [], []>} : vector<8x8xbf16>, vector<8x1000xbf16>, vector<8x1000xf32> -> vector<8x1000xf32>
    %129 = arith.addf %124, %128 : vector<8x1000xf32>
    %c21 = arith.constant 21 : index
    %c0_106 = arith.constant 0 : index
    %c0_107 = arith.constant 0 : index
    %130 = vector.load %arg2[%c21, %c0_106, %c0_107] : memref<27x8x8xbf16, #tpu.memory_space<vmem>>, vector<1x8x8xbf16>
    %131 = vector.shape_cast %130 : vector<1x8x8xbf16> to vector<8x8xbf16>
    %c0_108 = arith.constant 0 : index
    %c227 = arith.constant 227 : index
    %132 = vector.load %arg10[%c0_108, %c227] : memref<8x1256xbf16, #tpu.memory_space<vmem>>, vector<8x1000xbf16>
    %cst_109 = arith.constant dense<0.000000e+00> : vector<8x1000xf32>
    %133 = tpu.matmul %131, %132, %cst_109 {dimension_numbers = #tpu.dot_dimension_numbers<[1], [0], [0], [1], [0, 0, 1, 1], [], []>} : vector<8x8xbf16>, vector<8x1000xbf16>, vector<8x1000xf32> -> vector<8x1000xf32>
    %134 = arith.addf %129, %133 : vector<8x1000xf32>
    %c22 = arith.constant 22 : index
    %c0_110 = arith.constant 0 : index
    %c0_111 = arith.constant 0 : index
    %135 = vector.load %arg2[%c22, %c0_110, %c0_111] : memref<27x8x8xbf16, #tpu.memory_space<vmem>>, vector<1x8x8xbf16>
    %136 = vector.shape_cast %135 : vector<1x8x8xbf16> to vector<8x8xbf16>
    %c0_112 = arith.constant 0 : index
    %c228 = arith.constant 228 : index
    %137 = vector.load %arg10[%c0_112, %c228] : memref<8x1256xbf16, #tpu.memory_space<vmem>>, vector<8x1000xbf16>
    %cst_113 = arith.constant dense<0.000000e+00> : vector<8x1000xf32>
    %138 = tpu.matmul %136, %137, %cst_113 {dimension_numbers = #tpu.dot_dimension_numbers<[1], [0], [0], [1], [0, 0, 1, 1], [], []>} : vector<8x8xbf16>, vector<8x1000xbf16>, vector<8x1000xf32> -> vector<8x1000xf32>
    %139 = arith.addf %134, %138 : vector<8x1000xf32>
    %c23 = arith.constant 23 : index
    %c0_114 = arith.constant 0 : index
    %c0_115 = arith.constant 0 : index
    %140 = vector.load %arg2[%c23, %c0_114, %c0_115] : memref<27x8x8xbf16, #tpu.memory_space<vmem>>, vector<1x8x8xbf16>
    %141 = vector.shape_cast %140 : vector<1x8x8xbf16> to vector<8x8xbf16>
    %c0_116 = arith.constant 0 : index
    %c229 = arith.constant 229 : index
    %142 = vector.load %arg10[%c0_116, %c229] : memref<8x1256xbf16, #tpu.memory_space<vmem>>, vector<8x1000xbf16>
    %cst_117 = arith.constant dense<0.000000e+00> : vector<8x1000xf32>
    %143 = tpu.matmul %141, %142, %cst_117 {dimension_numbers = #tpu.dot_dimension_numbers<[1], [0], [0], [1], [0, 0, 1, 1], [], []>} : vector<8x8xbf16>, vector<8x1000xbf16>, vector<8x1000xf32> -> vector<8x1000xf32>
    %144 = arith.addf %139, %143 : vector<8x1000xf32>
    %c24 = arith.constant 24 : index
    %c0_118 = arith.constant 0 : index
    %c0_119 = arith.constant 0 : index
    %145 = vector.load %arg2[%c24, %c0_118, %c0_119] : memref<27x8x8xbf16, #tpu.memory_space<vmem>>, vector<1x8x8xbf16>
    %146 = vector.shape_cast %145 : vector<1x8x8xbf16> to vector<8x8xbf16>
    %c0_120 = arith.constant 0 : index
    %c237 = arith.constant 237 : index
    %147 = vector.load %arg10[%c0_120, %c237] : memref<8x1256xbf16, #tpu.memory_space<vmem>>, vector<8x1000xbf16>
    %cst_121 = arith.constant dense<0.000000e+00> : vector<8x1000xf32>
    %148 = tpu.matmul %146, %147, %cst_121 {dimension_numbers = #tpu.dot_dimension_numbers<[1], [0], [0], [1], [0, 0, 1, 1], [], []>} : vector<8x8xbf16>, vector<8x1000xbf16>, vector<8x1000xf32> -> vector<8x1000xf32>
    %149 = arith.addf %144, %148 : vector<8x1000xf32>
    %c25 = arith.constant 25 : index
    %c0_122 = arith.constant 0 : index
    %c0_123 = arith.constant 0 : index
    %150 = vector.load %arg2[%c25, %c0_122, %c0_123] : memref<27x8x8xbf16, #tpu.memory_space<vmem>>, vector<1x8x8xbf16>
    %151 = vector.shape_cast %150 : vector<1x8x8xbf16> to vector<8x8xbf16>
    %c0_124 = arith.constant 0 : index
    %c238 = arith.constant 238 : index
    %152 = vector.load %arg10[%c0_124, %c238] : memref<8x1256xbf16, #tpu.memory_space<vmem>>, vector<8x1000xbf16>
    %cst_125 = arith.constant dense<0.000000e+00> : vector<8x1000xf32>
    %153 = tpu.matmul %151, %152, %cst_125 {dimension_numbers = #tpu.dot_dimension_numbers<[1], [0], [0], [1], [0, 0, 1, 1], [], []>} : vector<8x8xbf16>, vector<8x1000xbf16>, vector<8x1000xf32> -> vector<8x1000xf32>
    %154 = arith.addf %149, %153 : vector<8x1000xf32>
    %c26 = arith.constant 26 : index
    %c0_126 = arith.constant 0 : index
    %c0_127 = arith.constant 0 : index
    %155 = vector.load %arg2[%c26, %c0_126, %c0_127] : memref<27x8x8xbf16, #tpu.memory_space<vmem>>, vector<1x8x8xbf16>
    %156 = vector.shape_cast %155 : vector<1x8x8xbf16> to vector<8x8xbf16>
    %c0_128 = arith.constant 0 : index
    %c239 = arith.constant 239 : index
    %157 = vector.load %arg10[%c0_128, %c239] : memref<8x1256xbf16, #tpu.memory_space<vmem>>, vector<8x1000xbf16>
    %cst_129 = arith.constant dense<0.000000e+00> : vector<8x1000xf32>
    %158 = tpu.matmul %156, %157, %cst_129 {dimension_numbers = #tpu.dot_dimension_numbers<[1], [0], [0], [1], [0, 0, 1, 1], [], []>} : vector<8x8xbf16>, vector<8x1000xbf16>, vector<8x1000xf32> -> vector<8x1000xf32>
    %159 = arith.addf %154, %158 : vector<8x1000xf32>
    %160 = arith.truncf %159 : vector<8x1000xf32> to vector<8x1000xbf16>
    %c0_130 = arith.constant 0 : index
    %c0_131 = arith.constant 0 : index
    %c0_132 = arith.constant 0 : index
    %161 = vector.load %arg7[%c0_130, %c0_131, %c0_132] : memref<1x8x1000xbf16, #tpu.memory_space<vmem>>, vector<1x8x1000xbf16>
    %162 = vector.shape_cast %161 : vector<1x8x1000xbf16> to vector<8x1000xbf16>
    %163 = vector.shape_cast %160 : vector<8x1000xbf16> to vector<1x8x1000xbf16>
    tpu.vector_store %arg7[%c0_130, %c0_131, %c0_132], %163 {strides = array<i32>} : memref<1x8x1000xbf16, #tpu.memory_space<vmem>>, vector<1x8x1000xbf16>,
    %c0_133 = arith.constant 0 : index
    %c0_134 = arith.constant 0 : index
    %164 = vector.load %arg6[%c0_133, %c0_134] : memref<1000x1xf32, #tpu.memory_space<vmem>>, vector<1000x1xf32>
    %cst_135 = arith.constant dense<0.000000e+00> : vector<8x1xf32>
    %165 = tpu.matmul %159, %164, %cst_135 {dimension_numbers = #tpu.dot_dimension_numbers<[1], [0], [0], [1], [0, 0, 1, 1], [], []>} : vector<8x1000xf32>, vector<1000x1xf32>, vector<8x1xf32> -> vector<8x1xf32>
    %c0_136 = arith.constant 0 : index
    %c0_137 = arith.constant 0 : index
    %c0_138 = arith.constant 0 : index
    %166 = vector.load %arg8[%c0_136, %c0_137, %c0_138] : memref<1x8x1xf32, #tpu.memory_space<vmem>>, vector<1x8x1xf32>
    %167 = vector.shape_cast %166 : vector<1x8x1xf32> to vector<8x1xf32>
    %168 = vector.shape_cast %165 : vector<8x1xf32> to vector<1x8x1xf32>
    tpu.vector_store %arg8[%c0_136, %c0_137, %c0_138], %168 {strides = array<i32>} : memref<1x8x1xf32, #tpu.memory_space<vmem>>, vector<1x8x1xf32>,
    %169 = arith.mulf %159, %159 : vector<8x1000xf32>
    %cst_139 = arith.constant dense<0.000000e+00> : vector<8x1xf32>
    %170 = tpu.matmul %169, %164, %cst_139 {dimension_numbers = #tpu.dot_dimension_numbers<[1], [0], [0], [1], [0, 0, 1, 1], [], []>} : vector<8x1000xf32>, vector<1000x1xf32>, vector<8x1xf32> -> vector<8x1xf32>
    %c0_140 = arith.constant 0 : index
    %c0_141 = arith.constant 0 : index
    %c0_142 = arith.constant 0 : index
    %171 = vector.load %arg9[%c0_140, %c0_141, %c0_142] : memref<1x8x1xf32, #tpu.memory_space<vmem>>, vector<1x8x1xf32>
    %172 = vector.shape_cast %171 : vector<1x8x1xf32> to vector<8x1xf32>
    %173 = vector.shape_cast %170 : vector<8x1xf32> to vector<1x8x1xf32>
    tpu.vector_store %arg9[%c0_140, %c0_141, %c0_142], %173 {strides = array<i32>} : memref<1x8x1xf32, #tpu.memory_space<vmem>>, vector<1x8x1xf32>,
    return
  }
  func.func @transform_0(%arg0: i32) -> (i32, i32, i32) {
    %c0_i32 = arith.constant 0 : i32
    %c0_i32_0 = arith.constant 0 : i32
    %c0_i32_1 = arith.constant 0 : i32
    return %arg0, %c0_i32, %c0_i32_0 : i32, i32, i32
  }
  func.func @transform_1(%arg0: i32) -> (i32, i32, i32) {
    %c0_i32 = arith.constant 0 : i32
    %c0_i32_0 = arith.constant 0 : i32
    %c0_i32_1 = arith.constant 0 : i32
    %c0_i32_2 = arith.constant 0 : i32
    return %c0_i32, %c0_i32_0, %c0_i32_1 : i32, i32, i32
  }
  func.func @transform_2(%arg0: i32) -> (i32, i32) {
    %c0_i32 = arith.constant 0 : i32
    %c0_i32_0 = arith.constant 0 : i32
    %c0_i32_1 = arith.constant 0 : i32
    return %c0_i32, %c0_i32_0 : i32, i32
  }
  func.func @transform_3(%arg0: i32) -> (i32, i32) {
    %c0_i32 = arith.constant 0 : i32
    %c0_i32_0 = arith.constant 0 : i32
    %c0_i32_1 = arith.constant 0 : i32
    return %c0_i32, %c0_i32_0 : i32, i32
  }
  func.func @transform_4(%arg0: i32) -> (i32, i32) {
    %c0_i32 = arith.constant 0 : i32
    %c0_i32_0 = arith.constant 0 : i32
    %c0_i32_1 = arith.constant 0 : i32
    return %c0_i32, %c0_i32_0 : i32, i32
  }
  func.func @transform_5(%arg0: i32) -> (i32, i32) {
    %c0_i32 = arith.constant 0 : i32
    %c0_i32_0 = arith.constant 0 : i32
    %c0_i32_1 = arith.constant 0 : i32
    return %c0_i32, %c0_i32_0 : i32, i32
  }
  func.func @transform_6(%arg0: i32) -> (i32, i32, i32) {
    %c0_i32 = arith.constant 0 : i32
    %c0_i32_0 = arith.constant 0 : i32
    %c0_i32_1 = arith.constant 0 : i32
    return %arg0, %c0_i32, %c0_i32_0 : i32, i32, i32
  }
  func.func @transform_7(%arg0: i32) -> (i32, i32, i32) {
    %c0_i32 = arith.constant 0 : i32
    %c0_i32_0 = arith.constant 0 : i32
    %c0_i32_1 = arith.constant 0 : i32
    return %arg0, %c0_i32, %c0_i32_0 : i32, i32, i32
  }
  func.func @transform_8(%arg0: i32) -> (i32, i32, i32) {
    %c0_i32 = arith.constant 0 : i32
    %c0_i32_0 = arith.constant 0 : i32
    %c0_i32_1 = arith.constant 0 : i32
    return %arg0, %c0_i32, %c0_i32_0 : i32, i32, i32
  }
}

</mosaic_0001>

<bundles_post_ra>
// kernel: residual_block_forward.5
= control target key start
LH: loop header
LB: loop body
LE: loop exit
PB: predicated region body
PF: predicated region fallthrough
CT: control target
= control target key end

     0   :  { %s725_s21 = smov 0   ;;  %s780_s0 = inlined_call_operand.vmem [shape: bf16[2,8,1000], index: 0, kind: input, shape index: {}]   ;;  %s781_s1 = inlined_call_operand.vmem [shape: bf16[2,4,1256], index: 1, kind: input, shape index: {}]   ;;  %s782_s2 = inlined_call_operand.vmem [shape: bf16[8,4], index: 2, kind: input, shape index: {}]   ;;  %s783_s3 = inlined_call_operand.vmem [shape: f32[8,1], index: 3, kind: input, shape index: {}]   ;;  %s784_s4 = inlined_call_operand.vmem [shape: f32[8,1], index: 4, kind: input, shape index: {}]   ;;  %s785_s5 = inlined_call_operand.vmem [shape: f32[8,1], index: 5, kind: input, shape index: {}]   ;;  %s786_s6 = inlined_call_operand.vmem [shape: f32[2,8,1000], index: 6, kind: output, shape index: {}]  }
   0x1 LB: > { %s643_s22 = sadd.s32 4294967295, %s686_s21   ;;  %p647_p0 = scmp.ge.s32.totalorder %s686_s21, 1  ;;  %s686_s21 = sphi %s725_s21, %s16_s21  }
   0x2   : > { %p222_p1 = scmp.lt.s32.totalorder %s686_s21, 3 }
   0x4   : > { %p223_p2 = pnand %p647_p0, %p222_p1 }
   0x5   : > { %p257_p3 = scmp.lt.s32.totalorder (!%p223_p2), %s643_s22, 1 }
   0x6   : > { %226 = sbr.rel (%p223_p2) target bundleno = 236 (0xec), region = 44 }
   0xb   : > { %v288_v0 = vlaneseq  ;;  %v523_v1 = vld [vmem:[%s784_s4] sm:$0xff]  ;;  %v688_v2 = vmov 1983009808   ;;  %v689_v4 = vmov 0   ;;  %s788_s22 = smov (!%p257_p3, %s643_s22), 1  ;;  %vm322_vm0 = vcmask 1041408  }
   0xc   : > { %v286_v3 = vunpack.c.l.s4 %v688_v2  ;;  %379 = vmatprep.mubr.bf16.mxu0 %v689_v4  ;;  %420 = vmatprep.mubr.bf16.mxu1 %v689_v4  ;;  %v537_v5 = vld [vmem:[%s785_s5] sm:$0xff]  ;;  %s665_s27 = smul.u32 20, %s788_s22  ;;  %vm318_vm1 = vcmask 31744   ;;  %s663_s11 = sshll.u32 %s788_s22, 5  ;;  %vm574_vm2 = vcmask 850944  }
   0xd   : > { %v289_v6 = vshrl.u32 %v288_v0, 7  ;;  %676 = vset.pattern.permute.xlu0 %v689_v4  ;;  %677 = vset.pattern.permute.xlu1 %v689_v4  ;;  %v276_v8 = vld [vmem:[%s783_s3] sm:$0xff]  ;;  %s261_s14 = scalar_lea.vmem %s780_s0, %s663_s11  ;;  %s664_s15 = sshll.u32 %s788_s22, 6 }
   0xe   : > { %v287_v7 = vunpack.c.0.s8 %v286_v3  ;;  %526 = vperm.xlu0 %676, %v523_v1   ;;  %540 = vperm.xlu1 %677, %v537_v5   ;;  %s266_s8 = scalar_lea.vmem %s781_s1, %s665_s27  ;;  %v273_v23 = vld [vmem:[%s782_s2] sm:$0xf]  ;;  %v512_v28 = vld [vmem:[%s261_s14 + $0x8] sm:$0xff]  ;;  %v513_v35 = vld [vmem:[%s261_s14 + $0x10] sm:$0xff]  ;;  %s767_s18 = scalar_lea.vmem %s786_s6, %s664_s15 }
   0xf   : > { %v274_v10 = vld [vmem:[%s266_s8 + $0x2] sm:$0xff]  ;;  %v275_v11 = vld [vmem:[%s266_s8 + $0xa] sm:$0xff]  ;;  %v517_v32 = vunpack.c.l.bf16 %v512_v28  ;;  %v518_v33 = vunpack.c.h.bf16 %v512_v28  ;;  %v514_v39 = vld [vmem:[%s261_s14 + $0x18] sm:$0xff]  ;;  %v519_v41 = vunpack.c.l.bf16 %v513_v35  ;;  %v520_v45 = vunpack.c.h.bf16 %v513_v35 }
  0x10   : > { %v290_v9 = vsub.s32 %v287_v7, %v289_v6  ;;  %v301_v13 = vcombine.high %v275_v11, %v275_v11  ;;  %v284_v15 = vcombine.high %v274_v10, %v274_v10  ;;  %v511_v27 = vld [vmem:[%s261_s14] sm:$0xff]  ;;  %v521_v46 = vunpack.c.l.bf16 %v514_v39 }
  0x11   : > { %v515_v29 = vunpack.c.l.bf16 %v511_v27  ;;  %v516_v31 = vunpack.c.h.bf16 %v511_v27  ;;  %v522_v61 = vunpack.c.h.bf16 %v514_v39 }
  0x12   : > { %279 = vperm.xlu0 %676, %v276_v8   ;;  %v291_v12 = vrot.slane %v274_v10, %v290_v9  ;;  %v308_v14 = vrot.slane %v275_v11, %v290_v9  ;;  %v298_v18 = vrot.slane %v284_v15, %v290_v9  ;;  %v315_v20 = vrot.slane %v301_v13, %v290_v9 }
  0x14   : > { %v299_v16 = vcombine.high %v291_v12, %v291_v12  ;;  %v324_v17 = vsel %vm322_vm0, %v291_v12, 0  ;;  %v316_v19 = vcombine.high %v308_v14, %v308_v14  ;;  %v300_v21 = vcombine.high %v298_v18, %v298_v18 }
  0x15   : > { %v330_v22 = vsel %vm322_vm0, %v298_v18, 0  ;;  %v317_v24 = vcombine.high %v315_v20, %v315_v20  ;;  %v336_v25 = vsel %vm322_vm0, %v308_v14, 0  ;;  %v342_v26 = vsel %vm322_vm0, %v315_v20, 0 }
  0x16   : > { %653 = vmatprep.subr.msk.bf16.mxu0 %vm322_vm0, %v299_v16  ;;  %655 = vmatprep.subr.msk.bf16.mxu1 %vm322_vm0, %v300_v21 }
  0x17   : > { %362 = vmatpush1.bf16.msra.mxu0 %v324_v17  ;;  %403 = vmatpush1.bf16.msra.mxu1 %v330_v22 }
  0x18   : > { %657 = vmatprep.subr.msk.bf16.mxu0 %vm322_vm0, %v316_v19  ;;  %659 = vmatprep.subr.msk.bf16.mxu1 %vm322_vm0, %v317_v24 }
  0x1a   : > { %654 = vmatmul.mubr.msk.bf16.vlgmr.msra.gmra.mxu0 %vm318_vm1, %v273_v23  ;;  %656 = vmatmul.mubr.msk.bf16.vlgmr.msra.gmra.mxu1 %vm318_vm1, %v273_v23 }
  0x1b   : > { %444 = vmatpush1.bf16.msra.mxu0 %v336_v25  ;;  %461 = vmatprep.mubr.bf16.mxu0 %v689_v4 }
  0x1c   : > { %485 = vmatpush1.bf16.msra.mxu1 %v342_v26  ;;  %502 = vmatprep.mubr.bf16.mxu1 %v689_v4 }
  0x22   : > { %658 = vmatmul.mubr.msk.bf16.vlgmr.msra.gmra.mxu0 %vm318_vm1, %v273_v23  ;;  %660 = vmatmul.mubr.msk.bf16.vlgmr.msra.gmra.mxu1 %vm318_vm1, %v273_v23 }
  0x89   : > { %v527_v30 = vpop.permute.xlu0 %526  ;;  %v541_v36 = vpop.permute.xlu1 %540 }
  0x8a   : > { %v529_v34 = vmul.f32 %v527_v30, %v515_v29  ;;  %v530_v37 = vmul.f32 %v527_v30, %v516_v31  ;;  %v531_v38 = vmul.f32 %v527_v30, %v517_v32  ;;  %v532_v42 = vmul.f32 %v527_v30, %v518_v33 }
  0x8b   : > { %v533_v52 = vmul.f32 %v527_v30, %v519_v41  ;;  %v534_v59 = vmul.f32 %v527_v30, %v520_v45  ;;  %v535_v60 = vmul.f32 %v527_v30, %v521_v46  ;;  %v536_v10 = vmul.f32 %v527_v30, %v522_v61 }
  0x8c   : > { %v543_v43 = vadd.f32 %v541_v36, %v529_v34  ;;  %v544_v48 = vadd.f32 %v541_v36, %v530_v37  ;;  %v545_v49 = vadd.f32 %v541_v36, %v531_v38  ;;  %v546_v55 = vadd.f32 %v541_v36, %v532_v42 }
  0x8d   : > { %v280_v40 = vpop.permute.xlu0 %279  ;;  %v547_v7 = vadd.f32 %v541_v36, %v533_v52  ;;  %v548_v13 = vadd.f32 %v541_v36, %v534_v59  ;;  %v549_v14 = vadd.f32 %v541_v36, %v535_v60  ;;  %v550_v22 = vadd.f32 %v541_v36, %v536_v10 }
  0xda   : > { %v381_v44 = vpop.f32.mrf.mxu0  ;;  %v422_v51 = vpop.f32.mrf.mxu1 }
  0xdb   : > { %v382_v47 = vadd.f32 %v381_v44, %v280_v40  ;;  %v423_v54 = vadd.f32 %v422_v51, %v280_v40 }
  0xdc   : > { %v383_v50 = vpop.f32.mrf.mxu0  ;;  %v424_v58 = vpop.f32.mrf.mxu1 }
  0xdd   : > { %v384_v53 = vadd.f32 %v383_v50, %v280_v40  ;;  %v551_v56 = vadd.f32 %v543_v43, %v382_v47  ;;  %v425_v62 = vadd.f32 %v424_v58, %v280_v40  ;;  %v553_v0 = vadd.f32 %v545_v49, %v423_v54 }
  0xde   : > { %v385_v57 = vpop.f32.mrf.mxu0  ;;  %v426_v3 = vpop.f32.mrf.mxu1 }
  0xdf   : > { %v552_v63 = vadd.f32 %v544_v48, %v384_v53  ;;  %v559_v1 = vmax.f32 %v551_v56, 0.0  ;;  %v554_v4 = vadd.f32 %v546_v55, %v425_v62  ;;  %v561_v6 = vmax.f32 %v553_v0, 0.0 }
  0xe0   : > { %v386_v2 = vpop.f32.mrf.mxu0  ;;  %v427_v8 = vpop.f32.mrf.mxu1 }
  0xe1   : > { %v560_v5 = vmax.f32 %v552_v63, 0.0  ;;  %567 = vst [vmem:[%s767_s18] sm:$0xff] %v559_v1  ;;  %v562_v11 = vmax.f32 %v554_v4, 0.0  ;;  %569 = vst [vmem:[%s767_s18 + $0x10] sm:$0xff] %v561_v6 }
  0xe2   : > { %v463_v9 = vpop.f32.mrf.mxu0  ;;  %v504_v16 = vpop.f32.mrf.mxu1 }
  0xe3   : > { %568 = vst [vmem:[%s767_s18 + $0x8] sm:$0xff] %v560_v5  ;;  %v464_v12 = vadd.f32 %v463_v9, %v280_v40  ;;  %570 = vst [vmem:[%s767_s18 + $0x18] sm:$0xff] %v562_v11  ;;  %v505_v19 = vadd.f32 %v504_v16, %v280_v40 }
  0xe4   : > { %v465_v15 = vpop.f32.mrf.mxu0  ;;  %v506_v21 = vpop.f32.mrf.mxu1 }
  0xe5   : > { %v555_v17 = vadd.f32 %v547_v7, %v464_v12  ;;  %v466_v18 = vadd.f32 %v465_v15, %v280_v40  ;;  %v557_v25 = vadd.f32 %v549_v14, %v505_v19  ;;  %v507_v26 = vadd.f32 %v506_v21, %v280_v40 }
  0xe6   : > { %v467_v20 = vpop.f32.mrf.mxu0  ;;  %v508_v28 = vpop.f32.mrf.mxu1 }
  0xe7   : > { %v563_v23 = vmax.f32 %v555_v17, 0.0  ;;  %v556_v24 = vadd.f32 %v548_v13, %v466_v18  ;;  %v565_v30 = vmax.f32 %v557_v25, 0.0  ;;  %v558_v31 = vadd.f32 %v550_v22, %v507_v26 }
  0xe8   : > { %v468_v27 = vpop.f32.mrf.mxu0  ;;  %v509_v32 = vpop.f32.mrf.mxu1 }
  0xe9   : > { %571 = vst [vmem:[%s767_s18 + $0x20] sm:$0xff] %v563_v23  ;;  %v564_v29 = vmax.f32 %v556_v24, 0.0  ;;  %573 = vst [vmem:[%s767_s18 + $0x30] sm:$0xff] %v565_v30  ;;  %v566_v33 = vmax.f32 %v558_v31, 0.0 }
  0xeb   : > { %572 = vst [vmem:[%s767_s18 + $0x28] sm:$0xff] %v564_v29  ;;  %575 = vst.msk [vmem:[%s767_s18 + $0x38] sm:$0xff] %vm574_vm2, %v566_v33 }
  0xec PF: > { %s16_s21 = sadd.s32 1, %s686_s21  }
  0xed   : > { %p13_p4 = scmp.ge.s32.totalorder %s16_s21, 4  }
  0xef   :  { %15 = sbr.rel (!%p13_p4) target bundleno = 1 (0x1), region = 77 }

// kernel: residual_block_forward.3
= control target key start
LH: loop header
LB: loop body
LE: loop exit
PB: predicated region body
PF: predicated region fallthrough
CT: control target
= control target key end

     0   :  { %s9013_s18 = smov 0   ;;  %s12062_s0 = inlined_call_operand.vmem [shape: bf16[2,4,1256], index: 0, kind: input, shape index: {}]   ;;  %s12063_s1 = inlined_call_operand.vmem [shape: bf16[27,8,4], index: 1, kind: input, shape index: {}]   ;;  %s12064_s2 = inlined_call_operand.vmem [shape: f32[1000,1], index: 2, kind: input, shape index: {}]   ;;  %s12065_s3 = inlined_call_operand.vmem [shape: bf16[2,8,1000], index: 3, kind: output, shape index: {0}]   ;;  %s12066_s4 = inlined_call_operand.vmem [shape: f32[2,8,1], index: 4, kind: output, shape index: {1}]   ;;  %s12067_s5 = inlined_call_operand.vmem [shape: f32[2,8,1], index: 5, kind: output, shape index: {2}]  }
   0x1 LB: > { %s8358_s19 = sadd.s32 4294967295, %s8952_s18   ;;  %p8362_p0 = scmp.ge.s32.totalorder %s8952_s18, 1  ;;  %s8952_s18 = sphi %s9013_s18, %s16_s18  }
   0x2   : > { %p192_p1 = scmp.lt.s32.totalorder %s8952_s18, 3 }
   0x4   : > { %p193_p2 = pnand %p8362_p0, %p192_p1 }
   0x6   : > { %196 = sbr.rel (%p193_p2) target bundleno = 1102 (0x44e), region = 32 }
   0xb   : > { %p228_p3 = scmp.lt.s32.totalorder %s8358_s19, 1  ;;  %v258_v0 = vlaneseq  ;;  %v8954_v1 = vmov 1983009808   ;;  %s8955_s24 = smov 110   ;;  %v8957_v13 = vmov 0   ;;  %vm304_vm0 = vcmask 900096  }
   0xc   : > { %v256_v2 = vunpack.c.l.s4 %v8954_v1  ;;  %s8956_s25 = smov 111   ;;  %455 = vmatprep.mubr.bf16.mxu0 %v8957_v13  ;;  %373 = vmatprep.mubr.bf16.mxu1 %v8957_v13  ;;  %s8958_s26 = smov 109   ;;  %vm316_vm1 = vcmask 1041408   ;;  %vm521_vm2 = vcmask 908288   ;;  %v9171_v29 = vld [vmem:[%s12063_s1 + $0x4] sm:$0xf] }
   0xd   : > { %s12078_s19 = smov (!%p228_p3, %s8358_s19), 1  ;;  %v259_v3 = vshrl.u32 %v258_v0, 7  ;;  %s8959_s27 = smov 101   ;;  %vm312_vm3 = vcmask 31744   ;;  %v9200_v42 = vld [vmem:[%s12063_s1] sm:$0xf] }
   0xe   : > { %v257_v4 = vunpack.c.0.s8 %v256_v2  ;;  %s8852_s20 = smul.u32 20, %s12078_s19  ;;  %s8960_s28 = smov 100   ;;  %vm776_vm4 = vcmask 891904   ;;  %v9258_v62 = vld [vmem:[%s12063_s1 + $0x8] sm:$0xf]  ;;  %vm1050_vm5 = vcmask 826368  }
   0xf   : > { %s8961_s29 = smov 99   ;;  %s8962_s30 = smov 91   ;;  %vm1325_vm6 = vcmask 818176   ;;  %vm1600_vm7 = vcmask 809984   ;;  %vm1875_vm8 = vcmask 744448   ;;  %vm2150_vm9 = vcmask 736256  }
  0x10   : > { %v9024_v5 = vsub.s32 %v257_v4, %v259_v3  ;;  %s9029_s23 = scalar_lea.vmem %s12062_s0, %s8852_s20  ;;  %s8963_s6 = smov 90   ;;  %vm2425_vm10 = vcmask 728064   ;;  %vm2700_vm11 = vcmask 89088   ;;  %vm2975_vm12 = vcmask 80896  }
  0x11   : > { %v249_v6 = vld [vmem:[%s9029_s23 + $0x8] sm:$0xff]  ;;  %v248_v7 = vld [vmem:[%s9029_s23] sm:$0xff]  ;;  %v9120_v19 = vld.sshfl [vmem:[%s9029_s23 + $0x10] sm:$0x3 pattern:$0x76325410] }
  0x12   : > { %v9034_v8 = vrot.slane %v249_v6, %v9024_v5  ;;  %v9037_v9 = vrot.slane %v248_v7, %v9024_v5  ;;  %v271_v10 = vcombine.high %v249_v6, %v249_v6  ;;  %v254_v12 = vcombine.high %v248_v7, %v248_v7  ;;  %s8964_s9 = smov 89   ;;  %s8965_s12 = smov 11  }
  0x13   : > { %s8966_s15 = smov 10   ;;  %s8967_s20 = smov 9   ;;  %vm3250_vm13 = vcmask 72704   ;;  %vm3525_vm14 = vcmask 7168   ;;  %vm4028_vm15 = vcmask 1039360  }
  0x14   : > { %296 = vrot.lane.b32.xlu0 %v9034_v8, %s8955_s24  ;;  %505 = vrot.lane.b32.xlu1 %v9037_v9, %s8956_s25  ;;  %v9044_v11 = vrot.slane %v271_v10, %v9024_v5  ;;  %v9054_v14 = vcombine.high %v9034_v8, %v9034_v8  ;;  %v9057_v15 = vrot.slane %v254_v12, %v9024_v5  ;;  %s8970_s7 = smov 119   ;;  %s8971_s10 = smov 118  }
  0x15   : > { %v9065_v16 = vcombine.high %v9037_v9, %v9037_v9  ;;  %s8972_s11 = smov 117   ;;  %s8973_s14 = smov 39  }
  0x16   : > { %v9081_v17 = vcombine.high %v9057_v15, %v9057_v15  ;;  %v9090_v18 = vcombine.high %v9044_v11, %v9044_v11  ;;  %s8974_s17 = smov 38   ;;  %s8975_s22 = smov 37  }
  0x18   : > { %288 = vrot.lane.b32.xlu0 %v9037_v9, %s8955_s24  ;;  %300 = vrot.lane.b32.xlu1 %v9044_v11, %s8955_s24 }
  0x1c   : > { %298 = vrot.lane.b32.xlu0 %v9054_v14, %s8955_s24  ;;  %509 = vrot.lane.b32.xlu1 %v9057_v15, %s8956_s25 }
  0x20   : > { %507 = vrot.lane.b32.xlu0 %v9065_v16, %s8956_s25  ;;  %290 = vrot.lane.b32.xlu1 %v9065_v16, %s8955_s24 }
  0x24   : > { %292 = vrot.lane.b32.xlu0 %v9057_v15, %s8955_s24  ;;  %513 = vrot.lane.b32.xlu1 %v9034_v8, %s8956_s25 }
  0x28   : > { %515 = vrot.lane.b32.xlu0 %v9054_v14, %s8956_s25  ;;  %517 = vrot.lane.b32.xlu1 %v9044_v11, %s8956_s25 }
  0x2c   : > { %760 = vrot.lane.b32.xlu1 %v9037_v9, %s8958_s26  ;;  %294 = vrot.lane.b32.xlu0 %v9081_v17, %s8955_s24 }
  0x30   : > { %764 = vrot.lane.b32.xlu1 %v9057_v15, %s8958_s26  ;;  %762 = vrot.lane.b32.xlu0 %v9065_v16, %s8958_s26 }
  0x34   : > { %768 = vrot.lane.b32.xlu1 %v9034_v8, %s8958_s26  ;;  %302 = vrot.lane.b32.xlu0 %v9090_v18, %s8955_s24 }
  0x38   : > { %772 = vrot.lane.b32.xlu1 %v9044_v11, %s8958_s26  ;;  %770 = vrot.lane.b32.xlu0 %v9054_v14, %s8958_s26 }
  0x3c   : > { %1032 = vrot.lane.b32.xlu1 %v9037_v9, %s8959_s27  ;;  %511 = vrot.lane.b32.xlu0 %v9081_v17, %s8956_s25 }
  0x40   : > { %1036 = vrot.lane.b32.xlu1 %v9057_v15, %s8959_s27  ;;  %1034 = vrot.lane.b32.xlu0 %v9065_v16, %s8959_s27 }
  0x44   : > { %1040 = vrot.lane.b32.xlu1 %v9034_v8, %s8959_s27  ;;  %519 = vrot.lane.b32.xlu0 %v9090_v18, %s8956_s25 }
  0x48   : > { %1044 = vrot.lane.b32.xlu1 %v9044_v11, %s8959_s27  ;;  %1042 = vrot.lane.b32.xlu0 %v9054_v14, %s8959_s27 }
  0x4c   : > { %1307 = vrot.lane.b32.xlu1 %v9037_v9, %s8960_s28  ;;  %766 = vrot.lane.b32.xlu0 %v9081_v17, %s8958_s26 }
  0x50   : > { %1311 = vrot.lane.b32.xlu1 %v9057_v15, %s8960_s28  ;;  %1309 = vrot.lane.b32.xlu0 %v9065_v16, %s8960_s28 }
  0x54   : > { %1315 = vrot.lane.b32.xlu1 %v9034_v8, %s8960_s28  ;;  %774 = vrot.lane.b32.xlu0 %v9090_v18, %s8958_s26  ;;  %s8968_s26 = smov 1  }
  0x58   : > { %1319 = vrot.lane.b32.xlu1 %v9044_v11, %s8960_s28  ;;  %1317 = vrot.lane.b32.xlu0 %v9054_v14, %s8960_s28 }
  0x5c   : > { %1582 = vrot.lane.b32.xlu1 %v9037_v9, %s8961_s29  ;;  %1038 = vrot.lane.b32.xlu0 %v9081_v17, %s8959_s27 }
  0x60   : > { %1586 = vrot.lane.b32.xlu1 %v9057_v15, %s8961_s29  ;;  %1584 = vrot.lane.b32.xlu0 %v9065_v16, %s8961_s29 }
  0x64   : > { %1048 = vrot.lane.b32.xlu1 %v9120_v19, %s8959_s27  ;;  %1046 = vrot.lane.b32.xlu0 %v9090_v18, %s8959_s27 }
  0x68   : > { %1592 = vrot.lane.b32.xlu1 %v9054_v14, %s8961_s29  ;;  %1590 = vrot.lane.b32.xlu0 %v9034_v8, %s8961_s29 }
  0x6c   : > { %1313 = vrot.lane.b32.xlu1 %v9081_v17, %s8960_s28  ;;  %1594 = vrot.lane.b32.xlu0 %v9044_v11, %s8961_s29 }
  0x70   : > { %1859 = vrot.lane.b32.xlu1 %v9065_v16, %s8962_s30  ;;  %1857 = vrot.lane.b32.xlu0 %v9037_v9, %s8962_s30 }
  0x74   : > { %1321 = vrot.lane.b32.xlu1 %v9090_v18, %s8960_s28  ;;  %1861 = vrot.lane.b32.xlu0 %v9057_v15, %s8962_s30 }
  0x78   : > { %1865 = vrot.lane.b32.xlu1 %v9034_v8, %s8962_s30  ;;  %1323 = vrot.lane.b32.xlu0 %v9120_v19, %s8960_s28 }
  0x7c   : > { %1869 = vrot.lane.b32.xlu1 %v9044_v11, %s8962_s30  ;;  %1867 = vrot.lane.b32.xlu0 %v9054_v14, %s8962_s30 }
  0x80   : > { %2132 = vrot.lane.b32.xlu1 %v9037_v9, %s8963_s6  ;;  %1588 = vrot.lane.b32.xlu0 %v9081_v17, %s8961_s29 }
  0x84   : > { %2136 = vrot.lane.b32.xlu1 %v9057_v15, %s8963_s6  ;;  %2134 = vrot.lane.b32.xlu0 %v9065_v16, %s8963_s6 }
  0x86   : > { %v297_v20 = vpop.permute.xlu0 %296  ;;  %v506_v21 = vpop.permute.xlu1 %505 }
  0x88   : > { %1598 = vrot.lane.b32.xlu1 %v9120_v19, %s8961_s29  ;;  %1596 = vrot.lane.b32.xlu0 %v9090_v18, %s8961_s29  ;;  %s8969_s29 = smov 127  }
  0x8a   : > { %v289_v22 = vpop.permute.xlu0 %288  ;;  %v9151_v23 = vpop.permute.xlu1 %300 }
  0x8c   : > { %2142 = vrot.lane.b32.xlu1 %v9054_v14, %s8963_s6  ;;  %2140 = vrot.lane.b32.xlu0 %v9034_v8, %s8963_s6 }
  0x8e   : > { %v299_v24 = vpop.permute.xlu0 %298  ;;  %v9157_v25 = vpop.permute.xlu1 %509 }
  0x8f   : > { %v310_v26 = vsel %vm304_vm0, %v299_v24, %v9151_v23  ;;  %v309_v27 = vsel %vm304_vm0, %v297_v20, %v299_v24 }
  0x90   : > { %8373 = vmatprep.subr.msk.bf16.mxu0 %vm316_vm1, %v310_v26  ;;  %1863 = vrot.lane.b32.xlu1 %v9081_v17, %s8962_s30  ;;  %v330_v28 = vsel %vm316_vm1, %v309_v27, 0 }
  0x91   : > { %2144 = vrot.lane.b32.xlu0 %v9044_v11, %s8963_s6  ;;  %438 = vmatpush1.bf16.msra.mxu0 %v330_v28 }
  0x92   : > { %v508_v30 = vpop.permute.xlu0 %507  ;;  %v291_v31 = vpop.permute.xlu1 %290 }
  0x93   : > { %v522_v32 = vsel %vm521_vm2, %v506_v21, %v508_v30  ;;  %v523_v33 = vsel %vm521_vm2, %v508_v30, %v9157_v25  ;;  %v305_v35 = vsel %vm304_vm0, %v289_v22, %v291_v31 }
  0x94   : > { %8374 = vmatmul.mubr.msk.bf16.vlgmr.msra.gmra.mxu0 %vm312_vm3, %v9171_v29  ;;  %2409 = vrot.lane.b32.xlu1 %v9065_v16, %s8964_s9  ;;  %v533_v34 = vsel %vm316_vm1, %v522_v32, 0  ;;  %v318_v39 = vsel %vm316_vm1, %v305_v35, 0 }
  0x95   : > { %8377 = vmatprep.subr.msk.bf16.mxu0 %vm316_vm1, %v523_v33  ;;  %2407 = vrot.lane.b32.xlu0 %v9037_v9, %s8964_s9 }
  0x96   : > { %571 = vmatpush1.bf16.msra.mxu0 %v533_v34  ;;  %v293_v36 = vpop.permute.xlu0 %292  ;;  %v9185_v37 = vpop.permute.xlu1 %513  ;;  %588 = vmatprep.mubr.bf16.mxu0 %v8957_v13 }
  0x97   : > { %v306_v38 = vsel %vm304_vm0, %v291_v31, %v293_v36 }
  0x98   : > { %1871 = vrot.lane.b32.xlu1 %v9090_v18, %s8962_s30  ;;  %8369 = vmatprep.subr.msk.bf16.mxu1 %vm316_vm1, %v306_v38 }
  0x99   : > { %2411 = vrot.lane.b32.xlu0 %v9057_v15, %s8964_s9  ;;  %356 = vmatpush1.bf16.msra.mxu1 %v318_v39 }
  0x9a   : > { %v516_v40 = vpop.permute.xlu0 %515  ;;  %v9195_v41 = vpop.permute.xlu1 %517 }
  0x9b   : > { %v526_v43 = vsel %vm521_vm2, %v9185_v37, %v516_v40  ;;  %v527_v44 = vsel %vm521_vm2, %v516_v40, %v9195_v41 }
  0x9c   : > { %2415 = vrot.lane.b32.xlu1 %v9034_v8, %s8964_s9  ;;  %8370 = vmatmul.mubr.msk.bf16.vlgmr.msra.gmra.mxu1 %vm312_vm3, %v9171_v29  ;;  %v545_v45 = vsel %vm316_vm1, %v526_v43, 0 }
  0x9d   : > { %8378 = vmatmul.mubr.msk.bf16.vlgmr.msra.gmra.mxu0 %vm312_vm3, %v9200_v42  ;;  %8381 = vmatprep.subr.msk.bf16.mxu0 %vm316_vm1, %v527_v44 }
  0x9e   : > { %1873 = vrot.lane.b32.xlu0 %v9120_v19, %s8962_s30  ;;  %653 = vmatpush1.bf16.msra.mxu0 %v545_v45  ;;  %v761_v46 = vpop.permute.xlu1 %760  ;;  %v295_v47 = vpop.permute.xlu0 %294 }
  0x9f   : > { %v307_v48 = vsel %vm304_vm0, %v293_v36, %v295_v47  ;;  %v308_v49 = vsel %vm304_vm0, %v295_v47, %v297_v20  ;;  %414 = vmatprep.mubr.bf16.mxu1 %v8957_v13  ;;  %670 = vmatprep.mubr.bf16.mxu0 %v8957_v13 }
  0xa0   : > { %2419 = vrot.lane.b32.xlu1 %v9044_v11, %s8964_s9  ;;  %8371 = vmatprep.subr.msk.bf16.mxu1 %vm316_vm1, %v308_v49  ;;  %v324_v50 = vsel %vm316_vm1, %v307_v48, 0  ;;  %v9378_v49 = vld [vmem:[%s12063_s1 + $0x10] sm:$0xf] }
  0xa1   : > { %397 = vmatpush1.bf16.msra.mxu1 %v324_v50 }
  0xa2   : > { %2417 = vrot.lane.b32.xlu0 %v9054_v14, %s8964_s9  ;;  %v9226_v51 = vpop.permute.xlu1 %764  ;;  %v763_v52 = vpop.permute.xlu0 %762 }
  0xa3   : > { %v777_v53 = vsel %vm776_vm4, %v761_v46, %v763_v52  ;;  %v778_v54 = vsel %vm776_vm4, %v763_v52, %v9226_v51 }
  0xa4   : > { %2682 = vrot.lane.b32.xlu1 %v9037_v9, %s8965_s12  ;;  %8372 = vmatmul.mubr.msk.bf16.vlgmr.msra.gmra.mxu1 %vm312_vm3, %v9171_v29  ;;  %v788_v55 = vsel %vm316_vm1, %v777_v53, 0 }
  0xa5   : > { %8382 = vmatmul.mubr.msk.bf16.vlgmr.msra.gmra.mxu0 %vm312_vm3, %v9200_v42  ;;  %8386 = vmatprep.subr.msk.bf16.mxu0 %vm316_vm1, %v778_v54 }
  0xa6   : > { %2138 = vrot.lane.b32.xlu0 %v9081_v17, %s8963_s6  ;;  %826 = vmatpush1.bf16.msra.mxu0 %v788_v55  ;;  %v9241_v56 = vpop.permute.xlu1 %768  ;;  %v303_v57 = vpop.permute.xlu0 %302 }
  0xa7   : > { %v311_v58 = vsel %vm304_vm0, %v9151_v23, %v303_v57  ;;  %8375 = vmatprep.subr.msk.bf16.mxu1 %vm316_vm1, %v303_v57  ;;  %496 = vmatprep.mubr.bf16.mxu1 %v8957_v13  ;;  %vm4291_vm0 = vcmask 973824  }
  0xa8   : > { %2686 = vrot.lane.b32.xlu1 %v9057_v15, %s8965_s12  ;;  %v336_v59 = vsel %vm316_vm1, %v311_v58, 0  ;;  %843 = vmatprep.mubr.bf16.mxu0 %v8957_v13 }
  0xa9   : > { %479 = vmatpush1.bf16.msra.mxu1 %v336_v59 }
  0xaa   : > { %2684 = vrot.lane.b32.xlu0 %v9065_v16, %s8965_s12  ;;  %v9253_v60 = vpop.permute.xlu1 %772  ;;  %v771_v61 = vpop.permute.xlu0 %770 }
  0xab   : > { %v781_v63 = vsel %vm776_vm4, %v9241_v56, %v771_v61  ;;  %v782_v0 = vsel %vm776_vm4, %v771_v61, %v9253_v60 }
  0xac   : > { %2148 = vrot.lane.b32.xlu1 %v9120_v19, %s8963_s6  ;;  %8376 = vmatmul.mubr.msk.bf16.vlgmr.msra.gmra.mxu1 %vm312_vm3, %v9171_v29  ;;  %v800_v1 = vsel %vm316_vm1, %v781_v63, 0  ;;  %v9318_v29 = vld [vmem:[%s12063_s1 + $0xc] sm:$0xf] }
  0xad   : > { %8387 = vmatmul.mubr.msk.bf16.vlgmr.msra.gmra.mxu0 %vm312_vm3, %v9258_v62  ;;  %8390 = vmatprep.subr.msk.bf16.mxu0 %vm316_vm1, %v782_v0 }
  0xae   : > { %2146 = vrot.lane.b32.xlu0 %v9090_v18, %s8963_s6  ;;  %908 = vmatpush1.bf16.msra.mxu0 %v800_v1  ;;  %v1033_v2 = vpop.permute.xlu1 %1032  ;;  %v512_v3 = vpop.permute.xlu0 %511 }
  0xaf   : > { %v524_v4 = vsel %vm521_vm2, %v9157_v25, %v512_v3  ;;  %v525_v6 = vsel %vm521_vm2, %v512_v3, %v9185_v37  ;;  %629 = vmatprep.mubr.bf16.mxu1 %v8957_v13  ;;  %925 = vmatprep.mubr.bf16.mxu0 %v8957_v13 }
  0xb0   : > { %2692 = vrot.lane.b32.xlu1 %v9054_v14, %s8965_s12  ;;  %8379 = vmatprep.subr.msk.bf16.mxu1 %vm316_vm1, %v525_v6  ;;  %v539_v7 = vsel %vm316_vm1, %v524_v4, 0 }
  0xb1   : > { %612 = vmatpush1.bf16.msra.mxu1 %v539_v7  ;;  %v9437_v7 = vld [vmem:[%s12063_s1 + $0x14] sm:$0xf] }
  0xb2   : > { %2690 = vrot.lane.b32.xlu0 %v9034_v8, %s8965_s12  ;;  %v9286_v10 = vpop.permute.xlu1 %1036  ;;  %v1035_v12 = vpop.permute.xlu0 %1034 }
  0xb3   : > { %v1051_v20 = vsel %vm1050_vm5, %v1033_v2, %v1035_v12  ;;  %v1052_v21 = vsel %vm1050_vm5, %v1035_v12, %v9286_v10 }
  0xb4   : > { %2413 = vrot.lane.b32.xlu1 %v9081_v17, %s8964_s9  ;;  %8380 = vmatmul.mubr.msk.bf16.vlgmr.msra.gmra.mxu1 %vm312_vm3, %v9200_v42  ;;  %v1063_v22 = vsel %vm316_vm1, %v1051_v20, 0 }
  0xb5   : > { %8391 = vmatmul.mubr.msk.bf16.vlgmr.msra.gmra.mxu0 %vm312_vm3, %v9258_v62  ;;  %8396 = vmatprep.subr.msk.bf16.mxu0 %vm316_vm1, %v1052_v21 }
  0xb6   : > { %2694 = vrot.lane.b32.xlu0 %v9044_v11, %s8965_s12  ;;  %1101 = vmatpush1.bf16.msra.mxu0 %v1063_v22  ;;  %v9301_v23 = vpop.permute.xlu1 %1040  ;;  %v520_v24 = vpop.permute.xlu0 %519 }
  0xb7   : > { %v528_v25 = vsel %vm521_vm2, %v9195_v41, %v520_v24  ;;  %8383 = vmatprep.subr.msk.bf16.mxu1 %vm316_vm1, %v520_v24  ;;  %711 = vmatprep.mubr.bf16.mxu1 %v8957_v13  ;;  %vm4554_vm2 = vcmask 965632  }
  0xb8   : > { %2959 = vrot.lane.b32.xlu1 %v9065_v16, %s8966_s15  ;;  %v551_v26 = vsel %vm316_vm1, %v528_v25, 0  ;;  %1118 = vmatprep.mubr.bf16.mxu0 %v8957_v13 }
  0xb9   : > { %694 = vmatpush1.bf16.msra.mxu1 %v551_v26 }
  0xba   : > { %2957 = vrot.lane.b32.xlu0 %v9037_v9, %s8966_s15  ;;  %v9313_v27 = vpop.permute.xlu1 %1044  ;;  %v1043_v28 = vpop.permute.xlu0 %1042 }
  0xbb   : > { %v1055_v30 = vsel %vm1050_vm5, %v9301_v23, %v1043_v28  ;;  %v1056_v31 = vsel %vm1050_vm5, %v1043_v28, %v9313_v27 }
  0xbc   : > { %2421 = vrot.lane.b32.xlu1 %v9090_v18, %s8964_s9  ;;  %8384 = vmatmul.mubr.msk.bf16.vlgmr.msra.gmra.mxu1 %vm312_vm3, %v9200_v42  ;;  %v1075_v32 = vsel %vm316_vm1, %v1055_v30, 0  ;;  %v3974_v30 = vld [vmem:[%s9029_s23 + $0x2] sm:$0xff] }
  0xbd   : > { %8397 = vmatmul.mubr.msk.bf16.vlgmr.msra.gmra.mxu0 %vm312_vm3, %v9318_v29  ;;  %8400 = vmatprep.subr.msk.bf16.mxu0 %vm316_vm1, %v1056_v31 }
  0xbe   : > { %2961 = vrot.lane.b32.xlu0 %v9057_v15, %s8966_s15  ;;  %1183 = vmatpush1.bf16.msra.mxu0 %v1075_v32  ;;  %v1308_v33 = vpop.permute.xlu1 %1307  ;;  %v767_v34 = vpop.permute.xlu0 %766 }
  0xbf   : > { %v779_v35 = vsel %vm776_vm4, %v9226_v51, %v767_v34  ;;  %v780_v36 = vsel %vm776_vm4, %v767_v34, %v9241_v56  ;;  %884 = vmatprep.mubr.bf16.mxu1 %v8957_v13  ;;  %1200 = vmatprep.mubr.bf16.mxu0 %v8957_v13 }
  0xc0   : > { %2965 = vrot.lane.b32.xlu1 %v9034_v8, %s8966_s15  ;;  %8388 = vmatprep.subr.msk.bf16.mxu1 %vm316_vm1, %v780_v36  ;;  %v794_v37 = vsel %vm316_vm1, %v779_v35, 0  ;;  %v9504_v35 = vrot.slane %v3974_v30, %v9024_v5 }
  0xc1   : > { %867 = vmatpush1.bf16.msra.mxu1 %v794_v37 }
  0xc2   : > { %2423 = vrot.lane.b32.xlu0 %v9120_v19, %s8964_s9  ;;  %v9346_v38 = vpop.permute.xlu1 %1311  ;;  %v1310_v39 = vpop.permute.xlu0 %1309 }
  0xc3   : > { %v1326_v40 = vsel %vm1325_vm6, %v1308_v33, %v1310_v39  ;;  %v1327_v41 = vsel %vm1325_vm6, %v1310_v39, %v9346_v38  ;;  %v9496_v33 = vld [vmem:[%s12063_s1 + $0x18] sm:$0xf] }
  0xc4   : > { %2969 = vrot.lane.b32.xlu1 %v9044_v11, %s8966_s15  ;;  %8389 = vmatmul.mubr.msk.bf16.vlgmr.msra.gmra.mxu1 %vm312_vm3, %v9258_v62  ;;  %v1338_v42 = vsel %vm316_vm1, %v1326_v40, 0  ;;  %v9524_v40 = vcombine.high %v9504_v35, %v9504_v35 }
  0xc5   : > { %8401 = vmatmul.mubr.msk.bf16.vlgmr.msra.gmra.mxu0 %vm312_vm3, %v9318_v29  ;;  %8406 = vmatprep.subr.msk.bf16.mxu0 %vm316_vm1, %v1327_v41 }
  0xc6   : > { %2967 = vrot.lane.b32.xlu0 %v9054_v14, %s8966_s15  ;;  %1376 = vmatpush1.bf16.msra.mxu0 %v1338_v42  ;;  %v9361_v43 = vpop.permute.xlu1 %1315  ;;  %v775_v44 = vpop.permute.xlu0 %774  ;;  %v3978_v42 = vcombine.high %v3974_v30, %v3974_v30 }
  0xc7   : > { %v783_v45 = vsel %vm776_vm4, %v9253_v60, %v775_v44  ;;  %8392 = vmatprep.subr.msk.bf16.mxu1 %vm316_vm1, %v775_v44  ;;  %966 = vmatprep.mubr.bf16.mxu1 %v8957_v13  ;;  %vm4817_vm4 = vcmask 957440  }
  0xc8   : > { %3232 = vrot.lane.b32.xlu1 %v9037_v9, %s8967_s20  ;;  %v806_v46 = vsel %vm316_vm1, %v783_v45, 0  ;;  %1393 = vmatprep.mubr.bf16.mxu0 %v8957_v13 }
  0xc9   : > { %949 = vmatpush1.bf16.msra.mxu1 %v806_v46  ;;  %v3975_v46 = vld [vmem:[%s9029_s23 + $0xa] sm:$0xff] }
  0xca   : > { %2688 = vrot.lane.b32.xlu0 %v9081_v17, %s8965_s12  ;;  %v9373_v47 = vpop.permute.xlu1 %1319  ;;  %v1318_v48 = vpop.permute.xlu0 %1317 }
  0xcb   : > { %v1330_v50 = vsel %vm1325_vm6, %v9361_v43, %v1318_v48  ;;  %v1331_v51 = vsel %vm1325_vm6, %v1318_v48, %v9373_v47 }
  0xcc   : > { %3236 = vrot.lane.b32.xlu1 %v9057_v15, %s8967_s20  ;;  %8393 = vmatmul.mubr.msk.bf16.vlgmr.msra.gmra.mxu1 %vm312_vm3, %v9258_v62  ;;  %v1350_v52 = vsel %vm316_vm1, %v1330_v50, 0 }
  0xcd   : > { %8407 = vmatmul.mubr.msk.bf16.vlgmr.msra.gmra.mxu0 %vm312_vm3, %v9378_v49  ;;  %8410 = vmatprep.subr.msk.bf16.mxu0 %vm316_vm1, %v1331_v51 }
  0xce   : > { %3234 = vrot.lane.b32.xlu0 %v9065_v16, %s8967_s20  ;;  %1458 = vmatpush1.bf16.msra.mxu0 %v1350_v52  ;;  %v1583_v53 = vpop.permute.xlu1 %1582  ;;  %v1039_v54 = vpop.permute.xlu0 %1038 }
  0xcf   : > { %v1053_v55 = vsel %vm1050_vm5, %v9286_v10, %v1039_v54  ;;  %v1054_v56 = vsel %vm1050_vm5, %v1039_v54, %v9301_v23  ;;  %1159 = vmatprep.mubr.bf16.mxu1 %v8957_v13  ;;  %1475 = vmatprep.mubr.bf16.mxu0 %v8957_v13  ;;  %v3995_v54 = vcombine.high %v3975_v46, %v3975_v46 }
  0xd0   : > { %2698 = vrot.lane.b32.xlu1 %v9120_v19, %s8965_s12  ;;  %8398 = vmatprep.subr.msk.bf16.mxu1 %vm316_vm1, %v1054_v56  ;;  %v1069_v57 = vsel %vm316_vm1, %v1053_v55, 0 }
  0xd1   : > { %1142 = vmatpush1.bf16.msra.mxu1 %v1069_v57 }
  0xd2   : > { %2696 = vrot.lane.b32.xlu0 %v9090_v18, %s8965_s12  ;;  %v9406_v58 = vpop.permute.xlu1 %1586  ;;  %v1585_v59 = vpop.permute.xlu0 %1584 }
  0xd3   : > { %v1601_v60 = vsel %vm1600_vm7, %v1583_v53, %v1585_v59  ;;  %v1602_v61 = vsel %vm1600_vm7, %v1585_v59, %v9406_v58  ;;  %v9558_v53 = vrot.slane %v3975_v46, %v9024_v5 }
  0xd4   : > { %3242 = vrot.lane.b32.xlu1 %v9054_v14, %s8967_s20  ;;  %8399 = vmatmul.mubr.msk.bf16.vlgmr.msra.gmra.mxu1 %vm312_vm3, %v9318_v29  ;;  %v1613_v62 = vsel %vm316_vm1, %v1601_v60, 0  ;;  %v9577_v60 = vrot.slane %v3995_v54, %v9024_v5 }
  0xd5   : > { %8411 = vmatmul.mubr.msk.bf16.vlgmr.msra.gmra.mxu0 %vm312_vm3, %v9378_v49  ;;  %8416 = vmatprep.subr.msk.bf16.mxu0 %vm316_vm1, %v1602_v61 }
  0xd6   : > { %3240 = vrot.lane.b32.xlu0 %v9034_v8, %s8967_s20  ;;  %1651 = vmatpush1.bf16.msra.mxu0 %v1613_v62  ;;  %v1049_v63 = vpop.permute.xlu1 %1048  ;;  %v1047_v0 = vpop.permute.xlu0 %1046 }
  0xd7   : > { %v1057_v1 = vsel %vm1050_vm5, %v9313_v27, %v1047_v0  ;;  %v1058_v2 = vsel %vm1050_vm5, %v1047_v0, %v1049_v63  ;;  %1241 = vmatprep.mubr.bf16.mxu1 %v8957_v13  ;;  %1668 = vmatprep.mubr.bf16.mxu0 %v8957_v13  ;;  %v9587_v63 = vcombine.high %v9558_v53, %v9558_v53  ;;  %vm5091_vm5 = vcmask 318464  }
  0xd8   : > { %2963 = vrot.lane.b32.xlu1 %v9081_v17, %s8966_s15  ;;  %8402 = vmatprep.subr.msk.bf16.mxu1 %vm316_vm1, %v1058_v2  ;;  %v1081_v3 = vsel %vm316_vm1, %v1057_v1, 0 }
  0xd9   : > { %1224 = vmatpush1.bf16.msra.mxu1 %v1081_v3 }
  0xda   : > { %3244 = vrot.lane.b32.xlu0 %v9044_v11, %s8967_s20  ;;  %v1593_v4 = vpop.permute.xlu1 %1592  ;;  %v9432_v6 = vpop.permute.xlu0 %1590 }
  0xdb   : > { %v1605_v10 = vsel %vm1600_vm7, %v9432_v6, %v1593_v4 }
  0xdc   : > { %3509 = vrot.lane.b32.xlu1 %v9065_v16, %s8968_s26  ;;  %8403 = vmatmul.mubr.msk.bf16.vlgmr.msra.gmra.mxu1 %vm312_vm3, %v9318_v29  ;;  %v1625_v23 = vsel %vm316_vm1, %v1605_v10, 0 }
  0xdd   : > { %8417 = vmatmul.mubr.msk.bf16.vlgmr.msra.gmra.mxu0 %vm312_vm3, %v9437_v7  ;;  %1434 = vmatprep.mubr.bf16.mxu1 %v8957_v13 }
  0xde   : > { %3507 = vrot.lane.b32.xlu0 %v9037_v9, %s8968_s26  ;;  %v1314_v12 = vpop.permute.xlu1 %1313  ;;  %v9450_v20 = vpop.permute.xlu0 %1594  ;;  %1750 = vmatprep.mubr.bf16.mxu0 %v8957_v13 }
  0xdf   : > { %v1328_v16 = vsel %vm1325_vm6, %v9346_v38, %v1314_v12  ;;  %v1329_v21 = vsel %vm1325_vm6, %v1314_v12, %v9361_v43  ;;  %v1606_v22 = vsel %vm1600_vm7, %v1593_v4, %v9450_v20 }
  0xe0   : > { %2971 = vrot.lane.b32.xlu1 %v9090_v18, %s8966_s15  ;;  %8408 = vmatprep.subr.msk.bf16.mxu1 %vm316_vm1, %v1329_v21  ;;  %v1344_v9 = vsel %vm316_vm1, %v1328_v16, 0 }
  0xe1   : > { %8420 = vmatprep.subr.msk.bf16.mxu0 %vm316_vm1, %v1606_v22  ;;  %1417 = vmatpush1.bf16.msra.mxu1 %v1344_v9 }
  0xe2   : > { %3511 = vrot.lane.b32.xlu0 %v9057_v15, %s8968_s26  ;;  %1733 = vmatpush1.bf16.msra.mxu0 %v1625_v23  ;;  %v1860_v24 = vpop.permute.xlu1 %1859  ;;  %v1858_v25 = vpop.permute.xlu0 %1857 }
  0xe3   : > { %v1876_v26 = vsel %vm1875_vm8, %v1858_v25, %v1860_v24  ;;  %v9645_v25 = vld [vmem:[%s12063_s1 + $0x20] sm:$0xf] }
  0xe4   : > { %3515 = vrot.lane.b32.xlu1 %v9034_v8, %s8968_s26  ;;  %8409 = vmatmul.mubr.msk.bf16.vlgmr.msra.gmra.mxu1 %vm312_vm3, %v9378_v49  ;;  %v1888_v28 = vsel %vm316_vm1, %v1876_v26, 0 }
  0xe5   : > { %8421 = vmatmul.mubr.msk.bf16.vlgmr.msra.gmra.mxu0 %vm312_vm3, %v9437_v7  ;;  %1516 = vmatprep.mubr.bf16.mxu1 %v8957_v13 }
  0xe6   : > { %2973 = vrot.lane.b32.xlu0 %v9120_v19, %s8966_s15  ;;  %v1322_v15 = vpop.permute.xlu1 %1321  ;;  %v9477_v27 = vpop.permute.xlu0 %1861  ;;  %1943 = vmatprep.mubr.bf16.mxu0 %v8957_v13  ;;  %s8980_s15 = smov 18  }
  0xe7   : > { %v1877_v8 = vsel %vm1875_vm8, %v1860_v24, %v9477_v27  ;;  %v1332_v29 = vsel %vm1325_vm6, %v9373_v47, %v1322_v15 }
  0xe8   : > { %3519 = vrot.lane.b32.xlu1 %v9044_v11, %s8968_s26  ;;  %8426 = vmatprep.subr.msk.bf16.mxu0 %vm316_vm1, %v1877_v8  ;;  %v1356_v34 = vsel %vm316_vm1, %v1332_v29, 0 }
  0xe9   : > { %1926 = vmatpush1.bf16.msra.mxu0 %v1888_v28 }
  0xea   : > { %3517 = vrot.lane.b32.xlu0 %v9054_v14, %s8968_s26  ;;  %v9491_v31 = vpop.permute.xlu1 %1865  ;;  %v1324_v32 = vpop.permute.xlu0 %1323 }
  0xeb   : > { %v1333_v11 = vsel %vm1325_vm6, %v1322_v15, %v1324_v32  ;;  %vm5366_vm6 = vcmask 310272  }
  0xec   : > { %3246 = vrot.lane.b32.xlu1 %v9090_v18, %s8967_s20  ;;  %8412 = vmatprep.subr.msk.bf16.mxu1 %vm316_vm1, %v1333_v11 }
  0xed   : > { %8427 = vmatmul.mubr.msk.bf16.vlgmr.msra.gmra.mxu0 %vm312_vm3, %v9496_v33  ;;  %1499 = vmatpush1.bf16.msra.mxu1 %v1356_v34  ;;  %v9674_v34 = vcombine.high %v9577_v60, %v9577_v60 }
  0xee   : > { %3238 = vrot.lane.b32.xlu0 %v9081_v17, %s8967_s20  ;;  %v9510_v14 = vpop.permute.xlu1 %1869  ;;  %v1868_v36 = vpop.permute.xlu0 %1867  ;;  %2025 = vmatprep.mubr.bf16.mxu0 %v8957_v13 }
  0xef   : > { %v1880_v37 = vsel %vm1875_vm8, %v9491_v31, %v1868_v36  ;;  %v1881_v38 = vsel %vm1875_vm8, %v1868_v36, %v9510_v14 }
  0xf0   : > { %3513 = vrot.lane.b32.xlu1 %v9081_v17, %s8968_s26  ;;  %8413 = vmatmul.mubr.msk.bf16.vlgmr.msra.gmra.mxu1 %vm312_vm3, %v9378_v49  ;;  %v1900_v39 = vsel %vm316_vm1, %v1880_v37, 0  ;;  %v9546_v49 = vrot.slane %v3978_v42, %v9024_v5 }
  0xf1   : > { %8430 = vmatprep.subr.msk.bf16.mxu0 %vm316_vm1, %v1881_v38  ;;  %1709 = vmatprep.mubr.bf16.mxu1 %v8957_v13 }
  0xf2   : > { %3248 = vrot.lane.b32.xlu0 %v9120_v19, %s8967_s20  ;;  %2008 = vmatpush1.bf16.msra.mxu0 %v1900_v39  ;;  %v2133_v41 = vpop.permute.xlu1 %2132  ;;  %v1589_v17 = vpop.permute.xlu0 %1588  ;;  %v9640_v24 = vcombine.high %v9546_v49, %v9546_v49  ;;  %s8981_s20 = smov 17  }
  0xf3   : > { %v1603_v43 = vsel %vm1600_vm7, %v9406_v58, %v1589_v17  ;;  %v1604_v44 = vsel %vm1600_vm7, %v1589_v17, %v9432_v6 }
  0xf4   : > { %4014 = vrot.lane.b32.xlu1 %v9524_v40, %s8969_s29  ;;  %8418 = vmatprep.subr.msk.bf16.mxu1 %vm316_vm1, %v1604_v44  ;;  %v1619_v45 = vsel %vm316_vm1, %v1603_v43, 0 }
  0xf5   : > { %8431 = vmatmul.mubr.msk.bf16.vlgmr.msra.gmra.mxu0 %vm312_vm3, %v9496_v33  ;;  %1692 = vmatpush1.bf16.msra.mxu1 %v1619_v45  ;;  %v9710_v45 = vld [vmem:[%s12063_s1 + $0x24] sm:$0xf] }
  0xf6   : > { %4012 = vrot.lane.b32.xlu0 %v9504_v35, %s8969_s29  ;;  %v9543_v47 = vpop.permute.xlu1 %2136  ;;  %v2135_v48 = vpop.permute.xlu0 %2134  ;;  %2218 = vmatprep.mubr.bf16.mxu0 %v8957_v13 }
  0xf7   : > { %v2151_v50 = vsel %vm2150_vm9, %v2133_v41, %v2135_v48  ;;  %v2152_v51 = vsel %vm2150_vm9, %v2135_v48, %v9543_v47 }
  0xf8   : > { %3521 = vrot.lane.b32.xlu1 %v9090_v18, %s8968_s26  ;;  %8419 = vmatmul.mubr.msk.bf16.vlgmr.msra.gmra.mxu1 %vm312_vm3, %v9437_v7  ;;  %v2163_v52 = vsel %vm316_vm1, %v2151_v50, 0  ;;  %v9567_v18 = vld [vmem:[%s12063_s1 + $0x1c] sm:$0xf] }
  0xf9   : > { %8436 = vmatprep.subr.msk.bf16.mxu0 %vm316_vm1, %v2152_v51  ;;  %1791 = vmatprep.mubr.bf16.mxu1 %v8957_v13 }
  0xfa   : > { %4016 = vrot.lane.b32.xlu0 %v9546_v49, %s8969_s29  ;;  %2201 = vmatpush1.bf16.msra.mxu0 %v2163_v52  ;;  %v1599_v55 = vpop.permute.xlu1 %1598  ;;  %v1597_v56 = vpop.permute.xlu0 %1596 }
  0xfb   : > { %v1607_v57 = vsel %vm1600_vm7, %v9450_v20, %v1597_v56  ;;  %v1608_v58 = vsel %vm1600_vm7, %v1597_v56, %v1599_v55  ;;  %vm5641_vm7 = vcmask 302080  }
  0xfc   : > { %4020 = vrot.lane.b32.xlu1 %v9558_v53, %s8969_s29  ;;  %8422 = vmatprep.subr.msk.bf16.mxu1 %vm316_vm1, %v1608_v58  ;;  %v1631_v59 = vsel %vm316_vm1, %v1607_v57, 0 }
  0xfd   : > { %8437 = vmatmul.mubr.msk.bf16.vlgmr.msra.gmra.mxu0 %vm312_vm3, %v9567_v18  ;;  %1774 = vmatpush1.bf16.msra.mxu1 %v1631_v59 }
  0xfe   : > { %3523 = vrot.lane.b32.xlu0 %v9120_v19, %s8968_s26  ;;  %v2143_v61 = vpop.permute.xlu1 %2142  ;;  %v9583_v62 = vpop.permute.xlu0 %2140  ;;  %2300 = vmatprep.mubr.bf16.mxu0 %v8957_v13  ;;  %s8976_s26 = smov 29  }
  0xff   : > { %v2155_v19 = vsel %vm2150_vm9, %v9583_v62, %v2143_v61 }
 0x100   : > { %4024 = vrot.lane.b32.xlu1 %v9577_v60, %s8969_s29  ;;  %8423 = vmatmul.mubr.msk.bf16.vlgmr.msra.gmra.mxu1 %vm312_vm3, %v9437_v7  ;;  %v2175_v7 = vsel %vm316_vm1, %v2155_v19, 0 }
 0x101   : > { %1984 = vmatprep.mubr.bf16.mxu1 %v8957_v13 }
 0x102   : > { %4022 = vrot.lane.b32.xlu0 %v9587_v63, %s8969_s29  ;;  %v1864_v0 = vpop.permute.xlu1 %1863 }
 0x103   : > { %v1878_v1 = vsel %vm1875_vm8, %v9477_v27, %v1864_v0  ;;  %v9601_v2 = vpop.permute.xlu0 %2144  ;;  %v1879_v3 = vsel %vm1875_vm8, %v1864_v0, %v9491_v31 }
 0x104   : > { %4277 = vrot.lane.b32.xlu1 %v9524_v40, %s8970_s7  ;;  %8428 = vmatprep.subr.msk.bf16.mxu1 %vm316_vm1, %v1879_v3  ;;  %v2156_v4 = vsel %vm2150_vm9, %v2143_v61, %v9601_v2  ;;  %v1894_v6 = vsel %vm316_vm1, %v1878_v1, 0 }
 0x105   : > { %8440 = vmatprep.subr.msk.bf16.mxu0 %vm316_vm1, %v2156_v4  ;;  %1967 = vmatpush1.bf16.msra.mxu1 %v1894_v6 }
 0x106   : > { %4275 = vrot.lane.b32.xlu0 %v9504_v35, %s8970_s7  ;;  %2283 = vmatpush1.bf16.msra.mxu0 %v2175_v7  ;;  %v2410_v10 = vpop.permute.xlu1 %2409 }
 0x107   : > { %v2408_v12 = vpop.permute.xlu0 %2407 }
 0x108   : > { %4283 = vrot.lane.b32.xlu1 %v9558_v53, %s8970_s7  ;;  %8429 = vmatmul.mubr.msk.bf16.vlgmr.msra.gmra.mxu1 %vm312_vm3, %v9496_v33  ;;  %v2426_v20 = vsel %vm2425_vm10, %v2408_v12, %v2410_v10 }
 0x109   : > { %8441 = vmatmul.mubr.msk.bf16.vlgmr.msra.gmra.mxu0 %vm312_vm3, %v9567_v18  ;;  %2066 = vmatprep.mubr.bf16.mxu1 %v8957_v13  ;;  %v2438_v9 = vsel %vm316_vm1, %v2426_v20, 0 }
 0x10a   : > { %4279 = vrot.lane.b32.xlu0 %v9546_v49, %s8970_s7  ;;  %v1872_v16 = vpop.permute.xlu1 %1871  ;;  %2493 = vmatprep.mubr.bf16.mxu0 %v8957_v13 }
 0x10b   : > { %v9626_v21 = vpop.permute.xlu0 %2411  ;;  %v1882_v26 = vsel %vm1875_vm8, %v9510_v14, %v1872_v16 }
 0x10c   : > { %4287 = vrot.lane.b32.xlu1 %v9577_v60, %s8970_s7  ;;  %v2427_v22 = vsel %vm2425_vm10, %v2410_v10, %v9626_v21  ;;  %v1906_v8 = vsel %vm316_vm1, %v1882_v26, 0  ;;  %v9779_v10 = vld [vmem:[%s12063_s1 + $0x28] sm:$0xf] }
 0x10d   : > { %8446 = vmatprep.subr.msk.bf16.mxu0 %vm316_vm1, %v2427_v22 }
 0x10e   : > { %4285 = vrot.lane.b32.xlu0 %v9587_v63, %s8970_s7  ;;  %2476 = vmatpush1.bf16.msra.mxu0 %v2438_v9  ;;  %v9636_v23 = vpop.permute.xlu1 %2415 }
 0x110   : > { %v1874_v15 = vpop.permute.xlu0 %1873  ;;  %4538 = vrot.lane.b32.xlu1 %v9504_v35, %s8971_s10 }
 0x111   : > { %v1883_v27 = vsel %vm1875_vm8, %v1872_v16, %v1874_v15  ;;  %8447 = vmatmul.mubr.msk.bf16.vlgmr.msra.gmra.mxu0 %vm312_vm3, %v9645_v25  ;;  %vm5916_vm8 = vcmask 236544  }
 0x112   : > { %4018 = vrot.lane.b32.xlu0 %v9640_v24, %s8969_s29  ;;  %8432 = vmatprep.subr.msk.bf16.mxu1 %vm316_vm1, %v1883_v27  ;;  %v9658_v28 = vpop.permute.xlu1 %2419 }
 0x113   : > { %2049 = vmatpush1.bf16.msra.mxu1 %v1906_v8  ;;  %2575 = vmatprep.mubr.bf16.mxu0 %v8957_v13 }
 0x114   : > { %v2418_v29 = vpop.permute.xlu0 %2417  ;;  %4542 = vrot.lane.b32.xlu1 %v9546_v49, %s8971_s10 }
 0x115   : > { %v2430_v30 = vsel %vm2425_vm10, %v9636_v23, %v2418_v29  ;;  %v2431_v31 = vsel %vm2425_vm10, %v2418_v29, %v9658_v28 }
 0x116   : > { %4540 = vrot.lane.b32.xlu0 %v9524_v40, %s8971_s10  ;;  %8433 = vmatmul.mubr.msk.bf16.vlgmr.msra.gmra.mxu1 %vm312_vm3, %v9496_v33  ;;  %v2450_v32 = vsel %vm316_vm1, %v2430_v30, 0  ;;  %v2683_v11 = vpop.permute.xlu1 %2682 }
 0x117   : > { %8450 = vmatprep.subr.msk.bf16.mxu0 %vm316_vm1, %v2431_v31  ;;  %2259 = vmatprep.mubr.bf16.mxu1 %v8957_v13 }
 0x118   : > { %2558 = vmatpush1.bf16.msra.mxu0 %v2450_v32  ;;  %v2139_v14 = vpop.permute.xlu0 %2138  ;;  %4546 = vrot.lane.b32.xlu1 %v9558_v53, %s8971_s10 }
 0x119   : > { %v2153_v36 = vsel %vm2150_vm9, %v9543_v47, %v2139_v14  ;;  %v2154_v33 = vsel %vm2150_vm9, %v2139_v14, %v9583_v62 }
 0x11a   : > { %4026 = vrot.lane.b32.xlu0 %v9674_v34, %s8969_s29  ;;  %8438 = vmatprep.subr.msk.bf16.mxu1 %vm316_vm1, %v2154_v33  ;;  %v2169_v37 = vsel %vm316_vm1, %v2153_v36, 0  ;;  %v9688_v38 = vpop.permute.xlu1 %2686  ;;  %v9836_v36 = vld [vmem:[%s12063_s1 + $0x2c] sm:$0xf]  ;;  %s8977_s29 = smov 28  }
 0x11b   : > { %8451 = vmatmul.mubr.msk.bf16.vlgmr.msra.gmra.mxu0 %vm312_vm3, %v9645_v25  ;;  %2242 = vmatpush1.bf16.msra.mxu1 %v2169_v37 }
 0x11c   : > { %v2685_v39 = vpop.permute.xlu0 %2684  ;;  %4550 = vrot.lane.b32.xlu1 %v9577_v60, %s8971_s10  ;;  %2768 = vmatprep.mubr.bf16.mxu0 %v8957_v13 }
 0x11d   : > { %v2701_v41 = vsel %vm2700_vm11, %v2683_v11, %v2685_v39  ;;  %v2702_v17 = vsel %vm2700_vm11, %v2685_v39, %v9688_v38 }
 0x11e   : > { %4548 = vrot.lane.b32.xlu0 %v9587_v63, %s8971_s10  ;;  %8439 = vmatmul.mubr.msk.bf16.vlgmr.msra.gmra.mxu1 %vm312_vm3, %v9567_v18  ;;  %v2713_v42 = vsel %vm316_vm1, %v2701_v41, 0  ;;  %v2149_v43 = vpop.permute.xlu1 %2148 }
 0x11f   : > { %8456 = vmatprep.subr.msk.bf16.mxu0 %vm316_vm1, %v2702_v17  ;;  %2341 = vmatprep.mubr.bf16.mxu1 %v8957_v13 }
 0x120   : > { %2751 = vmatpush1.bf16.msra.mxu0 %v2713_v42  ;;  %v2147_v44 = vpop.permute.xlu0 %2146  ;;  %4801 = vrot.lane.b32.xlu1 %v9504_v35, %s8972_s11 }
 0x121   : > { %v2157_v46 = vsel %vm2150_vm9, %v9601_v2, %v2147_v44  ;;  %v2158_v47 = vsel %vm2150_vm9, %v2147_v44, %v2149_v43  ;;  %vm6191_vm9 = vcmask 228352  }
 0x122   : > { %4281 = vrot.lane.b32.xlu0 %v9640_v24, %s8970_s7  ;;  %8442 = vmatprep.subr.msk.bf16.mxu1 %vm316_vm1, %v2158_v47  ;;  %v2181_v48 = vsel %vm316_vm1, %v2157_v46, 0  ;;  %v2693_v50 = vpop.permute.xlu1 %2692 }
 0x123   : > { %8457 = vmatmul.mubr.msk.bf16.vlgmr.msra.gmra.mxu0 %vm312_vm3, %v9710_v45  ;;  %2324 = vmatpush1.bf16.msra.mxu1 %v2181_v48 }
 0x124   : > { %v9721_v51 = vpop.permute.xlu0 %2690  ;;  %4805 = vrot.lane.b32.xlu1 %v9546_v49, %s8972_s11  ;;  %2850 = vmatprep.mubr.bf16.mxu0 %v8957_v13 }
 0x125   : > { %v2705_v54 = vsel %vm2700_vm11, %v9721_v51, %v2693_v50 }
 0x126   : > { %4803 = vrot.lane.b32.xlu0 %v9524_v40, %s8972_s11  ;;  %8443 = vmatmul.mubr.msk.bf16.vlgmr.msra.gmra.mxu1 %vm312_vm3, %v9567_v18  ;;  %v2414_v52 = vpop.permute.xlu1 %2413  ;;  %v2725_v59 = vsel %vm316_vm1, %v2705_v54, 0 }
 0x127   : > { %v2428_v55 = vsel %vm2425_vm10, %v9626_v21, %v2414_v52  ;;  %v2429_v56 = vsel %vm2425_vm10, %v2414_v52, %v9636_v23  ;;  %2534 = vmatprep.mubr.bf16.mxu1 %v8957_v13 }
 0x128   : > { %v9737_v57 = vpop.permute.xlu0 %2694  ;;  %4809 = vrot.lane.b32.xlu1 %v9558_v53, %s8972_s11  ;;  %8448 = vmatprep.subr.msk.bf16.mxu1 %vm316_vm1, %v2429_v56  ;;  %v2444_v18 = vsel %vm316_vm1, %v2428_v55, 0 }
 0x129   : > { %v2706_v58 = vsel %vm2700_vm11, %v2693_v50, %v9737_v57  ;;  %2517 = vmatpush1.bf16.msra.mxu1 %v2444_v18  ;;  %v9895_v18 = vld.sshfl [vmem:[%s9029_s23 + $0x12] sm:$0x3 pattern:$0x76325410] }
 0x12a   : > { %4289 = vrot.lane.b32.xlu0 %v9674_v34, %s8970_s7  ;;  %8460 = vmatprep.subr.msk.bf16.mxu0 %vm316_vm1, %v2706_v58  ;;  %v2960_v61 = vpop.permute.xlu1 %2959  ;;  %s8978_s7 = smov 27  }
 0x12b   : > { %2833 = vmatpush1.bf16.msra.mxu0 %v2725_v59 }
 0x12c   : > { %v2958_v62 = vpop.permute.xlu0 %2957  ;;  %4813 = vrot.lane.b32.xlu1 %v9577_v60, %s8972_s11 }
 0x12d   : > { %v2976_v0 = vsel %vm2975_vm12, %v2958_v62, %v2960_v61 }
 0x12e   : > { %4811 = vrot.lane.b32.xlu0 %v9587_v63, %s8972_s11  ;;  %8449 = vmatmul.mubr.msk.bf16.vlgmr.msra.gmra.mxu1 %vm312_vm3, %v9645_v25  ;;  %v2422_v19 = vpop.permute.xlu1 %2421  ;;  %v2988_v3 = vsel %vm316_vm1, %v2976_v0, 0 }
 0x12f   : > { %8461 = vmatmul.mubr.msk.bf16.vlgmr.msra.gmra.mxu0 %vm312_vm3, %v9710_v45  ;;  %2616 = vmatprep.mubr.bf16.mxu1 %v8957_v13  ;;  %v2432_v6 = vsel %vm2425_vm10, %v9658_v28, %v2422_v19 }
 0x130   : > { %v9759_v1 = vpop.permute.xlu0 %2961  ;;  %5073 = vrot.lane.b32.xlu1 %v9504_v35, %s8973_s14  ;;  %3043 = vmatprep.mubr.bf16.mxu0 %v8957_v13  ;;  %v2456_v20 = vsel %vm316_vm1, %v2432_v6, 0 }
 0x131   : > { %v2977_v2 = vsel %vm2975_vm12, %v2960_v61, %v9759_v1 }
 0x132   : > { %4544 = vrot.lane.b32.xlu0 %v9640_v24, %s8971_s10  ;;  %8466 = vmatprep.subr.msk.bf16.mxu0 %vm316_vm1, %v2977_v2  ;;  %v9770_v4 = vpop.permute.xlu1 %2965 }
 0x133   : > { %3026 = vmatpush1.bf16.msra.mxu0 %v2988_v3 }
 0x134   : > { %v2424_v7 = vpop.permute.xlu0 %2423  ;;  %5077 = vrot.lane.b32.xlu1 %v9546_v49, %s8973_s14 }
 0x135   : > { %v2433_v12 = vsel %vm2425_vm10, %v2422_v19, %v2424_v7  ;;  %vm6466_vm10 = vcmask 220160  }
 0x136   : > { %5075 = vrot.lane.b32.xlu0 %v9524_v40, %s8973_s14  ;;  %8452 = vmatprep.subr.msk.bf16.mxu1 %vm316_vm1, %v2433_v12  ;;  %v9786_v16 = vpop.permute.xlu1 %2969 }
 0x137   : > { %8467 = vmatmul.mubr.msk.bf16.vlgmr.msra.gmra.mxu0 %vm312_vm3, %v9779_v10  ;;  %2599 = vmatpush1.bf16.msra.mxu1 %v2456_v20 }
 0x138   : > { %v2968_v21 = vpop.permute.xlu0 %2967  ;;  %5081 = vrot.lane.b32.xlu1 %v9558_v53, %s8973_s14  ;;  %3125 = vmatprep.mubr.bf16.mxu0 %v8957_v13 }
 0x139   : > { %v2980_v22 = vsel %vm2975_vm12, %v9770_v4, %v2968_v21  ;;  %v2981_v9 = vsel %vm2975_vm12, %v2968_v21, %v9786_v16 }
 0x13a   : > { %4552 = vrot.lane.b32.xlu0 %v9674_v34, %s8971_s10  ;;  %8453 = vmatmul.mubr.msk.bf16.vlgmr.msra.gmra.mxu1 %vm312_vm3, %v9645_v25  ;;  %v3000_v23 = vsel %vm316_vm1, %v2980_v22, 0  ;;  %v3233_v26 = vpop.permute.xlu1 %3232  ;;  %s8979_s10 = smov 19  }
 0x13b   : > { %8470 = vmatprep.subr.msk.bf16.mxu0 %vm316_vm1, %v2981_v9  ;;  %2809 = vmatprep.mubr.bf16.mxu1 %v8957_v13 }
 0x13c   : > { %3108 = vmatpush1.bf16.msra.mxu0 %v3000_v23  ;;  %v2689_v15 = vpop.permute.xlu0 %2688  ;;  %5085 = vrot.lane.b32.xlu1 %v9577_v60, %s8973_s14 }
 0x13d   : > { %v2703_v27 = vsel %vm2700_vm11, %v9688_v38, %v2689_v15  ;;  %v2704_v8 = vsel %vm2700_vm11, %v2689_v15, %v9721_v51 }
 0x13e   : > { %5083 = vrot.lane.b32.xlu0 %v9587_v63, %s8973_s14  ;;  %8458 = vmatprep.subr.msk.bf16.mxu1 %vm316_vm1, %v2704_v8  ;;  %v2719_v25 = vsel %vm316_vm1, %v2703_v27, 0  ;;  %v9814_v28 = vpop.permute.xlu1 %3236 }
 0x13f   : > { %8471 = vmatmul.mubr.msk.bf16.vlgmr.msra.gmra.mxu0 %vm312_vm3, %v9779_v10  ;;  %2792 = vmatpush1.bf16.msra.mxu1 %v2719_v25 }
 0x140   : > { %v3235_v29 = vpop.permute.xlu0 %3234  ;;  %5348 = vrot.lane.b32.xlu1 %v9504_v35, %s8974_s17  ;;  %3318 = vmatprep.mubr.bf16.mxu0 %v8957_v13 }
 0x141   : > { %v3251_v30 = vsel %vm3250_vm13, %v3233_v26, %v3235_v29  ;;  %v3252_v31 = vsel %vm3250_vm13, %v3235_v29, %v9814_v28 }
 0x142   : > { %4807 = vrot.lane.b32.xlu0 %v9640_v24, %s8972_s11  ;;  %8459 = vmatmul.mubr.msk.bf16.vlgmr.msra.gmra.mxu1 %vm312_vm3, %v9710_v45  ;;  %v3263_v32 = vsel %vm316_vm1, %v3251_v30, 0  ;;  %v2699_v11 = vpop.permute.xlu1 %2698 }
 0x143   : > { %8476 = vmatprep.subr.msk.bf16.mxu0 %vm316_vm1, %v3252_v31  ;;  %2891 = vmatprep.mubr.bf16.mxu1 %v8957_v13  ;;  %v3777_v31 = vsel %vm316_vm1, %v9504_v35, 0 }
 0x144   : > { %3301 = vmatpush1.bf16.msra.mxu0 %v3263_v32  ;;  %v2697_v14 = vpop.permute.xlu0 %2696  ;;  %5352 = vrot.lane.b32.xlu1 %v9546_v49, %s8974_s17 }
 0x145   : > { %v2707_v33 = vsel %vm2700_vm11, %v9737_v57, %v2697_v14  ;;  %v2708_v37 = vsel %vm2700_vm11, %v2697_v14, %v2699_v11  ;;  %vm6741_vm11 = vcmask 154624  }
 0x146   : > { %5350 = vrot.lane.b32.xlu0 %v9524_v40, %s8974_s17  ;;  %8462 = vmatprep.subr.msk.bf16.mxu1 %vm316_vm1, %v2708_v37  ;;  %v2731_v38 = vsel %vm316_vm1, %v2707_v33, 0  ;;  %v3243_v39 = vpop.permute.xlu1 %3242 }
 0x147   : > { %8477 = vmatmul.mubr.msk.bf16.vlgmr.msra.gmra.mxu0 %vm312_vm3, %v9836_v36  ;;  %2874 = vmatpush1.bf16.msra.mxu1 %v2731_v38 }
 0x148   : > { %v9847_v41 = vpop.permute.xlu0 %3240  ;;  %5356 = vrot.lane.b32.xlu1 %v9558_v53, %s8974_s17  ;;  %3400 = vmatprep.mubr.bf16.mxu0 %v8957_v13 }
 0x149   : > { %v3255_v42 = vsel %vm3250_vm13, %v9847_v41, %v3243_v39 }
 0x14a   : > { %4815 = vrot.lane.b32.xlu0 %v9674_v34, %s8972_s11  ;;  %8463 = vmatmul.mubr.msk.bf16.vlgmr.msra.gmra.mxu1 %vm312_vm3, %v9710_v45  ;;  %v2964_v17 = vpop.permute.xlu1 %2963  ;;  %v3275_v48 = vsel %vm316_vm1, %v3255_v42, 0 }
 0x14b   : > { %v2978_v43 = vsel %vm2975_vm12, %v9759_v1, %v2964_v17  ;;  %v2979_v44 = vsel %vm2975_vm12, %v2964_v17, %v9770_v4  ;;  %3084 = vmatprep.mubr.bf16.mxu1 %v8957_v13  ;;  %v9912_v1 = vld [vmem:[%s12063_s1 + $0x30] sm:$0xf] }
 0x14c   : > { %v9863_v46 = vpop.permute.xlu0 %3244  ;;  %5360 = vrot.lane.b32.xlu1 %v9577_v60, %s8974_s17  ;;  %8468 = vmatprep.subr.msk.bf16.mxu1 %vm316_vm1, %v2979_v44  ;;  %v2994_v45 = vsel %vm316_vm1, %v2978_v43, 0 }
 0x14d   : > { %v3256_v47 = vsel %vm3250_vm13, %v3243_v39, %v9863_v46  ;;  %3067 = vmatpush1.bf16.msra.mxu1 %v2994_v45 }
 0x14e   : > { %5358 = vrot.lane.b32.xlu0 %v9587_v63, %s8974_s17  ;;  %8480 = vmatprep.subr.msk.bf16.mxu0 %vm316_vm1, %v3256_v47  ;;  %v3510_v50 = vpop.permute.xlu1 %3509 }
 0x14f   : > { %3383 = vmatpush1.bf16.msra.mxu0 %v3275_v48 }
 0x150   : > { %v3508_v51 = vpop.permute.xlu0 %3507  ;;  %5623 = vrot.lane.b32.xlu1 %v9504_v35, %s8975_s22 }
 0x151   : > { %v3526_v54 = vsel %vm3525_vm14, %v3508_v51, %v3510_v50  ;;  %v9989_v51 = vld [vmem:[%s12063_s1 + $0x34] sm:$0xf] }
 0x152   : > { %5079 = vrot.lane.b32.xlu0 %v9640_v24, %s8973_s14  ;;  %8469 = vmatmul.mubr.msk.bf16.vlgmr.msra.gmra.mxu1 %vm312_vm3, %v9779_v10  ;;  %v2972_v52 = vpop.permute.xlu1 %2971  ;;  %v3538_v58 = vsel %vm316_vm1, %v3526_v54, 0  ;;  %v3789_v54 = vsel %vm316_vm1, %v9558_v53, 0 }
 0x153   : > { %8481 = vmatmul.mubr.msk.bf16.vlgmr.msra.gmra.mxu0 %vm312_vm3, %v9836_v36  ;;  %3166 = vmatprep.mubr.bf16.mxu1 %v8957_v13  ;;  %v2982_v62 = vsel %vm2975_vm12, %v9786_v16, %v2972_v52 }
 0x154   : > { %v9885_v55 = vpop.permute.xlu0 %3511  ;;  %v9887_v56 = vpop.f32.mrf.mxu0  ;;  %5627 = vrot.lane.b32.xlu1 %v9546_v49, %s8975_s22  ;;  %3593 = vmatprep.mubr.bf16.mxu0 %v8957_v13  ;;  %v3006_v3 = vsel %vm316_vm1, %v2982_v62, 0 }
 0x155   : > { %v3527_v57 = vsel %vm3525_vm14, %v3510_v50, %v9885_v55 }
 0x156   : > { %5625 = vrot.lane.b32.xlu0 %v9524_v40, %s8975_s22  ;;  %8486 = vmatprep.subr.msk.bf16.mxu0 %vm316_vm1, %v3527_v57  ;;  %v9901_v59 = vpop.f32.mrf.mxu0  ;;  %v9903_v61 = vpop.permute.xlu1 %3515 }
 0x157   : > { %3576 = vmatpush1.bf16.msra.mxu0 %v3538_v58 }
 0x158   : > { %v2974_v19 = vpop.permute.xlu0 %2973  ;;  %v461_v0 = vpop.f32.mrf.mxu0  ;;  %5089 = vrot.lane.b32.xlu1 %v9895_v18, %s8973_s14 }
 0x159   : > { %v2983_v2 = vsel %vm2975_vm12, %v2972_v52, %v2974_v19  ;;  %vm7016_vm12 = vcmask 146432  }
 0x15a   : > { %5087 = vrot.lane.b32.xlu0 %v9674_v34, %s8973_s14  ;;  %8472 = vmatprep.subr.msk.bf16.mxu1 %vm316_vm1, %v2983_v2  ;;  %v462_v4 = vpop.f32.mrf.mxu0  ;;  %v9919_v6 = vpop.permute.xlu1 %3519 }
 0x15b   : > { %8487 = vmatmul.mubr.msk.bf16.vlgmr.msra.gmra.mxu0 %vm312_vm3, %v9912_v1  ;;  %3149 = vmatpush1.bf16.msra.mxu1 %v3006_v3 }
 0x15c   : > { %v3518_v7 = vpop.permute.xlu0 %3517  ;;  %v375_v12 = vpop.f32.mrf.mxu1  ;;  %5633 = vrot.lane.b32.xlu1 %v9587_v63, %s8975_s22  ;;  %3675 = vmatprep.mubr.bf16.mxu0 %v8957_v13 }
 0x15d   : > { %v3530_v20 = vsel %vm3525_vm14, %v9903_v61, %v3518_v7  ;;  %v590_v16 = vpop.f32.mrf.mxu0  ;;  %v3531_v21 = vsel %vm3525_vm14, %v3518_v7, %v9919_v6 }
 0x15e   : > { %v9930_v22 = vadd.f32 %v590_v16, %v375_v12  ;;  %5631 = vrot.lane.b32.xlu0 %v9558_v53, %s8975_s22  ;;  %8473 = vmatmul.mubr.msk.bf16.vlgmr.msra.gmra.mxu1 %vm312_vm3, %v9779_v10  ;;  %v3550_v9 = vsel %vm316_vm1, %v3530_v20, 0  ;;  %v377_v23 = vpop.f32.mrf.mxu1  ;;  %v3247_v26 = vpop.permute.xlu1 %3246 }
 0x15f   : > { %8490 = vmatprep.subr.msk.bf16.mxu0 %vm316_vm1, %v3531_v21  ;;  %v592_v15 = vpop.f32.mrf.mxu0  ;;  %3359 = vmatprep.mubr.bf16.mxu1 %v8957_v13  ;;  %v3257_v33 = vsel %vm3250_vm13, %v9863_v46, %v3247_v26 }
 0x160   : > { %3658 = vmatpush1.bf16.msra.mxu0 %v3550_v9  ;;  %v9939_v27 = vadd.f32 %v592_v15, %v377_v23  ;;  %v3239_v8 = vpop.permute.xlu0 %3238  ;;  %v379_v25 = vpop.f32.mrf.mxu1  ;;  %5354 = vrot.lane.b32.xlu1 %v9640_v24, %s8974_s17  ;;  %v3281_v44 = vsel %vm316_vm1, %v3257_v33, 0 }
 0x161   : > { %v3253_v10 = vsel %vm3250_vm13, %v9814_v28, %v3239_v8  ;;  %v594_v29 = vpop.f32.mrf.mxu0  ;;  %v3254_v30 = vsel %vm3250_vm13, %v3239_v8, %v9847_v41  ;;  %8495 = vmatprep.subr.msk.bf16.mxu0 %vm316_vm1, %v9524_v40 }
 0x162   : > { %5635 = vrot.lane.b32.xlu0 %v9577_v60, %s8975_s22  ;;  %8478 = vmatprep.subr.msk.bf16.mxu1 %vm316_vm1, %v3254_v30  ;;  %v3269_v32 = vsel %vm316_vm1, %v3253_v10, 0  ;;  %v380_v11 = vpop.f32.mrf.mxu1  ;;  %v3514_v14 = vpop.permute.xlu1 %3513 }
 0x163   : > { %8491 = vmatmul.mubr.msk.bf16.vlgmr.msra.gmra.mxu0 %vm312_vm3, %v9912_v1  ;;  %3342 = vmatpush1.bf16.msra.mxu1 %v3269_v32  ;;  %v595_v28 = vpop.f32.mrf.mxu0  ;;  %v3529_v47 = vsel %vm3525_vm14, %v3514_v14, %v9903_v61  ;;  %v3528_v58 = vsel %vm3525_vm14, %v9885_v55, %v3514_v14 }
 0x164   : > { %v3249_v37 = vpop.permute.xlu0 %3248  ;;  %5900 = vrot.lane.b32.xlu1 %v9524_v40, %s8976_s26  ;;  %v9961_v38 = vpop.f32.mrf.mxu1  ;;  %3815 = vmatpush1.bf16.msra.mxu0 %v3777_v31  ;;  %v3544_v2 = vsel %vm316_vm1, %v3528_v58, 0 }
 0x165   : > { %v3258_v39 = vsel %vm3250_vm13, %v3247_v26, %v3249_v37  ;;  %v672_v41 = vpop.f32.mrf.mxu0  ;;  %3832 = vmatprep.mubr.bf16.mxu0 %v8957_v13  ;;  %8499 = vmatprep.subr.msk.bf16.mxu0 %vm316_vm1, %v9587_v63  ;;  %vm7291_vm13 = vcmask 138240  }
 0x166   : > { %v9968_v17 = vadd.f32 %v672_v41, %v9887_v56  ;;  %5898 = vrot.lane.b32.xlu0 %v9504_v35, %s8976_s26  ;;  %8479 = vmatmul.mubr.msk.bf16.vlgmr.msra.gmra.mxu1 %vm312_vm3, %v9836_v36  ;;  %v4015_v42 = vpop.permute.xlu1 %4014  ;;  %v9974_v43 = vpop.f32.mrf.mxu1 }
 0x167   : > { %8482 = vmatprep.subr.msk.bf16.mxu1 %vm316_vm1, %v3258_v39  ;;  %v674_v46 = vpop.f32.mrf.mxu0  ;;  %3441 = vmatprep.mubr.bf16.mxu1 %v8957_v13 }
 0x168   : > { %3424 = vmatpush1.bf16.msra.mxu1 %v3281_v44  ;;  %v9980_v45 = vadd.f32 %v674_v46, %v9901_v59  ;;  %v4013_v48 = vpop.permute.xlu0 %4012  ;;  %5362 = vrot.lane.b32.xlu1 %v9674_v34, %s8974_s17  ;;  %v420_v50 = vpop.f32.mrf.mxu1 }
 0x169   : > { %8488 = vmatprep.subr.msk.bf16.mxu1 %vm316_vm1, %v3529_v47  ;;  %v676_v52 = vpop.f32.mrf.mxu0  ;;  %v4029_v7 = vsel %vm4028_vm15, %v4013_v48, %v4015_v42  ;;  %v3783_v47 = vsel %vm316_vm1, %v9546_v49, 0 }
 0x16a   : > { %5902 = vrot.lane.b32.xlu0 %v9546_v49, %s8976_s26  ;;  %v3522_v56 = vpop.permute.xlu1 %3521  ;;  %v421_v57 = vpop.f32.mrf.mxu1  ;;  %v4040_v23 = vsel %vm316_vm1, %v4029_v7, 0 }
 0x16b   : > { %8496 = vmatmul.mubr.msk.bf16.vlgmr.msra.gmra.mxu0 %vm312_vm3, %v9989_v51  ;;  %v677_v59 = vpop.f32.mrf.mxu0  ;;  %v3532_v26 = vsel %vm3525_vm14, %v9919_v6, %v3522_v56  ;;  %v10049_v6 = vld [vmem:[%s9029_s23 + $0xa] sm:$0xff] }
 0x16c   : > { %v10000_v61 = vpop.permute.xlu0 %4016  ;;  %3897 = vmatpush1.bf16.msra.mxu0 %v3789_v54  ;;  %5906 = vrot.lane.b32.xlu1 %v9558_v53, %s8976_s26  ;;  %v10004_v62 = vpop.f32.mrf.mxu1  ;;  %v10078_v39 = vrot.slane %v10049_v6, %v9024_v5  ;;  %v10106_v54 = vld [vmem:[%s9029_s23 + $0x2] sm:$0xff]  ;;  %v6149_v58 = vcombine.high %v10049_v6, %v10049_v6 }
 0x16d   : > { %v845_v19 = vpop.f32.mrf.mxu0  ;;  %v4030_v0 = vsel %vm4028_vm15, %v4015_v42, %v10000_v61  ;;  %3914 = vmatprep.mubr.bf16.mxu0 %v8957_v13 }
 0x16e   : > { %v10010_v55 = vadd.f32 %v845_v19, %v9930_v22  ;;  %5364 = vrot.lane.b32.xlu0 %v9895_v18, %s8974_s17  ;;  %8483 = vmatmul.mubr.msk.bf16.vlgmr.msra.gmra.mxu1 %vm312_vm3, %v9836_v36  ;;  %v10017_v53 = vpop.permute.xlu1 %4020  ;;  %v10019_v3 = vpop.f32.mrf.mxu1 }
 0x16f   : > { %3617 = vmatpush1.bf16.msra.mxu1 %v3544_v2  ;;  %8504 = vmatprep.subr.msk.bf16.mxu0 %vm316_vm1, %v4030_v0  ;;  %v847_v4 = vpop.f32.mrf.mxu0  ;;  %v10132_v2 = vrot.slane %v10106_v54, %v9024_v5 }
 0x170   : > { %v10024_v12 = vadd.f32 %v847_v4, %v9939_v27  ;;  %v3524_v20 = vpop.permute.xlu0 %3523  ;;  %5910 = vrot.lane.b32.xlu1 %v9577_v60, %s8976_s26  ;;  %v502_v36 = vpop.f32.mrf.mxu1  ;;  %3634 = vmatprep.mubr.bf16.mxu1 %v8957_v13 }
 0x171   : > { %v3533_v16 = vsel %vm3525_vm14, %v3522_v56, %v3524_v20  ;;  %v849_v21 = vpop.f32.mrf.mxu0  ;;  %v10143_v20 = vrot.slane %v6149_v58, %v9024_v5 }
 0x172   : > { %5908 = vrot.lane.b32.xlu0 %v9587_v63, %s8976_s26  ;;  %8492 = vmatprep.subr.msk.bf16.mxu1 %vm316_vm1, %v3533_v16  ;;  %v10033_v22 = vpop.permute.xlu1 %4024  ;;  %v503_v9 = vpop.f32.mrf.mxu1 }
 0x173   : > { %8500 = vmatmul.mubr.msk.bf16.vlgmr.msra.gmra.mxu0 %vm312_vm3, %v9989_v51  ;;  %v850_v15 = vpop.f32.mrf.mxu0 }
 0x174   : > { %4078 = vmatpush1.bf16.msra.mxu0 %v4040_v23  ;;  %v4023_v27 = vpop.permute.xlu0 %4022  ;;  %6173 = vrot.lane.b32.xlu1 %v9504_v35, %s8977_s29  ;;  %v631_v63 = vpop.f32.mrf.mxu1  ;;  %v3556_v35 = vsel %vm316_vm1, %v3532_v26, 0  ;;  %v3795_v23 = vsel %vm316_vm1, %v9577_v60, 0  ;;  %v10154_v26 = vcombine.high %v10132_v2, %v10132_v2 }
 0x175   : > { %v10043_v8 = vadd.f32 %v631_v63, %v9961_v38  ;;  %v927_v25 = vpop.f32.mrf.mxu0  ;;  %v4034_v10 = vsel %vm4028_vm15, %v4023_v27, %v10033_v22  ;;  %4095 = vmatprep.mubr.bf16.mxu0 %v8957_v13  ;;  %v4033_v14 = vsel %vm4028_vm15, %v10017_v53, %v4023_v27  ;;  %v10073_v38 = vld [vmem:[%s12063_s1 + $0x38] sm:$0xf] }
 0x176   : > { %v10052_v29 = vadd.f32 %v927_v25, %v9968_v17  ;;  %5629 = vrot.lane.b32.xlu0 %v9640_v24, %s8975_s22  ;;  %8489 = vmatmul.mubr.msk.bf16.vlgmr.msra.gmra.mxu1 %vm312_vm3, %v9912_v1  ;;  %v4278_v30 = vpop.permute.xlu1 %4277  ;;  %v633_v31 = vpop.f32.mrf.mxu1 }
 0x177   : > { %3699 = vmatpush1.bf16.msra.mxu1 %v3556_v35  ;;  %8508 = vmatprep.subr.msk.bf16.mxu0 %vm316_vm1, %v4034_v10  ;;  %v10061_v32 = vadd.f32 %v633_v31, %v9974_v43  ;;  %v929_v11 = vpop.f32.mrf.mxu0  ;;  %v4052_v43 = vsel %vm316_vm1, %v4033_v14, 0 }
 0x178   : > { %v10066_v28 = vadd.f32 %v929_v11, %v9980_v45  ;;  %v4276_v33 = vpop.permute.xlu0 %4275  ;;  %6177 = vrot.lane.b32.xlu1 %v9546_v49, %s8977_s29  ;;  %v635_v37 = vpop.f32.mrf.mxu1  ;;  %3716 = vmatprep.mubr.bf16.mxu1 %v8957_v13 }
 0x179   : > { %v931_v41 = vpop.f32.mrf.mxu0  ;;  %8497 = vmatprep.subr.msk.bf16.mxu1 %vm316_vm1, %v9640_v24  ;;  %v4292_v19 = vsel %vm4291_vm0, %v4276_v33, %v4278_v30 }
 0x17a   : > { %6175 = vrot.lane.b32.xlu0 %v9524_v40, %s8977_s29  ;;  %v10084_v17 = vpop.permute.xlu1 %4283  ;;  %v636_v42 = vpop.f32.mrf.mxu1  ;;  %v10095_v40 = vcombine.high %v10078_v39, %v10078_v39  ;;  %v4303_v36 = vsel %vm316_vm1, %v4292_v19, 0 }
 0x17b   : > { %8505 = vmatmul.mubr.msk.bf16.vlgmr.msra.gmra.mxu0 %vm312_vm3, %v10073_v38  ;;  %v932_v44 = vpop.f32.mrf.mxu0 }
 0x17c   : > { %4160 = vmatpush1.bf16.msra.mxu0 %v4052_v43  ;;  %v10089_v46 = vpop.permute.xlu0 %4279  ;;  %5639 = vrot.lane.b32.xlu1 %v9895_v18, %s8975_s22  ;;  %v713_v45 = vpop.f32.mrf.mxu1 }
 0x17d   : > { %v10100_v48 = vadd.f32 %v713_v45, %v10004_v62  ;;  %v1120_v50 = vpop.f32.mrf.mxu0  ;;  %v4293_v52 = vsel %vm4291_vm0, %v4278_v30, %v10089_v46  ;;  %4177 = vmatprep.mubr.bf16.mxu0 %v8957_v13 }
 0x17e   : > { %v10109_v56 = vadd.f32 %v1120_v50, %v10010_v55  ;;  %5637 = vrot.lane.b32.xlu0 %v9674_v34, %s8975_s22  ;;  %8493 = vmatmul.mubr.msk.bf16.vlgmr.msra.gmra.mxu1 %vm312_vm3, %v9912_v1  ;;  %v10115_v49 = vpop.permute.xlu1 %4287  ;;  %v715_v57 = vpop.f32.mrf.mxu1  ;;  %s8637_s22 = sshll.u32 %s12078_s19, 5 }
 0x17f   : > { %8513 = vmatprep.subr.msk.bf16.mxu0 %vm316_vm1, %v4293_v52  ;;  %v10121_v59 = vadd.f32 %v715_v57, %v10019_v3  ;;  %v1122_v62 = vpop.f32.mrf.mxu0  ;;  %3856 = vmatpush1.bf16.msra.mxu1 %v3783_v47 }
 0x180   : > { %v10125_v0 = vadd.f32 %v1122_v62, %v10024_v12  ;;  %v4286_v55 = vpop.permute.xlu0 %4285  ;;  %6183 = vrot.lane.b32.xlu1 %v10095_v40, %s8977_s29  ;;  %v717_v1 = vpop.f32.mrf.mxu1  ;;  %3873 = vmatprep.mubr.bf16.mxu1 %v8957_v13 }
 0x181   : > { %v1124_v3 = vpop.f32.mrf.mxu0  ;;  %8501 = vmatprep.subr.msk.bf16.mxu1 %vm316_vm1, %v9674_v34  ;;  %v4297_v4 = vsel %vm4291_vm0, %v4286_v55, %v10115_v49 }
 0x182   : > { %6181 = vrot.lane.b32.xlu0 %v10078_v39, %s8977_s29  ;;  %v10140_v7 = vpop.permute.xlu1 %4538  ;;  %v718_v12 = vpop.f32.mrf.mxu1 }
 0x183   : > { %8509 = vmatmul.mubr.msk.bf16.vlgmr.msra.gmra.mxu0 %vm312_vm3, %v10073_v38  ;;  %v1125_v16 = vpop.f32.mrf.mxu0 }
 0x184   : > { %4341 = vmatpush1.bf16.msra.mxu0 %v4303_v36  ;;  %v4019_v21 = vpop.permute.xlu0 %4018  ;;  %5904 = vrot.lane.b32.xlu1 %v9640_v24, %s8976_s26  ;;  %v886_v9 = vpop.f32.mrf.mxu1 }
 0x185   : > { %8517 = vmatprep.subr.msk.bf16.mxu0 %vm316_vm1, %v4297_v4  ;;  %v10158_v15 = vadd.f32 %v886_v9, %v10043_v8  ;;  %v1202_v27 = vpop.f32.mrf.mxu0  ;;  %v4032_v63 = vsel %vm4028_vm15, %v4019_v21, %v10017_v53  ;;  %4358 = vmatprep.mubr.bf16.mxu0 %v8957_v13  ;;  %v6407_v8 = vcombine.high %v10106_v54, %v10106_v54 }
 0x186   : > { %v10164_v25 = vadd.f32 %v1202_v27, %v10052_v29  ;;  %6185 = vrot.lane.b32.xlu0 %v10143_v20, %s8977_s29  ;;  %8498 = vmatmul.mubr.msk.bf16.vlgmr.msra.gmra.mxu1 %vm312_vm3, %v9989_v51  ;;  %v10170_v60 = vpop.permute.xlu1 %4542  ;;  %v888_v10 = vpop.f32.mrf.mxu1  ;;  %v4296_v29 = vsel %vm4291_vm0, %v10084_v17, %v4286_v55  ;;  %v4031_v41 = vsel %vm4028_vm15, %v10000_v61, %v4019_v21 }
 0x187   : > { %3938 = vmatpush1.bf16.msra.mxu1 %v3795_v23  ;;  %v10175_v53 = vadd.f32 %v888_v10, %v10061_v32  ;;  %v1204_v6 = vpop.f32.mrf.mxu0  ;;  %3955 = vmatprep.mubr.bf16.mxu1 %v8957_v13  ;;  %v10189_v32 = vld [vmem:[%s12063_s1 + $0x3c] sm:$0xf]  ;;  %v10198_v37 = vrot.slane %v6407_v8, %v9024_v5  ;;  %v4315_v42 = vsel %vm316_vm1, %v4296_v29, 0  ;;  %v10279_v8 = vld [vmem:[%s12063_s1 + $0x40] sm:$0xf] }
 0x188   : > { %8506 = vmatprep.subr.msk.bf16.mxu1 %vm316_vm1, %v4032_v63  ;;  %v10182_v35 = vadd.f32 %v1204_v6, %v10066_v28  ;;  %v4541_v30 = vpop.permute.xlu0 %4540  ;;  %6450 = vrot.lane.b32.xlu1 %v10154_v26, %s8978_s7  ;;  %v890_v31 = vpop.f32.mrf.mxu1 }
 0x189   : > { %v1206_v11 = vpop.f32.mrf.mxu0  ;;  %v4556_v14 = vsel %vm4554_vm2, %v4541_v30, %v10170_v60 }
 0x18a   : > { %6448 = vrot.lane.b32.xlu0 %v10132_v2, %s8978_s7  ;;  %v10195_v28 = vpop.permute.xlu1 %4546  ;;  %v891_v33 = vpop.f32.mrf.mxu1 }
 0x18b   : > { %8514 = vmatmul.mubr.msk.bf16.vlgmr.msra.gmra.mxu0 %vm312_vm3, %v10189_v32  ;;  %v1207_v43 = vpop.f32.mrf.mxu0 }
 0x18c   : > { %4423 = vmatpush1.bf16.msra.mxu0 %v4315_v42  ;;  %v4027_v44 = vpop.permute.xlu0 %4026  ;;  %5912 = vrot.lane.b32.xlu1 %v9674_v34, %s8976_s26  ;;  %v968_v45 = vpop.f32.mrf.mxu1  ;;  %v4046_v34 = vsel %vm316_vm1, %v4031_v41, 0 }
 0x18d   : > { %8522 = vmatprep.subr.msk.bf16.mxu0 %vm316_vm1, %v4556_v14  ;;  %v10209_v5 = vadd.f32 %v968_v45, %v10100_v48  ;;  %v1395_v47 = vpop.f32.mrf.mxu0  ;;  %4440 = vmatprep.mubr.bf16.mxu0 %v8957_v13  ;;  %v4035_v1 = vsel %vm4028_vm15, %v10033_v22, %v4027_v44  ;;  %v10311_v45 = vcombine.high %v10143_v20, %v10143_v20  ;;  %vm7663_vm15 = vcmask 850944  }
 0x18e   : > { %v10213_v61 = vadd.f32 %v1395_v47, %v10109_v56  ;;  %6452 = vrot.lane.b32.xlu0 %v10198_v37, %s8978_s7  ;;  %8502 = vmatmul.mubr.msk.bf16.vlgmr.msra.gmra.mxu1 %vm312_vm3, %v9989_v51  ;;  %v10220_v50 = vpop.permute.xlu1 %4550  ;;  %v970_v52 = vpop.f32.mrf.mxu1  ;;  %v4555_v56 = vsel %vm4554_vm2, %v10140_v7, %v4541_v30  ;;  %v4058_v16 = vsel %vm316_vm1, %v4035_v1, 0 }
 0x18f   : > { %4119 = vmatpush1.bf16.msra.mxu1 %v4046_v34  ;;  %v10223_v48 = vadd.f32 %v970_v52, %v10121_v59  ;;  %v1397_v54 = vpop.f32.mrf.mxu0  ;;  %4136 = vmatprep.mubr.bf16.mxu1 %v8957_v13 }
 0x190   : > { %8510 = vmatprep.subr.msk.bf16.mxu1 %vm316_vm1, %v4027_v44  ;;  %v10230_v57 = vadd.f32 %v1397_v54, %v10125_v0  ;;  %v4549_v51 = vpop.permute.xlu0 %4548  ;;  %6456 = vrot.lane.b32.xlu1 %v10078_v39, %s8978_s7  ;;  %v972_v58 = vpop.f32.mrf.mxu1  ;;  %v4566_v0 = vsel %vm316_vm1, %v4555_v56, 0 }
 0x191   : > { %v1399_v62 = vpop.f32.mrf.mxu0  ;;  %v4560_v59 = vsel %vm4554_vm2, %v4549_v51, %v10220_v50  ;;  %v4559_v27 = vsel %vm4554_vm2, %v10195_v28, %v4549_v51 }
 0x192   : > { %5914 = vrot.lane.b32.xlu0 %v9895_v18, %s8976_s26  ;;  %v10238_v19 = vpop.permute.xlu1 %4801  ;;  %v973_v55 = vpop.f32.mrf.mxu1  ;;  %v4578_v30 = vsel %vm316_vm1, %v4559_v27, 0  ;;  %s11345_s26 = scalar_lea.vmem %s12065_s3, %s8637_s22 }
 0x193   : > { %8518 = vmatmul.mubr.msk.bf16.vlgmr.msra.gmra.mxu0 %vm312_vm3, %v10189_v32  ;;  %v1400_v3 = vpop.f32.mrf.mxu0  ;;  %v10338_v55 = vcombine.high %v10198_v37, %v10198_v37 }
 0x194   : > { %4604 = vmatpush1.bf16.msra.mxu0 %v4566_v0  ;;  %v4282_v4 = vpop.permute.xlu0 %4281  ;;  %6460 = vrot.lane.b32.xlu1 %v10143_v20, %s8978_s7  ;;  %v1161_v7 = vpop.f32.mrf.mxu1 }
 0x195   : > { %8526 = vmatprep.subr.msk.bf16.mxu0 %vm316_vm1, %v4560_v59  ;;  %v4295_v12 = vsel %vm4291_vm0, %v4282_v4, %v10084_v17  ;;  %v10251_v36 = vadd.f32 %v1161_v7, %v10158_v15  ;;  %v1477_v22 = vpop.f32.mrf.mxu0  ;;  %4621 = vmatprep.mubr.bf16.mxu0 %v8957_v13  ;;  %v4294_v31 = vsel %vm4291_vm0, %v10089_v46, %v4282_v4 }
 0x196   : > { %v10256_v21 = vadd.f32 %v1477_v22, %v10164_v25  ;;  %6458 = vrot.lane.b32.xlu0 %v10095_v40, %s8978_s7  ;;  %8507 = vmatmul.mubr.msk.bf16.vlgmr.msra.gmra.mxu1 %vm312_vm3, %v10073_v38  ;;  %v10262_v9 = vpop.permute.xlu1 %4805  ;;  %v1163_v17 = vpop.f32.mrf.mxu1  ;;  %v4309_v46 = vsel %vm316_vm1, %v4294_v31, 0 }
 0x197   : > { %4201 = vmatpush1.bf16.msra.mxu1 %v4058_v16  ;;  %v10265_v23 = vadd.f32 %v1163_v17, %v10175_v53  ;;  %v1479_v15 = vpop.f32.mrf.mxu0  ;;  %4218 = vmatprep.mubr.bf16.mxu1 %v8957_v13  ;;  %v10372_v17 = vld [vmem:[%s12063_s1 + $0x44] sm:$0xf] }
 0x198   : > { %8515 = vmatprep.subr.msk.bf16.mxu1 %vm316_vm1, %v4295_v12  ;;  %v10272_v63 = vadd.f32 %v1479_v15, %v10182_v35  ;;  %v4804_v25 = vpop.permute.xlu0 %4803  ;;  %6723 = vrot.lane.b32.xlu1 %v10132_v2, %s8979_s10  ;;  %v1165_v10 = vpop.f32.mrf.mxu1 }
 0x199   : > { %v1481_v53 = vpop.f32.mrf.mxu0  ;;  %v4819_v6 = vsel %vm4817_vm4, %v4804_v25, %v10262_v9 }
 0x19a   : > { %6179 = vrot.lane.b32.xlu0 %v9640_v24, %s8977_s29  ;;  %v10285_v29 = vpop.permute.xlu1 %4809  ;;  %v1166_v35 = vpop.f32.mrf.mxu1 }
 0x19b   : > { %8523 = vmatmul.mubr.msk.bf16.vlgmr.msra.gmra.mxu0 %vm312_vm3, %v10279_v8  ;;  %v1482_v11 = vpop.f32.mrf.mxu0 }
 0x19c   : > { %4686 = vmatpush1.bf16.msra.mxu0 %v4578_v30  ;;  %v4290_v14 = vpop.permute.xlu0 %4289  ;;  %6727 = vrot.lane.b32.xlu1 %v10198_v37, %s8979_s10  ;;  %v1243_v33 = vpop.f32.mrf.mxu1 }
 0x19d   : > { %8531 = vmatprep.subr.msk.bf16.mxu0 %vm316_vm1, %v4819_v6  ;;  %v10296_v24 = vadd.f32 %v1243_v33, %v10209_v5  ;;  %v1670_v41 = vpop.f32.mrf.mxu0  ;;  %4703 = vmatprep.mubr.bf16.mxu0 %v8957_v13 }
 0x19e   : > { %v10301_v42 = vadd.f32 %v1670_v41, %v10213_v61  ;;  %6725 = vrot.lane.b32.xlu0 %v10154_v26, %s8979_s10  ;;  %8511 = vmatmul.mubr.msk.bf16.vlgmr.msra.gmra.mxu1 %vm312_vm3, %v10073_v38  ;;  %v10307_v43 = vpop.permute.xlu1 %4813  ;;  %v1245_v44 = vpop.f32.mrf.mxu1  ;;  %v4818_v61 = vsel %vm4817_vm4, %v10238_v19, %v4804_v25 }
 0x19f   : > { %4382 = vmatpush1.bf16.msra.mxu1 %v4309_v46  ;;  %v10314_v5 = vadd.f32 %v1245_v44, %v10223_v48  ;;  %v1672_v47 = vpop.f32.mrf.mxu0  ;;  %4399 = vmatprep.mubr.bf16.mxu1 %v8957_v13  ;;  %v4829_v58 = vsel %vm316_vm1, %v4818_v61, 0 }
 0x1a0   : > { %8519 = vmatprep.subr.msk.bf16.mxu1 %vm316_vm1, %v4290_v14  ;;  %v10321_v38 = vadd.f32 %v1672_v47, %v10230_v57  ;;  %v4812_v34 = vpop.permute.xlu0 %4811  ;;  %6189 = vrot.lane.b32.xlu1 %v9895_v18, %s8977_s29  ;;  %v1247_v52 = vpop.f32.mrf.mxu1  ;;  %v4298_v57 = vsel %vm4291_vm0, %v10115_v49, %v4290_v14 }
 0x1a1   : > { %v1674_v54 = vpop.f32.mrf.mxu0  ;;  %v4823_v48 = vsel %vm4817_vm4, %v4812_v34, %v10307_v43  ;;  %v4321_v3 = vsel %vm316_vm1, %v4298_v57, 0  ;;  %v4822_v22 = vsel %vm4817_vm4, %v10285_v29, %v4812_v34 }
 0x1a2   : > { %6187 = vrot.lane.b32.xlu0 %v10311_v45, %s8977_s29  ;;  %v5074_v56 = vpop.permute.xlu1 %5073  ;;  %v1248_v51 = vpop.f32.mrf.mxu1  ;;  %v4841_v10 = vsel %vm316_vm1, %v4822_v22, 0 }
 0x1a3   : > { %8527 = vmatmul.mubr.msk.bf16.vlgmr.msra.gmra.mxu0 %vm312_vm3, %v10279_v8  ;;  %v1675_v62 = vpop.f32.mrf.mxu0 }
 0x1a4   : > { %4867 = vmatpush1.bf16.msra.mxu0 %v4829_v58  ;;  %v4545_v59 = vpop.permute.xlu0 %4544  ;;  %6733 = vrot.lane.b32.xlu1 %v10095_v40, %s8979_s10  ;;  %v1436_v19 = vpop.f32.mrf.mxu1 }
 0x1a5   : > { %8535 = vmatprep.subr.msk.bf16.mxu0 %vm316_vm1, %v4823_v48  ;;  %v4558_v1 = vsel %vm4554_vm2, %v4545_v59, %v10195_v28  ;;  %v10344_v49 = vadd.f32 %v1436_v19, %v10251_v36  ;;  %v1752_v0 = vpop.f32.mrf.mxu0  ;;  %4884 = vmatprep.mubr.bf16.mxu0 %v8957_v13  ;;  %v4557_v53 = vsel %vm4554_vm2, %v10170_v60, %v4545_v59 }
 0x1a6   : > { %v10349_v4 = vadd.f32 %v1752_v0, %v10256_v21  ;;  %6731 = vrot.lane.b32.xlu0 %v10078_v39, %s8979_s10  ;;  %8516 = vmatmul.mubr.msk.bf16.vlgmr.msra.gmra.mxu1 %vm312_vm3, %v10189_v32  ;;  %v10355_v7 = vpop.permute.xlu1 %5077  ;;  %v1438_v28 = vpop.f32.mrf.mxu1  ;;  %v4572_v31 = vsel %vm316_vm1, %v4557_v53, 0  ;;  %v10450_v0 = vld [vmem:[%s12063_s1 + $0x48] sm:$0xf] }
 0x1a7   : > { %4464 = vmatpush1.bf16.msra.mxu1 %v4321_v3  ;;  %v10358_v12 = vadd.f32 %v1438_v28, %v10265_v23  ;;  %v1754_v36 = vpop.f32.mrf.mxu0  ;;  %4481 = vmatprep.mubr.bf16.mxu1 %v8957_v13 }
 0x1a8   : > { %8524 = vmatprep.subr.msk.bf16.mxu1 %vm316_vm1, %v4558_v1  ;;  %v10365_v16 = vadd.f32 %v1754_v36, %v10272_v63  ;;  %v5076_v21 = vpop.permute.xlu0 %5075  ;;  %6454 = vrot.lane.b32.xlu1 %v10338_v55, %s8978_s7  ;;  %v1440_v23 = vpop.f32.mrf.mxu1 }
 0x1a9   : > { %v1756_v15 = vpop.f32.mrf.mxu0  ;;  %v5093_v27 = vsel %vm5091_vm5, %v5076_v21, %v10355_v7  ;;  %v5092_v33 = vsel %vm5091_vm5, %v5074_v56, %v5076_v21 }
 0x1aa   : > { %6735 = vrot.lane.b32.xlu0 %v10143_v20, %s8979_s10  ;;  %v10378_v25 = vpop.permute.xlu1 %5081  ;;  %v1441_v63 = vpop.f32.mrf.mxu1 }
 0x1ab   : > { %8532 = vmatmul.mubr.msk.bf16.vlgmr.msra.gmra.mxu0 %vm312_vm3, %v10372_v17  ;;  %v1757_v6 = vpop.f32.mrf.mxu0 }
 0x1ac   : > { %4949 = vmatpush1.bf16.msra.mxu0 %v4841_v10  ;;  %v4553_v35 = vpop.permute.xlu0 %4552  ;;  %7000 = vrot.lane.b32.xlu1 %v10154_v26, %s8980_s15 }
 0x1ad   : > { %8541 = vmatprep.subr.msk.bf16.mxu0 %vm316_vm1, %v5093_v27  ;;  %v1945_v30 = vpop.f32.mrf.mxu0  ;;  %4966 = vmatprep.mubr.bf16.mxu0 %v8957_v13  ;;  %v4561_v52 = vsel %vm4554_vm2, %v10220_v50, %v4553_v35 }
 0x1ae   : > { %v10391_v11 = vadd.f32 %v1945_v30, %v10301_v42  ;;  %6998 = vrot.lane.b32.xlu0 %v10132_v2, %s8980_s15  ;;  %8520 = vmatmul.mubr.msk.bf16.vlgmr.msra.gmra.mxu1 %vm312_vm3, %v10189_v32  ;;  %v10397_v60 = vpop.permute.xlu1 %5085  ;;  %v4584_v50 = vsel %vm316_vm1, %v4561_v52, 0 }
 0x1af   : > { %4645 = vmatpush1.bf16.msra.mxu1 %v4572_v31  ;;  %v1947_v14 = vpop.f32.mrf.mxu0  ;;  %4662 = vmatprep.mubr.bf16.mxu1 %v8957_v13 }
 0x1b0   : > { %8528 = vmatprep.subr.msk.bf16.mxu1 %vm316_vm1, %v4553_v35  ;;  %v10403_v41 = vadd.f32 %v1947_v14, %v10321_v38  ;;  %v5084_v46 = vpop.permute.xlu0 %5083  ;;  %6462 = vrot.lane.b32.xlu1 %v10311_v45, %s8978_s7  ;;  %v1518_v42 = vpop.f32.mrf.mxu1  ;;  %v5104_v38 = vsel %vm316_vm1, %v5092_v33, 0 }
 0x1b1   : > { %v10408_v32 = vadd.f32 %v1518_v42, %v10296_v24  ;;  %v1949_v44 = vpop.f32.mrf.mxu0  ;;  %v5097_v47 = vsel %vm5091_vm5, %v5084_v46, %v10397_v60 }
 0x1b2   : > { %7002 = vrot.lane.b32.xlu0 %v10198_v37, %s8980_s15  ;;  %v5349_v61 = vpop.permute.xlu1 %5348  ;;  %v1520_v34 = vpop.f32.mrf.mxu1 }
 0x1b3   : > { %8536 = vmatmul.mubr.msk.bf16.vlgmr.msra.gmra.mxu0 %vm312_vm3, %v10372_v17  ;;  %v10420_v24 = vadd.f32 %v1520_v34, %v10314_v5  ;;  %v1950_v54 = vpop.f32.mrf.mxu0 }
 0x1b4   : > { %5142 = vmatpush1.bf16.msra.mxu0 %v5104_v38  ;;  %v4808_v48 = vpop.permute.xlu0 %4807  ;;  %7006 = vrot.lane.b32.xlu1 %v10078_v39, %s8980_s15  ;;  %v1522_v56 = vpop.f32.mrf.mxu1  ;;  %v10531_v54 = vld [vmem:[%s12063_s1 + $0x4c] sm:$0xf] }
 0x1b5   : > { %8545 = vmatprep.subr.msk.bf16.mxu0 %vm316_vm1, %v5097_v47  ;;  %v4821_v51 = vsel %vm4817_vm4, %v4808_v48, %v10285_v29  ;;  %v2027_v58 = vpop.f32.mrf.mxu0  ;;  %5159 = vmatprep.mubr.bf16.mxu0 %v8957_v13  ;;  %v5096_v29 = vsel %vm5091_vm5, %v10378_v25, %v5084_v46  ;;  %v4820_v21 = vsel %vm4817_vm4, %v10262_v9, %v4808_v48 }
 0x1b6   : > { %v10430_v5 = vadd.f32 %v2027_v58, %v10349_v4  ;;  %6464 = vrot.lane.b32.xlu0 %v9895_v18, %s8978_s7  ;;  %8525 = vmatmul.mubr.msk.bf16.vlgmr.msra.gmra.mxu1 %vm312_vm3, %v10279_v8  ;;  %v10436_v57 = vpop.permute.xlu1 %5352  ;;  %v1523_v62 = vpop.f32.mrf.mxu1  ;;  %v4835_v9 = vsel %vm316_vm1, %v4820_v21, 0 }
 0x1b7   : > { %4727 = vmatpush1.bf16.msra.mxu1 %v4584_v50  ;;  %v2029_v59 = vpop.f32.mrf.mxu0  ;;  %4744 = vmatprep.mubr.bf16.mxu1 %v8957_v13 }
 0x1b8   : > { %8533 = vmatprep.subr.msk.bf16.mxu1 %vm316_vm1, %v4821_v51  ;;  %v10443_v19 = vadd.f32 %v2029_v59, %v10365_v16  ;;  %v5351_v18 = vpop.permute.xlu0 %5350  ;;  %7010 = vrot.lane.b32.xlu1 %v10143_v20, %s8980_s15  ;;  %v1711_v1 = vpop.f32.mrf.mxu1  ;;  %v5116_v16 = vsel %vm316_vm1, %v5096_v29, 0 }
 0x1b9   : > { %v10453_v3 = vadd.f32 %v1711_v1, %v10344_v49  ;;  %v2031_v4 = vpop.f32.mrf.mxu0  ;;  %v5368_v28 = vsel %vm5366_vm6, %v5351_v18, %v10436_v57  ;;  %v5367_v6 = vsel %vm5366_vm6, %v5349_v61, %v5351_v18 }
 0x1ba   : > { %7008 = vrot.lane.b32.xlu0 %v10095_v40, %s8980_s15  ;;  %v10459_v36 = vpop.permute.xlu1 %5356  ;;  %v1713_v22 = vpop.f32.mrf.mxu1  ;;  %v5379_v42 = vsel %vm316_vm1, %v5367_v6, 0 }
 0x1bb   : > { %8542 = vmatmul.mubr.msk.bf16.vlgmr.msra.gmra.mxu0 %vm312_vm3, %v10450_v0  ;;  %v10467_v49 = vadd.f32 %v1713_v22, %v10358_v12  ;;  %v2032_v23 = vpop.f32.mrf.mxu0 }
 0x1bc   : > { %5224 = vmatpush1.bf16.msra.mxu0 %v5116_v16  ;;  %v4816_v15 = vpop.permute.xlu0 %4815  ;;  %7273 = vrot.lane.b32.xlu1 %v10132_v2, %s8981_s20  ;;  %v1715_v27 = vpop.f32.mrf.mxu1 }
 0x1bd   : > { %8551 = vmatprep.subr.msk.bf16.mxu0 %vm316_vm1, %v5368_v28  ;;  %v2220_v63 = vpop.f32.mrf.mxu0  ;;  %5241 = vmatprep.mubr.bf16.mxu0 %v8957_v13 }
 0x1be   : > { %v10475_v10 = vadd.f32 %v2220_v63, %v10391_v11  ;;  %6729 = vrot.lane.b32.xlu0 %v10338_v55, %s8979_s10  ;;  %8529 = vmatmul.mubr.msk.bf16.vlgmr.msra.gmra.mxu1 %vm312_vm3, %v10279_v8  ;;  %v10481_v12 = vpop.permute.xlu1 %5360  ;;  %v1716_v2 = vpop.f32.mrf.mxu1  ;;  %v10495_v11 = vld.sshfl [vmem:[%s9029_s23 + $0x12] sm:$0x3 pattern:$0x76325410]  ;;  %s8366_s23 = sshll.u32 %s12078_s19, 3 }
 0x1bf   : > { %4908 = vmatpush1.bf16.msra.mxu1 %v4835_v9  ;;  %v2222_v53 = vpop.f32.mrf.mxu0  ;;  %4925 = vmatprep.mubr.bf16.mxu1 %v8957_v13  ;;  %s241_s24 = scalar_lea.vmem %s12066_s4, %s8366_s23  ;;  %s245_s27 = scalar_lea.vmem %s12067_s5, %s8366_s23 }
 0x1c0   : > { %8537 = vmatprep.subr.msk.bf16.mxu1 %vm316_vm1, %v4816_v15  ;;  %v10487_v35 = vadd.f32 %v2222_v53, %v10403_v41  ;;  %v5359_v30 = vpop.permute.xlu0 %5358  ;;  %7277 = vrot.lane.b32.xlu1 %v10198_v37, %s8981_s20  ;;  %v1793_v31 = vpop.f32.mrf.mxu1  ;;  %v4824_v37 = vsel %vm4817_vm4, %v10307_v43, %v4816_v15 }
 0x1c1   : > { %v10492_v8 = vadd.f32 %v1793_v31, %v10408_v32  ;;  %v2224_v14 = vpop.f32.mrf.mxu0  ;;  %v5372_v33 = vsel %vm5366_vm6, %v5359_v30, %v10481_v12  ;;  %v4847_v43 = vsel %vm316_vm1, %v4824_v37, 0 }
 0x1c2   : > { %7275 = vrot.lane.b32.xlu0 %v10154_v26, %s8981_s20  ;;  %v5624_v46 = vpop.permute.xlu1 %5623  ;;  %v1795_v41 = vpop.f32.mrf.mxu1 }
 0x1c3   : > { %8546 = vmatmul.mubr.msk.bf16.vlgmr.msra.gmra.mxu0 %vm312_vm3, %v10450_v0  ;;  %v10507_v32 = vadd.f32 %v1795_v41, %v10420_v24  ;;  %v2225_v44 = vpop.f32.mrf.mxu0 }
 0x1c4   : > { %5417 = vmatpush1.bf16.msra.mxu0 %v5379_v42  ;;  %v5080_v47 = vpop.permute.xlu0 %5079  ;;  %6739 = vrot.lane.b32.xlu1 %v10495_v11, %s8979_s10  ;;  %v1797_v26 = vpop.f32.mrf.mxu1 }
 0x1c5   : > { %8555 = vmatprep.subr.msk.bf16.mxu0 %vm316_vm1, %v5372_v33  ;;  %v5095_v61 = vsel %vm5091_vm5, %v5080_v47, %v10378_v25  ;;  %5434 = vmatprep.mubr.bf16.mxu0 %v8957_v13  ;;  %v5371_v25 = vsel %vm5366_vm6, %v10459_v36, %v5359_v30  ;;  %v5094_v29 = vsel %vm5091_vm5, %v10355_v7, %v5080_v47 }
 0x1c6   : > { %6737 = vrot.lane.b32.xlu0 %v10311_v45, %s8979_s10  ;;  %8534 = vmatmul.mubr.msk.bf16.vlgmr.msra.gmra.mxu1 %vm312_vm3, %v10372_v17  ;;  %v10520_v34 = vpop.permute.xlu1 %5627  ;;  %v1798_v38 = vpop.f32.mrf.mxu1  ;;  %v5391_v59 = vsel %vm316_vm1, %v5371_v25, 0  ;;  %v5110_v22 = vsel %vm316_vm1, %v5094_v29, 0 }
 0x1c7   : > { %4990 = vmatpush1.bf16.msra.mxu1 %v4847_v43  ;;  %5007 = vmatprep.mubr.bf16.mxu1 %v8957_v13 }
 0x1c8   : > { %8543 = vmatprep.subr.msk.bf16.mxu1 %vm316_vm1, %v5095_v61  ;;  %v5626_v52 = vpop.permute.xlu0 %5625  ;;  %7012 = vrot.lane.b32.xlu1 %v10311_v45, %s8980_s15  ;;  %v1986_v24 = vpop.f32.mrf.mxu1 }
 0x1c9   : > { %v10534_v48 = vadd.f32 %v1986_v24, %v10453_v3  ;;  %v2302_v56 = vpop.f32.mrf.mxu0  ;;  %v5643_v51 = vsel %vm5641_vm7, %v5626_v52, %v10520_v34  ;;  %v5642_v21 = vsel %vm5641_vm7, %v5624_v46, %v5626_v52 }
 0x1ca   : > { %v10539_v58 = vadd.f32 %v2302_v56, %v10430_v5  ;;  %7004 = vrot.lane.b32.xlu0 %v10338_v55, %s8980_s15  ;;  %v5090_v50 = vpop.permute.xlu1 %5089  ;;  %v1988_v62 = vpop.f32.mrf.mxu1  ;;  %v5654_v27 = vsel %vm316_vm1, %v5642_v21, 0 }
 0x1cb   : > { %8552 = vmatmul.mubr.msk.bf16.vlgmr.msra.gmra.mxu0 %vm312_vm3, %v10531_v54  ;;  %v10549_v18 = vadd.f32 %v1988_v62, %v10467_v49  ;;  %v2304_v1 = vpop.f32.mrf.mxu0 }
 0x1cc   : > { %5499 = vmatpush1.bf16.msra.mxu0 %v5391_v59  ;;  %v10552_v5 = vadd.f32 %v2304_v1, %v10443_v19  ;;  %v5088_v3 = vpop.permute.xlu0 %5087  ;;  %7279 = vrot.lane.b32.xlu1 %v10338_v55, %s8981_s20  ;;  %v1990_v4 = vpop.f32.mrf.mxu1 }
 0x1cd   : > { %8561 = vmatprep.subr.msk.bf16.mxu0 %vm316_vm1, %v5643_v51  ;;  %v5099_v7 = vsel %vm5091_vm5, %v5088_v3, %v5090_v50  ;;  %v2306_v28 = vpop.f32.mrf.mxu0  ;;  %5516 = vmatprep.mubr.bf16.mxu0 %v8957_v13  ;;  %v5098_v63 = vsel %vm5091_vm5, %v10397_v60, %v5088_v3 }
 0x1ce   : > { %7014 = vrot.lane.b32.xlu0 %v10495_v11, %s8980_s15  ;;  %8538 = vmatmul.mubr.msk.bf16.vlgmr.msra.gmra.mxu1 %vm312_vm3, %v10372_v17  ;;  %v5634_v19 = vpop.permute.xlu1 %5633  ;;  %v1991_v16 = vpop.f32.mrf.mxu1  ;;  %v5122_v60 = vsel %vm316_vm1, %v5098_v63, 0 }
 0x1cf   : > { %5183 = vmatpush1.bf16.msra.mxu1 %v5110_v22  ;;  %v2307_v55 = vpop.f32.mrf.mxu0  ;;  %5200 = vmatprep.mubr.bf16.mxu1 %v8957_v13 }
 0x1d0   : > { %8547 = vmatprep.subr.msk.bf16.mxu1 %vm316_vm1, %v5099_v7  ;;  %v10567_v49 = vpop.permute.xlu0 %5631  ;;  %7285 = vrot.lane.b32.xlu1 %v10143_v20, %s8981_s20 }
 0x1d1   : > { %v2495_v23 = vpop.f32.mrf.mxu0  ;;  %v5646_v31 = vsel %vm5641_vm7, %v10567_v49, %v5634_v19 }
 0x1d2   : > { %v10572_v15 = vadd.f32 %v2495_v23, %v10475_v10  ;;  %7281 = vrot.lane.b32.xlu0 %v10078_v39, %s8981_s20  ;;  %v5355_v17 = vpop.permute.xlu1 %5354  ;;  %v5666_v41 = vsel %vm316_vm1, %v5646_v31, 0 }
 0x1d3   : > { %8556 = vmatmul.mubr.msk.bf16.vlgmr.msra.gmra.mxu0 %vm312_vm3, %v10531_v54  ;;  %v2497_v9 = vpop.f32.mrf.mxu0  ;;  %v5370_v39 = vsel %vm5366_vm6, %v5355_v17, %v10459_v36  ;;  %v5369_v42 = vsel %vm5366_vm6, %v10436_v57, %v5355_v17  ;;  %v10668_v17 = vld [vmem:[%s12063_s1 + $0x54] sm:$0xf] }
 0x1d4   : > { %5692 = vmatpush1.bf16.msra.mxu0 %v5654_v27  ;;  %v10582_v20 = vadd.f32 %v2497_v9, %v10487_v35  ;;  %v10584_v2 = vpop.permute.xlu0 %5635  ;;  %5709 = vmatprep.mubr.bf16.mxu0 %v8957_v13  ;;  %v5385_v57 = vsel %vm316_vm1, %v5369_v42, 0 }
 0x1d5   : > { %v5647_v10 = vsel %vm5641_vm7, %v5634_v19, %v10584_v2  ;;  %v2499_v53 = vpop.f32.mrf.mxu0  ;;  %7289 = vrot.lane.b32.xlu1 %v10495_v11, %s8981_s20 }
 0x1d6   : > { %v2068_v6 = vpop.f32.mrf.mxu1  ;;  %7287 = vrot.lane.b32.xlu0 %v10311_v45, %s8981_s20  ;;  %8544 = vmatmul.mubr.msk.bf16.vlgmr.msra.gmra.mxu1 %vm312_vm3, %v10450_v0  ;;  %v5901_v35 = vpop.permute.xlu1 %5900  ;;  %v10606_v45 = vld [vmem:[%s12063_s1 + $0x50] sm:$0xf] }
 0x1d7   : > { %v2081_v30 = vadd.f32 %v2068_v6, %v10492_v8  ;;  %5265 = vmatpush1.bf16.msra.mxu1 %v5122_v60  ;;  %8565 = vmatprep.subr.msk.bf16.mxu0 %vm316_vm1, %v5647_v10  ;;  %v2500_v36 = vpop.f32.mrf.mxu0 }
 0x1d8   : > { %8553 = vmatprep.subr.msk.bf16.mxu1 %vm316_vm1, %v5370_v39  ;;  %v2070_v11 = vpop.f32.mrf.mxu1  ;;  %v5899_v14 = vpop.permute.xlu0 %5898  ;;  %5282 = vmatprep.mubr.bf16.mxu1 %v8957_v13 }
 0x1d9   : > { %v2082_v8 = vadd.f32 %v2070_v11, %v10507_v32  ;;  %v5917_v24 = vsel %vm5916_vm8, %v5899_v14, %v5901_v35 }
 0x1da   : > { %v2072_v33 = vpop.f32.mrf.mxu1  ;;  %7283 = vrot.lane.b32.xlu0 %v10095_v40, %s8981_s20  ;;  %v5363_v46 = vpop.permute.xlu1 %5362 }
 0x1db   : > { %v2577_v37 = vpop.f32.mrf.mxu0  ;;  %8562 = vmatmul.mubr.msk.bf16.vlgmr.msra.gmra.mxu0 %vm312_vm3, %v10606_v45  ;;  %v5373_v29 = vsel %vm5366_vm6, %v10481_v12, %v5363_v46 }
 0x1dc   : > { %v10618_v44 = vadd.f32 %v2577_v37, %v10539_v58  ;;  %5774 = vmatpush1.bf16.msra.mxu0 %v5666_v41  ;;  %v2073_v32 = vpop.f32.mrf.mxu1  ;;  %v10620_v47 = vpop.permute.xlu0 %5902  ;;  %5791 = vmatprep.mubr.bf16.mxu0 %v8957_v13  ;;  %v5397_v28 = vsel %vm316_vm1, %v5373_v29, 0 }
 0x1dd   : > { %v2579_v40 = vpop.f32.mrf.mxu0  ;;  %v5918_v26 = vsel %vm5916_vm8, %v5901_v35, %v10620_v47 }
 0x1de   : > { %v10627_v61 = vadd.f32 %v2579_v40, %v10552_v5  ;;  %v2261_v43 = vpop.f32.mrf.mxu1  ;;  %8548 = vmatmul.mubr.msk.bf16.vlgmr.msra.gmra.mxu1 %vm312_vm3, %v10450_v0  ;;  %8571 = vmatprep.subr.msk.bf16.mxu0 %vm316_vm1, %v5918_v26  ;;  %v10632_v38 = vpop.permute.xlu1 %5906 }
 0x1df   : > { %v2352_v25 = vadd.f32 %v2261_v43, %v10534_v48  ;;  %v2581_v52 = vpop.f32.mrf.mxu0  ;;  %5458 = vmatpush1.bf16.msra.mxu1 %v5385_v57  ;;  %5475 = vmatprep.mubr.bf16.mxu1 %v8957_v13  ;;  %v5929_v48 = vsel %vm316_vm1, %v5917_v24, 0 }
 0x1e0   : > { %v2263_v56 = vpop.f32.mrf.mxu1  ;;  %v5365_v51 = vpop.permute.xlu0 %5364 }
 0x1e1   : > { %v2353_v58 = vadd.f32 %v2263_v56, %v10549_v18  ;;  %v2582_v50 = vpop.f32.mrf.mxu0  ;;  %v5374_v62 = vsel %vm5366_vm6, %v5363_v46, %v5365_v51 }
 0x1e2   : > { %v2265_v0 = vpop.f32.mrf.mxu1  ;;  %8557 = vmatprep.subr.msk.bf16.mxu1 %vm316_vm1, %v5374_v62  ;;  %v10640_v59 = vpop.permute.xlu1 %5910  ;;  %v10722_v50 = vld [vmem:[%s12063_s1 + $0x58] sm:$0xf] }
 0x1e3   : > { %v2770_v1 = vpop.f32.mrf.mxu0  ;;  %8566 = vmatmul.mubr.msk.bf16.vlgmr.msra.gmra.mxu0 %vm312_vm3, %v10606_v45 }
 0x1e4   : > { %v10648_v5 = vadd.f32 %v2770_v1, %v10572_v15  ;;  %5967 = vmatpush1.bf16.msra.mxu0 %v5929_v48  ;;  %v2266_v18 = vpop.f32.mrf.mxu1  ;;  %v5909_v3 = vpop.permute.xlu0 %5908  ;;  %5984 = vmatprep.mubr.bf16.mxu0 %v8957_v13 }
 0x1e5   : > { %v2772_v4 = vpop.f32.mrf.mxu0  ;;  %v5922_v7 = vsel %vm5916_vm8, %v5909_v3, %v10640_v59  ;;  %v5921_v21 = vsel %vm5916_vm8, %v10632_v38, %v5909_v3 }
 0x1e6   : > { %v10655_v12 = vadd.f32 %v2772_v4, %v10582_v20  ;;  %v2343_v22 = vpop.f32.mrf.mxu1  ;;  %8554 = vmatmul.mubr.msk.bf16.vlgmr.msra.gmra.mxu1 %vm312_vm3, %v10531_v54  ;;  %8575 = vmatprep.subr.msk.bf16.mxu0 %vm316_vm1, %v5922_v7  ;;  %v6174_v19 = vpop.permute.xlu1 %6173  ;;  %v5941_v10 = vsel %vm316_vm1, %v5921_v21, 0 }
 0x1e7   : > { %v10660_v16 = vadd.f32 %v2343_v22, %v2081_v30  ;;  %5540 = vmatpush1.bf16.msra.mxu1 %v5397_v28  ;;  %v2774_v55 = vpop.f32.mrf.mxu0  ;;  %5557 = vmatprep.mubr.bf16.mxu1 %v8957_v13 }
 0x1e8   : > { %v2345_v23 = vpop.f32.mrf.mxu1  ;;  %v5630_v15 = vpop.permute.xlu0 %5629 }
 0x1e9   : > { %v10670_v27 = vadd.f32 %v2345_v23, %v2082_v8  ;;  %v5645_v63 = vsel %vm5641_vm7, %v5630_v15, %v10567_v49  ;;  %v2775_v9 = vpop.f32.mrf.mxu0  ;;  %v5644_v53 = vsel %vm5641_vm7, %v10520_v34, %v5630_v15 }
 0x1ea   : > { %v2347_v20 = vpop.f32.mrf.mxu1  ;;  %8563 = vmatprep.subr.msk.bf16.mxu1 %vm316_vm1, %v5645_v63  ;;  %v10675_v39 = vpop.permute.xlu1 %6177  ;;  %v5660_v35 = vsel %vm316_vm1, %v5644_v53, 0 }
 0x1eb   : > { %8572 = vmatmul.mubr.msk.bf16.vlgmr.msra.gmra.mxu0 %vm312_vm3, %v10668_v17 }
 0x1ec   : > { %6049 = vmatpush1.bf16.msra.mxu0 %v5941_v10  ;;  %v2348_v60 = vpop.f32.mrf.mxu1  ;;  %v6176_v6 = vpop.permute.xlu0 %6175  ;;  %6066 = vmatprep.mubr.bf16.mxu0 %v8957_v13 }
 0x1ed   : > { %v6193_v49 = vsel %vm6191_vm9, %v6176_v6, %v10675_v39  ;;  %v6192_v11 = vsel %vm6191_vm9, %v6174_v19, %v6176_v6 }
 0x1ee   : > { %v2536_v30 = vpop.f32.mrf.mxu1  ;;  %8558 = vmatmul.mubr.msk.bf16.vlgmr.msra.gmra.mxu1 %vm312_vm3, %v10531_v54  ;;  %8581 = vmatprep.subr.msk.bf16.mxu0 %vm316_vm1, %v6193_v49  ;;  %v5640_v34 = vpop.permute.xlu1 %5639  ;;  %v6204_v40 = vsel %vm316_vm1, %v6192_v11, 0 }
 0x1ef   : > { %v10689_v36 = vadd.f32 %v2536_v30, %v2352_v25  ;;  %v2852_v31 = vpop.f32.mrf.mxu0  ;;  %5733 = vmatpush1.bf16.msra.mxu1 %v5660_v35  ;;  %5750 = vmatprep.mubr.bf16.mxu1 %v8957_v13 }
 0x1f0   : > { %v2904_v14 = vadd.f32 %v2852_v31, %v10618_v44  ;;  %v2538_v8 = vpop.f32.mrf.mxu1  ;;  %v5638_v33 = vpop.permute.xlu0 %5637 }
 0x1f1   : > { %v10694_v46 = vadd.f32 %v2538_v8, %v2353_v58  ;;  %v2854_v41 = vpop.f32.mrf.mxu0  ;;  %v5649_v54 = vsel %vm5641_vm7, %v5638_v33, %v5640_v34  ;;  %v5648_v26 = vsel %vm5641_vm7, %v10584_v2, %v5638_v33 }
 0x1f2   : > { %v2905_v42 = vadd.f32 %v2854_v41, %v10627_v61  ;;  %8567 = vmatprep.subr.msk.bf16.mxu1 %vm316_vm1, %v5649_v54  ;;  %v6184_v37 = vpop.permute.xlu1 %6183  ;;  %v2540_v32 = vpop.f32.mrf.mxu1  ;;  %v5672_v25 = vsel %vm316_vm1, %v5648_v26, 0  ;;  %v10773_v41 = vld [vmem:[%s12063_s1 + $0x5c] sm:$0xf] }
 0x1f3   : > { %v2856_v57 = vpop.f32.mrf.mxu0  ;;  %8576 = vmatmul.mubr.msk.bf16.vlgmr.msra.gmra.mxu0 %vm312_vm3, %v10668_v17 }
 0x1f4   : > { %6242 = vmatpush1.bf16.msra.mxu0 %v6204_v40  ;;  %v10704_v44 = vpop.permute.xlu0 %6181  ;;  %v2541_v43 = vpop.f32.mrf.mxu1  ;;  %6259 = vmatprep.mubr.bf16.mxu0 %v8957_v13 }
 0x1f5   : > { %v2857_v61 = vpop.f32.mrf.mxu0  ;;  %v6196_v56 = vsel %vm6191_vm9, %v10704_v44, %v6184_v37 }
 0x1f6   : > { %8564 = vmatmul.mubr.msk.bf16.vlgmr.msra.gmra.mxu1 %vm312_vm3, %v10606_v45  ;;  %v5905_v52 = vpop.permute.xlu1 %5904  ;;  %v6216_v1 = vsel %vm316_vm1, %v6196_v56, 0 }
 0x1f7   : > { %v3045_v24 = vpop.f32.mrf.mxu0  ;;  %5815 = vmatpush1.bf16.msra.mxu1 %v5672_v25  ;;  %v5920_v2 = vsel %vm5916_vm8, %v5905_v52, %v10632_v38  ;;  %5832 = vmatprep.mubr.bf16.mxu1 %v8957_v13 }
 0x1f8   : > { %v3175_v51 = vadd.f32 %v3045_v24, %v10648_v5  ;;  %v10716_v58 = vpop.permute.xlu0 %6185  ;;  %8573 = vmatprep.subr.msk.bf16.mxu1 %vm316_vm1, %v5920_v2  ;;  %v5919_v5 = vsel %vm5916_vm8, %v10620_v47, %v5905_v52 }
 0x1f9   : > { %v3047_v62 = vpop.f32.mrf.mxu0  ;;  %v6197_v38 = vsel %vm6191_vm9, %v6184_v37, %v10716_v58  ;;  %v5935_v22 = vsel %vm316_vm1, %v5919_v5, 0 }
 0x1fa   : > { %v3176_v0 = vadd.f32 %v3047_v62, %v10655_v12  ;;  %v2618_v48 = vpop.f32.mrf.mxu1  ;;  %8585 = vmatprep.subr.msk.bf16.mxu0 %vm316_vm1, %v6197_v38  ;;  %v6451_v29 = vpop.permute.xlu1 %6450 }
 0x1fb   : > { %v2631_v18 = vadd.f32 %v2618_v48, %v10660_v16  ;;  %v3049_v3 = vpop.f32.mrf.mxu0  ;;  %8582 = vmatmul.mubr.msk.bf16.vlgmr.msra.gmra.mxu0 %vm312_vm3, %v10722_v50 }
 0x1fc   : > { %6324 = vmatpush1.bf16.msra.mxu0 %v6216_v1  ;;  %v2620_v4 = vpop.f32.mrf.mxu1  ;;  %v6449_v7 = vpop.permute.xlu0 %6448  ;;  %6341 = vmatprep.mubr.bf16.mxu0 %v8957_v13 }
 0x1fd   : > { %v2632_v28 = vadd.f32 %v2620_v4, %v10670_v27  ;;  %v3050_v12 = vpop.f32.mrf.mxu0  ;;  %v6467_v55 = vsel %vm6466_vm10, %v6449_v7, %v6451_v29 }
 0x1fe   : > { %v2622_v19 = vpop.f32.mrf.mxu1  ;;  %8568 = vmatmul.mubr.msk.bf16.vlgmr.msra.gmra.mxu1 %vm312_vm3, %v10606_v45  ;;  %v5913_v47 = vpop.permute.xlu1 %5912  ;;  %v6479_v10 = vsel %vm316_vm1, %v6467_v55, 0 }
 0x1ff   : > { %v3127_v16 = vpop.f32.mrf.mxu0  ;;  %6008 = vmatpush1.bf16.msra.mxu1 %v5935_v22  ;;  %6025 = vmatprep.mubr.bf16.mxu1 %v8957_v13  ;;  %v5923_v53 = vsel %vm5916_vm8, %v10640_v59, %v5913_v47 }
 0x200   : > { %v10741_v21 = vadd.f32 %v3127_v16, %v2904_v14  ;;  %v2623_v23 = vpop.f32.mrf.mxu1  ;;  %v10743_v15 = vpop.permute.xlu0 %6452  ;;  %v5947_v11 = vsel %vm316_vm1, %v5923_v53, 0 }
 0x201   : > { %v3129_v27 = vpop.f32.mrf.mxu0  ;;  %v6468_v63 = vsel %vm6466_vm10, %v6451_v29, %v10743_v15 }
 0x202   : > { %v10747_v9 = vadd.f32 %v3129_v27, %v2905_v42  ;;  %v2811_v20 = vpop.f32.mrf.mxu1  ;;  %8591 = vmatprep.subr.msk.bf16.mxu0 %vm316_vm1, %v6468_v63  ;;  %v10750_v45 = vpop.permute.xlu1 %6456 }
 0x203   : > { %v2902_v60 = vadd.f32 %v2811_v20, %v10689_v36  ;;  %v3131_v6 = vpop.f32.mrf.mxu0  ;;  %8586 = vmatmul.mubr.msk.bf16.vlgmr.msra.gmra.mxu0 %vm312_vm3, %v10722_v50 }
 0x204   : > { %6517 = vmatpush1.bf16.msra.mxu0 %v6479_v10  ;;  %v2813_v49 = vpop.f32.mrf.mxu1  ;;  %v5915_v35 = vpop.permute.xlu0 %5914  ;;  %6534 = vmatprep.mubr.bf16.mxu0 %v8957_v13 }
 0x205   : > { %v2903_v30 = vadd.f32 %v2813_v49, %v10694_v46  ;;  %v3132_v34 = vpop.f32.mrf.mxu0  ;;  %v5924_v31 = vsel %vm5916_vm8, %v5913_v47, %v5915_v35 }
 0x206   : > { %v2815_v14 = vpop.f32.mrf.mxu1  ;;  %8574 = vmatmul.mubr.msk.bf16.vlgmr.msra.gmra.mxu1 %vm312_vm3, %v10668_v17  ;;  %8577 = vmatprep.subr.msk.bf16.mxu1 %vm316_vm1, %v5924_v31  ;;  %v10765_v59 = vpop.permute.xlu1 %6460 }
 0x207   : > { %v3320_v36 = vpop.f32.mrf.mxu0  ;;  %6090 = vmatpush1.bf16.msra.mxu1 %v5947_v11  ;;  %6107 = vmatprep.mubr.bf16.mxu1 %v8957_v13 }
 0x208   : > { %v10768_v8 = vadd.f32 %v3320_v36, %v3175_v51  ;;  %v2816_v33 = vpop.f32.mrf.mxu1  ;;  %v6459_v46 = vpop.permute.xlu0 %6458 }
 0x209   : > { %v3322_v54 = vpop.f32.mrf.mxu0  ;;  %v6471_v42 = vsel %vm6466_vm10, %v10750_v45, %v6459_v46  ;;  %v6472_v37 = vsel %vm6466_vm10, %v6459_v46, %v10765_v59 }
 0x20a   : > { %v10779_v32 = vadd.f32 %v3322_v54, %v3176_v0  ;;  %v6491_v40 = vsel %vm316_vm1, %v6471_v42, 0  ;;  %v2893_v26 = vpop.f32.mrf.mxu1  ;;  %8595 = vmatprep.subr.msk.bf16.mxu0 %vm316_vm1, %v6472_v37  ;;  %v6724_v57 = vpop.permute.xlu1 %6723 }
 0x20b   : > { %v10783_v43 = vadd.f32 %v2893_v26, %v2631_v18  ;;  %8592 = vmatmul.mubr.msk.bf16.vlgmr.msra.gmra.mxu0 %vm312_vm3, %v10773_v41  ;;  %v3324_v61 = vpop.f32.mrf.mxu0 }
 0x20c   : > { %6599 = vmatpush1.bf16.msra.mxu0 %v6491_v40  ;;  %v2895_v25 = vpop.f32.mrf.mxu1  ;;  %v6180_v52 = vpop.permute.xlu0 %6179  ;;  %6616 = vmatprep.mubr.bf16.mxu0 %v8957_v13 }
 0x20d   : > { %v10788_v24 = vadd.f32 %v2895_v25, %v2632_v28  ;;  %v6194_v2 = vsel %vm6191_vm9, %v10675_v39, %v6180_v52  ;;  %v6195_v56 = vsel %vm6191_vm9, %v6180_v52, %v10704_v44  ;;  %v3325_v51 = vpop.f32.mrf.mxu0 }
 0x20e   : > { %v6210_v62 = vsel %vm316_vm1, %v6194_v2, 0  ;;  %v2897_v38 = vpop.f32.mrf.mxu1  ;;  %8578 = vmatmul.mubr.msk.bf16.vlgmr.msra.gmra.mxu1 %vm312_vm3, %v10668_v17  ;;  %8583 = vmatprep.subr.msk.bf16.mxu1 %vm316_vm1, %v6195_v56  ;;  %v10798_v0 = vpop.permute.xlu1 %6727 }
 0x20f   : > { %6283 = vmatpush1.bf16.msra.mxu1 %v6210_v62  ;;  %6300 = vmatprep.mubr.bf16.mxu1 %v8957_v13 }
 0x210   : > { %v2898_v48 = vpop.f32.mrf.mxu1  ;;  %v6726_v39 = vpop.permute.xlu0 %6725 }
 0x211   : > { %v6742_v29 = vsel %vm6741_vm11, %v6724_v57, %v6726_v39  ;;  %v6743_v44 = vsel %vm6741_vm11, %v6726_v39, %v10798_v0 }
 0x212   : > { %v6754_v1 = vsel %vm316_vm1, %v6742_v29, 0  ;;  %v3086_v5 = vpop.f32.mrf.mxu1  ;;  %8601 = vmatprep.subr.msk.bf16.mxu0 %vm316_vm1, %v6743_v44  ;;  %v6190_v17 = vpop.permute.xlu1 %6189  ;;  %v10879_v44 = vld [vmem:[%s12063_s1 + $0x64] sm:$0xf] }
 0x213   : > { %v10806_v18 = vadd.f32 %v3086_v5, %v2902_v60  ;;  %v3402_v3 = vpop.f32.mrf.mxu0  ;;  %8596 = vmatmul.mubr.msk.bf16.vlgmr.msra.gmra.mxu0 %vm312_vm3, %v10773_v41 }
 0x214   : > { %v3454_v4 = vadd.f32 %v3402_v3, %v10741_v21  ;;  %6792 = vmatpush1.bf16.msra.mxu0 %v6754_v1  ;;  %v3088_v7 = vpop.f32.mrf.mxu1  ;;  %v6188_v28 = vpop.permute.xlu0 %6187  ;;  %6809 = vmatprep.mubr.bf16.mxu0 %v8957_v13 }
 0x215   : > { %v10812_v12 = vadd.f32 %v3088_v7, %v2903_v30  ;;  %v3404_v22 = vpop.f32.mrf.mxu0  ;;  %v6198_v19 = vsel %vm6191_vm9, %v10716_v58, %v6188_v28  ;;  %v6199_v47 = vsel %vm6191_vm9, %v6188_v28, %v6190_v17  ;;  %v10828_v58 = vld [vmem:[%s12063_s1 + $0x60] sm:$0xf] }
 0x216   : > { %v3455_v16 = vadd.f32 %v3404_v22, %v10747_v9  ;;  %v6222_v55 = vsel %vm316_vm1, %v6198_v19, 0  ;;  %8584 = vmatmul.mubr.msk.bf16.vlgmr.msra.gmra.mxu1 %vm312_vm3, %v10722_v50  ;;  %8587 = vmatprep.subr.msk.bf16.mxu1 %vm316_vm1, %v6199_v47  ;;  %v6734_v21 = vpop.permute.xlu1 %6733  ;;  %v3090_v23 = vpop.f32.mrf.mxu1 }
 0x217   : > { %v3406_v27 = vpop.f32.mrf.mxu0  ;;  %6365 = vmatpush1.bf16.msra.mxu1 %v6222_v55  ;;  %6382 = vmatprep.mubr.bf16.mxu1 %v8957_v13 }
 0x218   : > { %v10823_v63 = vpop.permute.xlu0 %6731  ;;  %v3091_v9 = vpop.f32.mrf.mxu1 }
 0x219   : > { %v3407_v20 = vpop.f32.mrf.mxu0  ;;  %v6746_v53 = vsel %vm6741_vm11, %v10823_v63, %v6734_v21 }
 0x21a   : > { %v6455_v10 = vpop.permute.xlu1 %6454  ;;  %v6766_v14 = vsel %vm316_vm1, %v6746_v53, 0 }
 0x21b   : > { %v3595_v60 = vpop.f32.mrf.mxu0  ;;  %8602 = vmatmul.mubr.msk.bf16.vlgmr.msra.gmra.mxu0 %vm312_vm3, %v10828_v58  ;;  %v6469_v6 = vsel %vm6466_vm10, %v10743_v15, %v6455_v10  ;;  %v6470_v49 = vsel %vm6466_vm10, %v6455_v10, %v10750_v45 }
 0x21c   : > { %v3725_v35 = vadd.f32 %v3595_v60, %v10768_v8  ;;  %v6485_v30 = vsel %vm316_vm1, %v6469_v6, 0  ;;  %v10840_v34 = vpop.permute.xlu0 %6735  ;;  %8593 = vmatprep.subr.msk.bf16.mxu1 %vm316_vm1, %v6470_v49  ;;  %6891 = vmatprep.mubr.bf16.mxu0 %v8957_v13 }
 0x21d   : > { %v3597_v31 = vpop.f32.mrf.mxu0  ;;  %v6747_v11 = vsel %vm6741_vm11, %v6734_v21, %v10840_v34 }
 0x21e   : > { %v10848_v15 = vadd.f32 %v3597_v31, %v10779_v32  ;;  %v3168_v45 = vpop.f32.mrf.mxu1  ;;  %8588 = vmatmul.mubr.msk.bf16.vlgmr.msra.gmra.mxu1 %vm312_vm3, %v10722_v50  ;;  %8605 = vmatprep.subr.msk.bf16.mxu0 %vm316_vm1, %v6747_v11  ;;  %v7001_v36 = vpop.permute.xlu1 %7000 }
 0x21f   : > { %v3181_v8 = vadd.f32 %v3168_v45, %v10783_v43  ;;  %v3599_v33 = vpop.f32.mrf.mxu0  ;;  %6558 = vmatpush1.bf16.msra.mxu1 %v6485_v30  ;;  %6874 = vmatpush1.bf16.msra.mxu0 %v6766_v14 }
 0x220   : > { %v3170_v46 = vpop.f32.mrf.mxu1  ;;  %v6999_v54 = vpop.permute.xlu0 %6998  ;;  %6575 = vmatprep.mubr.bf16.mxu1 %v8957_v13 }
 0x221   : > { %v3182_v42 = vadd.f32 %v3170_v46, %v10788_v24  ;;  %v3600_v37 = vpop.f32.mrf.mxu0  ;;  %v7017_v50 = vsel %vm7016_vm12, %v6999_v54, %v7001_v36 }
 0x222   : > { %v3172_v32 = vpop.f32.mrf.mxu1  ;;  %v6463_v40 = vpop.permute.xlu1 %6462  ;;  %v7029_v24 = vsel %vm316_vm1, %v7017_v50, 0 }
 0x223   : > { %v3677_v26 = vpop.f32.mrf.mxu0  ;;  %8606 = vmatmul.mubr.msk.bf16.vlgmr.msra.gmra.mxu0 %vm312_vm3, %v10828_v58  ;;  %v6473_v62 = vsel %vm6466_vm10, %v10765_v59, %v6463_v40  ;;  %v10923_v32 = vld [vmem:[%s12063_s1 + $0x68] sm:$0xf] }
 0x224   : > { %v3729_v57 = vadd.f32 %v3677_v26, %v3454_v4  ;;  %v3173_v43 = vpop.f32.mrf.mxu1  ;;  %v10859_v61 = vpop.permute.xlu0 %7002  ;;  %7084 = vmatprep.mubr.bf16.mxu0 %v8957_v13  ;;  %v6497_v59 = vsel %vm316_vm1, %v6473_v62, 0 }
 0x225   : > { %v3679_v25 = vpop.f32.mrf.mxu0  ;;  %v7018_v52 = vsel %vm7016_vm12, %v7001_v36, %v10859_v61 }
 0x226   : > { %v10865_v2 = vadd.f32 %v3679_v25, %v3455_v16  ;;  %v3361_v56 = vpop.f32.mrf.mxu1  ;;  %8594 = vmatmul.mubr.msk.bf16.vlgmr.msra.gmra.mxu1 %vm312_vm3, %v10773_v41  ;;  %8611 = vmatprep.subr.msk.bf16.mxu0 %vm316_vm1, %v7018_v52  ;;  %v10870_v51 = vpop.permute.xlu1 %7006 }
 0x227   : > { %v3452_v38 = vadd.f32 %v3361_v56, %v10806_v18  ;;  %v3681_v48 = vpop.f32.mrf.mxu0  ;;  %7067 = vmatpush1.bf16.msra.mxu0 %v7029_v24  ;;  %6657 = vmatprep.mubr.bf16.mxu1 %v8957_v13 }
 0x228   : > { %v3363_v39 = vpop.f32.mrf.mxu1  ;;  %v6465_v29 = vpop.permute.xlu0 %6464 }
 0x229   : > { %v3453_v1 = vadd.f32 %v3363_v39, %v10812_v12  ;;  %v3682_v5 = vpop.f32.mrf.mxu0  ;;  %v6474_v17 = vsel %vm6466_vm10, %v6463_v40, %v6465_v29 }
 0x22a   : > { %v3365_v3 = vpop.f32.mrf.mxu1  ;;  %8597 = vmatprep.subr.msk.bf16.mxu1 %vm316_vm1, %v6474_v17  ;;  %v10885_v18 = vpop.permute.xlu1 %7010 }
 0x22b   : > { %v3834_v4 = vpop.f32.mrf.mxu0  ;;  %8612 = vmatmul.mubr.msk.bf16.vlgmr.msra.gmra.mxu0 %vm312_vm3, %v10879_v44  ;;  %6640 = vmatpush1.bf16.msra.mxu1 %v6497_v59 }
 0x22c   : > { %v3964_v7 = vadd.f32 %v3834_v4, %v3725_v35  ;;  %v3366_v28 = vpop.f32.mrf.mxu1  ;;  %v7009_v22 = vpop.permute.xlu0 %7008  ;;  %7166 = vmatprep.mubr.bf16.mxu0 %v8957_v13 }
 0x22d   : > { %v10890_v12 = vpop.f32.mrf.mxu0  ;;  %v7021_v19 = vsel %vm7016_vm12, %v10870_v51, %v7009_v22  ;;  %v7022_v47 = vsel %vm7016_vm12, %v7009_v22, %v10885_v18 }
 0x22e   : > { %v7041_v16 = vsel %vm316_vm1, %v7021_v19, 0  ;;  %v3443_v55 = vpop.f32.mrf.mxu1  ;;  %8598 = vmatmul.mubr.msk.bf16.vlgmr.msra.gmra.mxu1 %vm312_vm3, %v10773_v41  ;;  %8615 = vmatprep.subr.msk.bf16.mxu0 %vm316_vm1, %v7022_v47  ;;  %v7274_v21 = vpop.permute.xlu1 %7273 }
 0x22f   : > { %v3456_v23 = vadd.f32 %v3443_v55, %v3181_v8  ;;  %v3838_v27 = vpop.f32.mrf.mxu0  ;;  %7149 = vmatpush1.bf16.msra.mxu0 %v7041_v16  ;;  %6850 = vmatprep.mubr.bf16.mxu1 %v8957_v13 }
 0x230   : > { %v3445_v9 = vpop.f32.mrf.mxu1  ;;  %v6730_v20 = vpop.permute.xlu0 %6729 }
 0x231   : > { %v3457_v10 = vadd.f32 %v3445_v9, %v3182_v42  ;;  %v3839_v53 = vpop.f32.mrf.mxu0  ;;  %v6744_v60 = vsel %vm6741_vm11, %v10798_v0, %v6730_v20  ;;  %v6745_v6 = vsel %vm6741_vm11, %v6730_v20, %v10823_v63 }
 0x232   : > { %v6760_v41 = vsel %vm316_vm1, %v6744_v60, 0  ;;  %v3447_v49 = vpop.f32.mrf.mxu1  ;;  %8603 = vmatprep.subr.msk.bf16.mxu1 %vm316_vm1, %v6745_v6  ;;  %v10907_v35 = vpop.permute.xlu1 %7277 }
 0x233   : > { %v3916_v30 = vpop.f32.mrf.mxu0  ;;  %8616 = vmatmul.mubr.msk.bf16.vlgmr.msra.gmra.mxu0 %vm312_vm3, %v10879_v44  ;;  %6833 = vmatpush1.bf16.msra.mxu1 %v6760_v41  ;;  %v3965_v41 = vadd.f32 %v10890_v12, %v10848_v15 }
 0x234   : > { %v3968_v31 = vadd.f32 %v3916_v30, %v3729_v57  ;;  %v3448_v11 = vpop.f32.mrf.mxu1  ;;  %v7276_v14 = vpop.permute.xlu0 %7275  ;;  %7359 = vmatprep.mubr.bf16.mxu0 %v8957_v13 }
 0x235   : > { %v3918_v0 = vpop.f32.mrf.mxu0  ;;  %v7292_v63 = vsel %vm7291_vm13, %v7274_v21, %v7276_v14  ;;  %v7293_v45 = vsel %vm7291_vm13, %v7276_v14, %v10907_v35 }
 0x236   : > { %v7304_v36 = vsel %vm316_vm1, %v7292_v63, 0  ;;  %v3636_v8 = vpop.f32.mrf.mxu1  ;;  %8604 = vmatmul.mubr.msk.bf16.vlgmr.msra.gmra.mxu1 %vm312_vm3, %v10828_v58  ;;  %8621 = vmatprep.subr.msk.bf16.mxu0 %vm316_vm1, %v7293_v45  ;;  %v6740_v33 = vpop.permute.xlu1 %6739  ;;  %v3969_v19 = vadd.f32 %v3918_v0, %v10865_v2 }
 0x237   : > { %v3727_v46 = vadd.f32 %v3636_v8, %v3452_v38  ;;  %v3920_v54 = vpop.f32.mrf.mxu0  ;;  %7342 = vmatpush1.bf16.msra.mxu0 %v7304_v36  ;;  %6932 = vmatprep.mubr.bf16.mxu1 %v8957_v13 }
 0x238   : > { %v3638_v42 = vpop.f32.mrf.mxu1  ;;  %v6738_v37 = vpop.permute.xlu0 %6737 }
 0x239   : > { %v10925_v40 = vadd.f32 %v3638_v42, %v3453_v1  ;;  %v3921_v50 = vpop.f32.mrf.mxu0  ;;  %v6748_v26 = vsel %vm6741_vm11, %v10840_v34, %v6738_v37  ;;  %v6749_v57 = vsel %vm6741_vm11, %v6738_v37, %v6740_v33 }
 0x23a   : > { %v6772_v43 = vsel %vm316_vm1, %v6748_v26, 0  ;;  %v3640_v25 = vpop.f32.mrf.mxu1  ;;  %8607 = vmatprep.subr.msk.bf16.mxu1 %vm316_vm1, %v6749_v57  ;;  %v7013_v24 = vpop.permute.xlu1 %7012 }
 0x23b   : > { %v4097_v52 = vpop.f32.mrf.mxu0  ;;  %8622 = vmatmul.mubr.msk.bf16.vlgmr.msra.gmra.mxu0 %vm312_vm3, %v10923_v32  ;;  %6915 = vmatpush1.bf16.msra.mxu1 %v6772_v43 }
 0x23c   : > { %v4227_v56 = vadd.f32 %v4097_v52, %v3964_v7  ;;  %v3641_v62 = vpop.f32.mrf.mxu1  ;;  %v7005_v38 = vpop.permute.xlu0 %7004  ;;  %7441 = vmatprep.mubr.bf16.mxu0 %v8957_v13 }
 0x23d   : > { %v4099_v48 = vpop.f32.mrf.mxu0  ;;  %v7019_v34 = vsel %vm7016_vm12, %v10859_v61, %v7005_v38  ;;  %v7020_v39 = vsel %vm7016_vm12, %v7005_v38, %v10870_v51 }
 0x23e   : > { %v7035_v29 = vsel %vm316_vm1, %v7019_v34, 0  ;;  %v3718_v1 = vpop.f32.mrf.mxu1  ;;  %8608 = vmatmul.mubr.msk.bf16.vlgmr.msra.gmra.mxu1 %vm312_vm3, %v10828_v58  ;;  %8613 = vmatprep.subr.msk.bf16.mxu1 %vm316_vm1, %v7020_v39  ;;  %v7280_v7 = vpop.permute.xlu1 %7279  ;;  %v7023_v58 = vsel %vm7016_vm12, %v10885_v18, %v7013_v24  ;;  %v4228_v14 = vadd.f32 %v4099_v48, %v3965_v41 }
 0x23f   : > { %v3731_v5 = vadd.f32 %v3718_v1, %v3456_v23  ;;  %v4101_v17 = vpop.f32.mrf.mxu0  ;;  %7108 = vmatpush1.bf16.msra.mxu1 %v7035_v29  ;;  %7125 = vmatprep.mubr.bf16.mxu1 %v8957_v13  ;;  %v7047_v27 = vsel %vm316_vm1, %v7023_v58, 0 }
 0x240   : > { %v3720_v59 = vpop.f32.mrf.mxu1  ;;  %v7015_v3 = vpop.permute.xlu0 %7014 }
 0x241   : > { %v10944_v4 = vadd.f32 %v3720_v59, %v3457_v10  ;;  %v4102_v61 = vpop.f32.mrf.mxu0  ;;  %v7024_v51 = vsel %vm7016_vm12, %v7013_v24, %v7015_v3 }
 0x242   : > { %v3722_v28 = vpop.f32.mrf.mxu1  ;;  %8617 = vmatprep.subr.msk.bf16.mxu1 %vm316_vm1, %v7024_v51  ;;  %v7286_v10 = vpop.permute.xlu1 %7285 }
 0x243   : > { %v4179_v22 = vpop.f32.mrf.mxu0 }
 0x244   : > { %v4231_v47 = vadd.f32 %v4179_v22, %v3968_v31  ;;  %v3723_v16 = vpop.f32.mrf.mxu1  ;;  %v7282_v55 = vpop.permute.xlu0 %7281  ;;  %v7294_v31 = vsel %vm7291_vm13, %v10907_v35, %v7280_v7 }
 0x245   : > { %v4181_v21 = vpop.f32.mrf.mxu0  ;;  %v7295_v23 = vsel %vm7291_vm13, %v7280_v7, %v7282_v55  ;;  %v7310_v54 = vsel %vm316_vm1, %v7294_v31, 0 }
 0x246   : > { %v4232_v9 = vadd.f32 %v4181_v21, %v3969_v19  ;;  %v3875_v20 = vpop.f32.mrf.mxu1  ;;  %8614 = vmatmul.mubr.msk.bf16.vlgmr.msra.gmra.mxu1 %vm312_vm3, %v10879_v44 }
 0x247   : > { %v3966_v53 = vadd.f32 %v3875_v20, %v3727_v46  ;;  %v4183_v60 = vpop.f32.mrf.mxu0  ;;  %7190 = vmatpush1.bf16.msra.mxu1 %v7047_v27  ;;  %7207 = vmatprep.mubr.bf16.mxu1 %v8957_v13  ;;  %v7290_v30 = vpop.permute.xlu1 %7289  ;;  %v7567_v20 = vld [vmem:[%s12064_s2 + $0xe8] sm:$0xff] }
 0x248   : > { %v3877_v2 = vpop.f32.mrf.mxu1  ;;  %v7288_v18 = vpop.permute.xlu0 %7287  ;;  %8623 = vmatprep.subr.msk.bf16.mxu1 %vm316_vm1, %v7295_v23  ;;  %v7552_v23 = vld [vmem:[%s12064_s2 + $0x70] sm:$0xff] }
 0x249   : > { %v4184_v6 = vpop.f32.mrf.mxu0  ;;  %v7299_v46 = vsel %vm7291_vm13, %v7288_v18, %v7290_v30  ;;  %v7298_v26 = vsel %vm7291_vm13, %v7286_v10, %v7288_v18  ;;  %v3967_v48 = vadd.f32 %v3877_v2, %v10925_v40  ;;  %v7566_v18 = vld [vmem:[%s12064_s2 + $0xe0] sm:$0xff]  ;;  %v7565_v30 = vld [vmem:[%s12064_s2 + $0xd8] sm:$0xff] }
 0x24a   : > { %v3879_v49 = vpop.f32.mrf.mxu1 }
 0x24b   : > { %v4360_v11 = vpop.f32.mrf.mxu0  ;;  %v7550_v49 = vld [vmem:[%s12064_s2 + $0x60] sm:$0xff] }
 0x24c   : > { %v4490_v0 = vadd.f32 %v4360_v11, %v4227_v56  ;;  %v3880_v63 = vpop.f32.mrf.mxu1  ;;  %v7284_v45 = vpop.permute.xlu0 %7283 }
 0x24d   : > { %v4362_v36 = vpop.f32.mrf.mxu0  ;;  %v7296_v8 = vsel %vm7291_vm13, %v7282_v55, %v7284_v45  ;;  %v7297_v33 = vsel %vm7291_vm13, %v7284_v45, %v7286_v10  ;;  %v7553_v55 = vld [vmem:[%s12064_s2 + $0x78] sm:$0xff]  ;;  %v7564_v63 = vld [vmem:[%s12064_s2 + $0xd0] sm:$0xff] }
 0x24e   : > { %v4491_v15 = vadd.f32 %v4362_v36, %v4228_v14  ;;  %v7316_v12 = vsel %vm316_vm1, %v7296_v8, 0  ;;  %v3957_v42 = vpop.f32.mrf.mxu1  ;;  %8618 = vmatmul.mubr.msk.bf16.vlgmr.msra.gmra.mxu1 %vm312_vm3, %v10879_v44  ;;  %8625 = vmatprep.subr.msk.bf16.mxu0 %vm316_vm1, %v7297_v33  ;;  %v7322_v44 = vsel %vm316_vm1, %v7298_v26, 0  ;;  %v12068_v36 = vmov 0.0   ;;  %v7548_v33 = vld [vmem:[%s12064_s2 + $0x50] sm:$0xff] }
 0x24f   : > { %v3970_v35 = vadd.f32 %v3957_v42, %v3731_v5  ;;  %v4364_v37 = vpop.f32.mrf.mxu0  ;;  %7383 = vmatpush1.bf16.msra.mxu1 %v7310_v54  ;;  %7424 = vmatpush1.bf16.msra.mxu0 %v7316_v12  ;;  %v7563_v12 = vld [vmem:[%s12064_s2 + $0xc8] sm:$0xff] }
 0x250   : > { %v3959_v50 = vpop.f32.mrf.mxu1  ;;  %7400 = vmatprep.mubr.bf16.mxu1 %v8957_v13  ;;  %8627 = vmatprep.subr.msk.bf16.mxu1 %vm316_vm1, %v7299_v46  ;;  %v7649_v46 = vld [vmem:[%s12064_s2 + $0x378] sm:$0xff]  ;;  %v7648_v37 = vld [vmem:[%s12064_s2 + $0x370] sm:$0xff]  ;;  %vm7534_vm1 = vcmask 1043456  }
 0x251   : > { %v4365_v57 = vpop.f32.mrf.mxu0  ;;  %v3971_v40 = vadd.f32 %v3959_v50, %v10944_v4 }
 0x252   : > { %v3961_v43 = vpop.f32.mrf.mxu1  ;;  %8626 = vmatmul.mubr.msk.bf16.vlgmr.msra.gmra.mxu0 %vm312_vm3, %v10923_v32  ;;  %v7562_v57 = vld [vmem:[%s12064_s2 + $0xc0] sm:$0xff] }
 0x253   : > { %v4442_v25 = vpop.f32.mrf.mxu0 }
 0x254   : > { %v4494_v52 = vadd.f32 %v4442_v25, %v4231_v47  ;;  %v3962_v24 = vpop.f32.mrf.mxu1 }
 0x255   : > { %v4444_v56 = vpop.f32.mrf.mxu0  ;;  %v7561_v24 = vld [vmem:[%s12064_s2 + $0xb8] sm:$0xff] }
 0x256   : > { %v4495_v62 = vadd.f32 %v4444_v56, %v4232_v9  ;;  %v4138_v38 = vpop.f32.mrf.mxu1  ;;  %8624 = vmatmul.mubr.msk.bf16.vlgmr.msra.gmra.mxu1 %vm312_vm3, %v10923_v32 }
 0x257   : > { %v4229_v34 = vadd.f32 %v4138_v38, %v3966_v53  ;;  %v4446_v39 = vpop.f32.mrf.mxu0  ;;  %7465 = vmatpush1.bf16.msra.mxu1 %v7322_v44  ;;  %7482 = vmatprep.mubr.bf16.mxu1 %v8957_v13  ;;  %v7569_v13 = vld [vmem:[%s12064_s2 + $0xf8] sm:$0xff]  ;;  %v7551_v53 = vld [vmem:[%s12064_s2 + $0x68] sm:$0xff]  ;;  %v7546_v44 = vld [vmem:[%s12064_s2 + $0x40] sm:$0xff] }
 0x258   : > { %v4140_v29 = vpop.f32.mrf.mxu1  ;;  %8642 = vmatprep.subr.mxu0 %v7569_v13  ;;  %7877 = vmatprep.subr.mxu1 %v12068_v36  ;;  %v7560_v39 = vld [vmem:[%s12064_s2 + $0xb0] sm:$0xff] }
 0x259   : > { %v4230_v1 = vadd.f32 %v4140_v29, %v3967_v48  ;;  %v4447_v5 = vpop.f32.mrf.mxu0  ;;  %8643 = vmatpush3.msra.mxu0 %v7553_v55  ;;  %v7545_v48 = vld [vmem:[%s12064_s2 + $0x38] sm:$0xff] }
 0x25a   : > { %v4142_v17 = vpop.f32.mrf.mxu1  ;;  %v7544_v5 = vld [vmem:[%s12064_s2 + $0x30] sm:$0xff]  ;;  %v7557_v55 = vld [vmem:[%s12064_s2 + $0x98] sm:$0xff] }
 0x25b   : > { %v4623_v59 = vpop.f32.mrf.mxu0  ;;  %v7645_v17 = vld [vmem:[%s12064_s2 + $0x358] sm:$0xff] }
 0x25c   : > { %v4753_v3 = vadd.f32 %v4623_v59, %v4490_v0  ;;  %v4143_v61 = vpop.f32.mrf.mxu1  ;;  %v7549_v0 = vld [vmem:[%s12064_s2 + $0x58] sm:$0xff] }
 0x25d   : > { %v4625_v51 = vpop.f32.mrf.mxu0  ;;  %v7559_v61 = vld [vmem:[%s12064_s2 + $0xa8] sm:$0xff] }
 0x25e   : > { %v4754_v7 = vadd.f32 %v4625_v51, %v4491_v15  ;;  %v4220_v28 = vpop.f32.mrf.mxu1  ;;  %8628 = vmatmul.mubr.msk.bf16.vlgmr.msra.gmra.mxu1 %vm312_vm3, %v10923_v32  ;;  %v7568_v32 = vld [vmem:[%s12064_s2 + $0xf0] sm:$0xff]  ;;  %vm7535_vm3 = vcmask 850948  }
 0x25f   : > { %v4233_v58 = vadd.f32 %v4220_v28, %v3970_v35  ;;  %v4627_v22 = vpop.f32.mrf.mxu0  ;;  %8644 = vmatprep.subr.mxu0 %v7568_v32  ;;  %7878 = vmatpush1.msra.mxu1 %v7649_v46  ;;  %v7547_v35 = vld [vmem:[%s12064_s2 + $0x48] sm:$0xff]  ;;  %v7644_v28 = vld [vmem:[%s12064_s2 + $0x350] sm:$0xff]  ;;  %v11159_v46 = vld [vmem:[%s12064_s2 + $0x1f8] sm:$0xff] }
 0x260   : > { %v4222_v19 = vpop.f32.mrf.mxu1  ;;  %8645 = vmatpush3.msra.mxu0 %v7552_v23  ;;  %7879 = vmatprep.subr.mxu1 %v12068_v36  ;;  %v7558_v22 = vld [vmem:[%s12064_s2 + $0xa0] sm:$0xff]  ;;  %v7541_v23 = vld [vmem:[%s12064_s2 + $0x18] sm:$0xff]  ;;  %vm7536_vm0 = vmor %vm7535_vm3, %vm7534_vm1 }
 0x261   : > { %v10985_v47 = vadd.f32 %v4222_v19, %v3971_v40  ;;  %v4628_v16 = vpop.f32.mrf.mxu0  ;;  %8646 = vmatprep.subr.mxu0 %v7567_v20  ;;  %7880 = vmatpush1.msra.mxu1 %v7648_v37  ;;  %v7637_v37 = vld [vmem:[%s12064_s2 + $0x318] sm:$0xff] }
 0x262   : > { %v4224_v4 = vpop.f32.mrf.mxu1  ;;  %8647 = vmatpush3.msra.mxu0 %v7551_v53  ;;  %7881 = vmatprep.subr.mxu1 %v12068_v36  ;;  %v7643_v16 = vld [vmem:[%s12064_s2 + $0x348] sm:$0xff]  ;;  %v7540_v53 = vld [vmem:[%s12064_s2 + $0x10] sm:$0xff] }
 0x263   : > { %v4705_v21 = vpop.f32.mrf.mxu0  ;;  %8648 = vmatprep.subr.mxu0 %v7566_v18 }
 0x264   : > { %v10996_v27 = vadd.f32 %v4705_v21, %v4494_v52  ;;  %v4225_v9 = vpop.f32.mrf.mxu1  ;;  %8649 = vmatpush3.msra.mxu0 %v7550_v49  ;;  %v7647_v52 = vld [vmem:[%s12064_s2 + $0x368] sm:$0xff] }
 0x265   : > { %v4707_v10 = vpop.f32.mrf.mxu0  ;;  %8650 = vmatprep.subr.mxu0 %v7565_v30  ;;  %7882 = vmatpush1.msra.mxu1 %v7647_v52  ;;  %v7556_v9 = vld [vmem:[%s12064_s2 + $0x90] sm:$0xff]  ;;  %v7539_v49 = vld [vmem:[%s12064_s2 + $0x8] sm:$0xff] }
 0x266   : > { %v11004_v60 = vadd.f32 %v4707_v10, %v4495_v62  ;;  %v4401_v2 = vpop.f32.mrf.mxu1  ;;  %8651 = vmatpush3.msra.mxu0 %v7549_v0  ;;  %7883 = vmatprep.subr.mxu1 %v12068_v36  ;;  %v7640_v30 = vld [vmem:[%s12064_s2 + $0x330] sm:$0xff] }
 0x267   : > { %v11009_v6 = vadd.f32 %v4401_v2, %v4229_v34  ;;  %v4709_v41 = vpop.f32.mrf.mxu0  ;;  %8652 = vmatprep.subr.mxu0 %v7564_v63  ;;  %v7646_v34 = vld [vmem:[%s12064_s2 + $0x360] sm:$0xff] }
 0x268   : > { %v4403_v31 = vpop.f32.mrf.mxu1  ;;  %8653 = vmatpush3.msra.mxu0 %v7548_v33  ;;  %7884 = vmatpush1.msra.mxu1 %v7646_v34  ;;  %v7634_v34 = vld [vmem:[%s12064_s2 + $0x300] sm:$0xff] }
 0x269   : > { %v11017_v11 = vadd.f32 %v4403_v31, %v4230_v1  ;;  %v4710_v14 = vpop.f32.mrf.mxu0  ;;  %8654 = vmatprep.subr.mxu0 %v7563_v12  ;;  %7885 = vmatprep.subr.mxu1 %v12068_v36  ;;  %v7638_v12 = vld [vmem:[%s12064_s2 + $0x320] sm:$0xff] }
 0x26a   : > { %v4405_v45 = vpop.f32.mrf.mxu1  ;;  %8655 = vmatpush3.msra.mxu0 %v7547_v35  ;;  %7886 = vmatpush1.msra.mxu1 %v7645_v17  ;;  %v7554_v14 = vld [vmem:[%s12064_s2 + $0x80] sm:$0xff] }
 0x26b   : > { %v4886_v8 = vpop.f32.mrf.mxu0  ;;  %8656 = vmatprep.subr.mxu0 %v7562_v57  ;;  %7887 = vmatprep.subr.mxu1 %v12068_v36  ;;  %v7538_v45 = vld [vmem:[%s12064_s2] sm:$0xff] }
 0x26c   : > { %v11032_v54 = vadd.f32 %v4886_v8, %v4753_v3  ;;  %v4406_v15 = vpop.f32.mrf.mxu1  ;;  %8657 = vmatpush3.msra.mxu0 %v7546_v44  ;;  %7888 = vmatpush1.msra.mxu1 %v7644_v28  ;;  %v7639_v8 = vld [vmem:[%s12064_s2 + $0x328] sm:$0xff] }
 0x26d   : > { %v4888_v42 = vpop.f32.mrf.mxu0  ;;  %8658 = vmatprep.subr.mxu0 %v7561_v24  ;;  %7889 = vmatprep.subr.mxu1 %v12068_v36 }
 0x26e   : > { %v11044_v50 = vadd.f32 %v4888_v42, %v4754_v7  ;;  %v4483_v26 = vpop.f32.mrf.mxu1  ;;  %8659 = vmatpush3.msra.mxu0 %v7545_v48  ;;  %v7543_v7 = vld [vmem:[%s12064_s2 + $0x28] sm:$0xff]  ;;  %7890 = vmatpush1.msra.mxu1 %v7643_v16 }
 0x26f   : > { %v11049_v43 = vadd.f32 %v4483_v26, %v4233_v58  ;;  %v4890_v25 = vpop.f32.mrf.mxu0  ;;  %8660 = vmatprep.subr.mxu0 %v7560_v39  ;;  %7891 = vmatprep.subr.mxu1 %v12068_v36 }
 0x270   : > { %v4485_v56 = vpop.f32.mrf.mxu1  ;;  %8661 = vmatpush3.msra.mxu0 %v7544_v5 }
 0x271   : > { %v11062_v62 = vadd.f32 %v4485_v56, %v10985_v47  ;;  %v4891_v38 = vpop.f32.mrf.mxu0  ;;  %8662 = vmatprep.subr.mxu0 %v7559_v61  ;;  %v7542_v47 = vld [vmem:[%s12064_s2 + $0x20] sm:$0xff]  ;;  %v7635_v56 = vld [vmem:[%s12064_s2 + $0x308] sm:$0xff] }
 0x272   : > { %v4487_v29 = vpop.f32.mrf.mxu1  ;;  %8663 = vmatpush3.msra.mxu0 %v7543_v7 }
 0x273   : > { %v4968_v1 = vpop.f32.mrf.mxu0  ;;  %8664 = vmatprep.subr.mxu0 %v7558_v22 }
 0x274   : > { %v11082_v59 = vadd.f32 %v4968_v1, %v10996_v27  ;;  %v4488_v3 = vpop.f32.mrf.mxu1  ;;  %8665 = vmatpush3.msra.mxu0 %v7542_v47  ;;  %v7642_v27 = vld [vmem:[%s12064_s2 + $0x340] sm:$0xff] }
 0x275   : > { %v4970_v51 = vpop.f32.mrf.mxu0  ;;  %8666 = vmatprep.subr.mxu0 %v7557_v55  ;;  %7892 = vmatpush1.msra.mxu1 %v7642_v27  ;;  %v11191_v1 = vld [vmem:[%s12064_s2 + $0x3e0] sm:$0xff]  ;;  %v11198_v3 = vld [vmem:[%s12064_s2 + $0x3d8] sm:$0xff] }
 0x276   : > { %v11095_v40 = vadd.f32 %v4970_v51, %v11004_v60  ;;  %v4664_v58 = vpop.f32.mrf.mxu1  ;;  %8667 = vmatpush3.msra.mxu0 %v7541_v23  ;;  %7893 = vmatprep.subr.mxu1 %v12068_v36  ;;  %v7641_v60 = vld [vmem:[%s12064_s2 + $0x338] sm:$0xff]  ;;  %v11219_v55 = vld [vmem:[%s12064_s2 + $0x3c0] sm:$0xff] }
 0x277   : > { %v11101_v13 = vadd.f32 %v4664_v58, %v11009_v6  ;;  %v4972_v19 = vpop.f32.mrf.mxu0  ;;  %8668 = vmatprep.subr.mxu0 %v7556_v9  ;;  %7894 = vmatpush1.msra.mxu1 %v7641_v60  ;;  %v7555_v6 = vld [vmem:[%s12064_s2 + $0x88] sm:$0xff]  ;;  %v11226_v23 = vld [vmem:[%s12064_s2 + $0x3b8] sm:$0xff] }
 0x278   : > { %v4666_v32 = vpop.f32.mrf.mxu1  ;;  %8669 = vmatpush3.msra.mxu0 %v7540_v53  ;;  %7895 = vmatprep.subr.mxu1 %v12068_v36  ;;  %v11212_v19 = vld [vmem:[%s12064_s2 + $0x3c8] sm:$0xff]  ;;  %v11233_v53 = vld [vmem:[%s12064_s2 + $0x3b0] sm:$0xff] }
 0x279   : > { %v11114_v4 = vadd.f32 %v4666_v32, %v11017_v11  ;;  %v4973_v21 = vpop.f32.mrf.mxu0  ;;  %8670 = vmatprep.subr.mxu0 %v7555_v6  ;;  %7896 = vmatpush1.msra.mxu1 %v7640_v30  ;;  %v11240_v6 = vld [vmem:[%s12064_s2 + $0x3a8] sm:$0xff]  ;;  %v11247_v30 = vld [vmem:[%s12064_s2 + $0x3a0] sm:$0xff] }
 0x27a   : > { %v4668_v20 = vpop.f32.mrf.mxu1  ;;  %8671 = vmatpush3.msra.mxu0 %v7539_v49  ;;  %7897 = vmatprep.subr.mxu1 %v12068_v36 }
 0x27b   : > { %v5161_v10 = vpop.f32.mrf.mxu0  ;;  %8672 = vmatprep.subr.mxu0 %v7554_v14  ;;  %7898 = vmatpush1.msra.mxu1 %v7639_v8 }
 0x27c   : > { %v5291_v2 = vadd.f32 %v5161_v10, %v11032_v54  ;;  %v4669_v18 = vpop.f32.mrf.mxu1  ;;  %8673 = vmatpush3.msra.mxu0 %v7538_v45  ;;  %7899 = vmatprep.subr.mxu1 %v12068_v36 }
 0x27d   : > { %v5163_v41 = vpop.f32.mrf.mxu0  ;;  %8677 = vmatprep.subr.mxu0 %v11159_v46  ;;  %7900 = vmatpush1.msra.mxu1 %v7638_v12 }
 0x27e   : > { %v5292_v31 = vadd.f32 %v5163_v41, %v11044_v50  ;;  %v4746_v11 = vpop.f32.mrf.mxu1  ;;  %7901 = vmatprep.subr.mxu1 %v12068_v36 }
 0x27f   : > { %v4759_v0 = vadd.f32 %v4746_v11, %v11049_v43  ;;  %v5165_v63 = vpop.f32.mrf.mxu0  ;;  %7902 = vmatpush1.msra.mxu1 %v7637_v37  ;;  %v7636_v43 = vld [vmem:[%s12064_s2 + $0x310] sm:$0xff] }
 0x280   : > { %v4748_v33 = vpop.f32.mrf.mxu1  ;;  %7903 = vmatprep.subr.mxu1 %v12068_v36 }
 0x281   : > { %v4760_v54 = vadd.f32 %v4748_v33, %v11062_v62  ;;  %v5166_v15 = vpop.f32.mrf.mxu0  ;;  %7904 = vmatpush1.msra.mxu1 %v7636_v43 }
 0x282   : > { %v4750_v42 = vpop.f32.mrf.mxu1  ;;  %7905 = vmatprep.subr.mxu1 %v12068_v36 }
 0x283   : > { %v5243_v35 = vpop.f32.mrf.mxu0  ;;  %7906 = vmatpush1.msra.mxu1 %v7635_v56 }
 0x284   : > { %v5295_v50 = vadd.f32 %v5243_v35, %v11082_v59  ;;  %v4751_v26 = vpop.f32.mrf.mxu1  ;;  %7907 = vmatprep.subr.mxu1 %v12068_v36  ;;  %v11268_v35 = vld [vmem:[%s12064_s2 + $0x388] sm:$0xff] }
 0x285   : > { %v5245_v57 = vpop.f32.mrf.mxu0  ;;  %7908 = vmatpush1.msra.mxu1 %v7634_v34  ;;  %12072 = vst [vmem:[#allocation2_spill] sm:$0xff] %v11268_v35  ;;  %v11275_v26 = vld [vmem:[%s12064_s2 + $0x380] sm:$0xff] }
 0x286   : > { %v5296_v25 = vadd.f32 %v5245_v57, %v11095_v40  ;;  %v4927_v44 = vpop.f32.mrf.mxu1  ;;  %7915 = vmatprep.subr.mxu1 %v12068_v36  ;;  %v11205_v40 = vld [vmem:[%s12064_s2 + $0x3d0] sm:$0xff]  ;;  %12073 = vst [vmem:[#allocation3_spill] sm:$0xff] %v11275_v26 }
 0x287   : > { %v5018_v52 = vadd.f32 %v4927_v44, %v11101_v13  ;;  %v5247_v24 = vpop.f32.mrf.mxu0  ;;  %7916 = vmatpush2.msra.mxu1 %v11191_v1 }
 0x288   : > { %v4929_v62 = vpop.f32.mrf.mxu1  ;;  %7917 = vmatprep.subr.mxu1 %v12068_v36 }
 0x289   : > { %v5019_v38 = vadd.f32 %v4929_v62, %v11114_v4  ;;  %v5248_v48 = vpop.f32.mrf.mxu0  ;;  %7918 = vmatpush2.msra.mxu1 %v11198_v3 }
 0x28a   : > { %v4931_v39 = vpop.f32.mrf.mxu1  ;;  %7919 = vmatprep.subr.mxu1 %v12068_v36 }
 0x28b   : > { %v5436_v29 = vpop.f32.mrf.mxu0  ;;  %7920 = vmatpush2.msra.mxu1 %v11205_v40 }
 0x28c   : > { %v5566_v5 = vadd.f32 %v5436_v29, %v5291_v2  ;;  %v4932_v17 = vpop.f32.mrf.mxu1  ;;  %7921 = vmatprep.subr.mxu1 %v12068_v36 }
 0x28d   : > { %v5438_v59 = vpop.f32.mrf.mxu0  ;;  %7922 = vmatpush2.msra.mxu1 %v11212_v19 }
 0x28e   : > { %v5567_v61 = vadd.f32 %v5438_v59, %v5292_v31  ;;  %v5009_v51 = vpop.f32.mrf.mxu1  ;;  %7923 = vmatprep.subr.mxu1 %v12068_v36 }
 0x28f   : > { %v5022_v7 = vadd.f32 %v5009_v51, %v4759_v0  ;;  %v5440_v28 = vpop.f32.mrf.mxu0  ;;  %7924 = vmatpush2.msra.mxu1 %v11219_v55  ;;  %v11254_v0 = vld [vmem:[%s12064_s2 + $0x398] sm:$0xff] }
 0x290   : > { %v5011_v58 = vpop.f32.mrf.mxu1  ;;  %7925 = vmatprep.subr.mxu1 %v12068_v36 }
 0x291   : > { %v5023_v22 = vadd.f32 %v5011_v58, %v4760_v54  ;;  %v5441_v13 = vpop.f32.mrf.mxu0  ;;  %7926 = vmatpush2.msra.mxu1 %v11226_v23  ;;  %v11261_v54 = vld [vmem:[%s12064_s2 + $0x390] sm:$0xff] }
 0x292   : > { %v5013_v47 = vpop.f32.mrf.mxu1  ;;  %7927 = vmatprep.subr.mxu1 %v12068_v36 }
 0x293   : > { %v5518_v16 = vpop.f32.mrf.mxu0  ;;  %7928 = vmatpush2.msra.mxu1 %v11233_v53 }
 0x294   : > { %v5570_v32 = vadd.f32 %v5518_v16, %v5295_v50  ;;  %v5014_v4 = vpop.f32.mrf.mxu1  ;;  %7929 = vmatprep.subr.mxu1 %v12068_v36 }
 0x295   : > { %v5520_v21 = vpop.f32.mrf.mxu0  ;;  %7930 = vmatpush2.msra.mxu1 %v11240_v6 }
 0x296   : > { %v5571_v27 = vadd.f32 %v5520_v21, %v5296_v25  ;;  %v5202_v9 = vpop.f32.mrf.mxu1  ;;  %7931 = vmatprep.subr.mxu1 %v12068_v36 }
 0x297   : > { %v5293_v20 = vadd.f32 %v5202_v9, %v5018_v52  ;;  %v5522_v10 = vpop.f32.mrf.mxu0  ;;  %7932 = vmatpush2.msra.mxu1 %v11247_v30 }
 0x298   : > { %v5204_v60 = vpop.f32.mrf.mxu1  ;;  %7933 = vmatprep.subr.mxu1 %v12068_v36 }
 0x299   : > { %v5294_v2 = vadd.f32 %v5204_v60, %v5019_v38  ;;  %v5523_v18 = vpop.f32.mrf.mxu0  ;;  %7934 = vmatpush2.msra.mxu1 %v11254_v0 }
 0x29a   : > { %v5206_v41 = vpop.f32.mrf.mxu1  ;;  %7935 = vmatprep.subr.mxu1 %v12068_v36 }
 0x29b   : > { %v5711_v49 = vpop.f32.mrf.mxu0  ;;  %7936 = vmatpush2.msra.mxu1 %v11261_v54 }
 0x29c   : > { %v5841_v31 = vadd.f32 %v5711_v49, %v5566_v5  ;;  %v5207_v11 = vpop.f32.mrf.mxu1  ;;  %7937 = vmatprep.subr.mxu1 %v12068_v36 }
 0x29d   : > { %v5713_v14 = vpop.f32.mrf.mxu0  ;;  %7938 = vmatpush2.msra.mxu1 %v11268_v35 }
 0x29e   : > { %v5842_v63 = vadd.f32 %v5713_v14, %v5567_v61  ;;  %v5284_v45 = vpop.f32.mrf.mxu1  ;;  %7939 = vmatprep.subr.mxu1 %v12068_v36  ;;  %v11477_v36 = vld [vmem:[%s12064_s2 + $0x130] sm:$0xff] }
 0x29f   : > { %v5297_v8 = vadd.f32 %v5284_v45, %v5022_v7  ;;  %v5715_v33 = vpop.f32.mrf.mxu0  ;;  %7940 = vmatpush2.msra.mxu1 %v11275_v26 }
 0x2a0   : > { %v5286_v15 = vpop.f32.mrf.mxu1  ;;  %8782 = vmatprep.subr.mxu1 %v11159_v46 }
 0x2a1   : > { %v5298_v12 = vadd.f32 %v5286_v15, %v5023_v22  ;;  %v5716_v42 = vpop.f32.mrf.mxu0 }
 0x2a2   : > { %v5288_v37 = vpop.f32.mrf.mxu1 }
 0x2a3   : > { %v5793_v50 = vpop.f32.mrf.mxu0 }
 0x2a4   : > { %v5845_v57 = vadd.f32 %v5793_v50, %v5570_v32  ;;  %v5289_v43 = vpop.f32.mrf.mxu1 }
 0x2a5   : > { %v5795_v25 = vpop.f32.mrf.mxu0 }
 0x2a6   : > { %v5846_v44 = vadd.f32 %v5795_v25, %v5571_v27  ;;  %v5477_v52 = vpop.f32.mrf.mxu1 }
 0x2a7   : > { %v5568_v24 = vadd.f32 %v5477_v52, %v5293_v20  ;;  %v5797_v56 = vpop.f32.mrf.mxu0 }
 0x2a8   : > { %v5479_v62 = vpop.f32.mrf.mxu1 }
 0x2a9   : > { %v5569_v38 = vadd.f32 %v5479_v62, %v5294_v2  ;;  %v5798_v48 = vpop.f32.mrf.mxu0 }
 0x2aa   : > { %v5481_v34 = vpop.f32.mrf.mxu1 }
 0x2ab   : > { %v5986_v39 = vpop.f32.mrf.mxu0 }
 0x2ac   : > { %v11279_v29 = vadd.f32 %v5986_v39, %v5841_v31  ;;  %v5482_v5 = vpop.f32.mrf.mxu1 }
 0x2ad   : > { %v5988_v17 = vpop.f32.mrf.mxu0 }
 0x2ae   : > { %v11281_v59 = vadd.f32 %v5988_v17, %v5842_v63  ;;  %v5559_v61 = vpop.f32.mrf.mxu1 }
 0x2af   : > { %v5572_v51 = vadd.f32 %v5559_v61, %v5297_v8  ;;  %v5990_v7 = vpop.f32.mrf.mxu0 }
 0x2b0   : > { %v5561_v28 = vpop.f32.mrf.mxu1 }
 0x2b1   : > { %v5573_v46 = vadd.f32 %v5561_v28, %v5298_v12  ;;  %v5991_v58 = vpop.f32.mrf.mxu0 }
 0x2b2   : > { %v5563_v22 = vpop.f32.mrf.mxu1 }
 0x2b3   : > { %v6068_v13 = vpop.f32.mrf.mxu0 }
 0x2b4   : > { %v6120_v47 = vadd.f32 %v6068_v13, %v5845_v57  ;;  %v5564_v16 = vpop.f32.mrf.mxu1 }
 0x2b5   : > { %v6070_v32 = vpop.f32.mrf.mxu0 }
 0x2b6   : > { %v6121_v4 = vadd.f32 %v6070_v32, %v5846_v44  ;;  %v5752_v21 = vpop.f32.mrf.mxu1 }
 0x2b7   : > { %v5843_v27 = vadd.f32 %v5752_v21, %v5568_v24  ;;  %v6072_v9 = vpop.f32.mrf.mxu0 }
 0x2b8   : > { %v5754_v20 = vpop.f32.mrf.mxu1 }
 0x2b9   : > { %v5844_v10 = vadd.f32 %v5754_v20, %v5569_v38  ;;  %v6073_v60 = vpop.f32.mrf.mxu0 }
 0x2ba   : > { %v5756_v2 = vpop.f32.mrf.mxu1 }
 0x2bb   : > { %v11283_v18 = vpop.f32.mrf.mxu0 }
 0x2bc   : > { %v5757_v41 = vpop.f32.mrf.mxu1 }
 0x2bd   : > { %v11285_v49 = vpop.f32.mrf.mxu0 }
 0x2be   : > { %v5834_v31 = vpop.f32.mrf.mxu1 }
 0x2bf   : > { %v5847_v11 = vadd.f32 %v5834_v31, %v5572_v51  ;;  %v6265_v14 = vpop.f32.mrf.mxu0 }
 0x2c0   : > { %v5836_v63 = vpop.f32.mrf.mxu1 }
 0x2c1   : > { %v5848_v45 = vadd.f32 %v5836_v63, %v5573_v46  ;;  %v6266_v8 = vpop.f32.mrf.mxu0 }
 0x2c2   : > { %v5838_v33 = vpop.f32.mrf.mxu1 }
 0x2c3   : > { %v6343_v15 = vpop.f32.mrf.mxu0 }
 0x2c4   : > { %v11287_v12 = vadd.f32 %v6343_v15, %v6120_v47  ;;  %v5839_v42 = vpop.f32.mrf.mxu1 }
 0x2c5   : > { %v6345_v37 = vpop.f32.mrf.mxu0 }
 0x2c6   : > { %v11289_v50 = vadd.f32 %v6345_v37, %v6121_v4  ;;  %v6027_v57 = vpop.f32.mrf.mxu1 }
 0x2c7   : > { %v11291_v43 = vadd.f32 %v6027_v57, %v5843_v27  ;;  %v6347_v25 = vpop.f32.mrf.mxu0 }
 0x2c8   : > { %v6029_v44 = vpop.f32.mrf.mxu1 }
 0x2c9   : > { %v11293_v52 = vadd.f32 %v6029_v44, %v5844_v10  ;;  %v6348_v24 = vpop.f32.mrf.mxu0 }
 0x2ca   : > { %v6031_v56 = vpop.f32.mrf.mxu1 }
 0x2cb   : > { %v6536_v62 = vpop.f32.mrf.mxu0 }
 0x2cc   : > { %v6032_v38 = vpop.f32.mrf.mxu1 }
 0x2cd   : > { %v6538_v48 = vpop.f32.mrf.mxu0 }
 0x2ce   : > { %v6109_v34 = vpop.f32.mrf.mxu1 }
 0x2cf   : > { %v11295_v39 = vadd.f32 %v6109_v34, %v5847_v11  ;;  %v6540_v5 = vpop.f32.mrf.mxu0 }
 0x2d0   : > { %v6111_v17 = vpop.f32.mrf.mxu1 }
 0x2d1   : > { %v11297_v61 = vadd.f32 %v6111_v17, %v5848_v45  ;;  %v6541_v51 = vpop.f32.mrf.mxu0  ;;  %v6391_v17 = vadd.f32 %v11283_v18, %v11279_v29 }
 0x2d2   : > { %v6113_v7 = vpop.f32.mrf.mxu1  ;;  %v6392_v51 = vadd.f32 %v11285_v49, %v11281_v59 }
 0x2d3   : > { %v11299_v28 = vpop.f32.mrf.mxu0 }
 0x2d4   : > { %v6114_v46 = vpop.f32.mrf.mxu1 }
 0x2d5   : > { %v11301_v58 = vpop.f32.mrf.mxu0 }
 0x2d6   : > { %v11303_v22 = vpop.f32.mrf.mxu1 }
 0x2d7   : > { %v6622_v13 = vpop.f32.mrf.mxu0 }
 0x2d8   : > { %v11305_v47 = vpop.f32.mrf.mxu1  ;;  %v6666_v13 = vadd.f32 %v6536_v62, %v6391_v17  ;;  %v11385_v17 = vld [vmem:[%s12064_s2 + $0x1e0] sm:$0xff] }
 0x2d9   : > { %v6623_v16 = vpop.f32.mrf.mxu0 }
 0x2da   : > { %v6306_v32 = vpop.f32.mrf.mxu1  ;;  %v6667_v16 = vadd.f32 %v6538_v48, %v6392_v51  ;;  %v11350_v48 = vld [vmem:[%s12064_s2 + $0x178] sm:$0xff]  ;;  %v11391_v51 = vld [vmem:[%s12064_s2 + $0x160] sm:$0xff] }
 0x2db   : > { %v6811_v4 = vpop.f32.mrf.mxu0 }
 0x2dc   : > { %v6307_v21 = vpop.f32.mrf.mxu1 }
 0x2dd   : > { %v6813_v27 = vpop.f32.mrf.mxu0 }
 0x2de   : > { %v11307_v9 = vpop.f32.mrf.mxu1 }
 0x2df   : > { %v6815_v20 = vpop.f32.mrf.mxu0 }
 0x2e0   : > { %v11309_v10 = vpop.f32.mrf.mxu1  ;;  %v6941_v20 = vadd.f32 %v6811_v4, %v6666_v13  ;;  %v11397_v13 = vld [vmem:[%s12064_s2 + $0x1d8] sm:$0xff] }
 0x2e1   : > { %v6816_v60 = vpop.f32.mrf.mxu0 }
 0x2e2   : > { %v6388_v2 = vpop.f32.mrf.mxu1  ;;  %v6942_v60 = vadd.f32 %v6813_v27, %v6667_v16  ;;  %v11403_v16 = vld [vmem:[%s12064_s2 + $0x158] sm:$0xff] }
 0x2e3   : > { %v11311_v41 = vpop.f32.mrf.mxu0 }
 0x2e4   : > { %v6389_v31 = vpop.f32.mrf.mxu1 }
 0x2e5   : > { %v11313_v11 = vpop.f32.mrf.mxu0 }
 0x2e6   : > { %v11315_v14 = vpop.f32.mrf.mxu1 }
 0x2e7   : > { %v6897_v63 = vpop.f32.mrf.mxu0 }
 0x2e8   : > { %v11317_v45 = vpop.f32.mrf.mxu1 }
 0x2e9   : > { %v6898_v8 = vpop.f32.mrf.mxu0 }
 0x2ea   : > { %v6581_v33 = vpop.f32.mrf.mxu1 }
 0x2eb   : > { %v7086_v15 = vpop.f32.mrf.mxu0 }
 0x2ec   : > { %v6582_v42 = vpop.f32.mrf.mxu1  ;;  %v7216_v63 = vadd.f32 %v7086_v15, %v6941_v20  ;;  %v11360_v15 = vld [vmem:[%s12064_s2 + $0x1f0] sm:$0xff] }
 0x2ed   : > { %v7088_v37 = vpop.f32.mrf.mxu0  ;;  %v11409_v20 = vld [vmem:[%s12064_s2 + $0x1d0] sm:$0xff] }
 0x2ee   : > { %v11319_v57 = vpop.f32.mrf.mxu1  ;;  %v7217_v8 = vadd.f32 %v7088_v37, %v6942_v60  ;;  %v11366_v37 = vld [vmem:[%s12064_s2 + $0x170] sm:$0xff] }
 0x2ef   : > { %v7090_v25 = vpop.f32.mrf.mxu0  ;;  %v11415_v60 = vld [vmem:[%s12064_s2 + $0x150] sm:$0xff] }
 0x2f0   : > { %v11321_v44 = vpop.f32.mrf.mxu1 }
 0x2f1   : > { %v7091_v24 = vpop.f32.mrf.mxu0 }
 0x2f2   : > { %v6663_v56 = vpop.f32.mrf.mxu1  ;;  %v11373_v24 = vld [vmem:[%s12064_s2 + $0x1e8] sm:$0xff] }
 0x2f3   : > { %v11323_v38 = vpop.f32.mrf.mxu0  ;;  %v11379_v56 = vld [vmem:[%s12064_s2 + $0x168] sm:$0xff] }
 0x2f4   : > { %v6664_v34 = vpop.f32.mrf.mxu1 }
 0x2f5   : > { %v11325_v5 = vpop.f32.mrf.mxu0 }
 0x2f6   : > { %v11331_v7 = vpop.f32.mrf.mxu1 }
 0x2f7   : > { %v7172_v46 = vpop.f32.mrf.mxu0 }
 0x2f8   : > { %v11333_v32 = vpop.f32.mrf.mxu1 }
 0x2f9   : > { %v7173_v21 = vpop.f32.mrf.mxu0 }
 0x2fa   : > { %v6856_v2 = vpop.f32.mrf.mxu1 }
 0x2fb   : > { %v7361_v31 = vpop.f32.mrf.mxu0 }
 0x2fc   : > { %v6857_v33 = vpop.f32.mrf.mxu1  ;;  %v11336_v18 = vadd.f32 %v7361_v31, %v7216_v63  ;;  %v11421_v31 = vld [vmem:[%s12064_s2 + $0x1c8] sm:$0xff] }
 0x2fd   : > { %v7363_v29 = vpop.f32.mrf.mxu0  ;;  %v11427_v63 = vld [vmem:[%s12064_s2 + $0x148] sm:$0xff]  ;;  %v11433_v33 = vld [vmem:[%s12064_s2 + $0x1c0] sm:$0xff] }
 0x2fe   : > { %v11338_v59 = vadd.f32 %v7363_v29, %v7217_v8  ;;  %v11340_v49 = vpop.f32.mrf.mxu1  ;;  %v11439_v29 = vld [vmem:[%s12064_s2 + $0x140] sm:$0xff] }
 0x2ff   : > { %v7365_v62 = vpop.f32.mrf.mxu0 }
 0x300   : > { %v8638_v4 = vpack.c.bf16 %v11338_v59, %v11336_v18  ;;  %7731 = vmatprep.mubr.f32.mxu0 %v11338_v59  ;;  %v11355_v27 = vpop.f32.mrf.mxu1 }
 0x301   : > { %v7366_v42 = vpop.f32.mrf.mxu0  ;;  %7732 = vmatmul.mubr.f32.vlgmr.msra.gmra.mxu0 %v11336_v18 }
 0x302   : > { %7531 = vst [vmem:[%s11345_s26] sm:$0xff] %v8638_v4  ;;  %8678 = vmatpush3.msra.mxu0 %v11350_v48  ;;  %v6938_v25 = vpop.f32.mrf.mxu1  ;;  %v11447_v4 = vld [vmem:[%s12064_s2 + $0x1b8] sm:$0xff]  ;;  %v6670_v42 = vadd.f32 %v11299_v28, %v11287_v12  ;;  %v6393_v12 = vadd.f32 %v11303_v22, %v11291_v43  ;;  %v11483_v43 = vld [vmem:[%s12064_s2 + $0x1a8] sm:$0xff] }
 0x303   : > { %8679 = vmatprep.subr.mxu0 %v11360_v15  ;;  %v6671_v25 = vadd.f32 %v11301_v58, %v11289_v50  ;;  %v6394_v50 = vadd.f32 %v11305_v47, %v11293_v52 }
 0x304   : > { %8680 = vmatpush3.msra.mxu0 %v11366_v37  ;;  %v6939_v34 = vpop.f32.mrf.mxu1  ;;  %v6945_v28 = vadd.f32 %v11311_v41, %v6670_v42  ;;  %v6668_v52 = vadd.f32 %v11315_v14, %v6393_v12  ;;  %v11499_v14 = vld [vmem:[%s12064_s2 + $0x1a0] sm:$0xff] }
 0x305   : > { %8681 = vmatprep.subr.mxu0 %v11373_v24  ;;  %v11457_v34 = vld [vmem:[%s12064_s2 + $0x138] sm:$0xff]  ;;  %v6946_v58 = vadd.f32 %v11313_v11, %v6671_v25  ;;  %v6669_v22 = vadd.f32 %v11317_v45, %v6394_v50  ;;  %v11511_v12 = vld [vmem:[%s12064_s2 + $0x120] sm:$0xff] }
 0x306   : > { %8682 = vmatpush3.msra.mxu0 %v11379_v56  ;;  %v7127_v46 = vpop.f32.mrf.mxu1  ;;  %v7220_v47 = vadd.f32 %v11323_v38, %v6945_v28  ;;  %v6943_v45 = vadd.f32 %v11331_v7, %v6668_v52  ;;  %v11517_v7 = vld [vmem:[%s12064_s2 + $0x198] sm:$0xff] }
 0x307   : > { %8683 = vmatprep.subr.mxu0 %v11385_v17  ;;  %v7221_v41 = vadd.f32 %v11325_v5, %v6946_v58  ;;  %v6944_v38 = vadd.f32 %v11333_v32, %v6669_v22  ;;  %v11525_v52 = vld [vmem:[%s12064_s2 + $0x118] sm:$0xff] }
 0x308   : > { %8684 = vmatpush3.msra.mxu0 %v11391_v51  ;;  %v7129_v21 = vpop.f32.mrf.mxu1  ;;  %v7218_v32 = vadd.f32 %v7127_v46, %v6943_v45  ;;  %v11544_v45 = vld [vmem:[%s12064_s2 + $0x110] sm:$0xff] }
 0x309   : > { %8685 = vmatprep.subr.mxu0 %v11397_v13  ;;  %v7219_v28 = vadd.f32 %v7129_v21, %v6944_v38  ;;  %v6397_v21 = vadd.f32 %v11307_v9, %v11295_v39  ;;  %v11550_v39 = vld [vmem:[%s12064_s2 + $0x188] sm:$0xff] }
 0x30a   : > { %8686 = vmatpush3.msra.mxu0 %v11403_v16  ;;  %v7131_v2 = vpop.f32.mrf.mxu1 }
 0x30b   : > { %8687 = vmatprep.subr.mxu0 %v11409_v20 }
 0x30c   : > { %8688 = vmatpush3.msra.mxu0 %v11415_v60  ;;  %v7132_v8 = vpop.f32.mrf.mxu1 }
 0x30d   : > { %8689 = vmatprep.subr.mxu0 %v11421_v31  ;;  %v11465_v8 = vld [vmem:[%s12064_s2 + $0x1b0] sm:$0xff] }
 0x30e   : > { %8690 = vmatpush3.msra.mxu0 %v11427_v63  ;;  %v11442_v62 = vpop.f32.mrf.mxu1 }
 0x30f   : > { %8691 = vmatprep.subr.mxu0 %v11433_v33 }
 0x310   : > { %8692 = vmatpush3.msra.mxu0 %v11439_v29  ;;  %v11460_v2 = vpop.f32.mrf.mxu1 }
 0x311   : > { %8693 = vmatprep.subr.mxu0 %v11447_v4 }
 0x312   : > { %8694 = vmatpush3.msra.mxu0 %v11457_v34  ;;  %v7213_v26 = vpop.f32.mrf.mxu1  ;;  %v7443_v35 = vpop.f32.mrf.mxu0 }
 0x313   : > { %8695 = vmatprep.subr.mxu0 %v11465_v8  ;;  %v11493_v26 = vld [vmem:[%s12064_s2 + $0x128] sm:$0xff]  ;;  %v11503_v5 = vadd.f32 %v7443_v35, %v7220_v47  ;;  %v11531_v47 = vld [vmem:[%s12064_s2 + $0x190] sm:$0xff] }
 0x314   : > { %8696 = vmatpush3.msra.mxu0 %v11477_v36  ;;  %v7214_v11 = vpop.f32.mrf.mxu1  ;;  %v7445_v42 = vpop.f32.mrf.mxu0 }
 0x315   : > { %8697 = vmatprep.subr.mxu0 %v11483_v43  ;;  %v11506_v25 = vadd.f32 %v7445_v42, %v7221_v41  ;;  %v6398_v41 = vadd.f32 %v11309_v10, %v11297_v61  ;;  %v6672_v61 = vadd.f32 %v11319_v57, %v6397_v21 }
 0x316   : > { %8698 = vmatpush3.msra.mxu0 %v11493_v26  ;;  %v7402_v50 = vpop.f32.mrf.mxu1  ;;  %v7447_v35 = vpop.f32.mrf.mxu0 }
 0x317   : > { %v8640_v58 = vpack.c.bf16 %v11506_v25, %v11503_v5  ;;  %8699 = vmatprep.subr.mxu0 %v11499_v14  ;;  %v11538_v11 = vadd.f32 %v7402_v50, %v7218_v32  ;;  %v6673_v9 = vadd.f32 %v11321_v44, %v6398_v41  ;;  %v11559_v50 = vld [vmem:[%s12064_s2 + $0x108] sm:$0xff]  ;;  %v11565_v32 = vld [vmem:[%s12064_s2 + $0x180] sm:$0xff]  ;;  %v6947_v57 = vadd.f32 %v11340_v49, %v6672_v61  ;;  %v11594_v41 = vld [vmem:[%s12064_s2 + $0x2f0] sm:$0xff] }
 0x318   : > { %8700 = vmatpush3.msra.mxu0 %v11511_v12  ;;  %v7404_v22 = vpop.f32.mrf.mxu1  ;;  %v7448_v46 = vpop.f32.mrf.mxu0  ;;  %v11612_v61 = vld [vmem:[%s12064_s2 + $0x2e8] sm:$0xff] }
 0x319   : > { %7533 = vst [vmem:[%s11345_s26 + $0x10] sm:$0xff] %v8640_v58  ;;  %8701 = vmatprep.subr.mxu0 %v11517_v7  ;;  %v7494_v42 = vadd.f32 %v7404_v22, %v7219_v28  ;;  %v6948_v44 = vadd.f32 %v11355_v27, %v6673_v9  ;;  %v11574_v28 = vld [vmem:[%s12064_s2 + $0x100] sm:$0xff]  ;;  %v11580_v22 = vld [vmem:[%s12064_s2 + $0x2f8] sm:$0xff]  ;;  %v7222_v49 = vadd.f32 %v11442_v62, %v6947_v57 }
 0x31a   : > { %8702 = vmatpush3.msra.mxu0 %v11525_v52  ;;  %v7406_v38 = vpop.f32.mrf.mxu1  ;;  %v11588_v46 = vld [vmem:[%s12064_s2 + $0x278] sm:$0xff]  ;;  %v11629_v57 = vld [vmem:[%s12064_s2 + $0x2e0] sm:$0xff] }
 0x31b   : > { %v8639_v10 = vpack.c.bf16 %v7494_v42, %v11538_v11  ;;  %8703 = vmatprep.subr.mxu0 %v11531_v47  ;;  %7801 = vmatprep.mubr.f32.mxu0 %v7494_v42  ;;  %v7223_v27 = vadd.f32 %v11460_v2, %v6948_v44  ;;  %v11605_v38 = vld [vmem:[%s12064_s2 + $0x270] sm:$0xff] }
 0x31c   : > { %8704 = vmatpush3.msra.mxu0 %v11544_v45  ;;  %v7407_v35 = vpop.f32.mrf.mxu1 }
 0x31d   : > { %7532 = vst [vmem:[%s11345_s26 + $0x8] sm:$0xff] %v8639_v10  ;;  %8705 = vmatprep.subr.mxu0 %v11550_v39  ;;  %v11622_v35 = vld [vmem:[%s12064_s2 + $0x268] sm:$0xff] }
 0x31e   : > { %8706 = vmatpush3.msra.mxu0 %v11559_v50  ;;  %v7484_v58 = vpop.f32.mrf.mxu1 }
 0x31f   : > { %8707 = vmatprep.subr.mxu0 %v11565_v32  ;;  %v11596_v62 = vadd.f32 %v7484_v58, %v7222_v49  ;;  %v7952_v58 = vmul.f32 %v7494_v42, %v7494_v42  ;;  %v11637_v49 = vld [vmem:[%s12064_s2 + $0x260] sm:$0xff]  ;;  %v11664_v42 = vld [vmem:[%s12064_s2 + $0x250] sm:$0xff] }
 0x320   : > { %8708 = vmatpush3.msra.mxu0 %v11574_v28  ;;  %v7486_v21 = vpop.f32.mrf.mxu1 }
 0x321   : > { %7802 = vmatmul.mubr.f32.vlgmr.msra.gmra.mxu0 %v11538_v11  ;;  %8712 = vmatprep.subr.mxu0 %v11580_v22  ;;  %v11600_v2 = vadd.f32 %v7486_v21, %v7223_v27  ;;  %v11644_v27 = vld [vmem:[%s12064_s2 + $0x2d8] sm:$0xff]  ;;  %v8905_v21 = vld [vmem:[%s12064_s2 + $0xe0] sm:$0xff] }
 0x322   : > { %8713 = vmatpush3.msra.mxu0 %v11588_v46  ;;  %7871 = vmatprep.mubr.f32.mxu0 %v11506_v25  ;;  %v7488_v9 = vpop.f32.mrf.mxu1 }
 0x323   : > { %v8641_v10 = vpack.c.bf16 %v11600_v2, %v11596_v62  ;;  %8714 = vmatprep.subr.mxu0 %v11594_v41  ;;  %8633 = vmatprep.mubr.msk.f32.mxu1 %vm7663_vm15, %v11600_v2  ;;  %v8907_v9 = vld [vmem:[%s12064_s2 + $0x370] sm:$0xff] }
 0x324   : > { %8715 = vmatpush3.msra.mxu0 %v11605_v38  ;;  %7942 = vmatmul.mubr.f32.vlgmr.msra.gmra.mxu1 %v11596_v62  ;;  %v7489_v44 = vpop.f32.mrf.mxu1 }
 0x325   : > { %7537 = vst.msk [vmem:[%s11345_s26 + $0x18] sm:$0xff] %vm7536_vm0, %v8641_v10  ;;  %8716 = vmatprep.subr.mxu0 %v11612_v61  ;;  %8783 = vmatpush3.msra.mxu1 %v11350_v48  ;;  %v11650_v48 = vld [vmem:[%s12064_s2 + $0x258] sm:$0xff] }
 0x326   : > { %8717 = vmatpush3.msra.mxu0 %v11622_v35  ;;  %8784 = vmatprep.subr.mxu1 %v11360_v15  ;;  %v11657_v15 = vld [vmem:[%s12064_s2 + $0x2d0] sm:$0xff]  ;;  %v8908_v10 = vld [vmem:[%s12064_s2 + $0xd8] sm:$0xff] }
 0x327   : > { %8718 = vmatprep.subr.mxu0 %v11629_v57  ;;  %8094 = vmatprep.mubr.f32.mxu1 %v7952_v58  ;;  %v8909_v44 = vld [vmem:[%s12064_s2 + $0x58] sm:$0xff]  ;;  %v8910_v58 = vld [vmem:[%s12064_s2 + $0x368] sm:$0xff] }
 0x328   : > { %8719 = vmatpush3.msra.mxu0 %v11637_v49  ;;  %8785 = vmatpush3.msra.mxu1 %v11366_v37  ;;  %v11671_v37 = vld [vmem:[%s12064_s2 + $0x2c8] sm:$0xff] }
 0x329   : > { %8720 = vmatprep.subr.mxu0 %v11644_v27  ;;  %8786 = vmatprep.subr.mxu1 %v11373_v24  ;;  %v11678_v24 = vld [vmem:[%s12064_s2 + $0x248] sm:$0xff] }
 0x32a   : > { %8721 = vmatpush3.msra.mxu0 %v11650_v48  ;;  %8787 = vmatpush3.msra.mxu1 %v11379_v56  ;;  %v11685_v56 = vld [vmem:[%s12064_s2 + $0x2c0] sm:$0xff] }
 0x32b   : > { %8722 = vmatprep.subr.mxu0 %v11657_v15  ;;  %8788 = vmatprep.subr.mxu1 %v11385_v17  ;;  %v11692_v17 = vld [vmem:[%s12064_s2 + $0x240] sm:$0xff] }
 0x32c   : > { %8723 = vmatpush3.msra.mxu0 %v11664_v42  ;;  %8789 = vmatpush3.msra.mxu1 %v11391_v51  ;;  %v11699_v51 = vld [vmem:[%s12064_s2 + $0x2b8] sm:$0xff] }
 0x32d   : > { %8724 = vmatprep.subr.mxu0 %v11671_v37  ;;  %8790 = vmatprep.subr.mxu1 %v11397_v13  ;;  %v11706_v13 = vld [vmem:[%s12064_s2 + $0x238] sm:$0xff] }
 0x32e   : > { %8725 = vmatpush3.msra.mxu0 %v11678_v24  ;;  %8791 = vmatpush3.msra.mxu1 %v11403_v16  ;;  %v11713_v16 = vld [vmem:[%s12064_s2 + $0x2b0] sm:$0xff] }
 0x32f   : > { %8726 = vmatprep.subr.mxu0 %v11685_v56  ;;  %8792 = vmatprep.subr.mxu1 %v11409_v20  ;;  %v11720_v20 = vld [vmem:[%s12064_s2 + $0x230] sm:$0xff] }
 0x330   : > { %8727 = vmatpush3.msra.mxu0 %v11692_v17  ;;  %8793 = vmatpush3.msra.mxu1 %v11415_v60  ;;  %v11727_v60 = vld [vmem:[%s12064_s2 + $0x2a8] sm:$0xff] }
 0x331   : > { %8728 = vmatprep.subr.mxu0 %v11699_v51  ;;  %8794 = vmatprep.subr.mxu1 %v11421_v31  ;;  %v11734_v31 = vld [vmem:[%s12064_s2 + $0x228] sm:$0xff] }
 0x332   : > { %8729 = vmatpush3.msra.mxu0 %v11706_v13  ;;  %8795 = vmatpush3.msra.mxu1 %v11427_v63  ;;  %v11741_v63 = vld [vmem:[%s12064_s2 + $0x2a0] sm:$0xff] }
 0x333   : > { %8730 = vmatprep.subr.mxu0 %v11713_v16  ;;  %8796 = vmatprep.subr.mxu1 %v11433_v33  ;;  %v11748_v33 = vld [vmem:[%s12064_s2 + $0x220] sm:$0xff] }
 0x334   : > { %8731 = vmatpush3.msra.mxu0 %v11720_v20  ;;  %8797 = vmatpush3.msra.mxu1 %v11439_v29  ;;  %v11755_v29 = vld [vmem:[%s12064_s2 + $0x298] sm:$0xff] }
 0x335   : > { %8732 = vmatprep.subr.mxu0 %v11727_v60  ;;  %8798 = vmatprep.subr.mxu1 %v11447_v4  ;;  %v11762_v4 = vld [vmem:[%s12064_s2 + $0x218] sm:$0xff] }
 0x336   : > { %8733 = vmatpush3.msra.mxu0 %v11734_v31  ;;  %8799 = vmatpush3.msra.mxu1 %v11457_v34  ;;  %v11769_v34 = vld [vmem:[%s12064_s2 + $0x290] sm:$0xff] }
 0x337   : > { %8734 = vmatprep.subr.mxu0 %v11741_v63  ;;  %8800 = vmatprep.subr.mxu1 %v11465_v8  ;;  %v11776_v8 = vld [vmem:[%s12064_s2 + $0x210] sm:$0xff] }
 0x338   : > { %8735 = vmatpush3.msra.mxu0 %v11748_v33  ;;  %8801 = vmatpush3.msra.mxu1 %v11477_v36  ;;  %v11783_v36 = vld [vmem:[%s12064_s2 + $0x288] sm:$0xff] }
 0x339   : > { %8736 = vmatprep.subr.mxu0 %v11755_v29  ;;  %8802 = vmatprep.subr.mxu1 %v11483_v43  ;;  %v11790_v43 = vld [vmem:[%s12064_s2 + $0x208] sm:$0xff] }
 0x33a   : > { %8737 = vmatpush3.msra.mxu0 %v11762_v4  ;;  %8803 = vmatpush3.msra.mxu1 %v11493_v26  ;;  %v11797_v26 = vld [vmem:[%s12064_s2 + $0x280] sm:$0xff] }
 0x33b   : > { %8738 = vmatprep.subr.mxu0 %v11769_v34  ;;  %8804 = vmatprep.subr.mxu1 %v11499_v14  ;;  %v11804_v14 = vld [vmem:[%s12064_s2 + $0x200] sm:$0xff] }
 0x33c   : > { %8739 = vmatpush3.msra.mxu0 %v11776_v8  ;;  %8805 = vmatpush3.msra.mxu1 %v11511_v12  ;;  %v8898_v12 = vld [vmem:[%s12064_s2 + $0xf8] sm:$0xff] }
 0x33d   : > { %8740 = vmatprep.subr.mxu0 %v11783_v36  ;;  %8806 = vmatprep.subr.mxu1 %v11517_v7  ;;  %v7950_v7 = vmul.f32 %v11338_v59, %v11338_v59  ;;  %v8901_v59 = vld [vmem:[%s12064_s2 + $0x70] sm:$0xff] }
 0x33e   : > { %8741 = vmatpush3.msra.mxu0 %v11790_v43  ;;  %8807 = vmatpush3.msra.mxu1 %v11525_v52  ;;  %v8899_v52 = vld [vmem:[%s12064_s2 + $0x78] sm:$0xff] }
 0x33f   : > { %8742 = vmatprep.subr.mxu0 %v11797_v26  ;;  %8808 = vmatprep.subr.mxu1 %v11531_v47  ;;  %v7951_v47 = vmul.f32 %v11538_v11, %v11538_v11  ;;  %v8902_v11 = vld [vmem:[%s12064_s2 + $0xe8] sm:$0xff] }
 0x340   : > { %8743 = vmatpush3.msra.mxu0 %v11804_v14  ;;  %8809 = vmatpush3.msra.mxu1 %v11544_v45  ;;  %v8900_v45 = vld [vmem:[%s12064_s2 + $0xf0] sm:$0xff] }
 0x341   : > { %7872 = vmatmul.mubr.f32.vlgmr.msra.gmra.mxu0 %v11503_v5  ;;  %8747 = vmatprep.subr.mxu0 %v8898_v12  ;;  %v8911_v12 = vld [vmem:[%s12064_s2 + $0xd0] sm:$0xff] }
 0x342   : > { %8810 = vmatprep.subr.mxu1 %v11550_v39  ;;  %8748 = vmatpush3.msra.mxu0 %v8899_v52  ;;  %v7956_v39 = vmul.f32 %v11600_v2, %v11600_v2  ;;  %v8906_v2 = vld [vmem:[%s12064_s2 + $0x60] sm:$0xff] }
 0x343   : > { %8024 = vmatprep.mubr.f32.mxu0 %v7950_v7  ;;  %8811 = vmatpush3.msra.mxu1 %v11559_v50  ;;  %v12074_v50 = vmov 0.0   ;;  %v8912_v7 = vld [vmem:[%s12064_s2 + $0x50] sm:$0xff]  ;;  %v8913_v52 = vld [vmem:[%s12064_s2 + $0x360] sm:$0xff] }
 0x344   : > { %8749 = vmatprep.subr.mxu0 %v8900_v45  ;;  %8812 = vmatprep.subr.mxu1 %v11565_v32  ;;  %v8903_v32 = vld [vmem:[%s12064_s2 + $0x68] sm:$0xff] }
 0x345   : > { %8750 = vmatpush3.msra.mxu0 %v8901_v59  ;;  %8813 = vmatpush3.msra.mxu1 %v11574_v28  ;;  %v8904_v28 = vld [vmem:[%s12064_s2 + $0x378] sm:$0xff]  ;;  %v8915_v45 = vld [vmem:[%s12064_s2 + $0x48] sm:$0xff] }
 0x346   : > { %8751 = vmatprep.subr.mxu0 %v8902_v11  ;;  %8095 = vmatmul.mubr.f32.vlgmr.msra.gmra.mxu1 %v7951_v47  ;;  %v8914_v47 = vld [vmem:[%s12064_s2 + $0xc8] sm:$0xff]  ;;  %v8916_v59 = vld [vmem:[%s12064_s2 + $0x358] sm:$0xff]  ;;  %v8918_v11 = vld [vmem:[%s12064_s2 + $0x40] sm:$0xff] }
 0x347   : > { %8170 = vmatprep.subr.mxu1 %v12074_v50  ;;  %8752 = vmatpush3.msra.mxu0 %v8903_v32  ;;  %v8919_v32 = vld [vmem:[%s12064_s2 + $0x350] sm:$0xff] }
 0x348   : > { %8171 = vmatpush1.msra.mxu1 %v8904_v28  ;;  %8634 = vmatprep.mubr.msk.f32.mxu1 %vm7663_vm15, %v7956_v39  ;;  %v8917_v39 = vld [vmem:[%s12064_s2 + $0xc0] sm:$0xff]  ;;  %v8920_v28 = vld [vmem:[%s12064_s2 + $0xb8] sm:$0xff] }
 0x349   : > { %8753 = vmatprep.subr.mxu0 %v8905_v21  ;;  %8172 = vmatprep.subr.mxu1 %v12074_v50  ;;  %v8921_v21 = vld [vmem:[%s12064_s2 + $0x38] sm:$0xff] }
 0x34a   : > { %8754 = vmatpush3.msra.mxu0 %v8906_v2  ;;  %8173 = vmatpush1.msra.mxu1 %v8907_v9  ;;  %v8922_v2 = vld [vmem:[%s12064_s2 + $0x348] sm:$0xff]  ;;  %v8923_v9 = vld [vmem:[%s12064_s2 + $0xb0] sm:$0xff] }
 0x34b   : > { %8755 = vmatprep.subr.mxu0 %v8908_v10  ;;  %8174 = vmatprep.subr.mxu1 %v12074_v50  ;;  %v8924_v10 = vld [vmem:[%s12064_s2 + $0x30] sm:$0xff] }
 0x34c   : > { %8756 = vmatpush3.msra.mxu0 %v8909_v44  ;;  %8175 = vmatpush1.msra.mxu1 %v8910_v58  ;;  %v8925_v44 = vld [vmem:[%s12064_s2 + $0x340] sm:$0xff]  ;;  %v8926_v58 = vld [vmem:[%s12064_s2 + $0xa8] sm:$0xff] }
 0x34d   : > { %8757 = vmatprep.subr.mxu0 %v8911_v12  ;;  %8176 = vmatprep.subr.mxu1 %v12074_v50  ;;  %v8927_v12 = vld [vmem:[%s12064_s2 + $0x28] sm:$0xff] }
 0x34e   : > { %8758 = vmatpush3.msra.mxu0 %v8912_v7  ;;  %8177 = vmatpush1.msra.mxu1 %v8913_v52  ;;  %v8928_v7 = vld [vmem:[%s12064_s2 + $0x338] sm:$0xff]  ;;  %v8929_v52 = vld [vmem:[%s12064_s2 + $0xa0] sm:$0xff] }
 0x34f   : > { %8759 = vmatprep.subr.mxu0 %v8914_v47  ;;  %8178 = vmatprep.subr.mxu1 %v12074_v50  ;;  %v8930_v47 = vld [vmem:[%s12064_s2 + $0x20] sm:$0xff] }
 0x350   : > { %8760 = vmatpush3.msra.mxu0 %v8915_v45  ;;  %8179 = vmatpush1.msra.mxu1 %v8916_v59  ;;  %v8931_v45 = vld [vmem:[%s12064_s2 + $0x330] sm:$0xff]  ;;  %v8932_v59 = vld [vmem:[%s12064_s2 + $0x98] sm:$0xff] }
 0x351   : > { %8761 = vmatprep.subr.mxu0 %v8917_v39  ;;  %8180 = vmatprep.subr.mxu1 %v12074_v50  ;;  %v8933_v39 = vld [vmem:[%s12064_s2 + $0x18] sm:$0xff] }
 0x352   : > { %8762 = vmatpush3.msra.mxu0 %v8918_v11  ;;  %8181 = vmatpush1.msra.mxu1 %v8919_v32  ;;  %v8934_v11 = vld [vmem:[%s12064_s2 + $0x328] sm:$0xff]  ;;  %v8935_v32 = vld [vmem:[%s12064_s2 + $0x90] sm:$0xff] }
 0x353   : > { %8763 = vmatprep.subr.mxu0 %v8920_v28  ;;  %8182 = vmatprep.subr.mxu1 %v12074_v50  ;;  %v8936_v28 = vld [vmem:[%s12064_s2 + $0x10] sm:$0xff] }
 0x354   : > { %8764 = vmatpush3.msra.mxu0 %v8921_v21  ;;  %8183 = vmatpush1.msra.mxu1 %v8922_v2  ;;  %v8937_v21 = vld [vmem:[%s12064_s2 + $0x320] sm:$0xff]  ;;  %v8938_v2 = vld [vmem:[%s12064_s2 + $0x88] sm:$0xff] }
 0x355   : > { %8765 = vmatprep.subr.mxu0 %v8923_v9  ;;  %8184 = vmatprep.subr.mxu1 %v12074_v50  ;;  %v8939_v9 = vld [vmem:[%s12064_s2 + $0x8] sm:$0xff] }
 0x356   : > { %8766 = vmatpush3.msra.mxu0 %v8924_v10  ;;  %8185 = vmatpush1.msra.mxu1 %v8925_v44  ;;  %v8940_v10 = vld [vmem:[%s12064_s2 + $0x318] sm:$0xff]  ;;  %v7949_v44 = vmul.f32 %v11336_v18, %v11336_v18  ;;  %v7954_v18 = vmul.f32 %v11506_v25, %v11506_v25  ;;  %v8945_v25 = vld [vmem:[%s12064_s2 + $0x300] sm:$0xff] }
 0x357   : > { %8767 = vmatprep.subr.mxu0 %v8926_v58  ;;  %8186 = vmatprep.subr.mxu1 %v12074_v50  ;;  %v8941_v58 = vld [vmem:[%s12064_s2 + $0x80] sm:$0xff] }
 0x358   : > { %8768 = vmatpush3.msra.mxu0 %v8927_v12  ;;  %8187 = vmatpush1.msra.mxu1 %v8928_v7  ;;  %v8942_v12 = vld [vmem:[%s12064_s2] sm:$0xff]  ;;  %v8943_v7 = vld [vmem:[%s12064_s2 + $0x310] sm:$0xff] }
 0x359   : > { %8769 = vmatprep.subr.mxu0 %v8929_v52  ;;  %8188 = vmatprep.subr.mxu1 %v12074_v50  ;;  %v8944_v52 = vld [vmem:[%s12064_s2 + $0x308] sm:$0xff] }
 0x35a   : > { %8770 = vmatpush3.msra.mxu0 %v8930_v47  ;;  %8189 = vmatpush1.msra.mxu1 %v8931_v45 }
 0x35b   : > { %8771 = vmatprep.subr.mxu0 %v8932_v59  ;;  %8190 = vmatprep.subr.mxu1 %v12074_v50 }
 0x35c   : > { %8772 = vmatpush3.msra.mxu0 %v8933_v39  ;;  %8191 = vmatpush1.msra.mxu1 %v8934_v11 }
 0x35d   : > { %8773 = vmatprep.subr.mxu0 %v8935_v32  ;;  %8192 = vmatprep.subr.mxu1 %v12074_v50 }
 0x35e   : > { %8774 = vmatpush3.msra.mxu0 %v8936_v28  ;;  %8193 = vmatpush1.msra.mxu1 %v8937_v21 }
 0x35f   : > { %8775 = vmatprep.subr.mxu0 %v8938_v2  ;;  %8194 = vmatprep.subr.mxu1 %v12074_v50 }
 0x360   : > { %8776 = vmatpush3.msra.mxu0 %v8939_v9  ;;  %8195 = vmatpush1.msra.mxu1 %v8940_v10 }
 0x361   : > { %8777 = vmatprep.subr.mxu0 %v8941_v58  ;;  %8196 = vmatprep.subr.mxu1 %v12074_v50 }
 0x362   : > { %8778 = vmatpush3.msra.mxu0 %v8942_v12  ;;  %8197 = vmatpush1.msra.mxu1 %v8943_v7 }
 0x363   : > { %8025 = vmatmul.mubr.f32.vlgmr.msra.gmra.mxu0 %v7949_v44  ;;  %8817 = vmatprep.subr.mxu0 %v11580_v22 }
 0x364   : > { %8198 = vmatprep.subr.mxu1 %v12074_v50  ;;  %8818 = vmatpush3.msra.mxu0 %v11588_v46 }
 0x365   : > { %8164 = vmatprep.mubr.f32.mxu0 %v7954_v18  ;;  %8199 = vmatpush1.msra.mxu1 %v8944_v52 }
 0x366   : > { %8819 = vmatprep.subr.mxu0 %v11594_v41  ;;  %8200 = vmatprep.subr.mxu1 %v12074_v50 }
 0x367   : > { %8820 = vmatpush3.msra.mxu0 %v11605_v38  ;;  %8201 = vmatpush1.msra.mxu1 %v8945_v25 }
 0x368   : > { %8821 = vmatprep.subr.mxu0 %v11612_v61  ;;  %8208 = vmatprep.subr.mxu1 %v12074_v50 }
 0x369   : > { %8822 = vmatpush3.msra.mxu0 %v11622_v35  ;;  %8209 = vmatpush2.msra.mxu1 %v11191_v1  ;;  %v12075_v1 = vld [vmem:[#allocation2_spill] sm:$0xff] }
 0x36a   : > { %8823 = vmatprep.subr.mxu0 %v11629_v57  ;;  %8210 = vmatprep.subr.mxu1 %v12074_v50 }
 0x36b   : > { %8824 = vmatpush3.msra.mxu0 %v11637_v49  ;;  %8211 = vmatpush2.msra.mxu1 %v11198_v3  ;;  %v7955_v3 = vmul.f32 %v11596_v62, %v11596_v62 }
 0x36c   : > { %8825 = vmatprep.subr.mxu0 %v11644_v27  ;;  %8212 = vmatprep.subr.mxu1 %v12074_v50 }
 0x36d   : > { %8826 = vmatpush3.msra.mxu0 %v11650_v48  ;;  %8213 = vmatpush2.msra.mxu1 %v11205_v40  ;;  %v12076_v40 = vld [vmem:[#allocation3_spill] sm:$0xff] }
 0x36e   : > { %8827 = vmatprep.subr.mxu0 %v11657_v15  ;;  %8214 = vmatprep.subr.mxu1 %v12074_v50 }
 0x36f   : > { %8828 = vmatpush3.msra.mxu0 %v11664_v42  ;;  %8215 = vmatpush2.msra.mxu1 %v11212_v19  ;;  %v7953_v19 = vmul.f32 %v11503_v5, %v11503_v5 }
 0x370   : > { %8829 = vmatprep.subr.mxu0 %v11671_v37  ;;  %8216 = vmatprep.subr.mxu1 %v12074_v50 }
 0x371   : > { %8830 = vmatpush3.msra.mxu0 %v11678_v24  ;;  %8217 = vmatpush2.msra.mxu1 %v11219_v55 }
 0x372   : > { %8831 = vmatprep.subr.mxu0 %v11685_v56  ;;  %8218 = vmatprep.subr.mxu1 %v12074_v50 }
 0x373   : > { %8832 = vmatpush3.msra.mxu0 %v11692_v17  ;;  %8219 = vmatpush2.msra.mxu1 %v11226_v23 }
 0x374   : > { %8833 = vmatprep.subr.mxu0 %v11699_v51  ;;  %8220 = vmatprep.subr.mxu1 %v12074_v50 }
 0x375   : > { %8834 = vmatpush3.msra.mxu0 %v11706_v13  ;;  %8221 = vmatpush2.msra.mxu1 %v11233_v53 }
 0x376   : > { %8835 = vmatprep.subr.mxu0 %v11713_v16  ;;  %8222 = vmatprep.subr.mxu1 %v12074_v50 }
 0x377   : > { %8836 = vmatpush3.msra.mxu0 %v11720_v20  ;;  %8223 = vmatpush2.msra.mxu1 %v11240_v6 }
 0x378   : > { %8837 = vmatprep.subr.mxu0 %v11727_v60  ;;  %8224 = vmatprep.subr.mxu1 %v12074_v50 }
 0x379   : > { %8838 = vmatpush3.msra.mxu0 %v11734_v31  ;;  %8225 = vmatpush2.msra.mxu1 %v11247_v30 }
 0x37a   : > { %8839 = vmatprep.subr.mxu0 %v11741_v63  ;;  %8226 = vmatprep.subr.mxu1 %v12074_v50 }
 0x37b   : > { %8840 = vmatpush3.msra.mxu0 %v11748_v33  ;;  %8227 = vmatpush2.msra.mxu1 %v11254_v0 }
 0x37c   : > { %8841 = vmatprep.subr.mxu0 %v11755_v29  ;;  %8228 = vmatprep.subr.mxu1 %v12074_v50 }
 0x37d   : > { %8842 = vmatpush3.msra.mxu0 %v11762_v4  ;;  %8229 = vmatpush2.msra.mxu1 %v11261_v54 }
 0x37e   : > { %8843 = vmatprep.subr.mxu0 %v11769_v34  ;;  %8230 = vmatprep.subr.mxu1 %v12074_v50 }
 0x37f   : > { %8844 = vmatpush3.msra.mxu0 %v11776_v8  ;;  %8231 = vmatpush2.msra.mxu1 %v12075_v1 }
 0x380   : > { %8845 = vmatprep.subr.mxu0 %v11783_v36  ;;  %8232 = vmatprep.subr.mxu1 %v12074_v50 }
 0x381   : > { %8846 = vmatpush3.msra.mxu0 %v11790_v43  ;;  %8233 = vmatpush2.msra.mxu1 %v12076_v40 }
 0x382   : > { %8847 = vmatprep.subr.mxu0 %v11797_v26  ;;  %8235 = vmatmul.mubr.f32.vlgmr.msra.gmra.mxu1 %v7955_v3 }
 0x383   : > { %8848 = vmatpush3.msra.mxu0 %v11804_v14 }
 0x384   : > { %8165 = vmatmul.mubr.f32.vlgmr.msra.gmra.mxu0 %v7953_v19 }
 0x3c1   : > { %v8674_v53 = vpop.f32.mrf.mxu0 }
 0x3c3   : > { %v8675_v6 = vpop.f32.mrf.mxu0 }
 0x3c4   : > { %v8676_v46 = vadd.f32 %v8675_v6, %v8674_v53 }
 0x3e1   : > { %v8709_v30 = vpop.f32.mrf.mxu0 }
 0x3e3   : > { %v8710_v0 = vpop.f32.mrf.mxu0 }
 0x3e4   : > { %v7943_v55 = vpop.f32.mrf.mxu1  ;;  %v8711_v54 = vadd.f32 %v8710_v0, %v8709_v30 }
 0x3e6   : > { %v7945_v23 = vpop.f32.mrf.mxu1  ;;  %v7804_v62 = vadd.f32 %v8711_v54, %v8676_v46 }
 0x401   : > { %v8744_v22 = vpop.f32.mrf.mxu0 }
 0x403   : > { %v8745_v41 = vpop.f32.mrf.mxu0 }
 0x404   : > { %v8746_v5 = vadd.f32 %v8745_v41, %v8744_v22 }
 0x406   : > { %v7874_v38 = vadd.f32 %v8746_v5, %v7804_v62  ;;  %v8814_v35 = vpop.f32.mrf.mxu1 }
 0x408   : > { %v7944_v61 = vadd.f32 %v7943_v55, %v7874_v38  ;;  %v8815_v49 = vpop.f32.mrf.mxu1 }
 0x409   : > { %v8816_v24 = vadd.f32 %v8815_v49, %v8814_v35 }
 0x40a   : > { %7948 = vst.msk [vmem:[%s241_s24] sm:$0xff] %vm3525_vm14, %v7944_v61 }
 0x423   : > { %v8779_v57 = vpop.f32.mrf.mxu0 }
 0x425   : > { %v8780_v27 = vpop.f32.mrf.mxu0 }
 0x426   : > { %v8781_v15 = vadd.f32 %v8780_v27, %v8779_v57 }
 0x428   : > { %v8097_v17 = vadd.f32 %v8816_v24, %v8781_v15 }
 0x442   : > { %v8236_v48 = vpop.f32.mrf.mxu1 }
 0x444   : > { %v8849_v42 = vpop.f32.mrf.mxu0  ;;  %v8238_v37 = vpop.f32.mrf.mxu1 }
 0x446   : > { %v8850_v56 = vpop.f32.mrf.mxu0 }
 0x447   : > { %v8851_v51 = vadd.f32 %v8850_v56, %v8849_v42 }
 0x449   : > { %v8167_v13 = vadd.f32 %v8851_v51, %v8097_v17 }
 0x44b   : > { %v8237_v16 = vadd.f32 %v8236_v48, %v8167_v13 }
 0x44d   : > { %8240 = vst.msk [vmem:[%s245_s27] sm:$0xff] %vm3525_vm14, %v8237_v16 }
 0x44e PF: > { %s16_s18 = sadd.s32 1, %s8952_s18  }
 0x44f   : > { %p13_p4 = scmp.ge.s32.totalorder %s16_s18, 4  }
 0x451   :  { %15 = sbr.rel (!%p13_p4) target bundleno = 1 (0x1), region = 112 }

// kernel: residual_block_forward.4
= control target key start
LH: loop header
LB: loop body
LE: loop exit
PB: predicated region body
PF: predicated region fallthrough
CT: control target
= control target key end

     0   :  { %s8227_s27 = smov 0   ;;  %s11269_s0 = inlined_call_operand.vmem [shape: bf16[2,8,1000], index: 0, kind: input, shape index: {}]   ;;  %s11270_s1 = inlined_call_operand.vmem [shape: bf16[27,8,8], index: 1, kind: input, shape index: {}]   ;;  %s11271_s2 = inlined_call_operand.vmem [shape: f32[8,1], index: 2, kind: input, shape index: {}]   ;;  %s11272_s3 = inlined_call_operand.vmem [shape: f32[8,1], index: 3, kind: input, shape index: {}]   ;;  %s11273_s4 = inlined_call_operand.vmem [shape: f32[1,1000], index: 4, kind: input, shape index: {}]   ;;  %s11274_s5 = inlined_call_operand.vmem [shape: f32[1000,1], index: 5, kind: input, shape index: {}]   ;;  %s11275_s6 = inlined_call_operand.vmem [shape: bf16[2,8,1000], index: 6, kind: output, shape index: {0}]   ;;  %s11276_s7 = inlined_call_operand.vmem [shape: f32[2,8,1], index: 7, kind: output, shape index: {1}]   ;;  %s11277_s8 = inlined_call_operand.vmem [shape: f32[2,8,1], index: 8, kind: output, shape index: {2}]  }
   0x1 LB: > { %s7522_s28 = sadd.s32 4294967295, %s8152_s27   ;;  %p7526_p0 = scmp.ge.s32.totalorder %s8152_s27, 1  ;;  %s8152_s27 = sphi %s8227_s27, %s19_s27  }
   0x2   : > { %p267_p1 = scmp.lt.s32.totalorder %s8152_s27, 3 }
   0x4   : > { %p268_p2 = pnand %p7526_p0, %p267_p1 }
   0x6   : > { %271 = sbr.rel (%p268_p2) target bundleno = 1245 (0x4dd), region = 44 }
   0xb   : > { %v340_v0 = vld [vmem:[%s11271_s2] sm:$0xff]  ;;  %vm428_vm0 = vcmask 1044288   ;;  %v8154_v1 = vmov 0   ;;  %vm429_vm1 = vcmask 850948   ;;  %p309_p3 = scmp.lt.s32.totalorder %s7522_s28, 1  ;;  %v379_v3 = vlaneseq  ;;  %s8155_s17 = smov 110  }
   0xc   : > { %8077 = vset.pattern.permute.xlu0 %v8154_v1  ;;  %427 = vst [vmem:[#allocation2] sm:$0xf] %v8154_v1  ;;  %663 = vmatprep.mubr.bf16.mxu0 %v8154_v1  ;;  %vm430_vm2 = vmor %vm429_vm1, %vm428_vm0  ;;  %v354_v2 = vld [vmem:[%s11272_s3] sm:$0xff]  ;;  %vm467_vm4 = vcmask 1043456   ;;  %s8156_s18 = smov 111   ;;  %s8157_s19 = smov 109  }
   0xd   : > { %343 = vperm.xlu0 %8077, %v340_v0   ;;  %581 = vmatprep.mubr.bf16.mxu1 %v8154_v1  ;;  %431 = vst.msk [vmem:[#allocation2 + $0x20] sm:$0xff] %vm430_vm2, %v8154_v1  ;;  %s11302_s28 = smov (!%p309_p3, %s7522_s28), 1  ;;  %v376_v4 = vld [vmem:[%s11273_s4] sm:$0xff]  ;;  %v380_v5 = vshrl.u32 %v379_v3, 7  ;;  %vm8273_vm13 = vmor %vm429_vm1, %vm467_vm4  ;;  %s8158_s20 = smov 101   ;;  %vm513_vm14 = vcmask 900096  }
   0xe   : > { %vm377_vm3 = vcmp.ne.f32.partialorder %v376_v4, 0.0  ;;  %s7821_s13 = sshll.u32 %s11302_s28, 5  ;;  %s8159_s21 = smov 100   ;;  %vm521_vm15 = vcmask 64512   ;;  %vm729_vm0 = vcmask 908288   ;;  %vm946_vm1 = vcmask 891904  }
   0xf   : > { %v378_v6 = vsel %vm377_vm3, 1, %v8154_v1  ;;  %s313_s16 = scalar_lea.vmem %s11269_s0, %s7821_s13  ;;  %v381_v7 = vsub.s32 0, %v380_v5  ;;  %v385_v8 = vsub.s32 1, %v380_v5  ;;  %v389_v9 = vsub.s32 2, %v380_v5  ;;  %s8160_s22 = smov 99  }
  0x10   : > { %v393_v10 = vsub.s32 3, %v380_v5  ;;  %v397_v11 = vsub.s32 4, %v380_v5  ;;  %v401_v12 = vsub.s32 5, %v380_v5  ;;  %v405_v13 = vsub.s32 6, %v380_v5  ;;  %v328_v15 = vld [vmem:[%s313_s16] sm:$0xff]  ;;  %v329_v16 = vld [vmem:[%s313_s16 + $0x8] sm:$0xff] }
  0x11   : > { %357 = vperm.xlu0 %8077, %v354_v2   ;;  %v409_v14 = vsub.s32 7, %v380_v5  ;;  %v330_v17 = vld [vmem:[%s313_s16 + $0x10] sm:$0xff]  ;;  %v331_v18 = vld [vmem:[%s313_s16 + $0x18] sm:$0xff]  ;;  %v382_v19 = vrot.slane %v378_v6, %v381_v7  ;;  %v386_v20 = vrot.slane %v378_v6, %v385_v8  ;;  %v390_v21 = vrot.slane %v378_v6, %v389_v9  ;;  %s8161_s23 = smov 91   ;;  %s8162_s24 = smov 90  }
  0x12   : > { %v394_v22 = vrot.slane %v378_v6, %v393_v10  ;;  %v398_v23 = vrot.slane %v378_v6, %v397_v11  ;;  %v402_v24 = vrot.slane %v378_v6, %v401_v12  ;;  %v406_v25 = vrot.slane %v378_v6, %v405_v13  ;;  %s8163_s29 = smov 89   ;;  %s8164_s10 = smov 11   ;;  %v10873_v2 = vld [vmem:[%s11274_s5 + $0x2d0] sm:$0xff] }
  0x13   : > { %v410_v26 = vrot.slane %v378_v6, %v409_v14  ;;  %v332_v27 = vunpack.c.l.bf16 %v328_v15  ;;  %v333_v28 = vunpack.c.h.bf16 %v328_v15  ;;  %v334_v29 = vunpack.c.l.bf16 %v329_v16  ;;  %s8165_s14 = smov 10   ;;  %s8168_s25 = smov 127  }
  0x14   : > { %v335_v30 = vunpack.c.h.bf16 %v329_v16  ;;  %v336_v32 = vunpack.c.l.bf16 %v330_v17  ;;  %v337_v33 = vunpack.c.h.bf16 %v330_v17  ;;  %v338_v34 = vunpack.c.l.bf16 %v331_v18  ;;  %s8169_s30 = smov 119   ;;  %s8170_s11 = smov 118  }
  0x15   : > { %v339_v35 = vunpack.c.h.bf16 %v331_v18  ;;  %vm411_vm5 = vcmp.eq.s32.totalorder %v382_v19, 1  ;;  %vm412_vm6 = vcmp.eq.s32.totalorder %v386_v20, 1  ;;  %vm413_vm7 = vcmp.eq.s32.totalorder %v390_v21, 1  ;;  %s8171_s12 = smov 117   ;;  %s8172_s16 = smov 39  }
  0x16   : > { %vm414_vm8 = vcmp.eq.s32.totalorder %v394_v22, 1  ;;  %vm415_vm9 = vcmp.eq.s32.totalorder %v398_v23, 1  ;;  %vm416_vm10 = vcmp.eq.s32.totalorder %v402_v24, 1  ;;  %vm417_vm11 = vcmp.eq.s32.totalorder %v406_v25, 1  ;;  %s8178_s15 = smov 19   ;;  %s7531_s9 = sshll.u32 %s11302_s28, 3 }
  0x17   : > { %vm418_vm12 = vcmp.eq.s32.totalorder %v410_v26, 1  ;;  %vm1201_vm2 = vcmask 826368   ;;  %vm1429_vm3 = vcmask 818176  }
  0x88   : > { %v344_v31 = vpop.permute.xlu0 %343 }
  0x89   : > { %v346_v36 = vmul.f32 %v344_v31, %v332_v27  ;;  %v347_v37 = vmul.f32 %v344_v31, %v333_v28  ;;  %v348_v38 = vmul.f32 %v344_v31, %v334_v29  ;;  %v349_v39 = vmul.f32 %v344_v31, %v335_v30 }
  0x8a   : > { %v350_v40 = vmul.f32 %v344_v31, %v336_v32  ;;  %v351_v41 = vmul.f32 %v344_v31, %v337_v33  ;;  %v352_v42 = vmul.f32 %v344_v31, %v338_v34  ;;  %v353_v43 = vmul.f32 %v344_v31, %v339_v35  ;;  %v8403_v31 = vld [vmem:[%s11270_s1 + $0x4] sm:$0xf] }
  0x8c   : > { %v358_v44 = vpop.permute.xlu0 %357 }
  0x8d   : > { %v360_v45 = vadd.f32 %v358_v44, %v346_v36  ;;  %v361_v46 = vadd.f32 %v358_v44, %v347_v37  ;;  %v362_v47 = vadd.f32 %v358_v44, %v348_v38  ;;  %v363_v48 = vadd.f32 %v358_v44, %v349_v39 }
  0x8e   : > { %v364_v49 = vadd.f32 %v358_v44, %v350_v40  ;;  %v365_v50 = vadd.f32 %v358_v44, %v351_v41  ;;  %v366_v51 = vadd.f32 %v358_v44, %v352_v42  ;;  %v367_v52 = vadd.f32 %v358_v44, %v353_v43  ;;  %v8428_v43 = vld [vmem:[%s11270_s1] sm:$0xf] }
  0x8f   : > { %v368_v53 = vmax.f32 %v360_v45, 0.0  ;;  %v369_v54 = vmax.f32 %v361_v46, 0.0  ;;  %v370_v55 = vmax.f32 %v362_v47, 0.0  ;;  %v371_v56 = vmax.f32 %v363_v48, 0.0 }
  0x90   : > { %v372_v57 = vmax.f32 %v364_v49, 0.0  ;;  %v373_v58 = vmax.f32 %v365_v50, 0.0  ;;  %v374_v59 = vmax.f32 %v366_v51, 0.0  ;;  %v375_v60 = vmax.f32 %v367_v52, 0.0 }
  0x91   : > { %v8260_v61 = vsel %vm411_vm5, %v368_v53, 0.0  ;;  %v8263_v62 = vsel %vm412_vm6, %v369_v54, 0.0  ;;  %v8266_v63 = vsel %vm413_vm7, %v370_v55, 0.0  ;;  %v8269_v0 = vsel %vm414_vm8, %v371_v56, 0.0 }
  0x92   : > { %v8278_v3 = vsel %vm415_vm9, %v372_v57, 0.0  ;;  %v8281_v4 = vsel %vm416_vm10, %v373_v58, 0.0  ;;  %v425_v5 = vsel %vm417_vm11, %v374_v59, 0.0  ;;  %v426_v6 = vsel %vm418_vm12, %v375_v60, 0.0 }
  0x93   : > { %v7823_v7 = vpack.c.bf16 %v8263_v62, %v8260_v61  ;;  %v7824_v8 = vpack.c.bf16 %v8269_v0, %v8266_v63  ;;  %v7825_v9 = vpack.c.bf16 %v8281_v4, %v8278_v3  ;;  %v7826_v10 = vpack.c.bf16 %v426_v6, %v425_v5 }
  0x94   : > { %vm1657_vm5 = vcmask 809984   ;;  %vm1885_vm6 = vcmask 744448   ;;  %vm2113_vm7 = vcmask 736256   ;;  %vm2341_vm8 = vcmask 728064  }
  0x95   : > { %464 = vst [vmem:[#allocation2 + $0x4] sm:$0xff] %v7823_v7  ;;  %465 = vst [vmem:[#allocation2 + $0xc] sm:$0xff] %v7824_v8  ;;  %vm2569_vm9 = vcmask 89088   ;;  %vm2797_vm10 = vcmask 80896   ;;  %vm3025_vm11 = vcmask 72704   ;;  %vm3253_vm12 = vcmask 7168  }
  0x96   : > { %466 = vst [vmem:[#allocation2 + $0x14] sm:$0xff] %v7825_v9  ;;  %469 = vst.msk [vmem:[#allocation2 + $0x1c] sm:$0xff] %vm8273_vm13, %v7826_v10 }
  0x9c   : > { %v471_v15 = vld [vmem:[#allocation2] sm:$0xff]  ;;  %v472_v19 = vld [vmem:[#allocation2 + $0x8] sm:$0xff] }
  0x9d   : > { %v474_v11 = vld [vmem:[#allocation2 + $0x18] sm:$0xff]  ;;  %v473_v12 = vld [vmem:[#allocation2 + $0x10] sm:$0xff]  ;;  %v8301_v17 = vcombine.high %v471_v15, %v471_v15  ;;  %v8305_v18 = vcombine.low %v471_v15, %v471_v15  ;;  %v8309_v20 = vcombine.low %v472_v19, %v472_v19  ;;  %v8315_v21 = vcombine.high %v472_v19, %v472_v19  ;;  %v8355_v23 = vld [vmem:[#allocation2 + $0x20] ss:$0 sps:$4 sm:$0xff]  }
  0x9e   : > { %v8293_v13 = vcombine.low %v474_v11, %v474_v11  ;;  %v8295_v14 = vcombine.low %v473_v12, %v473_v12  ;;  %v8299_v16 = vcombine.high %v473_v12, %v473_v12  ;;  %v8321_v22 = vcombine.high %v474_v11, %v474_v11  ;;  %v8486_v12 = vld [vmem:[%s11270_s1 + $0x8] sm:$0xf] }
  0xa0   : > { %509 = vrot.lane.b32.xlu0 %v8293_v13, %s8155_s17  ;;  %505 = vrot.lane.b32.xlu1 %v8295_v14, %s8155_s17 }
  0xa4   : > { %507 = vrot.lane.b32.xlu1 %v8299_v16, %s8155_s17  ;;  %715 = vrot.lane.b32.xlu0 %v8301_v17, %s8156_s18 }
  0xa8   : > { %497 = vrot.lane.b32.xlu0 %v8305_v18, %s8155_s17  ;;  %713 = vrot.lane.b32.xlu1 %v8305_v18, %s8156_s18 }
  0xac   : > { %501 = vrot.lane.b32.xlu0 %v8309_v20, %s8155_s17  ;;  %717 = vrot.lane.b32.xlu1 %v8309_v20, %s8156_s18 }
  0xb0   : > { %723 = vrot.lane.b32.xlu0 %v8299_v16, %s8156_s18  ;;  %499 = vrot.lane.b32.xlu1 %v8301_v17, %s8155_s17 }
  0xb4   : > { %503 = vrot.lane.b32.xlu0 %v8315_v21, %s8155_s17  ;;  %721 = vrot.lane.b32.xlu1 %v8295_v14, %s8156_s18 }
  0xb8   : > { %932 = vrot.lane.b32.xlu0 %v8301_v17, %s8157_s19  ;;  %725 = vrot.lane.b32.xlu1 %v8293_v13, %s8156_s18 }
  0xbc   : > { %511 = vrot.lane.b32.xlu0 %v8321_v22, %s8155_s17  ;;  %930 = vrot.lane.b32.xlu1 %v8305_v18, %s8157_s19  ;;  %s8166_s17 = smov 9  }
  0xc0   : > { %940 = vrot.lane.b32.xlu0 %v8299_v16, %s8157_s19  ;;  %934 = vrot.lane.b32.xlu1 %v8309_v20, %s8157_s19 }
  0xc4   : > { %719 = vrot.lane.b32.xlu0 %v8315_v21, %s8156_s18  ;;  %938 = vrot.lane.b32.xlu1 %v8295_v14, %s8157_s19 }
  0xc8   : > { %1185 = vrot.lane.b32.xlu0 %v8301_v17, %s8158_s20  ;;  %942 = vrot.lane.b32.xlu1 %v8293_v13, %s8157_s19 }
  0xcc   : > { %727 = vrot.lane.b32.xlu0 %v8321_v22, %s8156_s18  ;;  %1183 = vrot.lane.b32.xlu1 %v8305_v18, %s8158_s20  ;;  %s8179_s18 = smov 18  }
  0xd0   : > { %1193 = vrot.lane.b32.xlu0 %v8299_v16, %s8158_s20  ;;  %1187 = vrot.lane.b32.xlu1 %v8309_v20, %s8158_s20 }
  0xd4   : > { %936 = vrot.lane.b32.xlu0 %v8315_v21, %s8157_s19  ;;  %1191 = vrot.lane.b32.xlu1 %v8295_v14, %s8158_s20 }
  0xd8   : > { %1413 = vrot.lane.b32.xlu0 %v8301_v17, %s8159_s21  ;;  %1195 = vrot.lane.b32.xlu1 %v8293_v13, %s8158_s20 }
  0xdc   : > { %944 = vrot.lane.b32.xlu0 %v8321_v22, %s8157_s19  ;;  %1411 = vrot.lane.b32.xlu1 %v8305_v18, %s8159_s21  ;;  %s8173_s19 = smov 38  }
  0xe0   : > { %1421 = vrot.lane.b32.xlu0 %v8299_v16, %s8159_s21  ;;  %1415 = vrot.lane.b32.xlu1 %v8309_v20, %s8159_s21 }
  0xe4   : > { %1189 = vrot.lane.b32.xlu0 %v8315_v21, %s8158_s20  ;;  %1419 = vrot.lane.b32.xlu1 %v8295_v14, %s8159_s21 }
  0xe8   : > { %1641 = vrot.lane.b32.xlu0 %v8301_v17, %s8160_s22  ;;  %1423 = vrot.lane.b32.xlu1 %v8293_v13, %s8159_s21 }
  0xec   : > { %1197 = vrot.lane.b32.xlu0 %v8321_v22, %s8158_s20  ;;  %1639 = vrot.lane.b32.xlu1 %v8305_v18, %s8160_s22 }
  0xf0   : > { %1647 = vrot.lane.b32.xlu0 %v8295_v14, %s8160_s22  ;;  %1643 = vrot.lane.b32.xlu1 %v8309_v20, %s8160_s22 }
  0xf4   : > { %1651 = vrot.lane.b32.xlu0 %v8293_v13, %s8160_s22  ;;  %1199 = vrot.lane.b32.xlu1 %v8355_v23, %s8158_s20  ;;  %s8167_s20 = smov 1  }
  0xf8   : > { %1867 = vrot.lane.b32.xlu0 %v8305_v18, %s8161_s23  ;;  %1649 = vrot.lane.b32.xlu1 %v8299_v16, %s8160_s22 }
  0xfc   : > { %1871 = vrot.lane.b32.xlu0 %v8309_v20, %s8161_s23  ;;  %1417 = vrot.lane.b32.xlu1 %v8315_v21, %s8159_s21 }
 0x100   : > { %1427 = vrot.lane.b32.xlu0 %v8355_v23, %s8159_s21  ;;  %1869 = vrot.lane.b32.xlu1 %v8301_v17, %s8161_s23 }
 0x104   : > { %1877 = vrot.lane.b32.xlu0 %v8299_v16, %s8161_s23  ;;  %1425 = vrot.lane.b32.xlu1 %v8321_v22, %s8159_s21 }
 0x108   : > { %1645 = vrot.lane.b32.xlu0 %v8315_v21, %s8160_s22  ;;  %1875 = vrot.lane.b32.xlu1 %v8295_v14, %s8161_s23 }
 0x10c   : > { %2097 = vrot.lane.b32.xlu0 %v8301_v17, %s8162_s24  ;;  %1879 = vrot.lane.b32.xlu1 %v8293_v13, %s8161_s23 }
 0x110   : > { %1653 = vrot.lane.b32.xlu0 %v8321_v22, %s8160_s22  ;;  %2095 = vrot.lane.b32.xlu1 %v8305_v18, %s8162_s24 }
 0x112   : > { %v8385_v24 = vpop.permute.xlu0 %509  ;;  %v506_v25 = vpop.permute.xlu1 %505 }
 0x114   : > { %2103 = vrot.lane.b32.xlu0 %v8295_v14, %s8162_s24  ;;  %2099 = vrot.lane.b32.xlu1 %v8309_v20, %s8162_s24 }
 0x116   : > { %v508_v26 = vpop.permute.xlu1 %507  ;;  %v716_v27 = vpop.permute.xlu0 %715 }
 0x117   : > { %v519_v28 = vsel %vm513_vm14, %v508_v26, %v8385_v24  ;;  %v518_v29 = vsel %vm513_vm14, %v506_v25, %v508_v26 }
 0x118   : > { %7550 = vmatprep.subr.msk.bf16.mxu0 %vm467_vm4, %v519_v28  ;;  %2107 = vrot.lane.b32.xlu0 %v8293_v13, %s8162_s24  ;;  %v538_v30 = vsel %vm467_vm4, %v518_v29, 0 }
 0x119   : > { %1655 = vrot.lane.b32.xlu1 %v8355_v23, %s8160_s22  ;;  %646 = vmatpush1.bf16.msra.mxu0 %v538_v30  ;;  %s8174_s22 = smov 37  }
 0x11a   : > { %v498_v32 = vpop.permute.xlu0 %497  ;;  %v714_v33 = vpop.permute.xlu1 %713 }
 0x11b   : > { %v730_v34 = vsel %vm729_vm0, %v714_v33, %v716_v27 }
 0x11c   : > { %2323 = vrot.lane.b32.xlu0 %v8305_v18, %s8163_s29  ;;  %7551 = vmatmul.mubr.msk.bf16.vlgmr.msra.gmra.mxu0 %vm521_vm15, %v8403_v31  ;;  %v741_v38 = vsel %vm467_vm4, %v730_v34, 0 }
 0x11d   : > { %2105 = vrot.lane.b32.xlu1 %v8299_v16, %s8162_s24  ;;  %796 = vmatprep.mubr.bf16.mxu0 %v8154_v1 }
 0x11e   : > { %v502_v35 = vpop.permute.xlu0 %501  ;;  %v8413_v36 = vpop.permute.xlu1 %717 }
 0x11f   : > { %v731_v37 = vsel %vm729_vm0, %v716_v27, %v8413_v36 }
 0x120   : > { %2327 = vrot.lane.b32.xlu0 %v8309_v20, %s8163_s29  ;;  %7554 = vmatprep.subr.msk.bf16.mxu0 %vm467_vm4, %v731_v37 }
 0x121   : > { %1873 = vrot.lane.b32.xlu1 %v8315_v21, %s8161_s23  ;;  %779 = vmatpush1.bf16.msra.mxu0 %v741_v38 }
 0x122   : > { %v724_v39 = vpop.permute.xlu0 %723  ;;  %v500_v40 = vpop.permute.xlu1 %499 }
 0x123   : > { %v515_v41 = vsel %vm513_vm14, %v500_v40, %v502_v35  ;;  %v514_v42 = vsel %vm513_vm14, %v498_v32, %v500_v40 }
 0x124   : > { %1883 = vrot.lane.b32.xlu0 %v8355_v23, %s8161_s23  ;;  %7546 = vmatprep.subr.msk.bf16.mxu1 %vm467_vm4, %v515_v41  ;;  %v526_v44 = vsel %vm467_vm4, %v514_v42, 0  ;;  %v8534_v41 = vld [vmem:[%s11270_s1 + $0xc] sm:$0xf] }
 0x125   : > { %2325 = vrot.lane.b32.xlu1 %v8301_v17, %s8163_s29  ;;  %564 = vmatpush1.bf16.msra.mxu1 %v526_v44 }
 0x126   : > { %v504_v45 = vpop.permute.xlu0 %503  ;;  %v722_v46 = vpop.permute.xlu1 %721  ;;  %7555 = vmatmul.mubr.msk.bf16.vlgmr.msra.gmra.mxu0 %vm521_vm15, %v8428_v43 }
 0x127   : > { %v516_v47 = vsel %vm513_vm14, %v502_v35, %v504_v45  ;;  %v517_v48 = vsel %vm513_vm14, %v504_v45, %v506_v25  ;;  %878 = vmatprep.mubr.bf16.mxu0 %v8154_v1  ;;  %v734_v50 = vsel %vm729_vm0, %v722_v46, %v724_v39 }
 0x128   : > { %2333 = vrot.lane.b32.xlu0 %v8299_v16, %s8163_s29  ;;  %7547 = vmatmul.mubr.msk.bf16.vlgmr.msra.gmra.mxu1 %vm521_vm15, %v8403_v31  ;;  %v532_v49 = vsel %vm467_vm4, %v516_v47, 0  ;;  %v753_v54 = vsel %vm467_vm4, %v734_v50, 0 }
 0x129   : > { %1881 = vrot.lane.b32.xlu1 %v8321_v22, %s8161_s23  ;;  %7548 = vmatprep.subr.msk.bf16.mxu1 %vm467_vm4, %v517_v48  ;;  %s8180_s23 = smov 17  }
 0x12a   : > { %605 = vmatpush1.bf16.msra.mxu1 %v532_v49  ;;  %v933_v51 = vpop.permute.xlu0 %932  ;;  %v726_v52 = vpop.permute.xlu1 %725  ;;  %622 = vmatprep.mubr.bf16.mxu1 %v8154_v1 }
 0x12b   : > { %v735_v53 = vsel %vm729_vm0, %v724_v39, %v726_v52 }
 0x12c   : > { %2101 = vrot.lane.b32.xlu0 %v8315_v21, %s8162_s24  ;;  %7558 = vmatprep.subr.msk.bf16.mxu0 %vm467_vm4, %v735_v53 }
 0x12d   : > { %2331 = vrot.lane.b32.xlu1 %v8295_v14, %s8163_s29  ;;  %861 = vmatpush1.bf16.msra.mxu0 %v753_v54 }
 0x12e   : > { %v512_v55 = vpop.permute.xlu0 %511  ;;  %v931_v56 = vpop.permute.xlu1 %930 }
 0x12f   : > { %v520_v57 = vsel %vm513_vm14, %v8385_v24, %v512_v55  ;;  %7552 = vmatprep.subr.msk.bf16.mxu1 %vm467_vm4, %v512_v55  ;;  %v947_v59 = vsel %vm946_vm1, %v931_v56, %v933_v51  ;;  %vm3704_vm14 = vcmask 1039360  }
 0x130   : > { %2553 = vrot.lane.b32.xlu0 %v8301_v17, %s8164_s10  ;;  %7549 = vmatmul.mubr.msk.bf16.vlgmr.msra.gmra.mxu1 %vm521_vm15, %v8403_v31  ;;  %v544_v58 = vsel %vm467_vm4, %v520_v57, 0  ;;  %v958_v7 = vsel %vm467_vm4, %v947_v59, 0 }
 0x131   : > { %2335 = vrot.lane.b32.xlu1 %v8293_v13, %s8163_s29  ;;  %7559 = vmatmul.mubr.msk.bf16.vlgmr.msra.gmra.mxu0 %vm521_vm15, %v8428_v43 }
 0x132   : > { %687 = vmatpush1.bf16.msra.mxu1 %v544_v58  ;;  %v941_v60 = vpop.permute.xlu0 %940  ;;  %v935_v5 = vpop.permute.xlu1 %934  ;;  %704 = vmatprep.mubr.bf16.mxu1 %v8154_v1 }
 0x133   : > { %v948_v6 = vsel %vm946_vm1, %v933_v51, %v935_v5  ;;  %1013 = vmatprep.mubr.bf16.mxu0 %v8154_v1 }
 0x134   : > { %2109 = vrot.lane.b32.xlu0 %v8321_v22, %s8162_s24  ;;  %7563 = vmatprep.subr.msk.bf16.mxu0 %vm467_vm4, %v948_v6 }
 0x135   : > { %2551 = vrot.lane.b32.xlu1 %v8305_v18, %s8164_s10  ;;  %996 = vmatpush1.bf16.msra.mxu0 %v958_v7 }
 0x136   : > { %v720_v8 = vpop.permute.xlu0 %719  ;;  %v939_v9 = vpop.permute.xlu1 %938 }
 0x137   : > { %v732_v10 = vsel %vm729_vm0, %v8413_v36, %v720_v8  ;;  %v733_v11 = vsel %vm729_vm0, %v720_v8, %v722_v46  ;;  %v951_v19 = vsel %vm946_vm1, %v939_v9, %v941_v60 }
 0x138   : > { %2559 = vrot.lane.b32.xlu0 %v8295_v14, %s8164_s10  ;;  %7553 = vmatmul.mubr.msk.bf16.vlgmr.msra.gmra.mxu1 %vm521_vm15, %v8403_v31  ;;  %v747_v15 = vsel %vm467_vm4, %v732_v10, 0  ;;  %v970_v27 = vsel %vm467_vm4, %v951_v19, 0 }
 0x139   : > { %2555 = vrot.lane.b32.xlu1 %v8309_v20, %s8164_s10  ;;  %7556 = vmatprep.subr.msk.bf16.mxu1 %vm467_vm4, %v733_v11 }
 0x13a   : > { %7564 = vmatmul.mubr.msk.bf16.vlgmr.msra.gmra.mxu0 %vm521_vm15, %v8486_v12  ;;  %820 = vmatpush1.bf16.msra.mxu1 %v747_v15  ;;  %v1186_v24 = vpop.permute.xlu0 %1185  ;;  %v943_v25 = vpop.permute.xlu1 %942 }
 0x13b   : > { %v952_v26 = vsel %vm946_vm1, %v941_v60, %v943_v25  ;;  %837 = vmatprep.mubr.bf16.mxu1 %v8154_v1  ;;  %1095 = vmatprep.mubr.bf16.mxu0 %v8154_v1 }
 0x13c   : > { %2563 = vrot.lane.b32.xlu0 %v8293_v13, %s8164_s10  ;;  %7567 = vmatprep.subr.msk.bf16.mxu0 %vm467_vm4, %v952_v26 }
 0x13d   : > { %2111 = vrot.lane.b32.xlu1 %v8355_v23, %s8162_s24  ;;  %1078 = vmatpush1.bf16.msra.mxu0 %v970_v27 }
 0x13e   : > { %v728_v28 = vpop.permute.xlu0 %727  ;;  %v1184_v29 = vpop.permute.xlu1 %1183 }
 0x13f   : > { %v736_v30 = vsel %vm729_vm0, %v726_v52, %v728_v28  ;;  %7560 = vmatprep.subr.msk.bf16.mxu1 %vm467_vm4, %v728_v28  ;;  %v1202_v32 = vsel %vm1201_vm2, %v1184_v29, %v1186_v24  ;;  %vm3929_vm0 = vcmask 973824  }
 0x140   : > { %2779 = vrot.lane.b32.xlu0 %v8305_v18, %s8165_s14  ;;  %7557 = vmatmul.mubr.msk.bf16.vlgmr.msra.gmra.mxu1 %vm521_vm15, %v8428_v43  ;;  %v759_v31 = vsel %vm467_vm4, %v736_v30, 0  ;;  %v1214_v36 = vsel %vm467_vm4, %v1202_v32, 0  ;;  %v8647_v32 = vld [vmem:[%s11270_s1 + $0x14] sm:$0xf] }
 0x141   : > { %2561 = vrot.lane.b32.xlu1 %v8299_v16, %s8164_s10  ;;  %902 = vmatpush1.bf16.msra.mxu1 %v759_v31 }
 0x142   : > { %7568 = vmatmul.mubr.msk.bf16.vlgmr.msra.gmra.mxu0 %vm521_vm15, %v8486_v12  ;;  %v1194_v33 = vpop.permute.xlu0 %1193  ;;  %v1188_v34 = vpop.permute.xlu1 %1187  ;;  %919 = vmatprep.mubr.bf16.mxu1 %v8154_v1 }
 0x143   : > { %v1203_v35 = vsel %vm1201_vm2, %v1186_v24, %v1188_v34  ;;  %1269 = vmatprep.mubr.bf16.mxu0 %v8154_v1 }
 0x144   : > { %2783 = vrot.lane.b32.xlu0 %v8309_v20, %s8165_s14  ;;  %7581 = vmatprep.subr.msk.bf16.mxu0 %vm467_vm4, %v1203_v35 }
 0x145   : > { %2329 = vrot.lane.b32.xlu1 %v8315_v21, %s8163_s29  ;;  %1252 = vmatpush1.bf16.msra.mxu0 %v1214_v36 }
 0x146   : > { %v937_v37 = vpop.permute.xlu0 %936  ;;  %v1192_v38 = vpop.permute.xlu1 %1191 }
 0x147   : > { %v949_v39 = vsel %vm946_vm1, %v935_v5, %v937_v37  ;;  %v950_v40 = vsel %vm946_vm1, %v937_v37, %v939_v9  ;;  %v1206_v44 = vsel %vm1201_vm2, %v1192_v38, %v1194_v33  ;;  %v8590_v5 = vld [vmem:[%s11270_s1 + $0x10] sm:$0xf] }
 0x148   : > { %2339 = vrot.lane.b32.xlu0 %v8355_v23, %s8163_s29  ;;  %7561 = vmatmul.mubr.msk.bf16.vlgmr.msra.gmra.mxu1 %vm521_vm15, %v8428_v43  ;;  %v964_v42 = vsel %vm467_vm4, %v949_v39, 0  ;;  %v1226_v43 = vsel %vm467_vm4, %v1206_v44, 0 }
 0x149   : > { %2781 = vrot.lane.b32.xlu1 %v8301_v17, %s8165_s14  ;;  %7565 = vmatprep.subr.msk.bf16.mxu1 %vm467_vm4, %v950_v40 }
 0x14a   : > { %7582 = vmatmul.mubr.msk.bf16.vlgmr.msra.gmra.mxu0 %vm521_vm15, %v8534_v41  ;;  %1037 = vmatpush1.bf16.msra.mxu1 %v964_v42  ;;  %v1414_v45 = vpop.permute.xlu0 %1413  ;;  %v8547_v46 = vpop.permute.xlu1 %1195 }
 0x14b   : > { %v1207_v47 = vsel %vm1201_vm2, %v1194_v33, %v8547_v46  ;;  %1054 = vmatprep.mubr.bf16.mxu1 %v8154_v1  ;;  %1351 = vmatprep.mubr.bf16.mxu0 %v8154_v1 }
 0x14c   : > { %2789 = vrot.lane.b32.xlu0 %v8299_v16, %s8165_s14  ;;  %7585 = vmatprep.subr.msk.bf16.mxu0 %vm467_vm4, %v1207_v47 }
 0x14d   : > { %2337 = vrot.lane.b32.xlu1 %v8321_v22, %s8163_s29  ;;  %1334 = vmatpush1.bf16.msra.mxu0 %v1226_v43 }
 0x14e   : > { %v945_v48 = vpop.permute.xlu0 %944  ;;  %v1412_v49 = vpop.permute.xlu1 %1411 }
 0x14f   : > { %v953_v50 = vsel %vm946_vm1, %v943_v25, %v945_v48  ;;  %7569 = vmatprep.subr.msk.bf16.mxu1 %vm467_vm4, %v945_v48  ;;  %v1430_v52 = vsel %vm1429_vm3, %v1412_v49, %v1414_v45  ;;  %v8704_v49 = vld [vmem:[%s11270_s1 + $0x18] sm:$0xf]  ;;  %vm4154_vm1 = vcmask 965632  }
 0x150   : > { %2557 = vrot.lane.b32.xlu0 %v8315_v21, %s8164_s10  ;;  %7566 = vmatmul.mubr.msk.bf16.vlgmr.msra.gmra.mxu1 %vm521_vm15, %v8486_v12  ;;  %v976_v51 = vsel %vm467_vm4, %v953_v50, 0  ;;  %v1442_v56 = vsel %vm467_vm4, %v1430_v52, 0  ;;  %v8718_v52 = vpack.c.bf16 %v8260_v61, %v8260_v61 }
 0x151   : > { %2787 = vrot.lane.b32.xlu1 %v8295_v14, %s8165_s14  ;;  %1119 = vmatpush1.bf16.msra.mxu1 %v976_v51 }
 0x152   : > { %7586 = vmatmul.mubr.msk.bf16.vlgmr.msra.gmra.mxu0 %vm521_vm15, %v8534_v41  ;;  %v1422_v53 = vpop.permute.xlu0 %1421  ;;  %v8571_v54 = vpop.permute.xlu1 %1415  ;;  %1136 = vmatprep.mubr.bf16.mxu1 %v8154_v1 }
 0x153   : > { %v1431_v55 = vsel %vm1429_vm3, %v1414_v45, %v8571_v54  ;;  %1497 = vmatprep.mubr.bf16.mxu0 %v8154_v1 }
 0x154   : > { %3009 = vrot.lane.b32.xlu0 %v8301_v17, %s8166_s17  ;;  %7590 = vmatprep.subr.msk.bf16.mxu0 %vm467_vm4, %v1431_v55 }
 0x155   : > { %2791 = vrot.lane.b32.xlu1 %v8293_v13, %s8165_s14  ;;  %1480 = vmatpush1.bf16.msra.mxu0 %v1442_v56 }
 0x156   : > { %v1190_v57 = vpop.permute.xlu0 %1189  ;;  %v8583_v58 = vpop.permute.xlu1 %1419 }
 0x157   : > { %v1204_v59 = vsel %vm1201_vm2, %v1188_v34, %v1190_v57  ;;  %v1205_v60 = vsel %vm1201_vm2, %v1190_v57, %v1192_v38  ;;  %v1434_v7 = vsel %vm1429_vm3, %v8583_v58, %v1422_v53  ;;  %v8739_v57 = vpack.c.bf16 %v8266_v63, %v8266_v63 }
 0x158   : > { %2565 = vrot.lane.b32.xlu0 %v8321_v22, %s8164_s10  ;;  %7570 = vmatmul.mubr.msk.bf16.vlgmr.msra.gmra.mxu1 %vm521_vm15, %v8486_v12  ;;  %v1220_v6 = vsel %vm467_vm4, %v1204_v59, 0  ;;  %v1454_v11 = vsel %vm467_vm4, %v1434_v7, 0 }
 0x159   : > { %3007 = vrot.lane.b32.xlu1 %v8305_v18, %s8166_s17  ;;  %7583 = vmatprep.subr.msk.bf16.mxu1 %vm467_vm4, %v1205_v60 }
 0x15a   : > { %7591 = vmatmul.mubr.msk.bf16.vlgmr.msra.gmra.mxu0 %vm521_vm15, %v8590_v5  ;;  %1293 = vmatpush1.bf16.msra.mxu1 %v1220_v6  ;;  %v1642_v8 = vpop.permute.xlu0 %1641  ;;  %v8604_v9 = vpop.permute.xlu1 %1423 }
 0x15b   : > { %v1435_v10 = vsel %vm1429_vm3, %v1422_v53, %v8604_v9  ;;  %1310 = vmatprep.mubr.bf16.mxu1 %v8154_v1  ;;  %1579 = vmatprep.mubr.bf16.mxu0 %v8154_v1 }
 0x15c   : > { %3015 = vrot.lane.b32.xlu0 %v8295_v14, %s8166_s17  ;;  %7594 = vmatprep.subr.msk.bf16.mxu0 %vm467_vm4, %v1435_v10 }
 0x15d   : > { %3011 = vrot.lane.b32.xlu1 %v8309_v20, %s8166_s17  ;;  %1562 = vmatpush1.bf16.msra.mxu0 %v1454_v11  ;;  %v8787_v11 = vpack.c.bf16 %v8278_v3, %v8278_v3 }
 0x15e   : > { %v1198_v12 = vpop.permute.xlu0 %1197  ;;  %v1640_v15 = vpop.permute.xlu1 %1639 }
 0x15f   : > { %v1658_v19 = vsel %vm1657_vm5, %v1640_v15, %v1642_v8  ;;  %v1208_v28 = vsel %vm1201_vm2, %v8547_v46, %v1198_v12 }
 0x160   : > { %3019 = vrot.lane.b32.xlu0 %v8293_v13, %s8166_s17  ;;  %7584 = vmatmul.mubr.msk.bf16.vlgmr.msra.gmra.mxu1 %vm521_vm15, %v8534_v41  ;;  %v1670_v27 = vsel %vm467_vm4, %v1658_v19, 0 }
 0x161   : > { %2567 = vrot.lane.b32.xlu1 %v8355_v23, %s8164_s10  ;;  %1392 = vmatprep.mubr.bf16.mxu1 %v8154_v1 }
 0x162   : > { %7595 = vmatmul.mubr.msk.bf16.vlgmr.msra.gmra.mxu0 %vm521_vm15, %v8590_v5  ;;  %v8626_v24 = vpop.permute.xlu0 %1647  ;;  %v8628_v25 = vpop.permute.xlu1 %1643 }
 0x163   : > { %v1659_v26 = vsel %vm1657_vm5, %v1642_v8, %v8628_v25  ;;  %1725 = vmatprep.mubr.bf16.mxu0 %v8154_v1 }
 0x164   : > { %3235 = vrot.lane.b32.xlu0 %v8305_v18, %s8167_s20  ;;  %7599 = vmatprep.subr.msk.bf16.mxu0 %vm467_vm4, %v1659_v26  ;;  %v1232_v18 = vsel %vm467_vm4, %v1208_v28, 0 }
 0x165   : > { %3017 = vrot.lane.b32.xlu1 %v8299_v16, %s8166_s17  ;;  %1708 = vmatpush1.bf16.msra.mxu0 %v1670_v27 }
 0x166   : > { %v8641_v29 = vpop.permute.xlu0 %1651  ;;  %v1200_v30 = vpop.permute.xlu1 %1199 }
 0x167   : > { %v1209_v31 = vsel %vm1201_vm2, %v1198_v12, %v1200_v30  ;;  %v8792_v12 = vld [vmem:[%s11270_s1 + $0x1c] sm:$0xf]  ;;  %vm4379_vm2 = vcmask 957440  }
 0x168   : > { %3239 = vrot.lane.b32.xlu0 %v8309_v20, %s8167_s20  ;;  %7587 = vmatprep.subr.msk.bf16.mxu1 %vm467_vm4, %v1209_v31 }
 0x169   : > { %2785 = vrot.lane.b32.xlu1 %v8315_v21, %s8165_s14  ;;  %1375 = vmatpush1.bf16.msra.mxu1 %v1232_v18 }
 0x16a   : > { %7600 = vmatmul.mubr.msk.bf16.vlgmr.msra.gmra.mxu0 %vm521_vm15, %v8647_v32  ;;  %v1868_v33 = vpop.permute.xlu0 %1867  ;;  %v1650_v34 = vpop.permute.xlu1 %1649 }
 0x16b   : > { %v1662_v35 = vsel %vm1657_vm5, %v8626_v24, %v1650_v34  ;;  %v1663_v36 = vsel %vm1657_vm5, %v1650_v34, %v8641_v29  ;;  %1807 = vmatprep.mubr.bf16.mxu0 %v8154_v1  ;;  %v8835_v34 = vpack.c.bf16 %v8269_v0, %v8269_v0 }
 0x16c   : > { %2795 = vrot.lane.b32.xlu0 %v8355_v23, %s8165_s14  ;;  %7588 = vmatmul.mubr.msk.bf16.vlgmr.msra.gmra.mxu1 %vm521_vm15, %v8534_v41  ;;  %v1682_v20 = vsel %vm467_vm4, %v1662_v35, 0 }
 0x16d   : > { %3237 = vrot.lane.b32.xlu1 %v8301_v17, %s8167_s20  ;;  %7603 = vmatprep.subr.msk.bf16.mxu0 %vm467_vm4, %v1663_v36 }
 0x16e   : > { %1790 = vmatpush1.bf16.msra.mxu0 %v1682_v20  ;;  %v8670_v37 = vpop.permute.xlu0 %1871  ;;  %v1418_v38 = vpop.permute.xlu1 %1417  ;;  %1538 = vmatprep.mubr.bf16.mxu1 %v8154_v1 }
 0x16f   : > { %v1432_v39 = vsel %vm1429_vm3, %v8571_v54, %v1418_v38  ;;  %v1433_v40 = vsel %vm1429_vm3, %v1418_v38, %v8583_v58 }
 0x170   : > { %3245 = vrot.lane.b32.xlu0 %v8299_v16, %s8167_s20  ;;  %7592 = vmatprep.subr.msk.bf16.mxu1 %vm467_vm4, %v1433_v40  ;;  %v1448_v17 = vsel %vm467_vm4, %v1432_v39, 0  ;;  %v8853_v39 = vld [vmem:[%s11270_s1 + $0x20] sm:$0xf] }
 0x171   : > { %2793 = vrot.lane.b32.xlu1 %v8321_v22, %s8165_s14  ;;  %1521 = vmatpush1.bf16.msra.mxu1 %v1448_v17  ;;  %s10563_s14 = scalar_lea.vmem %s11275_s6, %s7821_s13 }
 0x172   : > { %7604 = vmatmul.mubr.msk.bf16.vlgmr.msra.gmra.mxu0 %vm521_vm15, %v8647_v32  ;;  %v1428_v41 = vpop.permute.xlu0 %1427  ;;  %v1870_v42 = vpop.permute.xlu1 %1869 }
 0x173   : > { %v1886_v44 = vsel %vm1885_vm6, %v1868_v33, %v1870_v42  ;;  %v1887_v45 = vsel %vm1885_vm6, %v1870_v42, %v8670_v37  ;;  %1953 = vmatprep.mubr.bf16.mxu0 %v8154_v1 }
 0x174   : > { %3013 = vrot.lane.b32.xlu0 %v8315_v21, %s8166_s17  ;;  %7593 = vmatmul.mubr.msk.bf16.vlgmr.msra.gmra.mxu1 %vm521_vm15, %v8590_v5  ;;  %v1898_v16 = vsel %vm467_vm4, %v1886_v44, 0 }
 0x175   : > { %3243 = vrot.lane.b32.xlu1 %v8295_v14, %s8167_s20  ;;  %7608 = vmatprep.subr.msk.bf16.mxu0 %vm467_vm4, %v1887_v45 }
 0x176   : > { %1936 = vmatpush1.bf16.msra.mxu0 %v1898_v16  ;;  %v1878_v46 = vpop.permute.xlu0 %1877  ;;  %v1426_v47 = vpop.permute.xlu1 %1425  ;;  %1620 = vmatprep.mubr.bf16.mxu1 %v8154_v1 }
 0x177   : > { %v1436_v43 = vsel %vm1429_vm3, %v8604_v9, %v1426_v47  ;;  %v1437_v48 = vsel %vm1429_vm3, %v1426_v47, %v1428_v41  ;;  %vm4634_vm3 = vcmask 318464  }
 0x178   : > { %3023 = vrot.lane.b32.xlu0 %v8355_v23, %s8166_s17  ;;  %7596 = vmatprep.subr.msk.bf16.mxu1 %vm467_vm4, %v1437_v48  ;;  %v1460_v14 = vsel %vm467_vm4, %v1436_v43, 0 }
 0x179   : > { %3247 = vrot.lane.b32.xlu1 %v8293_v13, %s8167_s20  ;;  %1603 = vmatpush1.bf16.msra.mxu1 %v1460_v14 }
 0x17a   : > { %7609 = vmatmul.mubr.msk.bf16.vlgmr.msra.gmra.mxu0 %vm521_vm15, %v8704_v49  ;;  %v1646_v50 = vpop.permute.xlu0 %1645  ;;  %v8714_v51 = vpop.permute.xlu1 %1875 }
 0x17b   : > { %v1660_v53 = vsel %vm1657_vm5, %v8628_v25, %v1646_v50  ;;  %v1661_v54 = vsel %vm1657_vm5, %v1646_v50, %v8626_v24  ;;  %2035 = vmatprep.mubr.bf16.mxu0 %v8154_v1  ;;  %v1890_v61 = vsel %vm1885_vm6, %v8714_v51, %v1878_v46 }
 0x17c   : > { %3688 = vrot.lane.b32.xlu0 %v8718_v52, %s8168_s25  ;;  %7597 = vmatmul.mubr.msk.bf16.vlgmr.msra.gmra.mxu1 %vm521_vm15, %v8590_v5  ;;  %v1676_v13 = vsel %vm467_vm4, %v1660_v53, 0  ;;  %v1910_v59 = vsel %vm467_vm4, %v1890_v61, 0  ;;  %v8752_v5 = vpack.c.bf16 %v8263_v62, %v8263_v62  ;;  %v8769_v62 = vpack.c.bf16 %v8281_v4, %v8281_v4 }
 0x17d   : > { %3021 = vrot.lane.b32.xlu1 %v8321_v22, %s8166_s17  ;;  %7601 = vmatprep.subr.msk.bf16.mxu1 %vm467_vm4, %v1661_v54 }
 0x17e   : > { %1749 = vmatpush1.bf16.msra.mxu1 %v1676_v13  ;;  %v2098_v55 = vpop.permute.xlu0 %2097  ;;  %v8735_v56 = vpop.permute.xlu1 %1879  ;;  %1766 = vmatprep.mubr.bf16.mxu1 %v8154_v1 }
 0x17f   : > { %v1891_v58 = vsel %vm1885_vm6, %v1878_v46, %v8735_v56 }
 0x180   : > { %3692 = vrot.lane.b32.xlu0 %v8739_v57, %s8168_s25  ;;  %7612 = vmatprep.subr.msk.bf16.mxu0 %vm467_vm4, %v1891_v58 }
 0x181   : > { %3241 = vrot.lane.b32.xlu1 %v8315_v21, %s8167_s20  ;;  %2018 = vmatpush1.bf16.msra.mxu0 %v1910_v59 }
 0x182   : > { %v1654_v60 = vpop.permute.xlu0 %1653  ;;  %v2096_v63 = vpop.permute.xlu1 %2095 }
 0x183   : > { %v2114_v6 = vsel %vm2113_vm7, %v2096_v63, %v2098_v55  ;;  %v1664_v4 = vsel %vm1657_vm5, %v8641_v29, %v1654_v60  ;;  %v8926_v63 = vld [vmem:[%s11270_s1 + $0x24] sm:$0xf] }
 0x184   : > { %3251 = vrot.lane.b32.xlu0 %v8355_v23, %s8167_s20  ;;  %7602 = vmatmul.mubr.msk.bf16.vlgmr.msra.gmra.mxu1 %vm521_vm15, %v8647_v32  ;;  %v2126_v8 = vsel %vm467_vm4, %v2114_v6, 0  ;;  %v1688_v3 = vsel %vm467_vm4, %v1664_v4, 0 }
 0x185   : > { %3690 = vrot.lane.b32.xlu1 %v8752_v5, %s8168_s25  ;;  %7613 = vmatmul.mubr.msk.bf16.vlgmr.msra.gmra.mxu0 %vm521_vm15, %v8704_v49 }
 0x186   : > { %v8763_v21 = vpop.permute.xlu0 %2103  ;;  %v8765_v7 = vpop.permute.xlu1 %2099  ;;  %2181 = vmatprep.mubr.bf16.mxu0 %v8154_v1  ;;  %1848 = vmatprep.mubr.bf16.mxu1 %v8154_v1 }
 0x187   : > { %v2115_v23 = vsel %vm2113_vm7, %v2098_v55, %v8765_v7 }
 0x188   : > { %3698 = vrot.lane.b32.xlu0 %v8769_v62, %s8168_s25  ;;  %7617 = vmatprep.subr.msk.bf16.mxu0 %vm467_vm4, %v2115_v23 }
 0x189   : > { %3249 = vrot.lane.b32.xlu1 %v8321_v22, %s8167_s20  ;;  %2164 = vmatpush1.bf16.msra.mxu0 %v2126_v8  ;;  %v3466_v22 = vld [vmem:[#allocation2 + $0x1c] sm:$0xff] }
 0x18a   : > { %v8783_v9 = vpop.permute.xlu0 %2107  ;;  %v8803_v25 = vcombine.low %v3466_v22, %v3466_v22  ;;  %v8866_v44 = vcombine.high %v3466_v22, %v3466_v22  ;;  %v4588_v22 = vld [vmem:[#allocation2 + $0x4] sm:$0xff] }
 0x18b   : > { %v1656_v10 = vpop.permute.xlu1 %1655 }
 0x18c   : > { %v1665_v15 = vsel %vm1657_vm5, %v1654_v60, %v1656_v10  ;;  %3913 = vrot.lane.b32.xlu0 %v8718_v52, %s8169_s30  ;;  %vm4862_vm5 = vcmask 310272  }
 0x18d   : > { %3696 = vrot.lane.b32.xlu1 %v8787_v11, %s8168_s25  ;;  %7605 = vmatprep.subr.msk.bf16.mxu1 %vm467_vm4, %v1665_v15 }
 0x18e   : > { %7618 = vmatmul.mubr.msk.bf16.vlgmr.msra.gmra.mxu0 %vm521_vm15, %v8792_v12  ;;  %1831 = vmatpush1.bf16.msra.mxu1 %v1688_v3  ;;  %v2324_v19 = vpop.permute.xlu0 %2323 }
 0x18f   : > { %v2106_v24 = vpop.permute.xlu1 %2105  ;;  %2263 = vmatprep.mubr.bf16.mxu0 %v8154_v1 }
 0x190   : > { %v2118_v26 = vsel %vm2113_vm7, %v8763_v21, %v2106_v24  ;;  %3917 = vrot.lane.b32.xlu0 %v8739_v57, %s8169_s30  ;;  %v2119_v27 = vsel %vm2113_vm7, %v2106_v24, %v8783_v9 }
 0x191   : > { %3700 = vrot.lane.b32.xlu1 %v8803_v25, %s8168_s25  ;;  %7606 = vmatmul.mubr.msk.bf16.vlgmr.msra.gmra.mxu1 %vm521_vm15, %v8647_v32  ;;  %v2138_v28 = vsel %vm467_vm4, %v2118_v26, 0  ;;  %v8965_v26 = vcombine.high %v4588_v22, %v4588_v22 }
 0x192   : > { %7621 = vmatprep.subr.msk.bf16.mxu0 %vm467_vm4, %v2119_v27  ;;  %v8818_v29 = vpop.permute.xlu0 %2327  ;;  %1994 = vmatprep.mubr.bf16.mxu1 %v8154_v1 }
 0x193   : > { %2246 = vmatpush1.bf16.msra.mxu0 %v2138_v28  ;;  %v1874_v30 = vpop.permute.xlu1 %1873 }
 0x194   : > { %v1888_v31 = vsel %vm1885_vm6, %v8670_v37, %v1874_v30  ;;  %3923 = vrot.lane.b32.xlu0 %v8769_v62, %s8169_s30  ;;  %v1889_v18 = vsel %vm1885_vm6, %v1874_v30, %v8714_v51 }
 0x195   : > { %3915 = vrot.lane.b32.xlu1 %v8752_v5, %s8169_s30  ;;  %7610 = vmatprep.subr.msk.bf16.mxu1 %vm467_vm4, %v1889_v18  ;;  %v1904_v32 = vsel %vm467_vm4, %v1888_v31, 0 }
 0x196   : > { %7622 = vmatmul.mubr.msk.bf16.vlgmr.msra.gmra.mxu0 %vm521_vm15, %v8792_v12  ;;  %1977 = vmatpush1.bf16.msra.mxu1 %v1904_v32  ;;  %v1884_v33 = vpop.permute.xlu0 %1883  ;;  %v8980_v32 = vcombine.low %v4588_v22, %v4588_v22 }
 0x197   : > { %v2326_v35 = vpop.permute.xlu1 %2325  ;;  %2409 = vmatprep.mubr.bf16.mxu0 %v8154_v1 }
 0x198   : > { %v2342_v36 = vsel %vm2341_vm8, %v2324_v19, %v2326_v35  ;;  %3694 = vrot.lane.b32.xlu0 %v8835_v34, %s8168_s25  ;;  %v2343_v20 = vsel %vm2341_vm8, %v2326_v35, %v8818_v29  ;;  %v4590_v35 = vld [vmem:[#allocation2 + $0x14] sm:$0xff] }
 0x199   : > { %3921 = vrot.lane.b32.xlu1 %v8787_v11, %s8169_s30  ;;  %7611 = vmatmul.mubr.msk.bf16.vlgmr.msra.gmra.mxu1 %vm521_vm15, %v8704_v49  ;;  %v2354_v0 = vsel %vm467_vm4, %v2342_v36, 0 }
 0x19a   : > { %7626 = vmatprep.subr.msk.bf16.mxu0 %vm467_vm4, %v2343_v20  ;;  %v2334_v37 = vpop.permute.xlu0 %2333  ;;  %2076 = vmatprep.mubr.bf16.mxu1 %v8154_v1 }
 0x19b   : > { %2392 = vmatpush1.bf16.msra.mxu0 %v2354_v0  ;;  %v1882_v38 = vpop.permute.xlu1 %1881  ;;  %v4589_v0 = vld [vmem:[#allocation2 + $0xc] sm:$0xff] }
 0x19c   : > { %v1892_v40 = vsel %vm1885_vm6, %v8735_v56, %v1882_v38  ;;  %4140 = vrot.lane.b32.xlu0 %v8752_v5, %s8170_s11  ;;  %v1893_v17 = vsel %vm1885_vm6, %v1882_v38, %v1884_v33  ;;  %v8985_v33 = vld [vmem:[%s11270_s1 + $0x28] sm:$0xf]  ;;  %vm5090_vm6 = vcmask 302080  }
 0x19d   : > { %3925 = vrot.lane.b32.xlu1 %v8803_v25, %s8169_s30  ;;  %7614 = vmatprep.subr.msk.bf16.mxu1 %vm467_vm4, %v1893_v17  ;;  %v1916_v41 = vsel %vm467_vm4, %v1892_v40, 0  ;;  %v8998_v40 = vcombine.high %v4590_v35, %v4590_v35 }
 0x19e   : > { %7627 = vmatmul.mubr.msk.bf16.vlgmr.msra.gmra.mxu0 %vm521_vm15, %v8853_v39  ;;  %2059 = vmatpush1.bf16.msra.mxu1 %v1916_v41  ;;  %v2102_v42 = vpop.permute.xlu0 %2101 }
 0x19f   : > { %v2116_v45 = vsel %vm2113_vm7, %v8765_v7, %v2102_v42  ;;  %v8870_v16 = vpop.permute.xlu1 %2331  ;;  %v2117_v46 = vsel %vm2113_vm7, %v2102_v42, %v8763_v21  ;;  %2491 = vmatprep.mubr.bf16.mxu0 %v8154_v1  ;;  %v9004_v42 = vcombine.low %v4589_v0, %v4589_v0 }
 0x1a0   : > { %3702 = vrot.lane.b32.xlu0 %v8866_v44, %s8168_s25  ;;  %7619 = vmatprep.subr.msk.bf16.mxu1 %vm467_vm4, %v2117_v46  ;;  %v2132_v47 = vsel %vm467_vm4, %v2116_v45, 0  ;;  %v2346_v43 = vsel %vm2341_vm8, %v8870_v16, %v2334_v37  ;;  %s8175_s25 = smov 29  }
 0x1a1   : > { %4138 = vrot.lane.b32.xlu1 %v8718_v52, %s8170_s11  ;;  %7615 = vmatmul.mubr.msk.bf16.vlgmr.msra.gmra.mxu1 %vm521_vm15, %v8704_v49  ;;  %v2366_v49 = vsel %vm467_vm4, %v2346_v43, 0 }
 0x1a2   : > { %2205 = vmatpush1.bf16.msra.mxu1 %v2132_v47  ;;  %v2554_v48 = vpop.permute.xlu0 %2553  ;;  %2222 = vmatprep.mubr.bf16.mxu1 %v8154_v1 }
 0x1a3   : > { %v8886_v14 = vpop.permute.xlu1 %2335 }
 0x1a4   : > { %4148 = vrot.lane.b32.xlu0 %v8769_v62, %s8170_s11  ;;  %v2347_v50 = vsel %vm2341_vm8, %v2334_v37, %v8886_v14 }
 0x1a5   : > { %4142 = vrot.lane.b32.xlu1 %v8739_v57, %s8170_s11  ;;  %7630 = vmatprep.subr.msk.bf16.mxu0 %vm467_vm4, %v2347_v50 }
 0x1a6   : > { %2474 = vmatpush1.bf16.msra.mxu0 %v2366_v49  ;;  %v2110_v51 = vpop.permute.xlu0 %2109 }
 0x1a7   : > { %v2552_v53 = vpop.permute.xlu1 %2551  ;;  %v2120_v58 = vsel %vm2113_vm7, %v8783_v9, %v2110_v51 }
 0x1a8   : > { %3919 = vrot.lane.b32.xlu0 %v8835_v34, %s8169_s30  ;;  %v2570_v54 = vsel %vm2569_vm9, %v2552_v53, %v2554_v48  ;;  %v2144_v21 = vsel %vm467_vm4, %v2120_v58, 0 }
 0x1a9   : > { %4146 = vrot.lane.b32.xlu1 %v8787_v11, %s8170_s11  ;;  %7620 = vmatmul.mubr.msk.bf16.vlgmr.msra.gmra.mxu1 %vm521_vm15, %v8792_v12  ;;  %v2582_v56 = vsel %vm467_vm4, %v2570_v54, 0 }
 0x1aa   : > { %7631 = vmatmul.mubr.msk.bf16.vlgmr.msra.gmra.mxu0 %vm521_vm15, %v8853_v39  ;;  %v8905_v13 = vpop.permute.xlu0 %2559  ;;  %2304 = vmatprep.mubr.bf16.mxu1 %v8154_v1 }
 0x1ab   : > { %v8908_v61 = vpop.permute.xlu1 %2555  ;;  %2637 = vmatprep.mubr.bf16.mxu0 %v8154_v1 }
 0x1ac   : > { %4365 = vrot.lane.b32.xlu0 %v8752_v5, %s8171_s12  ;;  %v2571_v55 = vsel %vm2569_vm9, %v2554_v48, %v8908_v61  ;;  %v9022_v48 = vcombine.low %v4590_v35, %v4590_v35 }
 0x1ad   : > { %4150 = vrot.lane.b32.xlu1 %v8803_v25, %s8170_s11  ;;  %7635 = vmatprep.subr.msk.bf16.mxu0 %vm467_vm4, %v2571_v55 }
 0x1ae   : > { %2620 = vmatpush1.bf16.msra.mxu0 %v2582_v56  ;;  %v8921_v59 = vpop.permute.xlu0 %2563 }
 0x1af   : > { %v2112_v60 = vpop.permute.xlu1 %2111 }
 0x1b0   : > { %v2121_v6 = vsel %vm2113_vm7, %v2110_v51, %v2112_v60  ;;  %3927 = vrot.lane.b32.xlu0 %v8866_v44, %s8169_s30  ;;  %v9062_v60 = vld [vmem:[%s11270_s1 + $0x2c] sm:$0xf]  ;;  %s8176_s30 = smov 28   ;;  %vm5318_vm7 = vcmask 236544  }
 0x1b1   : > { %4363 = vrot.lane.b32.xlu1 %v8718_v52, %s8171_s12  ;;  %7623 = vmatprep.subr.msk.bf16.mxu1 %vm467_vm4, %v2121_v6 }
 0x1b2   : > { %7636 = vmatmul.mubr.msk.bf16.vlgmr.msra.gmra.mxu0 %vm521_vm15, %v8926_v63  ;;  %2287 = vmatpush1.bf16.msra.mxu1 %v2144_v21  ;;  %v2780_v7 = vpop.permute.xlu0 %2779 }
 0x1b3   : > { %v2562_v23 = vpop.permute.xlu1 %2561  ;;  %2719 = vmatprep.mubr.bf16.mxu0 %v8154_v1 }
 0x1b4   : > { %v2574_v8 = vsel %vm2569_vm9, %v8905_v13, %v2562_v23  ;;  %4373 = vrot.lane.b32.xlu0 %v8769_v62, %s8171_s12  ;;  %v2575_v4 = vsel %vm2569_vm9, %v2562_v23, %v8921_v59 }
 0x1b5   : > { %4367 = vrot.lane.b32.xlu1 %v8739_v57, %s8171_s12  ;;  %7624 = vmatmul.mubr.msk.bf16.vlgmr.msra.gmra.mxu1 %vm521_vm15, %v8792_v12  ;;  %v2594_v9 = vsel %vm467_vm4, %v2574_v8, 0 }
 0x1b6   : > { %7639 = vmatprep.subr.msk.bf16.mxu0 %vm467_vm4, %v2575_v4  ;;  %v8950_v10 = vpop.permute.xlu0 %2783  ;;  %2450 = vmatprep.mubr.bf16.mxu1 %v8154_v1 }
 0x1b7   : > { %2702 = vmatpush1.bf16.msra.mxu0 %v2594_v9  ;;  %v2330_v15 = vpop.permute.xlu1 %2329 }
 0x1b8   : > { %v2344_v3 = vsel %vm2341_vm8, %v8818_v29, %v2330_v15  ;;  %4144 = vrot.lane.b32.xlu0 %v8835_v34, %s8170_s11  ;;  %v2345_v12 = vsel %vm2341_vm8, %v2330_v15, %v8870_v16 }
 0x1b9   : > { %4371 = vrot.lane.b32.xlu1 %v8787_v11, %s8171_s12  ;;  %7628 = vmatprep.subr.msk.bf16.mxu1 %vm467_vm4, %v2345_v12  ;;  %v2360_v19 = vsel %vm467_vm4, %v2344_v3, 0 }
 0x1ba   : > { %7640 = vmatmul.mubr.msk.bf16.vlgmr.msra.gmra.mxu0 %vm521_vm15, %v8926_v63  ;;  %2433 = vmatpush1.bf16.msra.mxu1 %v2360_v19  ;;  %v2340_v24 = vpop.permute.xlu0 %2339 }
 0x1bb   : > { %v2782_v27 = vpop.permute.xlu1 %2781  ;;  %2865 = vmatprep.mubr.bf16.mxu0 %v8154_v1 }
 0x1bc   : > { %v2798_v28 = vsel %vm2797_vm10, %v2780_v7, %v2782_v27  ;;  %4618 = vrot.lane.b32.xlu0 %v8965_v26, %s8172_s16  ;;  %v2799_v29 = vsel %vm2797_vm10, %v2782_v27, %v8950_v10  ;;  %v9073_v7 = vcombine.high %v4589_v0, %v4589_v0 }
 0x1bd   : > { %4375 = vrot.lane.b32.xlu1 %v8803_v25, %s8171_s12  ;;  %7629 = vmatmul.mubr.msk.bf16.vlgmr.msra.gmra.mxu1 %vm521_vm15, %v8853_v39  ;;  %v2810_v30 = vsel %vm467_vm4, %v2798_v28, 0 }
 0x1be   : > { %7644 = vmatprep.subr.msk.bf16.mxu0 %vm467_vm4, %v2799_v29  ;;  %v2790_v31 = vpop.permute.xlu0 %2789  ;;  %2532 = vmatprep.mubr.bf16.mxu1 %v8154_v1 }
 0x1bf   : > { %2848 = vmatpush1.bf16.msra.mxu0 %v2810_v30  ;;  %v2338_v18 = vpop.permute.xlu1 %2337 }
 0x1c0   : > { %v2348_v36 = vsel %vm2341_vm8, %v8886_v14, %v2338_v18  ;;  %4152 = vrot.lane.b32.xlu0 %v8866_v44, %s8170_s11  ;;  %v2349_v20 = vsel %vm2341_vm8, %v2338_v18, %v2340_v24  ;;  %s8177_s11 = smov 27   ;;  %vm5546_vm8 = vcmask 228352  }
 0x1c1   : > { %4616 = vrot.lane.b32.xlu1 %v8980_v32, %s8172_s16  ;;  %7632 = vmatprep.subr.msk.bf16.mxu1 %vm467_vm4, %v2349_v20  ;;  %v2372_v37 = vsel %vm467_vm4, %v2348_v36, 0  ;;  %v9123_v20 = vld [vmem:[%s11270_s1 + $0x30] sm:$0xf] }
 0x1c2   : > { %7645 = vmatmul.mubr.msk.bf16.vlgmr.msra.gmra.mxu0 %vm521_vm15, %v8985_v33  ;;  %2515 = vmatpush1.bf16.msra.mxu1 %v2372_v37  ;;  %v2558_v38 = vpop.permute.xlu0 %2557 }
 0x1c3   : > { %v2572_v17 = vsel %vm2569_vm9, %v8908_v61, %v2558_v38  ;;  %v9002_v41 = vpop.permute.xlu1 %2787  ;;  %v2573_v45 = vsel %vm2569_vm9, %v2558_v38, %v8905_v13  ;;  %2947 = vmatprep.mubr.bf16.mxu0 %v8154_v1 }
 0x1c4   : > { %4626 = vrot.lane.b32.xlu0 %v8998_v40, %s8172_s16  ;;  %7637 = vmatprep.subr.msk.bf16.mxu1 %vm467_vm4, %v2573_v45  ;;  %v2588_v16 = vsel %vm467_vm4, %v2572_v17, 0  ;;  %v2802_v46 = vsel %vm2797_vm10, %v9002_v41, %v2790_v31  ;;  %v9134_v17 = vld [vmem:[#allocation2 + $0x24] ss:$0 sps:$4 sm:$0xff]  }
 0x1c5   : > { %4620 = vrot.lane.b32.xlu1 %v9004_v42, %s8172_s16  ;;  %7633 = vmatmul.mubr.msk.bf16.vlgmr.msra.gmra.mxu1 %vm521_vm15, %v8853_v39  ;;  %v2822_v39 = vsel %vm467_vm4, %v2802_v46, 0 }
 0x1c6   : > { %2661 = vmatpush1.bf16.msra.mxu1 %v2588_v16  ;;  %v3010_v47 = vpop.permute.xlu0 %3009  ;;  %2678 = vmatprep.mubr.bf16.mxu1 %v8154_v1 }
 0x1c7   : > { %v9020_v43 = vpop.permute.xlu1 %2791 }
 0x1c8   : > { %4369 = vrot.lane.b32.xlu0 %v8835_v34, %s8171_s12  ;;  %v2803_v14 = vsel %vm2797_vm10, %v2790_v31, %v9020_v43 }
 0x1c9   : > { %4624 = vrot.lane.b32.xlu1 %v9022_v48, %s8172_s16  ;;  %7648 = vmatprep.subr.msk.bf16.mxu0 %vm467_vm4, %v2803_v14 }
 0x1ca   : > { %2930 = vmatpush1.bf16.msra.mxu0 %v2822_v39  ;;  %v2566_v50 = vpop.permute.xlu0 %2565 }
 0x1cb   : > { %v3008_v49 = vpop.permute.xlu1 %3007  ;;  %v2576_v55 = vsel %vm2569_vm9, %v8921_v59, %v2566_v50 }
 0x1cc   : > { %4846 = vrot.lane.b32.xlu0 %v8965_v26, %s8173_s19  ;;  %v3026_v51 = vsel %vm3025_vm11, %v3008_v49, %v3010_v47  ;;  %v2600_v59 = vsel %vm467_vm4, %v2576_v55, 0 }
 0x1cd   : > { %4628 = vrot.lane.b32.xlu1 %v8803_v25, %s8172_s16  ;;  %7638 = vmatmul.mubr.msk.bf16.vlgmr.msra.gmra.mxu1 %vm521_vm15, %v8926_v63  ;;  %v3038_v61 = vsel %vm467_vm4, %v3026_v51, 0 }
 0x1ce   : > { %7649 = vmatmul.mubr.msk.bf16.vlgmr.msra.gmra.mxu0 %vm521_vm15, %v8985_v33  ;;  %v9041_v53 = vpop.permute.xlu0 %3015  ;;  %2760 = vmatprep.mubr.bf16.mxu1 %v8154_v1 }
 0x1cf   : > { %v9044_v54 = vpop.permute.xlu1 %3011  ;;  %3093 = vmatprep.mubr.bf16.mxu0 %v8154_v1 }
 0x1d0   : > { %4377 = vrot.lane.b32.xlu0 %v8866_v44, %s8171_s12  ;;  %v3027_v13 = vsel %vm3025_vm11, %v3010_v47, %v9044_v54  ;;  %s322_s12 = scalar_lea.vmem %s11276_s7, %s7531_s9 }
 0x1d1   : > { %4844 = vrot.lane.b32.xlu1 %v8980_v32, %s8173_s19  ;;  %7653 = vmatprep.subr.msk.bf16.mxu0 %vm467_vm4, %v3027_v13 }
 0x1d2   : > { %3076 = vmatpush1.bf16.msra.mxu0 %v3038_v61  ;;  %v9057_v56 = vpop.permute.xlu0 %3019 }
 0x1d3   : > { %v2568_v58 = vpop.permute.xlu1 %2567 }
 0x1d4   : > { %v2577_v6 = vsel %vm2569_vm9, %v2566_v50, %v2568_v58  ;;  %4854 = vrot.lane.b32.xlu0 %v8998_v40, %s8173_s19  ;;  %vm5774_vm9 = vcmask 220160  }
 0x1d5   : > { %4848 = vrot.lane.b32.xlu1 %v9004_v42, %s8173_s19  ;;  %7641 = vmatprep.subr.msk.bf16.mxu1 %vm467_vm4, %v2577_v6 }
 0x1d6   : > { %7654 = vmatmul.mubr.msk.bf16.vlgmr.msra.gmra.mxu0 %vm521_vm15, %v9062_v60  ;;  %2743 = vmatpush1.bf16.msra.mxu1 %v2600_v59  ;;  %v3236_v21 = vpop.permute.xlu0 %3235 }
 0x1d7   : > { %v3018_v23 = vpop.permute.xlu1 %3017  ;;  %3175 = vmatprep.mubr.bf16.mxu0 %v8154_v1 }
 0x1d8   : > { %v3030_v8 = vsel %vm3025_vm11, %v9041_v53, %v3018_v23  ;;  %4622 = vrot.lane.b32.xlu0 %v9073_v7, %s8172_s16  ;;  %v3031_v4 = vsel %vm3025_vm11, %v3018_v23, %v9057_v56 }
 0x1d9   : > { %4852 = vrot.lane.b32.xlu1 %v9022_v48, %s8173_s19  ;;  %7642 = vmatmul.mubr.msk.bf16.vlgmr.msra.gmra.mxu1 %vm521_vm15, %v8926_v63  ;;  %v3050_v9 = vsel %vm467_vm4, %v3030_v8, 0 }
 0x1da   : > { %7657 = vmatprep.subr.msk.bf16.mxu0 %vm467_vm4, %v3031_v4  ;;  %v9088_v15 = vpop.permute.xlu0 %3239  ;;  %2906 = vmatprep.mubr.bf16.mxu1 %v8154_v1 }
 0x1db   : > { %3158 = vmatpush1.bf16.msra.mxu0 %v3050_v9  ;;  %v2786_v22 = vpop.permute.xlu1 %2785 }
 0x1dc   : > { %v2800_v3 = vsel %vm2797_vm10, %v8950_v10, %v2786_v22  ;;  %5074 = vrot.lane.b32.xlu0 %v8965_v26, %s8174_s22  ;;  %v2801_v63 = vsel %vm2797_vm10, %v2786_v22, %v9002_v41  ;;  %v9097_v12 = vpop.f32.mrf.mxu0 }
 0x1dd   : > { %4856 = vrot.lane.b32.xlu1 %v8803_v25, %s8173_s19  ;;  %7646 = vmatprep.subr.msk.bf16.mxu1 %vm467_vm4, %v2801_v63  ;;  %v2816_v19 = vsel %vm467_vm4, %v2800_v3, 0 }
 0x1de   : > { %7658 = vmatmul.mubr.msk.bf16.vlgmr.msra.gmra.mxu0 %vm521_vm15, %v9062_v60  ;;  %2889 = vmatpush1.bf16.msra.mxu1 %v2816_v19  ;;  %v2796_v10 = vpop.permute.xlu0 %2795  ;;  %v9105_v24 = vpop.f32.mrf.mxu0 }
 0x1df   : > { %v3238_v27 = vpop.permute.xlu1 %3237  ;;  %3321 = vmatprep.mubr.bf16.mxu0 %v8154_v1 }
 0x1e0   : > { %v3254_v28 = vsel %vm3253_vm12, %v3236_v21, %v3238_v27  ;;  %4630 = vrot.lane.b32.xlu0 %v8866_v44, %s8172_s16  ;;  %v3255_v29 = vsel %vm3253_vm12, %v3238_v27, %v9088_v15  ;;  %v669_v30 = vpop.f32.mrf.mxu0 }
 0x1e1   : > { %5072 = vrot.lane.b32.xlu1 %v8980_v32, %s8174_s22  ;;  %7647 = vmatmul.mubr.msk.bf16.vlgmr.msra.gmra.mxu1 %vm521_vm15, %v8985_v33  ;;  %v3266_v31 = vsel %vm467_vm4, %v3254_v28, 0 }
 0x1e2   : > { %7662 = vmatprep.subr.msk.bf16.mxu0 %vm467_vm4, %v3255_v29  ;;  %v3246_v18 = vpop.permute.xlu0 %3245  ;;  %v670_v35 = vpop.f32.mrf.mxu0  ;;  %2988 = vmatprep.mubr.bf16.mxu1 %v8154_v1 }
 0x1e3   : > { %3304 = vmatpush1.bf16.msra.mxu0 %v3266_v31  ;;  %v2794_v36 = vpop.permute.xlu1 %2793  ;;  %v9213_v35 = vld [vmem:[%s11270_s1 + $0x34] sm:$0xf] }
 0x1e4   : > { %v2804_v0 = vsel %vm2797_vm10, %v9020_v43, %v2794_v36  ;;  %5080 = vrot.lane.b32.xlu0 %v9022_v48, %s8174_s22  ;;  %v2805_v37 = vsel %vm2797_vm10, %v2794_v36, %v2796_v10  ;;  %vm6002_vm10 = vcmask 154624  }
 0x1e5   : > { %5076 = vrot.lane.b32.xlu1 %v9004_v42, %s8174_s22  ;;  %7650 = vmatprep.subr.msk.bf16.mxu1 %vm467_vm4, %v2805_v37  ;;  %v2828_v38 = vsel %vm467_vm4, %v2804_v0, 0 }
 0x1e6   : > { %7663 = vmatmul.mubr.msk.bf16.vlgmr.msra.gmra.mxu0 %vm521_vm15, %v9123_v20  ;;  %2971 = vmatpush1.bf16.msra.mxu1 %v2828_v38  ;;  %v3014_v41 = vpop.permute.xlu0 %3013  ;;  %v798_v45 = vpop.f32.mrf.mxu0  ;;  %v3503_v38 = vsel %vm467_vm4, %v8787_v11, 0 }
 0x1e7   : > { %v3028_v16 = vsel %vm3025_vm11, %v9044_v54, %v3014_v41  ;;  %v3244_v46 = vpop.permute.xlu1 %3243  ;;  %v3029_v47 = vsel %vm3025_vm11, %v3014_v41, %v9041_v53  ;;  %3403 = vmatprep.mubr.bf16.mxu0 %v8154_v1 }
 0x1e8   : > { %5084 = vrot.lane.b32.xlu0 %v8803_v25, %s8174_s22  ;;  %v583_v43 = vpop.f32.mrf.mxu1  ;;  %7655 = vmatprep.subr.msk.bf16.mxu1 %vm467_vm4, %v3029_v47  ;;  %v3044_v14 = vsel %vm467_vm4, %v3028_v16, 0  ;;  %v800_v39 = vpop.f32.mrf.mxu0  ;;  %v3258_v49 = vsel %vm3253_vm12, %v3244_v46, %v3246_v18 }
 0x1e9   : > { %v9147_v50 = vadd.f32 %v798_v45, %v583_v43  ;;  %4632 = vrot.lane.b32.xlu1 %v9134_v17, %s8172_s16  ;;  %7651 = vmatmul.mubr.msk.bf16.vlgmr.msra.gmra.mxu1 %vm521_vm15, %v8985_v33  ;;  %v3278_v58 = vsel %vm467_vm4, %v3258_v49, 0  ;;  %s326_s16 = scalar_lea.vmem %s11277_s8, %s7531_s9 }
 0x1ea   : > { %3117 = vmatpush1.bf16.msra.mxu1 %v3044_v14  ;;  %v3024_v51 = vpop.permute.xlu0 %3023  ;;  %v585_v53 = vpop.f32.mrf.mxu1  ;;  %3134 = vmatprep.mubr.bf16.mxu1 %v8154_v1 }
 0x1eb   : > { %v9155_v54 = vadd.f32 %v800_v39, %v585_v53  ;;  %v9157_v13 = vpop.permute.xlu1 %3247  ;;  %v802_v61 = vpop.f32.mrf.mxu0 }
 0x1ec   : > { %5300 = vrot.lane.b32.xlu0 %v8980_v32, %s8175_s25  ;;  %v587_v55 = vpop.f32.mrf.mxu1  ;;  %v3259_v33 = vsel %vm3253_vm12, %v3246_v18, %v9157_v13 }
 0x1ed   : > { %5082 = vrot.lane.b32.xlu1 %v8998_v40, %s8174_s22  ;;  %7666 = vmatprep.subr.msk.bf16.mxu0 %vm467_vm4, %v3259_v33  ;;  %v803_v6 = vpop.f32.mrf.mxu0 }
 0x1ee   : > { %3386 = vmatpush1.bf16.msra.mxu0 %v3278_v58  ;;  %v9167_v59 = vpop.permute.xlu0 %3688  ;;  %v588_v21 = vpop.f32.mrf.mxu1 }
 0x1ef   : > { %7679 = vmatprep.subr.msk.bf16.mxu0 %vm467_vm4, %v8752_v5  ;;  %v3022_v23 = vpop.permute.xlu1 %3021 }
 0x1f0   : > { %v3032_v8 = vsel %vm3025_vm11, %v9057_v56, %v3022_v23  ;;  %5304 = vrot.lane.b32.xlu0 %v9004_v42, %s8175_s25  ;;  %v9175_v4 = vpop.f32.mrf.mxu1  ;;  %v3033_v9 = vsel %vm3025_vm11, %v3022_v23, %v3024_v51  ;;  %v3491_v56 = vsel %vm467_vm4, %v8718_v52, 0  ;;  %vm6230_vm11 = vcmask 146432  }
 0x1f1   : > { %v880_v22 = vpop.f32.mrf.mxu0  ;;  %4850 = vrot.lane.b32.xlu1 %v9073_v7, %s8173_s19  ;;  %7656 = vmatmul.mubr.msk.bf16.vlgmr.msra.gmra.mxu1 %vm521_vm15, %v9062_v60  ;;  %v3056_v5 = vsel %vm467_vm4, %v3032_v8, 0 }
 0x1f2   : > { %v9184_v3 = vadd.f32 %v880_v22, %v9097_v12  ;;  %7659 = vmatprep.subr.msk.bf16.mxu1 %vm467_vm4, %v3033_v9  ;;  %7667 = vmatmul.mubr.msk.bf16.vlgmr.msra.gmra.mxu0 %vm521_vm15, %v9123_v20  ;;  %v9191_v63 = vpop.permute.xlu0 %3692  ;;  %v9193_v19 = vpop.f32.mrf.mxu1 }
 0x1f3   : > { %3199 = vmatpush1.bf16.msra.mxu1 %v3056_v5  ;;  %3529 = vmatpush1.bf16.msra.mxu0 %v3491_v56  ;;  %v882_v10 = vpop.f32.mrf.mxu0  ;;  %v3242_v27 = vpop.permute.xlu1 %3241 }
 0x1f4   : > { %v9196_v28 = vadd.f32 %v882_v10, %v9105_v24  ;;  %7683 = vmatprep.subr.msk.bf16.mxu0 %vm467_vm4, %v8769_v62  ;;  %4860 = vrot.lane.b32.xlu0 %v9134_v17, %s8173_s19  ;;  %v628_v12 = vpop.f32.mrf.mxu1  ;;  %v3257_v52 = vsel %vm3253_vm12, %v3242_v27, %v3244_v46  ;;  %v3256_v30 = vsel %vm3253_vm12, %v9088_v15, %v3242_v27  ;;  %v9299_v27 = vld [vmem:[%s11270_s1 + $0x38] sm:$0xf] }
 0x1f5   : > { %v884_v29 = vpop.f32.mrf.mxu0  ;;  %5302 = vrot.lane.b32.xlu1 %v8965_v26, %s8175_s25  ;;  %7664 = vmatprep.subr.msk.bf16.mxu1 %vm467_vm4, %v3257_v52  ;;  %v3272_v15 = vsel %vm467_vm4, %v3256_v30, 0  ;;  %v3497_v52 = vsel %vm467_vm4, %v8739_v57, 0 }
 0x1f6   : > { %v3252_v24 = vpop.permute.xlu0 %3251  ;;  %v629_v31 = vpop.f32.mrf.mxu1  ;;  %3216 = vmatprep.mubr.bf16.mxu1 %v8154_v1  ;;  %3546 = vmatprep.mubr.bf16.mxu0 %v8154_v1 }
 0x1f7   : > { %v885_v62 = vpop.f32.mrf.mxu0  ;;  %v3691_v18 = vpop.permute.xlu1 %3690 }
 0x1f8   : > { %5310 = vrot.lane.b32.xlu0 %v8998_v40, %s8175_s25  ;;  %v9217_v36 = vpop.f32.mrf.mxu1  ;;  %v3706_v0 = vsel %vm3704_vm14, %v3691_v18, %v9191_v63  ;;  %v3705_v49 = vsel %vm3704_vm14, %v9167_v59, %v3691_v18 }
 0x1f9   : > { %4858 = vrot.lane.b32.xlu1 %v8866_v44, %s8173_s19  ;;  %7660 = vmatmul.mubr.msk.bf16.vlgmr.msra.gmra.mxu1 %vm521_vm15, %v9062_v60  ;;  %v3716_v58 = vsel %vm467_vm4, %v3705_v49, 0 }
 0x1fa   : > { %v1015_v37 = vpop.f32.mrf.mxu0  ;;  %3345 = vmatpush1.bf16.msra.mxu1 %v3272_v15  ;;  %7680 = vmatmul.mubr.msk.bf16.vlgmr.msra.gmra.mxu0 %vm521_vm15, %v9213_v35  ;;  %v3699_v41 = vpop.permute.xlu0 %3698 }
 0x1fb   : > { %v9231_v45 = vadd.f32 %v1015_v37, %v9147_v50  ;;  %3611 = vmatpush1.bf16.msra.mxu0 %v3503_v38  ;;  %v9233_v16 = vpop.f32.mrf.mxu1  ;;  %v3250_v60 = vpop.permute.xlu1 %3249  ;;  %3362 = vmatprep.mubr.bf16.mxu1 %v8154_v1 }
 0x1fc   : > { %7688 = vmatprep.subr.msk.bf16.mxu0 %vm467_vm4, %v3706_v0  ;;  %v1017_v46 = vpop.f32.mrf.mxu0  ;;  %5078 = vrot.lane.b32.xlu0 %v9073_v7, %s8174_s22  ;;  %v3261_v47 = vsel %vm3253_vm12, %v3250_v60, %v3252_v24  ;;  %v3260_v14 = vsel %vm3253_vm12, %v9157_v13, %v3250_v60 }
 0x1fd   : > { %v9241_v11 = vadd.f32 %v1017_v46, %v9155_v54  ;;  %v710_v43 = vpop.f32.mrf.mxu1  ;;  %5308 = vrot.lane.b32.xlu1 %v9022_v48, %s8175_s25  ;;  %7668 = vmatprep.subr.msk.bf16.mxu1 %vm467_vm4, %v3261_v47  ;;  %v3284_v13 = vsel %vm467_vm4, %v3260_v14, 0 }
 0x1fe   : > { %v1019_v39 = vpop.f32.mrf.mxu0  ;;  %v9248_v50 = vpop.permute.xlu0 %3913  ;;  %3628 = vmatprep.mubr.bf16.mxu0 %v8154_v1 }
 0x1ff   : > { %v711_v51 = vpop.f32.mrf.mxu1  ;;  %v9253_v53 = vpop.permute.xlu1 %3696 }
 0x200   : > { %v1020_v54 = vpop.f32.mrf.mxu0  ;;  %5530 = vrot.lane.b32.xlu0 %v8965_v26, %s8176_s30  ;;  %v3709_v56 = vsel %vm3704_vm14, %v9253_v53, %v3699_v41 }
 0x201   : > { %v839_v61 = vpop.f32.mrf.mxu1  ;;  %5312 = vrot.lane.b32.xlu1 %v8803_v25, %s8175_s25  ;;  %7665 = vmatmul.mubr.msk.bf16.vlgmr.msra.gmra.mxu1 %vm521_vm15, %v9123_v20  ;;  %v3728_v31 = vsel %vm467_vm4, %v3709_v56, 0 }
 0x202   : > { %v9263_v55 = vadd.f32 %v839_v61, %v9175_v4  ;;  %v1097_v33 = vpop.f32.mrf.mxu0  ;;  %3427 = vmatpush1.bf16.msra.mxu1 %v3284_v13  ;;  %7684 = vmatmul.mubr.msk.bf16.vlgmr.msra.gmra.mxu0 %vm521_vm15, %v9213_v35  ;;  %v9268_v6 = vpop.permute.xlu0 %3917 }
 0x203   : > { %v9271_v59 = vadd.f32 %v1097_v33, %v9184_v3  ;;  %3754 = vmatpush1.bf16.msra.mxu0 %v3716_v58  ;;  %7681 = vmatprep.subr.msk.bf16.mxu1 %vm467_vm4, %v8835_v34  ;;  %v841_v21 = vpop.f32.mrf.mxu1  ;;  %v9275_v23 = vpop.permute.xlu1 %3700 }
 0x204   : > { %v9278_v8 = vadd.f32 %v841_v21, %v9193_v19  ;;  %v1099_v4 = vpop.f32.mrf.mxu0  ;;  %5086 = vrot.lane.b32.xlu0 %v8866_v44, %s8174_s22  ;;  %v3710_v9 = vsel %vm3704_vm14, %v3699_v41, %v9275_v23  ;;  %3444 = vmatprep.mubr.bf16.mxu1 %v8154_v1 }
 0x205   : > { %v9286_v22 = vadd.f32 %v1099_v4, %v9196_v28  ;;  %v843_v5 = vpop.f32.mrf.mxu1  ;;  %5528 = vrot.lane.b32.xlu1 %v8980_v32, %s8176_s30  ;;  %7692 = vmatprep.subr.msk.bf16.mxu0 %vm467_vm4, %v3710_v9 }
 0x206   : > { %v1101_v34 = vpop.f32.mrf.mxu0  ;;  %v9291_v3 = vpop.permute.xlu0 %3923  ;;  %3771 = vmatprep.mubr.bf16.mxu0 %v8154_v1  ;;  %v9391_v5 = vld [vmem:[%s11270_s1 + $0x3c] sm:$0xf] }
 0x207   : > { %v844_v19 = vpop.f32.mrf.mxu1  ;;  %v3916_v10 = vpop.permute.xlu1 %3915 }
 0x208   : > { %v1102_v28 = vpop.f32.mrf.mxu0  ;;  %5536 = vrot.lane.b32.xlu0 %v9022_v48, %s8176_s30  ;;  %v3931_v29 = vsel %vm3929_vm0, %v3916_v10, %v9268_v6 }
 0x209   : > { %v921_v12 = vpop.f32.mrf.mxu1  ;;  %5532 = vrot.lane.b32.xlu1 %v9004_v42, %s8176_s30  ;;  %7669 = vmatmul.mubr.msk.bf16.vlgmr.msra.gmra.mxu1 %vm521_vm15, %v9123_v20 }
 0x20a   : > { %v9312_v30 = vadd.f32 %v921_v12, %v9217_v36  ;;  %v1271_v24 = vpop.f32.mrf.mxu0  ;;  %3570 = vmatpush1.bf16.msra.mxu1 %v3497_v52  ;;  %7689 = vmatmul.mubr.msk.bf16.vlgmr.msra.gmra.mxu0 %vm521_vm15, %v9299_v27  ;;  %v3695_v62 = vpop.permute.xlu0 %3694 }
 0x20b   : > { %v9318_v18 = vadd.f32 %v1271_v24, %v9231_v45  ;;  %3836 = vmatpush1.bf16.msra.mxu0 %v3728_v31  ;;  %7685 = vmatprep.subr.msk.bf16.mxu1 %vm467_vm4, %v8866_v44  ;;  %v923_v57 = vpop.f32.mrf.mxu1  ;;  %v9322_v20 = vpop.permute.xlu1 %3921  ;;  %v3930_v45 = vsel %vm3929_vm0, %v9248_v50, %v3916_v10  ;;  %v3708_v49 = vsel %vm3704_vm14, %v3695_v62, %v9253_v53 }
 0x20c   : > { %7697 = vmatprep.subr.msk.bf16.mxu0 %vm467_vm4, %v3931_v29  ;;  %v9326_v36 = vadd.f32 %v923_v57, %v9233_v16  ;;  %v1273_v15 = vpop.f32.mrf.mxu0  ;;  %5540 = vrot.lane.b32.xlu0 %v8803_v25, %s8176_s30  ;;  %v3941_v50 = vsel %vm467_vm4, %v3930_v45, 0 }
 0x20d   : > { %v9331_v0 = vadd.f32 %v1273_v15, %v9241_v11  ;;  %v925_v37 = vpop.f32.mrf.mxu1  ;;  %5088 = vrot.lane.b32.xlu1 %v9134_v17, %s8174_s22  ;;  %3587 = vmatprep.mubr.bf16.mxu1 %v8154_v1  ;;  %v3509_v11 = vsel %vm467_vm4, %v8803_v25, 0 }
 0x20e   : > { %v1275_v38 = vpop.f32.mrf.mxu0  ;;  %v9336_v41 = vpop.permute.xlu0 %4140  ;;  %3853 = vmatprep.mubr.bf16.mxu0 %v8154_v1 }
 0x20f   : > { %v926_v16 = vpop.f32.mrf.mxu1  ;;  %v9341_v60 = vpop.permute.xlu1 %3925 }
 0x210   : > { %v1276_v46 = vpop.f32.mrf.mxu0  ;;  %5756 = vrot.lane.b32.xlu0 %v8980_v32, %s8177_s11  ;;  %v3935_v43 = vsel %vm3929_vm0, %v9291_v3, %v9341_v60 }
 0x211   : > { %v1056_v47 = vpop.f32.mrf.mxu1  ;;  %5538 = vrot.lane.b32.xlu1 %v8998_v40, %s8176_s30  ;;  %7682 = vmatmul.mubr.msk.bf16.vlgmr.msra.gmra.mxu1 %vm521_vm15, %v9213_v35 }
 0x212   : > { %v9355_v14 = vadd.f32 %v1056_v47, %v9263_v55  ;;  %v1353_v39 = vpop.f32.mrf.mxu0  ;;  %3652 = vmatpush1.bf16.msra.mxu1 %v3509_v11  ;;  %7693 = vmatmul.mubr.msk.bf16.vlgmr.msra.gmra.mxu0 %vm521_vm15, %v9299_v27  ;;  %v3703_v51 = vpop.permute.xlu0 %3702 }
 0x213   : > { %v9363_v54 = vadd.f32 %v1353_v39, %v9271_v59  ;;  %3979 = vmatpush1.bf16.msra.mxu0 %v3941_v50  ;;  %7690 = vmatprep.subr.msk.bf16.mxu1 %vm467_vm4, %v3708_v49  ;;  %v1058_v61 = vpop.f32.mrf.mxu1  ;;  %v4139_v13 = vpop.permute.xlu1 %4138  ;;  %v3707_v59 = vsel %vm3704_vm14, %v9191_v63, %v3695_v62 }
 0x214   : > { %7701 = vmatprep.subr.msk.bf16.mxu0 %vm467_vm4, %v3935_v43  ;;  %v9368_v55 = vadd.f32 %v1058_v61, %v9278_v8  ;;  %v1355_v33 = vpop.f32.mrf.mxu0  ;;  %5760 = vrot.lane.b32.xlu0 %v9004_v42, %s8177_s11  ;;  %v3934_v8 = vsel %vm3929_vm0, %v9322_v20, %v9291_v3  ;;  %v3722_v3 = vsel %vm467_vm4, %v3707_v59, 0 }
 0x215   : > { %v9373_v53 = vadd.f32 %v1355_v33, %v9286_v22  ;;  %v1060_v58 = vpop.f32.mrf.mxu1  ;;  %5306 = vrot.lane.b32.xlu1 %v9073_v7, %s8175_s25  ;;  %3669 = vmatprep.mubr.bf16.mxu1 %v8154_v1  ;;  %v3953_v28 = vsel %vm467_vm4, %v3934_v8, 0 }
 0x216   : > { %v1357_v21 = vpop.f32.mrf.mxu0  ;;  %v9380_v4 = vpop.permute.xlu0 %4148  ;;  %3996 = vmatprep.mubr.bf16.mxu0 %v8154_v1  ;;  %v9483_v58 = vld [vmem:[%s11270_s1 + $0x40] sm:$0xf] }
 0x217   : > { %v1061_v9 = vpop.f32.mrf.mxu1  ;;  %v9386_v22 = vpop.permute.xlu1 %4142 }
 0x218   : > { %v1358_v34 = vpop.f32.mrf.mxu0  ;;  %5316 = vrot.lane.b32.xlu0 %v9134_v17, %s8175_s25  ;;  %v4156_v63 = vsel %vm4154_vm1, %v9336_v41, %v9386_v22 }
 0x219   : > { %v1138_v56 = vpop.f32.mrf.mxu1  ;;  %5758 = vrot.lane.b32.xlu1 %v8965_v26, %s8177_s11  ;;  %7686 = vmatmul.mubr.msk.bf16.vlgmr.msra.gmra.mxu1 %vm521_vm15, %v9213_v35 }
 0x21a   : > { %v9404_v19 = vadd.f32 %v1138_v56, %v9312_v30  ;;  %v1499_v10 = vpop.f32.mrf.mxu0  ;;  %3795 = vmatpush1.bf16.msra.mxu1 %v3722_v3  ;;  %7698 = vmatmul.mubr.msk.bf16.vlgmr.msra.gmra.mxu0 %vm521_vm15, %v9391_v5  ;;  %v3920_v12 = vpop.permute.xlu0 %3919 }
 0x21b   : > { %v9410_v52 = vadd.f32 %v1499_v10, %v9318_v18  ;;  %4061 = vmatpush1.bf16.msra.mxu0 %v3953_v28  ;;  %7694 = vmatprep.subr.msk.bf16.mxu1 %vm467_vm4, %v3703_v51  ;;  %v1140_v35 = vpop.f32.mrf.mxu1  ;;  %v9413_v29 = vpop.permute.xlu1 %4146  ;;  %v3711_v18 = vsel %vm3704_vm14, %v9275_v23, %v3703_v51  ;;  %v3933_v46 = vsel %vm3929_vm0, %v3920_v12, %v9322_v20  ;;  %vm6458_vm14 = vcmask 138240  }
 0x21c   : > { %7706 = vmatprep.subr.msk.bf16.mxu0 %vm467_vm4, %v4156_v63  ;;  %v9417_v30 = vadd.f32 %v1140_v35, %v9326_v36  ;;  %v1501_v24 = vpop.f32.mrf.mxu0  ;;  %5766 = vrot.lane.b32.xlu0 %v8998_v40, %s8177_s11  ;;  %v4155_v36 = vsel %vm4154_vm1, %v4139_v13, %v9336_v41  ;;  %v3734_v45 = vsel %vm467_vm4, %v3711_v18, 0  ;;  %v3932_v61 = vsel %vm3929_vm0, %v9268_v6, %v3920_v12 }
 0x21d   : > { %v9422_v31 = vadd.f32 %v1501_v24, %v9331_v0  ;;  %v1142_v62 = vpop.f32.mrf.mxu1  ;;  %5314 = vrot.lane.b32.xlu1 %v8866_v44, %s8175_s25  ;;  %3812 = vmatprep.mubr.bf16.mxu1 %v8154_v1  ;;  %v4166_v41 = vsel %vm467_vm4, %v4155_v36, 0  ;;  %v4159_v33 = vsel %vm4154_vm1, %v9413_v29, %v9380_v4  ;;  %v3947_v6 = vsel %vm467_vm4, %v3932_v61, 0 }
 0x21e   : > { %v1503_v57 = vpop.f32.mrf.mxu0  ;;  %v9429_v15 = vpop.permute.xlu0 %4365  ;;  %4078 = vmatprep.mubr.bf16.mxu0 %v8154_v1 }
 0x21f   : > { %v1143_v37 = vpop.f32.mrf.mxu1  ;;  %v9434_v0 = vpop.permute.xlu1 %4150 }
 0x220   : > { %v1504_v38 = vpop.f32.mrf.mxu0  ;;  %5534 = vrot.lane.b32.xlu0 %v9073_v7, %s8176_s30  ;;  %v4160_v23 = vsel %vm4154_vm1, %v9380_v4, %v9434_v0  ;;  %v4178_v4 = vsel %vm467_vm4, %v4159_v33, 0 }
 0x221   : > { %v1312_v16 = vpop.f32.mrf.mxu1  ;;  %5764 = vrot.lane.b32.xlu1 %v9022_v48, %s8177_s11  ;;  %7691 = vmatmul.mubr.msk.bf16.vlgmr.msra.gmra.mxu1 %vm521_vm15, %v9299_v27 }
 0x222   : > { %v9450_v47 = vadd.f32 %v1312_v16, %v9355_v14  ;;  %v1581_v11 = vpop.f32.mrf.mxu0  ;;  %3877 = vmatpush1.bf16.msra.mxu1 %v3734_v45  ;;  %7702 = vmatmul.mubr.msk.bf16.vlgmr.msra.gmra.mxu0 %vm521_vm15, %v9391_v5  ;;  %v3928_v43 = vpop.permute.xlu0 %3927 }
 0x223   : > { %v9455_v39 = vadd.f32 %v1581_v11, %v9363_v54  ;;  %4204 = vmatpush1.bf16.msra.mxu0 %v4166_v41  ;;  %7699 = vmatprep.subr.msk.bf16.mxu1 %vm467_vm4, %v3933_v46  ;;  %v1314_v50 = vpop.f32.mrf.mxu1  ;;  %v4364_v49 = vpop.permute.xlu1 %4363  ;;  %v3936_v12 = vsel %vm3929_vm0, %v9341_v60, %v3928_v43 }
 0x224   : > { %7710 = vmatprep.subr.msk.bf16.mxu0 %vm467_vm4, %v4160_v23  ;;  %v9460_v20 = vadd.f32 %v1314_v50, %v9368_v55  ;;  %v1583_v14 = vpop.f32.mrf.mxu0  ;;  %5986 = vrot.lane.b32.xlu0 %v8965_v26, %s8178_s15  ;;  %v4380_v24 = vsel %vm4379_vm2, %v4364_v49, %v9429_v15  ;;  %v3959_v60 = vsel %vm467_vm4, %v3936_v12, 0 }
 0x225   : > { %v9465_v51 = vadd.f32 %v1583_v14, %v9373_v53  ;;  %5768 = vrot.lane.b32.xlu1 %v8803_v25, %s8177_s11  ;;  %3894 = vmatprep.mubr.bf16.mxu1 %v8154_v1  ;;  %v1316_v54 = vpop.f32.mrf.mxu1 }
 0x226   : > { %v1585_v13 = vpop.f32.mrf.mxu0  ;;  %v9472_v55 = vpop.permute.xlu0 %4373  ;;  %4221 = vmatprep.mubr.bf16.mxu0 %v8154_v1  ;;  %v9572_v54 = vld [vmem:[%s11270_s1 + $0x44] sm:$0xf] }
 0x227   : > { %v9478_v53 = vpop.permute.xlu1 %4367  ;;  %v1317_v59 = vpop.f32.mrf.mxu1 }
 0x228   : > { %v1586_v21 = vpop.f32.mrf.mxu0  ;;  %5542 = vrot.lane.b32.xlu0 %v8866_v44, %s8176_s30  ;;  %v4381_v8 = vsel %vm4379_vm2, %v9429_v15, %v9478_v53 }
 0x229   : > { %5984 = vrot.lane.b32.xlu1 %v8980_v32, %s8178_s15  ;;  %7695 = vmatmul.mubr.msk.bf16.vlgmr.msra.gmra.mxu1 %vm521_vm15, %v9299_v27 }
 0x22a   : > { %v1727_v9 = vpop.f32.mrf.mxu0  ;;  %4020 = vmatpush1.bf16.msra.mxu1 %v3947_v6  ;;  %7707 = vmatmul.mubr.msk.bf16.vlgmr.msra.gmra.mxu0 %vm521_vm15, %v9483_v58  ;;  %v4145_v34 = vpop.permute.xlu0 %4144 }
 0x22b   : > { %v9499_v63 = vadd.f32 %v1727_v9, %v9410_v52  ;;  %4286 = vmatpush1.bf16.msra.mxu0 %v4178_v4  ;;  %7703 = vmatprep.subr.msk.bf16.mxu1 %vm467_vm4, %v3928_v43  ;;  %v9502_v56 = vpop.permute.xlu1 %4371  ;;  %v4158_v15 = vsel %vm4154_vm1, %v4145_v34, %v9413_v29  ;;  %v4157_v11 = vsel %vm4154_vm1, %v9386_v22, %v4145_v34 }
 0x22c   : > { %7715 = vmatprep.subr.msk.bf16.mxu0 %vm467_vm4, %v4381_v8  ;;  %v1729_v3 = vpop.f32.mrf.mxu0  ;;  %5992 = vrot.lane.b32.xlu0 %v9022_v48, %s8178_s15  ;;  %v1394_v27 = vpop.f32.mrf.mxu1  ;;  %v4384_v49 = vsel %vm4379_vm2, %v9502_v56, %v9472_v55  ;;  %v4172_v61 = vsel %vm467_vm4, %v4157_v11, 0 }
 0x22d   : > { %v9508_v10 = vadd.f32 %v1729_v3, %v9422_v31  ;;  %v9511_v28 = vadd.f32 %v1394_v27, %v9404_v19  ;;  %5988 = vrot.lane.b32.xlu1 %v9004_v42, %s8178_s15  ;;  %4037 = vmatprep.mubr.bf16.mxu1 %v8154_v1 }
 0x22e   : > { %v1731_v52 = vpop.f32.mrf.mxu0  ;;  %v9518_v35 = vpop.permute.xlu0 %4618  ;;  %4303 = vmatprep.mubr.bf16.mxu0 %v8154_v1 }
 0x22f   : > { %v1396_v31 = vpop.f32.mrf.mxu1  ;;  %v9523_v62 = vpop.permute.xlu1 %4375 }
 0x230   : > { %v9526_v19 = vadd.f32 %v1396_v31, %v9417_v30  ;;  %v1732_v18 = vpop.f32.mrf.mxu0  ;;  %5996 = vrot.lane.b32.xlu0 %v8803_v25, %s8178_s15  ;;  %v4385_v57 = vsel %vm4379_vm2, %v9472_v55, %v9523_v62  ;;  %v4391_v30 = vsel %vm467_vm4, %v4380_v24, 0 }
 0x231   : > { %v1398_v36 = vpop.f32.mrf.mxu1  ;;  %5544 = vrot.lane.b32.xlu1 %v9134_v17, %s8176_s30  ;;  %7700 = vmatmul.mubr.msk.bf16.vlgmr.msra.gmra.mxu1 %vm521_vm15, %v9391_v5 }
 0x232   : > { %v1809_v37 = vpop.f32.mrf.mxu0  ;;  %4102 = vmatpush1.bf16.msra.mxu1 %v3959_v60  ;;  %7711 = vmatmul.mubr.msk.bf16.vlgmr.msra.gmra.mxu0 %vm521_vm15, %v9483_v58  ;;  %v4153_v38 = vpop.permute.xlu0 %4152 }
 0x233   : > { %v9544_v45 = vadd.f32 %v1809_v37, %v9455_v39  ;;  %4429 = vmatpush1.bf16.msra.mxu0 %v4391_v30  ;;  %7708 = vmatprep.subr.msk.bf16.mxu1 %vm467_vm4, %v4158_v15  ;;  %v1399_v23 = vpop.f32.mrf.mxu1  ;;  %v4617_v16 = vpop.permute.xlu1 %4616  ;;  %v4161_v34 = vsel %vm4154_vm1, %v9434_v0, %v4153_v38 }
 0x234   : > { %7719 = vmatprep.subr.msk.bf16.mxu0 %vm467_vm4, %v4385_v57  ;;  %v1811_v41 = vpop.f32.mrf.mxu0  ;;  %6212 = vrot.lane.b32.xlu0 %v8980_v32, %s8179_s18 }
 0x235   : > { %v9551_v29 = vadd.f32 %v1811_v41, %v9465_v51  ;;  %v1540_v46 = vpop.f32.mrf.mxu1  ;;  %5994 = vrot.lane.b32.xlu1 %v8998_v40, %s8178_s15  ;;  %4119 = vmatprep.mubr.bf16.mxu1 %v8154_v1 }
 0x236   : > { %v9559_v43 = vadd.f32 %v1540_v46, %v9450_v47  ;;  %v1813_v39 = vpop.f32.mrf.mxu0  ;;  %v9561_v50 = vpop.permute.xlu0 %4626  ;;  %4446 = vmatprep.mubr.bf16.mxu0 %v8154_v1 }
 0x237   : > { %v1542_v14 = vpop.f32.mrf.mxu1  ;;  %v9567_v51 = vpop.permute.xlu1 %4620 }
 0x238   : > { %v9575_v22 = vadd.f32 %v1542_v14, %v9460_v20  ;;  %v1814_v47 = vpop.f32.mrf.mxu0  ;;  %6216 = vrot.lane.b32.xlu0 %v9004_v42, %s8179_s18  ;;  %v4636_v13 = vsel %vm4634_vm3, %v9518_v35, %v9567_v51  ;;  %v4403_v20 = vsel %vm467_vm4, %v4384_v49, 0 }
 0x239   : > { %v1544_v55 = vpop.f32.mrf.mxu1  ;;  %5762 = vrot.lane.b32.xlu1 %v9073_v7, %s8177_s11  ;;  %7704 = vmatmul.mubr.msk.bf16.vlgmr.msra.gmra.mxu1 %vm521_vm15, %v9391_v5 }
 0x23a   : > { %v1955_v33 = vpop.f32.mrf.mxu0  ;;  %4245 = vmatpush1.bf16.msra.mxu1 %v4172_v61  ;;  %7716 = vmatmul.mubr.msk.bf16.vlgmr.msra.gmra.mxu0 %vm521_vm15, %v9572_v54  ;;  %v4370_v59 = vpop.permute.xlu0 %4369 }
 0x23b   : > { %v9591_v21 = vadd.f32 %v1955_v33, %v9499_v63  ;;  %4511 = vmatpush1.bf16.msra.mxu0 %v4403_v20  ;;  %7712 = vmatprep.subr.msk.bf16.mxu1 %vm467_vm4, %v4153_v38  ;;  %v1545_v6 = vpop.f32.mrf.mxu1  ;;  %v9594_v8 = vpop.permute.xlu1 %4624 }
 0x23c   : > { %7733 = vmatprep.subr.msk.bf16.mxu0 %vm467_vm4, %v4636_v13  ;;  %v1957_v5 = vpop.f32.mrf.mxu0  ;;  %5772 = vrot.lane.b32.xlu0 %v9134_v17, %s8177_s11 }
 0x23d   : > { %v9600_v4 = vadd.f32 %v1957_v5, %v9508_v10  ;;  %v1622_v9 = vpop.f32.mrf.mxu1  ;;  %6214 = vrot.lane.b32.xlu1 %v8965_v26, %s8179_s18  ;;  %4262 = vmatprep.mubr.bf16.mxu1 %v8154_v1  ;;  %v4635_v10 = vsel %vm4634_vm3, %v4617_v16, %v9518_v35  ;;  %v4639_v16 = vsel %vm4634_vm3, %v9594_v8, %v9561_v50 }
 0x23e   : > { %v9608_v63 = vadd.f32 %v1622_v9, %v9511_v28  ;;  %v9610_v3 = vpop.permute.xlu0 %4846  ;;  %4528 = vmatprep.mubr.bf16.mxu0 %v8154_v1  ;;  %v1959_v27 = vpop.f32.mrf.mxu0  ;;  %v4184_v28 = vsel %vm467_vm4, %v4161_v34, 0  ;;  %v4647_v35 = vsel %vm467_vm4, %v4635_v10, 0  ;;  %v4659_v14 = vsel %vm467_vm4, %v4639_v16, 0 }
 0x23f   : > { %v1624_v12 = vpop.f32.mrf.mxu1  ;;  %v9615_v52 = vpop.permute.xlu1 %4628 }
 0x240   : > { %v9618_v24 = vadd.f32 %v1624_v12, %v9526_v19  ;;  %6222 = vrot.lane.b32.xlu0 %v8998_v40, %s8179_s18  ;;  %v1960_v0 = vpop.f32.mrf.mxu0  ;;  %v4640_v31 = vsel %vm4634_vm3, %v9561_v50, %v9615_v52  ;;  %v4383_v19 = vsel %vm4379_vm2, %v4370_v59, %v9502_v56  ;;  %v4382_v56 = vsel %vm4379_vm2, %v9478_v53, %v4370_v59  ;;  %v9659_v53 = vld [vmem:[%s11270_s1 + $0x48] sm:$0xf] }
 0x241   : > { %v1626_v18 = vpop.f32.mrf.mxu1  ;;  %5770 = vrot.lane.b32.xlu1 %v8866_v44, %s8177_s11  ;;  %7709 = vmatmul.mubr.msk.bf16.vlgmr.msra.gmra.mxu1 %vm521_vm15, %v9483_v58  ;;  %v4397_v39 = vsel %vm467_vm4, %v4382_v56, 0 }
 0x242   : > { %4327 = vmatpush1.bf16.msra.mxu1 %v4184_v28  ;;  %7720 = vmatmul.mubr.msk.bf16.vlgmr.msra.gmra.mxu0 %vm521_vm15, %v9572_v54  ;;  %v4378_v60 = vpop.permute.xlu0 %4377 }
 0x243   : > { %4685 = vmatpush1.bf16.msra.mxu0 %v4647_v35  ;;  %7717 = vmatprep.subr.msk.bf16.mxu1 %vm467_vm4, %v4383_v19  ;;  %v1627_v57 = vpop.f32.mrf.mxu1  ;;  %v4845_v36 = vpop.permute.xlu1 %4844 }
 0x244   : > { %7737 = vmatprep.subr.msk.bf16.mxu0 %vm467_vm4, %v4640_v31  ;;  %5990 = vrot.lane.b32.xlu0 %v9073_v7, %s8178_s15  ;;  %v4863_v20 = vsel %vm4862_vm5, %v4845_v36, %v9610_v3 }
 0x245   : > { %v1768_v30 = vpop.f32.mrf.mxu1  ;;  %v2037_v15 = vpop.f32.mrf.mxu0  ;;  %6220 = vrot.lane.b32.xlu1 %v9022_v48, %s8179_s18  ;;  %4344 = vmatprep.mubr.bf16.mxu1 %v8154_v1 }
 0x246   : > { %v9645_v37 = vadd.f32 %v1768_v30, %v9559_v43  ;;  %v9648_v38 = vadd.f32 %v2037_v15, %v9544_v45  ;;  %v9650_v23 = vpop.permute.xlu0 %4854  ;;  %4702 = vmatprep.mubr.bf16.mxu0 %v8154_v1 }
 0x247   : > { %v1770_v41 = vpop.f32.mrf.mxu1  ;;  %v2039_v46 = vpop.f32.mrf.mxu0 }
 0x248   : > { %v9662_v11 = vadd.f32 %v1770_v41, %v9575_v22  ;;  %v9665_v45 = vadd.f32 %v2039_v46, %v9551_v29  ;;  %v9667_v43 = vpop.permute.xlu1 %4848  ;;  %6442 = vrot.lane.b32.xlu0 %v8965_v26, %s8180_s23 }
 0x249   : > { %v4864_v50 = vsel %vm4862_vm5, %v9610_v3, %v9667_v43  ;;  %v2041_v49 = vpop.f32.mrf.mxu0  ;;  %6224 = vrot.lane.b32.xlu1 %v8803_v25, %s8179_s18  ;;  %7713 = vmatmul.mubr.msk.bf16.vlgmr.msra.gmra.mxu1 %vm521_vm15, %v9483_v58  ;;  %v1772_v29 = vpop.f32.mrf.mxu1  ;;  %v4386_v58 = vsel %vm4379_vm2, %v9523_v62, %v4378_v60 }
 0x24a   : > { %4470 = vmatpush1.bf16.msra.mxu1 %v4397_v39  ;;  %7734 = vmatmul.mubr.msk.bf16.vlgmr.msra.gmra.mxu0 %vm521_vm15, %v9659_v53  ;;  %v4623_v26 = vpop.permute.xlu0 %4622 }
 0x24b   : > { %4767 = vmatpush1.bf16.msra.mxu0 %v4659_v14  ;;  %7721 = vmatprep.subr.msk.bf16.mxu1 %vm467_vm4, %v4378_v60  ;;  %v2042_v22 = vpop.f32.mrf.mxu0  ;;  %v1773_v47 = vpop.f32.mrf.mxu1  ;;  %v4638_v34 = vsel %vm4634_vm3, %v4623_v26, %v9594_v8  ;;  %v4637_v0 = vsel %vm4634_vm3, %v9567_v51, %v4623_v26 }
 0x24c   : > { %7742 = vmatprep.subr.msk.bf16.mxu0 %vm467_vm4, %v4864_v50  ;;  %v9684_v61 = vpop.permute.xlu1 %4852  ;;  %5998 = vrot.lane.b32.xlu0 %v8866_v44, %s8178_s15  ;;  %v4653_v60 = vsel %vm467_vm4, %v4637_v0, 0 }
 0x24d   : > { %6440 = vrot.lane.b32.xlu1 %v8980_v32, %s8180_s23  ;;  %4487 = vmatprep.mubr.bf16.mxu1 %v8154_v1  ;;  %v4409_v32 = vsel %vm467_vm4, %v4386_v58, 0 }
 0x24e   : > { %v2183_v13 = vpop.f32.mrf.mxu0  ;;  %v9693_v55 = vpop.permute.xlu0 %5074  ;;  %4784 = vmatprep.mubr.bf16.mxu0 %v8154_v1 }
 0x24f   : > { %v9699_v33 = vadd.f32 %v2183_v13, %v9591_v21  ;;  %v4875_v21 = vsel %vm467_vm4, %v4863_v20, 0 }
 0x250   : > { %v2185_v59 = vpop.f32.mrf.mxu0  ;;  %v9701_v6 = vpop.permute.xlu1 %4856  ;;  %6218 = vrot.lane.b32.xlu0 %v9073_v7, %s8179_s18 }
 0x251   : > { %v9707_v62 = vadd.f32 %v2185_v59, %v9600_v4  ;;  %v4868_v5 = vsel %vm4862_vm5, %v9650_v23, %v9701_v6  ;;  %v1850_v9 = vpop.f32.mrf.mxu1  ;;  %6444 = vrot.lane.b32.xlu1 %v9004_v42, %s8180_s23  ;;  %7718 = vmatmul.mubr.msk.bf16.vlgmr.msra.gmra.mxu1 %vm521_vm15, %v9572_v54 }
 0x252   : > { %v9720_v3 = vadd.f32 %v1850_v9, %v9608_v63  ;;  %v2187_v4 = vpop.f32.mrf.mxu0  ;;  %4552 = vmatpush1.bf16.msra.mxu1 %v4409_v32  ;;  %7738 = vmatmul.mubr.msk.bf16.vlgmr.msra.gmra.mxu0 %vm521_vm15, %v9659_v53  ;;  %v4631_v27 = vpop.permute.xlu0 %4630 }
 0x253   : > { %4913 = vmatpush1.bf16.msra.mxu0 %v4875_v21  ;;  %7735 = vmatprep.subr.msk.bf16.mxu1 %vm467_vm4, %v4638_v34  ;;  %v1852_v42 = vpop.f32.mrf.mxu1 }
 0x254   : > { %7746 = vmatprep.subr.msk.bf16.mxu0 %vm467_vm4, %v4868_v5  ;;  %v9727_v10 = vadd.f32 %v1852_v42, %v9618_v24  ;;  %v2188_v12 = vpop.f32.mrf.mxu0  ;;  %v5073_v8 = vpop.permute.xlu1 %5072  ;;  %6228 = vrot.lane.b32.xlu0 %v9134_v17, %s8179_s18  ;;  %v4867_v24 = vsel %vm4862_vm5, %v9684_v61, %v9650_v23 }
 0x255   : > { %v1854_v63 = vpop.f32.mrf.mxu1  ;;  %6000 = vrot.lane.b32.xlu1 %v9134_v17, %s8178_s15  ;;  %4569 = vmatprep.mubr.bf16.mxu1 %v8154_v1  ;;  %v9748_v17 = vld [vmem:[%s11270_s1 + $0x4c] sm:$0xf]  ;;  %v4887_v15 = vsel %vm467_vm4, %v4867_v24, 0  ;;  %v5091_v50 = vsel %vm5090_vm6, %v5073_v8, %v9693_v55 }
 0x256   : > { %v2265_v28 = vpop.f32.mrf.mxu0  ;;  %v9736_v31 = vpop.permute.xlu0 %5080  ;;  %4930 = vmatprep.mubr.bf16.mxu0 %v8154_v1  ;;  %v5103_v47 = vsel %vm467_vm4, %v5091_v50, 0 }
 0x257   : > { %v9743_v18 = vadd.f32 %v2265_v28, %v9648_v38  ;;  %v1855_v35 = vpop.f32.mrf.mxu1 }
 0x258   : > { %v2267_v51 = vpop.f32.mrf.mxu0  ;;  %v9750_v19 = vpop.permute.xlu1 %5076  ;;  %6448 = vrot.lane.b32.xlu0 %v9022_v48, %s8180_s23 }
 0x259   : > { %v9756_v57 = vadd.f32 %v2267_v51, %v9665_v45  ;;  %v5092_v36 = vsel %vm5090_vm6, %v9693_v55, %v9750_v19  ;;  %v1996_v30 = vpop.f32.mrf.mxu1  ;;  %6226 = vrot.lane.b32.xlu1 %v8866_v44, %s8179_s18  ;;  %7722 = vmatmul.mubr.msk.bf16.vlgmr.msra.gmra.mxu1 %vm521_vm15, %v9572_v54  ;;  %v4641_v45 = vsel %vm4634_vm3, %v9615_v52, %v4631_v27 }
 0x25a   : > { %v9767_v48 = vadd.f32 %v1996_v30, %v9645_v37  ;;  %v2269_v56 = vpop.f32.mrf.mxu0  ;;  %4726 = vmatpush1.bf16.msra.mxu1 %v4653_v60  ;;  %7743 = vmatmul.mubr.msk.bf16.vlgmr.msra.gmra.mxu0 %vm521_vm15, %v9748_v17  ;;  %v9771_v38 = vpop.permute.xlu0 %5084 }
 0x25b   : > { %4995 = vmatpush1.bf16.msra.mxu0 %v4887_v15  ;;  %v1998_v23 = vpop.f32.mrf.mxu1  ;;  %4743 = vmatprep.mubr.bf16.mxu1 %v8154_v1 }
 0x25c   : > { %7751 = vmatprep.subr.msk.bf16.mxu0 %vm467_vm4, %v5092_v36  ;;  %v9776_v54 = vadd.f32 %v1998_v23, %v9662_v11  ;;  %v2270_v16 = vpop.f32.mrf.mxu0  ;;  %v4633_v41 = vpop.permute.xlu1 %4632  ;;  %6454 = vrot.lane.b32.xlu0 %v8866_v44, %s8180_s23 }
 0x25d   : > { %v4642_v37 = vsel %vm4634_vm3, %v4631_v27, %v4633_v41  ;;  %v2000_v46 = vpop.f32.mrf.mxu1  ;;  %6446 = vrot.lane.b32.xlu1 %v9073_v7, %s8180_s23  ;;  %5012 = vmatprep.mubr.bf16.mxu0 %v8154_v1  ;;  %v4665_v7 = vsel %vm467_vm4, %v4641_v45, 0 }
 0x25e   : > { %v2411_v39 = vpop.f32.mrf.mxu0  ;;  %7739 = vmatprep.subr.msk.bf16.mxu1 %vm467_vm4, %v4642_v37  ;;  %v9787_v11 = vpop.permute.xlu0 %5300 }
 0x25f   : > { %v9792_v44 = vadd.f32 %v2411_v39, %v9699_v33  ;;  %v2001_v49 = vpop.f32.mrf.mxu1 }
 0x260   : > { %v2413_v29 = vpop.f32.mrf.mxu0  ;;  %v5083_v14 = vpop.permute.xlu1 %5082  ;;  %6450 = vrot.lane.b32.xlu0 %v8998_v40, %s8180_s23 }
 0x261   : > { %v9798_v52 = vadd.f32 %v2413_v29, %v9707_v62  ;;  %v5096_v26 = vsel %vm5090_vm6, %v5083_v14, %v9771_v38  ;;  %v2078_v22 = vpop.f32.mrf.mxu1  ;;  %6452 = vrot.lane.b32.xlu1 %v8803_v25, %s8180_s23  ;;  %7736 = vmatmul.mubr.msk.bf16.vlgmr.msra.gmra.mxu1 %vm521_vm15, %v9659_v53  ;;  %v8096_v62 = vld [vmem:[#allocation2 + $0x24] ss:$0 sps:$4 sm:$0xff]   ;;  %v5095_v21 = vsel %vm5090_vm6, %v9736_v31, %v5083_v14 }
 0x262   : > { %v9808_v58 = vadd.f32 %v2078_v22, %v9720_v3  ;;  %4808 = vmatpush1.bf16.msra.mxu1 %v4665_v7  ;;  %7747 = vmatmul.mubr.msk.bf16.vlgmr.msra.gmra.mxu0 %vm521_vm15, %v9748_v17  ;;  %v9812_v40 = vpop.permute.xlu0 %5304  ;;  %v2415_v13 = vpop.f32.mrf.mxu0  ;;  %v9831_v3 = vld [vmem:[%s11270_s1 + $0x50] sm:$0xf]  ;;  %v5115_v42 = vsel %vm467_vm4, %v5095_v21, 0 }
 0x263   : > { %5141 = vmatpush1.bf16.msra.mxu0 %v5103_v47  ;;  %v2080_v55 = vpop.f32.mrf.mxu1  ;;  %4825 = vmatprep.mubr.bf16.mxu1 %v8154_v1 }
 0x264   : > { %7755 = vmatprep.subr.msk.bf16.mxu0 %vm467_vm4, %v5096_v26  ;;  %v9817_v25 = vadd.f32 %v2080_v55, %v9727_v10  ;;  %v4851_v20 = vpop.permute.xlu1 %4850  ;;  %v2416_v33 = vpop.f32.mrf.mxu0  ;;  %5158 = vmatprep.mubr.bf16.mxu0 %v8154_v1 }
 0x265   : > { %v4866_v59 = vsel %vm4862_vm5, %v4851_v20, %v9684_v61  ;;  %v2082_v32 = vpop.f32.mrf.mxu1  ;;  %6456 = vrot.lane.b32.xlu1 %v8096_v62, %s8180_s23  ;;  %v4865_v5 = vsel %vm4862_vm5, %v9667_v43, %v4851_v20 }
 0x266   : > { %7744 = vmatprep.subr.msk.bf16.mxu1 %vm467_vm4, %v4866_v59  ;;  %v4861_v9 = vpop.permute.xlu0 %4860  ;;  %v4881_v4 = vsel %vm467_vm4, %v4865_v5, 0 }
 0x267   : > { %v2083_v34 = vpop.f32.mrf.mxu1 }
 0x268   : > { %v5303_v61 = vpop.permute.xlu1 %5302 }
 0x269   : > { %v5320_v27 = vsel %vm5318_vm7, %v5303_v61, %v9812_v40  ;;  %v2224_v43 = vpop.f32.mrf.mxu1  ;;  %7740 = vmatmul.mubr.msk.bf16.vlgmr.msra.gmra.mxu1 %vm521_vm15, %v9659_v53  ;;  %v5319_v15 = vsel %vm5318_vm7, %v9787_v11, %v5303_v61 }
 0x26a   : > { %v9840_v10 = vadd.f32 %v2224_v43, %v9767_v48  ;;  %v2493_v12 = vpop.f32.mrf.mxu0  ;;  %4954 = vmatpush1.bf16.msra.mxu1 %v4881_v4  ;;  %7752 = vmatmul.mubr.msk.bf16.vlgmr.msra.gmra.mxu0 %vm521_vm15, %v9831_v3  ;;  %v5311_v8 = vpop.permute.xlu0 %5310 }
 0x26b   : > { %v2545_v63 = vadd.f32 %v2493_v12, %v9743_v18  ;;  %5223 = vmatpush1.bf16.msra.mxu0 %v5115_v42  ;;  %v2226_v0 = vpop.f32.mrf.mxu1  ;;  %4971 = vmatprep.mubr.bf16.mxu1 %v8154_v1 }
 0x26c   : > { %7760 = vmatprep.subr.msk.bf16.mxu0 %vm467_vm4, %v5320_v27  ;;  %v9848_v53 = vadd.f32 %v2226_v0, %v9776_v54  ;;  %v2495_v28 = vpop.f32.mrf.mxu0  ;;  %v4859_v24 = vpop.permute.xlu1 %4858  ;;  %5240 = vmatprep.mubr.bf16.mxu0 %v8154_v1 }
 0x26d   : > { %v2546_v35 = vadd.f32 %v2495_v28, %v9756_v57  ;;  %v4870_v51 = vsel %vm4862_vm5, %v4859_v24, %v4861_v9  ;;  %v2228_v60 = vpop.f32.mrf.mxu1  ;;  %v4869_v18 = vsel %vm4862_vm5, %v9701_v6, %v4859_v24  ;;  %v5331_v6 = vsel %vm467_vm4, %v5319_v15, 0 }
 0x26e   : > { %v2497_v36 = vpop.f32.mrf.mxu0  ;;  %7748 = vmatprep.subr.msk.bf16.mxu1 %vm467_vm4, %v4870_v51  ;;  %v5079_v30 = vpop.permute.xlu0 %5078  ;;  %v4893_v57 = vsel %vm467_vm4, %v4869_v18, 0 }
 0x26f   : > { %v2229_v48 = vpop.f32.mrf.mxu1  ;;  %v5094_v56 = vsel %vm5090_vm6, %v5079_v30, %v9736_v31  ;;  %v5093_v50 = vsel %vm5090_vm6, %v9750_v19, %v5079_v30 }
 0x270   : > { %v2498_v23 = vpop.f32.mrf.mxu0  ;;  %v9860_v54 = vpop.permute.xlu1 %5308  ;;  %v5109_v19 = vsel %vm467_vm4, %v5093_v50, 0 }
 0x271   : > { %7745 = vmatmul.mubr.msk.bf16.vlgmr.msra.gmra.mxu1 %vm521_vm15, %v9748_v17  ;;  %v5323_v14 = vsel %vm5318_vm7, %v9860_v54, %v5311_v8 }
 0x272   : > { %v2639_v16 = vpop.f32.mrf.mxu0  ;;  %5036 = vmatpush1.bf16.msra.mxu1 %v4893_v57  ;;  %7756 = vmatmul.mubr.msk.bf16.vlgmr.msra.gmra.mxu0 %vm521_vm15, %v9831_v3  ;;  %v5531_v41 = vpop.permute.xlu0 %5530  ;;  %v5343_v13 = vsel %vm467_vm4, %v5323_v14, 0  ;;  %v9941_v57 = vld [vmem:[%s11270_s1 + $0x58] sm:$0xf] }
 0x273   : > { %v2769_v37 = vadd.f32 %v2639_v16, %v9792_v44  ;;  %5369 = vmatpush1.bf16.msra.mxu0 %v5331_v6  ;;  %7753 = vmatprep.subr.msk.bf16.mxu1 %vm467_vm4, %v5094_v56 }
 0x274   : > { %v2641_v31 = vpop.f32.mrf.mxu0  ;;  %v9870_v46 = vpop.permute.xlu1 %5312  ;;  %5053 = vmatprep.mubr.bf16.mxu1 %v8154_v1  ;;  %5386 = vmatprep.mubr.bf16.mxu0 %v8154_v1 }
 0x275   : > { %v2770_v45 = vadd.f32 %v2641_v31, %v9798_v52  ;;  %v5324_v39 = vsel %vm5318_vm7, %v5311_v8, %v9870_v46  ;;  %v2306_v11 = vpop.f32.mrf.mxu1  ;;  %v9886_v52 = vld [vmem:[%s11270_s1 + $0x54] sm:$0xf] }
 0x276   : > { %v2319_v44 = vadd.f32 %v2306_v11, %v9808_v58  ;;  %v2643_v49 = vpop.f32.mrf.mxu0  ;;  %7764 = vmatprep.subr.msk.bf16.mxu0 %vm467_vm4, %v5324_v39  ;;  %v5087_v29 = vpop.permute.xlu0 %5086 }
 0x277   : > { %v2308_v7 = vpop.f32.mrf.mxu1  ;;  %v5097_v61 = vsel %vm5090_vm6, %v9771_v38, %v5087_v29 }
 0x278   : > { %v2320_v26 = vadd.f32 %v2308_v7, %v9817_v25  ;;  %v2644_v22 = vpop.f32.mrf.mxu0  ;;  %v5529_v47 = vpop.permute.xlu1 %5528 }
 0x279   : > { %v2310_v58 = vpop.f32.mrf.mxu1  ;;  %7749 = vmatmul.mubr.msk.bf16.vlgmr.msra.gmra.mxu1 %vm521_vm15, %v9748_v17  ;;  %v5547_v4 = vsel %vm5546_vm8, %v5529_v47, %v5531_v41 }
 0x27a   : > { %v2721_v55 = vpop.f32.mrf.mxu0  ;;  %5182 = vmatpush1.bf16.msra.mxu1 %v5109_v19  ;;  %7761 = vmatmul.mubr.msk.bf16.vlgmr.msra.gmra.mxu0 %vm521_vm15, %v9886_v52  ;;  %v9895_v20 = vpop.permute.xlu0 %5536  ;;  %v5559_v0 = vsel %vm467_vm4, %v5547_v4, 0 }
 0x27b   : > { %v9897_v33 = vadd.f32 %v2721_v55, %v2545_v63  ;;  %5451 = vmatpush1.bf16.msra.mxu0 %v5343_v13  ;;  %v2311_v25 = vpop.f32.mrf.mxu1  ;;  %5199 = vmatprep.mubr.bf16.mxu1 %v8154_v1 }
 0x27c   : > { %v2723_v59 = vpop.f32.mrf.mxu0  ;;  %v9900_v32 = vpop.permute.xlu1 %5532  ;;  %5468 = vmatprep.mubr.bf16.mxu0 %v8154_v1 }
 0x27d   : > { %v9903_v17 = vadd.f32 %v2723_v59, %v2546_v35  ;;  %v5548_v62 = vsel %vm5546_vm8, %v5531_v41, %v9900_v32  ;;  %v2452_v5 = vpop.f32.mrf.mxu1 }
 0x27e   : > { %v2543_v9 = vadd.f32 %v2452_v5, %v9840_v10  ;;  %v2725_v21 = vpop.f32.mrf.mxu0  ;;  %7769 = vmatprep.subr.msk.bf16.mxu0 %vm467_vm4, %v5548_v62  ;;  %v9909_v34 = vpop.permute.xlu0 %5540  ;;  %v5121_v10 = vsel %vm467_vm4, %v5097_v61, 0 }
 0x27f   : > { %v2454_v27 = vpop.f32.mrf.mxu1 }
 0x280   : > { %v2544_v43 = vadd.f32 %v2454_v27, %v9848_v53  ;;  %v2726_v42 = vpop.f32.mrf.mxu0  ;;  %v5089_v12 = vpop.permute.xlu1 %5088 }
 0x281   : > { %v5098_v8 = vsel %vm5090_vm6, %v5087_v29, %v5089_v12  ;;  %v2456_v63 = vpop.f32.mrf.mxu1  ;;  %7754 = vmatmul.mubr.msk.bf16.vlgmr.msra.gmra.mxu1 %vm521_vm15, %v9831_v3 }
 0x282   : > { %v2867_v28 = vpop.f32.mrf.mxu0  ;;  %7757 = vmatprep.subr.msk.bf16.mxu1 %vm467_vm4, %v5098_v8  ;;  %7765 = vmatmul.mubr.msk.bf16.vlgmr.msra.gmra.mxu0 %vm521_vm15, %v9886_v52  ;;  %v5757_v38 = vpop.permute.xlu0 %5756 }
 0x283   : > { %v9923_v53 = vadd.f32 %v2867_v28, %v2769_v37  ;;  %5597 = vmatpush1.bf16.msra.mxu0 %v5559_v0  ;;  %5264 = vmatpush1.bf16.msra.mxu1 %v5121_v10  ;;  %v2457_v24 = vpop.f32.mrf.mxu1 }
 0x284   : > { %v2869_v35 = vpop.f32.mrf.mxu0  ;;  %v5539_v51 = vpop.permute.xlu1 %5538  ;;  %5281 = vmatprep.mubr.bf16.mxu1 %v8154_v1  ;;  %5614 = vmatprep.mubr.bf16.mxu0 %v8154_v1 }
 0x285   : > { %v9927_v60 = vadd.f32 %v2869_v35, %v2770_v45  ;;  %v5552_v18 = vsel %vm5546_vm8, %v5539_v51, %v9909_v34  ;;  %v2534_v36 = vpop.f32.mrf.mxu1  ;;  %v5551_v56 = vsel %vm5546_vm8, %v9895_v20, %v5539_v51 }
 0x286   : > { %v9931_v30 = vadd.f32 %v2534_v36, %v2319_v44  ;;  %7773 = vmatprep.subr.msk.bf16.mxu0 %vm467_vm4, %v5552_v18  ;;  %v9934_v15 = vpop.permute.xlu0 %5760  ;;  %v2871_v48 = vpop.f32.mrf.mxu0  ;;  %v5571_v39 = vsel %vm467_vm4, %v5551_v56, 0 }
 0x287   : > { %v2536_v23 = vpop.f32.mrf.mxu1 }
 0x288   : > { %v9943_v6 = vadd.f32 %v2536_v23, %v2320_v26  ;;  %v5307_v16 = vpop.permute.xlu1 %5306  ;;  %v2872_v41 = vpop.f32.mrf.mxu0 }
 0x289   : > { %v5321_v37 = vsel %vm5318_vm7, %v9812_v40, %v5307_v16  ;;  %v5322_v31 = vsel %vm5318_vm7, %v5307_v16, %v9860_v54  ;;  %v2538_v45 = vpop.f32.mrf.mxu1  ;;  %7758 = vmatmul.mubr.msk.bf16.vlgmr.msra.gmra.mxu1 %vm521_vm15, %v9831_v3 }
 0x28a   : > { %v5337_v11 = vsel %vm467_vm4, %v5321_v37, 0  ;;  %7762 = vmatprep.subr.msk.bf16.mxu1 %vm467_vm4, %v5322_v31  ;;  %7770 = vmatmul.mubr.msk.bf16.vlgmr.msra.gmra.mxu0 %vm521_vm15, %v9941_v57  ;;  %v5317_v50 = vpop.permute.xlu0 %5316 }
 0x28b   : > { %5679 = vmatpush1.bf16.msra.mxu0 %v5571_v39  ;;  %5410 = vmatpush1.bf16.msra.mxu1 %v5337_v11  ;;  %v2539_v40 = vpop.f32.mrf.mxu1 }
 0x28c   : > { %v5759_v44 = vpop.permute.xlu1 %5758  ;;  %5427 = vmatprep.mubr.bf16.mxu1 %v8154_v1  ;;  %5696 = vmatprep.mubr.bf16.mxu0 %v8154_v1 }
 0x28d   : > { %v5776_v3 = vsel %vm5774_vm9, %v5759_v44, %v9934_v15  ;;  %v2680_v54 = vpop.f32.mrf.mxu1  ;;  %v5775_v7 = vsel %vm5774_vm9, %v5757_v38, %v5759_v44 }
 0x28e   : > { %v9960_v49 = vadd.f32 %v2680_v54, %v2543_v9  ;;  %v2949_v29 = vpop.f32.mrf.mxu0  ;;  %7778 = vmatprep.subr.msk.bf16.mxu0 %vm467_vm4, %v5776_v3  ;;  %v5767_v14 = vpop.permute.xlu0 %5766  ;;  %v5787_v62 = vsel %vm467_vm4, %v5775_v7, 0 }
 0x28f   : > { %v3001_v26 = vadd.f32 %v2949_v29, %v9897_v33  ;;  %v2682_v22 = vpop.f32.mrf.mxu1 }
 0x290   : > { %v9965_v47 = vadd.f32 %v2682_v22, %v2544_v43  ;;  %v2951_v19 = vpop.f32.mrf.mxu0  ;;  %v5315_v58 = vpop.permute.xlu1 %5314 }
 0x291   : > { %v3002_v13 = vadd.f32 %v2951_v19, %v9903_v17  ;;  %v5325_v55 = vsel %vm5318_vm7, %v9870_v46, %v5315_v58  ;;  %v5326_v25 = vsel %vm5318_vm7, %v5315_v58, %v5317_v50  ;;  %7763 = vmatmul.mubr.msk.bf16.vlgmr.msra.gmra.mxu1 %vm521_vm15, %v9886_v52  ;;  %v2684_v59 = vpop.f32.mrf.mxu1 }
 0x292   : > { %v5349_v33 = vsel %vm467_vm4, %v5325_v55, 0  ;;  %v2953_v5 = vpop.f32.mrf.mxu0  ;;  %7766 = vmatprep.subr.msk.bf16.mxu1 %vm467_vm4, %v5326_v25  ;;  %7774 = vmatmul.mubr.msk.bf16.vlgmr.msra.gmra.mxu0 %vm521_vm15, %v9941_v57  ;;  %v5535_v17 = vpop.permute.xlu0 %5534 }
 0x293   : > { %5825 = vmatpush1.bf16.msra.mxu0 %v5787_v62  ;;  %5492 = vmatpush1.bf16.msra.mxu1 %v5349_v33  ;;  %v5550_v46 = vsel %vm5546_vm8, %v5535_v17, %v9895_v20  ;;  %v2685_v9 = vpop.f32.mrf.mxu1  ;;  %v5549_v4 = vsel %vm5546_vm8, %v9900_v32, %v5535_v17  ;;  %v9991_v20 = vld [vmem:[%s11270_s1 + $0x5c] sm:$0xf] }
 0x294   : > { %v2954_v21 = vpop.f32.mrf.mxu0  ;;  %v9980_v61 = vpop.permute.xlu1 %5764  ;;  %7771 = vmatprep.subr.msk.bf16.mxu1 %vm467_vm4, %v5550_v46  ;;  %5509 = vmatprep.mubr.bf16.mxu1 %v8154_v1  ;;  %v5565_v10 = vsel %vm467_vm4, %v5549_v4, 0 }
 0x295   : > { %5842 = vmatprep.mubr.bf16.mxu0 %v8154_v1  ;;  %v5779_v12 = vsel %vm5774_vm9, %v9980_v61, %v5767_v14 }
 0x296   : > { %v3095_v27 = vpop.f32.mrf.mxu0  ;;  %v5987_v43 = vpop.permute.xlu0 %5986  ;;  %v5799_v35 = vsel %vm467_vm4, %v5779_v12, 0 }
 0x297   : > { %v3225_v42 = vadd.f32 %v3095_v27, %v9923_v53 }
 0x298   : > { %v3097_v8 = vpop.f32.mrf.mxu0  ;;  %v9995_v63 = vpop.permute.xlu1 %5768 }
 0x299   : > { %v3226_v0 = vadd.f32 %v3097_v8, %v9927_v60  ;;  %v5780_v32 = vsel %vm5774_vm9, %v5767_v14, %v9995_v63  ;;  %v2762_v28 = vpop.f32.mrf.mxu1  ;;  %7767 = vmatmul.mubr.msk.bf16.vlgmr.msra.gmra.mxu1 %vm521_vm15, %v9886_v52 }
 0x29a   : > { %v2775_v38 = vadd.f32 %v2762_v28, %v9931_v30  ;;  %v3099_v53 = vpop.f32.mrf.mxu0  ;;  %5638 = vmatpush1.bf16.msra.mxu1 %v5565_v10  ;;  %7779 = vmatmul.mubr.msk.bf16.vlgmr.msra.gmra.mxu0 %vm521_vm15, %v9991_v20  ;;  %v5543_v24 = vpop.permute.xlu0 %5542 }
 0x29b   : > { %7782 = vmatprep.subr.msk.bf16.mxu0 %vm467_vm4, %v5780_v32  ;;  %v2764_v51 = vpop.f32.mrf.mxu1  ;;  %5655 = vmatprep.mubr.bf16.mxu1 %v8154_v1  ;;  %v5553_v44 = vsel %vm5546_vm8, %v9909_v34, %v5543_v24 }
 0x29c   : > { %5907 = vmatpush1.bf16.msra.mxu0 %v5799_v35  ;;  %v2776_v60 = vadd.f32 %v2764_v51, %v9943_v6  ;;  %v3100_v18 = vpop.f32.mrf.mxu0  ;;  %v5985_v52 = vpop.permute.xlu1 %5984  ;;  %5924 = vmatprep.mubr.bf16.mxu0 %v8154_v1 }
 0x29d   : > { %v2766_v36 = vpop.f32.mrf.mxu1  ;;  %v6003_v56 = vsel %vm6002_vm10, %v5985_v52, %v5987_v43 }
 0x29e   : > { %v3177_v30 = vpop.f32.mrf.mxu0  ;;  %v10011_v48 = vpop.permute.xlu0 %5992  ;;  %v6015_v39 = vsel %vm467_vm4, %v6003_v56, 0 }
 0x29f   : > { %v10014_v23 = vadd.f32 %v3177_v30, %v3001_v26  ;;  %v2767_v16 = vpop.f32.mrf.mxu1  ;;  %v5577_v26 = vsel %vm467_vm4, %v5553_v44, 0 }
 0x2a0   : > { %v3179_v41 = vpop.f32.mrf.mxu0  ;;  %v10016_v37 = vpop.permute.xlu1 %5988 }
 0x2a1   : > { %v10018_v31 = vadd.f32 %v3179_v41, %v3002_v13  ;;  %v6004_v6 = vsel %vm6002_vm10, %v5987_v43, %v10016_v37  ;;  %v2908_v45 = vpop.f32.mrf.mxu1  ;;  %7772 = vmatmul.mubr.msk.bf16.vlgmr.msra.gmra.mxu1 %vm521_vm15, %v9941_v57 }
 0x2a2   : > { %v2999_v11 = vadd.f32 %v2908_v45, %v9960_v49  ;;  %v3181_v50 = vpop.f32.mrf.mxu0  ;;  %7783 = vmatmul.mubr.msk.bf16.vlgmr.msra.gmra.mxu0 %vm521_vm15, %v9991_v20  ;;  %7787 = vmatprep.subr.msk.bf16.mxu0 %vm467_vm4, %v6004_v6  ;;  %v10029_v40 = vpop.permute.xlu0 %5996 }
 0x2a3   : > { %6053 = vmatpush1.bf16.msra.mxu0 %v6015_v39  ;;  %v2910_v3 = vpop.f32.mrf.mxu1  ;;  %5737 = vmatprep.mubr.bf16.mxu1 %v8154_v1 }
 0x2a4   : > { %v3000_v54 = vadd.f32 %v2910_v3, %v9965_v47  ;;  %v3182_v29 = vpop.f32.mrf.mxu0  ;;  %v5545_v14 = vpop.permute.xlu1 %5544  ;;  %6070 = vmatprep.mubr.bf16.mxu0 %v8154_v1  ;;  %v10044_v47 = vld [vmem:[%s11270_s1 + $0x60] sm:$0xf] }
 0x2a5   : > { %v5554_v49 = vsel %vm5546_vm8, %v5543_v24, %v5545_v14  ;;  %v2912_v7 = vpop.f32.mrf.mxu1 }
 0x2a6   : > { %v3323_v22 = vpop.f32.mrf.mxu0  ;;  %7775 = vmatprep.subr.msk.bf16.mxu1 %vm467_vm4, %v5554_v49  ;;  %v6213_v19 = vpop.permute.xlu0 %6212 }
 0x2a7   : > { %v10039_v34 = vadd.f32 %v3323_v22, %v3225_v42  ;;  %5720 = vmatpush1.bf16.msra.mxu1 %v5577_v26  ;;  %v2913_v58 = vpop.f32.mrf.mxu1 }
 0x2a8   : > { %v3325_v13 = vpop.f32.mrf.mxu0  ;;  %v5995_v55 = vpop.permute.xlu1 %5994 }
 0x2a9   : > { %v10046_v25 = vadd.f32 %v3325_v13, %v3226_v0  ;;  %v6007_v59 = vsel %vm6002_vm10, %v10011_v48, %v5995_v55  ;;  %v6008_v62 = vsel %vm6002_vm10, %v5995_v55, %v10029_v40  ;;  %v2990_v33 = vpop.f32.mrf.mxu1 }
 0x2aa   : > { %v6027_v5 = vsel %vm467_vm4, %v6007_v59, 0  ;;  %v3003_v17 = vadd.f32 %v2990_v33, %v2775_v38  ;;  %7776 = vmatmul.mubr.msk.bf16.vlgmr.msra.gmra.mxu1 %vm521_vm15, %v9941_v57  ;;  %7788 = vmatmul.mubr.msk.bf16.vlgmr.msra.gmra.mxu0 %vm521_vm15, %v10044_v47  ;;  %v10057_v46 = vpop.permute.xlu0 %6216  ;;  %v3327_v9 = vpop.f32.mrf.mxu0 }
 0x2ab   : > { %7791 = vmatprep.subr.msk.bf16.mxu0 %vm467_vm4, %v6008_v62  ;;  %v2992_v21 = vpop.f32.mrf.mxu1  ;;  %5883 = vmatprep.mubr.bf16.mxu1 %v8154_v1 }
 0x2ac   : > { %6135 = vmatpush1.bf16.msra.mxu0 %v6027_v5  ;;  %v3004_v4 = vadd.f32 %v2992_v21, %v2776_v60  ;;  %v5763_v27 = vpop.permute.xlu1 %5762  ;;  %v3328_v43 = vpop.f32.mrf.mxu0  ;;  %6152 = vmatprep.mubr.bf16.mxu0 %v8154_v1 }
 0x2ad   : > { %v5777_v57 = vsel %vm5774_vm9, %v9934_v15, %v5763_v27  ;;  %v5778_v42 = vsel %vm5774_vm9, %v5763_v27, %v9980_v61  ;;  %v2994_v12 = vpop.f32.mrf.mxu1 }
 0x2ae   : > { %v5793_v8 = vsel %vm467_vm4, %v5777_v57, 0  ;;  %7780 = vmatprep.subr.msk.bf16.mxu1 %vm467_vm4, %v5778_v42  ;;  %v5773_v10 = vpop.permute.xlu0 %5772 }
 0x2af   : > { %5866 = vmatpush1.bf16.msra.mxu1 %v5793_v8  ;;  %v2995_v0 = vpop.f32.mrf.mxu1 }
 0x2b0   : > { %v6215_v32 = vpop.permute.xlu1 %6214 }
 0x2b1   : > { %v6231_v28 = vsel %vm6230_vm11, %v6213_v19, %v6215_v32  ;;  %v6232_v38 = vsel %vm6230_vm11, %v6215_v32, %v10057_v46  ;;  %v3136_v53 = vpop.f32.mrf.mxu1 }
 0x2b2   : > { %v6243_v15 = vsel %vm467_vm4, %v6231_v28, 0  ;;  %v3227_v24 = vadd.f32 %v3136_v53, %v2999_v11  ;;  %v3405_v61 = vpop.f32.mrf.mxu0  ;;  %7781 = vmatmul.mubr.msk.bf16.vlgmr.msra.gmra.mxu1 %vm521_vm15, %v9991_v20  ;;  %7792 = vmatmul.mubr.msk.bf16.vlgmr.msra.gmra.mxu0 %vm521_vm15, %v10044_v47  ;;  %v6223_v35 = vpop.permute.xlu0 %6222 }
 0x2b3   : > { %v3457_v51 = vadd.f32 %v3405_v61, %v10014_v23  ;;  %7796 = vmatprep.subr.msk.bf16.mxu0 %vm467_vm4, %v6232_v38  ;;  %v3138_v60 = vpop.f32.mrf.mxu1  ;;  %5965 = vmatprep.mubr.bf16.mxu1 %v8154_v1 }
 0x2b4   : > { %6281 = vmatpush1.bf16.msra.mxu0 %v6243_v15  ;;  %v3228_v18 = vadd.f32 %v3138_v60, %v3000_v54  ;;  %v3407_v52 = vpop.f32.mrf.mxu0  ;;  %v5771_v36 = vpop.permute.xlu1 %5770  ;;  %6298 = vmatprep.mubr.bf16.mxu0 %v8154_v1  ;;  %v10138_v15 = vld [vmem:[%s11270_s1 + $0x68] sm:$0xf] }
 0x2b5   : > { %v10081_v30 = vadd.f32 %v3407_v52, %v10018_v31  ;;  %v5781_v56 = vsel %vm5774_vm9, %v9995_v63, %v5771_v36  ;;  %v5782_v16 = vsel %vm5774_vm9, %v5771_v36, %v5773_v10  ;;  %v3140_v23 = vpop.f32.mrf.mxu1  ;;  %v10095_v63 = vld [vmem:[%s11270_s1 + $0x64] sm:$0xf] }
 0x2b6   : > { %v5805_v41 = vsel %vm467_vm4, %v5781_v56, 0  ;;  %v3409_v6 = vpop.f32.mrf.mxu0  ;;  %7784 = vmatprep.subr.msk.bf16.mxu1 %vm467_vm4, %v5782_v16  ;;  %v5991_v45 = vpop.permute.xlu0 %5990 }
 0x2b7   : > { %5948 = vmatpush1.bf16.msra.mxu1 %v5805_v41  ;;  %v6005_v39 = vsel %vm6002_vm10, %v10016_v37, %v5991_v45  ;;  %v6006_v31 = vsel %vm6002_vm10, %v5991_v45, %v10011_v48  ;;  %v3141_v11 = vpop.f32.mrf.mxu1 }
 0x2b8   : > { %v6021_v50 = vsel %vm467_vm4, %v6005_v39, 0  ;;  %v3410_v44 = vpop.f32.mrf.mxu0  ;;  %v10098_v3 = vpop.permute.xlu1 %6220  ;;  %7789 = vmatprep.subr.msk.bf16.mxu1 %vm467_vm4, %v6006_v31 }
 0x2b9   : > { %v3218_v54 = vpop.f32.mrf.mxu1  ;;  %v6235_v37 = vsel %vm6230_vm11, %v10098_v3, %v6223_v35 }
 0x2ba   : > { %v3231_v29 = vadd.f32 %v3218_v54, %v3003_v17  ;;  %v3548_v14 = vpop.f32.mrf.mxu0  ;;  %7785 = vmatmul.mubr.msk.bf16.vlgmr.msra.gmra.mxu1 %vm521_vm15, %v9991_v20  ;;  %7797 = vmatmul.mubr.msk.bf16.vlgmr.msra.gmra.mxu0 %vm521_vm15, %v10095_v63  ;;  %v6443_v48 = vpop.permute.xlu0 %6442  ;;  %v6255_v13 = vsel %vm467_vm4, %v6235_v37, 0 }
 0x2bb   : > { %v3678_v49 = vadd.f32 %v3548_v14, %v10039_v34  ;;  %6094 = vmatpush1.bf16.msra.mxu1 %v6021_v50  ;;  %v3220_v7 = vpop.f32.mrf.mxu1  ;;  %6111 = vmatprep.mubr.bf16.mxu1 %v8154_v1 }
 0x2bc   : > { %v3232_v26 = vadd.f32 %v3220_v7, %v3004_v4  ;;  %v10109_v22 = vpop.f32.mrf.mxu0  ;;  %v10111_v19 = vpop.permute.xlu1 %6224  ;;  %6380 = vmatprep.mubr.bf16.mxu0 %v8154_v1 }
 0x2bd   : > { %v6236_v20 = vsel %vm6230_vm11, %v6223_v35, %v10111_v19  ;;  %v3222_v58 = vpop.f32.mrf.mxu1 }
 0x2be   : > { %v3552_v55 = vpop.f32.mrf.mxu0  ;;  %7800 = vmatprep.subr.msk.bf16.mxu0 %vm467_vm4, %v6236_v20  ;;  %v5999_v34 = vpop.permute.xlu0 %5998 }
 0x2bf   : > { %6363 = vmatpush1.bf16.msra.mxu0 %v6255_v13  ;;  %v3223_v59 = vpop.f32.mrf.mxu1  ;;  %v6009_v38 = vsel %vm6002_vm10, %v10029_v40, %v5999_v34 }
 0x2c0   : > { %v3553_v62 = vpop.f32.mrf.mxu0  ;;  %v6441_v33 = vpop.permute.xlu1 %6440  ;;  %v6033_v60 = vsel %vm467_vm4, %v6009_v38, 0 }
 0x2c1   : > { %v3364_v5 = vpop.f32.mrf.mxu1  ;;  %v6459_v4 = vsel %vm6458_vm14, %v6441_v33, %v6443_v48 }
 0x2c2   : > { %v3455_v17 = vadd.f32 %v3364_v5, %v3227_v24  ;;  %v3630_v9 = vpop.f32.mrf.mxu0  ;;  %7790 = vmatmul.mubr.msk.bf16.vlgmr.msra.gmra.mxu1 %vm521_vm15, %v10044_v47  ;;  %7801 = vmatmul.mubr.msk.bf16.vlgmr.msra.gmra.mxu0 %vm521_vm15, %v10095_v63  ;;  %v6219_v21 = vpop.permute.xlu0 %6218  ;;  %v6471_v0 = vsel %vm467_vm4, %v6459_v4, 0 }
 0x2c3   : > { %v3682_v27 = vadd.f32 %v3630_v9, %v3457_v51  ;;  %v3366_v43 = vpop.f32.mrf.mxu1  ;;  %6526 = vmatprep.mubr.bf16.mxu0 %v8154_v1  ;;  %6193 = vmatprep.mubr.bf16.mxu1 %v8154_v1  ;;  %v6233_v36 = vsel %vm6230_vm11, %v10057_v46, %v6219_v21  ;;  %v6234_v56 = vsel %vm6230_vm11, %v6219_v21, %v10098_v3 }
 0x2c4   : > { %v10125_v57 = vadd.f32 %v3366_v43, %v3228_v18  ;;  %v3632_v42 = vpop.f32.mrf.mxu0  ;;  %v10127_v12 = vpop.permute.xlu1 %6444  ;;  %v6249_v31 = vsel %vm467_vm4, %v6233_v36, 0  ;;  %v3679_v9 = vadd.f32 %v10109_v22, %v10046_v25 }
 0x2c5   : > { %v6460_v8 = vsel %vm6458_vm14, %v6443_v48, %v10127_v12  ;;  %v3368_v10 = vpop.f32.mrf.mxu1 }
 0x2c6   : > { %v3634_v32 = vpop.f32.mrf.mxu0  ;;  %7805 = vmatprep.subr.msk.bf16.mxu0 %vm467_vm4, %v6460_v8  ;;  %v6229_v28 = vpop.permute.xlu0 %6228 }
 0x2c7   : > { %6509 = vmatpush1.bf16.msra.mxu0 %v6471_v0  ;;  %v3369_v53 = vpop.f32.mrf.mxu1 }
 0x2c8   : > { %v3635_v24 = vpop.f32.mrf.mxu0  ;;  %v6001_v61 = vpop.permute.xlu1 %6000 }
 0x2c9   : > { %v6010_v35 = vsel %vm6002_vm10, %v5999_v34, %v6001_v61  ;;  %v3446_v51 = vpop.f32.mrf.mxu1 }
 0x2ca   : > { %v3459_v18 = vadd.f32 %v3446_v51, %v3231_v29  ;;  %v3773_v52 = vpop.f32.mrf.mxu0  ;;  %7793 = vmatprep.subr.msk.bf16.mxu1 %vm467_vm4, %v6010_v35  ;;  %7806 = vmatmul.mubr.msk.bf16.vlgmr.msra.gmra.mxu0 %vm521_vm15, %v10138_v15  ;;  %v6449_v40 = vpop.permute.xlu0 %6448 }
 0x2cb   : > { %v3903_v16 = vadd.f32 %v3773_v52, %v3678_v49  ;;  %6176 = vmatpush1.bf16.msra.mxu1 %v6033_v60  ;;  %v3448_v23 = vpop.f32.mrf.mxu1  ;;  %6608 = vmatprep.mubr.bf16.mxu0 %v8154_v1  ;;  %v3683_v49 = vadd.f32 %v3632_v42, %v10081_v30 }
 0x2cc   : > { %v10150_v41 = vadd.f32 %v3448_v23, %v3232_v26  ;;  %v3775_v6 = vpop.f32.mrf.mxu0  ;;  %7798 = vmatprep.subr.msk.bf16.mxu1 %vm467_vm4, %v6234_v56  ;;  %v6227_v45 = vpop.permute.xlu1 %6226 }
 0x2cd   : > { %v3450_v39 = vpop.f32.mrf.mxu1  ;;  %v6238_v50 = vsel %vm6230_vm11, %v6227_v45, %v6229_v28  ;;  %v3904_v43 = vadd.f32 %v3775_v6, %v3679_v9  ;;  %v6729_v9 = vld [vmem:[%s11274_s5 + $0xd8] sm:$0xff] }
 0x2ce   : > { %v3777_v11 = vpop.f32.mrf.mxu0  ;;  %7794 = vmatmul.mubr.msk.bf16.vlgmr.msra.gmra.mxu1 %vm521_vm15, %v10044_v47  ;;  %v6455_v46 = vpop.permute.xlu0 %6454  ;;  %v6237_v47 = vsel %vm6230_vm11, %v10111_v19, %v6227_v45 }
 0x2cf   : > { %6322 = vmatpush1.bf16.msra.mxu1 %v6249_v31  ;;  %v3451_v44 = vpop.f32.mrf.mxu1  ;;  %6339 = vmatprep.mubr.bf16.mxu1 %v8154_v1  ;;  %v6261_v33 = vsel %vm467_vm4, %v6237_v47, 0  ;;  %v6732_v47 = vld [vmem:[%s11274_s5 + $0xf0] sm:$0xff] }
 0x2d0   : > { %v3778_v3 = vpop.f32.mrf.mxu0  ;;  %7802 = vmatprep.subr.msk.bf16.mxu1 %vm467_vm4, %v6238_v50  ;;  %v6447_v54 = vpop.permute.xlu1 %6446 }
 0x2d1   : > { %v3589_v29 = vpop.f32.mrf.mxu1  ;;  %v6462_v30 = vsel %vm6458_vm14, %v6447_v54, %v6449_v40  ;;  %v6461_v42 = vsel %vm6458_vm14, %v10127_v12, %v6447_v54 }
 0x2d2   : > { %v3680_v14 = vadd.f32 %v3589_v29, %v3455_v17  ;;  %v3855_v48 = vpop.f32.mrf.mxu0  ;;  %v6451_v37 = vpop.permute.xlu0 %6450  ;;  %v6477_v53 = vsel %vm467_vm4, %v6461_v42, 0 }
 0x2d3   : > { %v3907_v7 = vadd.f32 %v3855_v48, %v3682_v27  ;;  %v6463_v26 = vsel %vm6458_vm14, %v6449_v40, %v6451_v37  ;;  %v3591_v20 = vpop.f32.mrf.mxu1 }
 0x2d4   : > { %v6483_v58 = vsel %vm467_vm4, %v6463_v26, 0  ;;  %v3857_v13 = vpop.f32.mrf.mxu0  ;;  %v6453_v55 = vpop.permute.xlu1 %6452  ;;  %v3681_v35 = vadd.f32 %v3591_v20, %v10125_v57 }
 0x2d5   : > { %v3908_v34 = vadd.f32 %v3857_v13, %v3683_v49  ;;  %v6464_v59 = vsel %vm6458_vm14, %v6451_v37, %v6453_v55  ;;  %v3593_v62 = vpop.f32.mrf.mxu1  ;;  %v6716_v13 = vld [vmem:[%s11274_s5 + $0x70] sm:$0xff] }
 0x2d6   : > { %v3859_v5 = vpop.f32.mrf.mxu0  ;;  %7799 = vmatmul.mubr.msk.bf16.vlgmr.msra.gmra.mxu1 %vm521_vm15, %v10095_v63  ;;  %7809 = vmatprep.subr.msk.bf16.mxu0 %vm467_vm4, %v6464_v59 }
 0x2d7   : > { %6404 = vmatpush1.bf16.msra.mxu1 %v6261_v33  ;;  %6591 = vmatpush1.bf16.msra.mxu0 %v6483_v58  ;;  %v3594_v19 = vpop.f32.mrf.mxu1  ;;  %v6715_v5 = vld [vmem:[%s11274_s5 + $0x68] sm:$0xff] }
 0x2d8   : > { %7807 = vmatprep.subr.msk.bf16.mxu1 %vm467_vm4, %v6462_v30  ;;  %v3860_v17 = vpop.f32.mrf.mxu0  ;;  %6421 = vmatprep.mubr.bf16.mxu1 %v8154_v1  ;;  %v6457_v0 = vpop.permute.xlu1 %6456  ;;  %v6730_v30 = vld [vmem:[%s11274_s5 + $0xe0] sm:$0xff] }
 0x2d9   : > { %v3671_v21 = vpop.f32.mrf.mxu1  ;;  %v6466_v25 = vsel %vm6458_vm14, %v6455_v46, %v6457_v0  ;;  %v6714_v17 = vld [vmem:[%s11274_s5 + $0x60] sm:$0xff] }
 0x2da   : > { %v3684_v4 = vadd.f32 %v3671_v21, %v3459_v18  ;;  %v3998_v27 = vpop.f32.mrf.mxu0  ;;  %7810 = vmatmul.mubr.msk.bf16.vlgmr.msra.gmra.mxu0 %vm521_vm15, %v10138_v15  ;;  %v6465_v18 = vsel %vm6458_vm14, %v6453_v55, %v6455_v46  ;;  %v6731_v55 = vld [vmem:[%s11274_s5 + $0xe8] sm:$0xff] }
 0x2db   : > { %v4128_v8 = vadd.f32 %v3998_v27, %v3903_v16  ;;  %v3673_v10 = vpop.f32.mrf.mxu1  ;;  %v6489_v23 = vsel %vm467_vm4, %v6465_v18, 0  ;;  %v6713_v27 = vld [vmem:[%s11274_s5 + $0x58] sm:$0xff] }
 0x2dc   : > { %v4000_v32 = vpop.f32.mrf.mxu0  ;;  %v3685_v31 = vadd.f32 %v3673_v10, %v10150_v41  ;;  %v6717_v41 = vld [vmem:[%s11274_s5 + $0x78] sm:$0xff] }
 0x2dd   : > { %v4129_v28 = vadd.f32 %v4000_v32, %v3904_v43  ;;  %v3675_v38 = vpop.f32.mrf.mxu1  ;;  %v6728_v43 = vld [vmem:[%s11274_s5 + $0xd0] sm:$0xff] }
 0x2de   : > { %v4002_v24 = vpop.f32.mrf.mxu0  ;;  %7803 = vmatmul.mubr.msk.bf16.vlgmr.msra.gmra.mxu1 %vm521_vm15, %v10095_v63  ;;  %v6712_v38 = vld [vmem:[%s11274_s5 + $0x50] sm:$0xff] }
 0x2df   : > { %6550 = vmatpush1.bf16.msra.mxu1 %v6477_v53  ;;  %v3676_v22 = vpop.f32.mrf.mxu1  ;;  %6567 = vmatprep.mubr.bf16.mxu1 %v8154_v1  ;;  %v6813_v53 = vld [vmem:[%s11274_s5 + $0x378] sm:$0xff]  ;;  %v6727_v24 = vld [vmem:[%s11274_s5 + $0xc8] sm:$0xff] }
 0x2e0   : > { %7811 = vmatprep.subr.msk.bf16.mxu1 %vm467_vm4, %v6466_v25  ;;  %v4003_v12 = vpop.f32.mrf.mxu0  ;;  %vm6827_vm4 = vcmask 850944  }
 0x2e1   : > { %v3814_v61 = vpop.f32.mrf.mxu1 }
 0x2e2   : > { %v3905_v51 = vadd.f32 %v3814_v61, %v3680_v14  ;;  %v4080_v60 = vpop.f32.mrf.mxu0 }
 0x2e3   : > { %v4132_v52 = vadd.f32 %v4080_v60, %v3907_v7  ;;  %v3816_v40 = vpop.f32.mrf.mxu1  ;;  %v6726_v60 = vld [vmem:[%s11274_s5 + $0xc0] sm:$0xff] }
 0x2e4   : > { %v3906_v36 = vadd.f32 %v3816_v40, %v3681_v35  ;;  %v4082_v63 = vpop.f32.mrf.mxu0  ;;  %v6711_v35 = vld [vmem:[%s11274_s5 + $0x48] sm:$0xff] }
 0x2e5   : > { %v4133_v56 = vadd.f32 %v4082_v63, %v3908_v34  ;;  %v3818_v16 = vpop.f32.mrf.mxu1  ;;  %v6811_v40 = vld [vmem:[%s11274_s5 + $0x368] sm:$0xff] }
 0x2e6   : > { %v4084_v6 = vpop.f32.mrf.mxu0  ;;  %7808 = vmatmul.mubr.msk.bf16.vlgmr.msra.gmra.mxu1 %vm521_vm15, %v10138_v15  ;;  %v6709_v16 = vld [vmem:[%s11274_s5 + $0x38] sm:$0xff] }
 0x2e7   : > { %6632 = vmatpush1.bf16.msra.mxu1 %v6489_v23  ;;  %v3819_v45 = vpop.f32.mrf.mxu1  ;;  %6649 = vmatprep.mubr.bf16.mxu1 %v8154_v1  ;;  %v6733_v1 = vld [vmem:[%s11274_s5 + $0xf8] sm:$0xff]  ;;  %v6810_v23 = vld [vmem:[%s11274_s5 + $0x360] sm:$0xff]  ;;  %v6724_v6 = vld [vmem:[%s11274_s5 + $0xb0] sm:$0xff] }
 0x2e8   : > { %v4085_v57 = vpop.f32.mrf.mxu0  ;;  %7831 = vmatprep.subr.mxu0 %v6733_v1  ;;  %v6808_v1 = vld [vmem:[%s11274_s5 + $0x350] sm:$0xff] }
 0x2e9   : > { %v3896_v39 = vpop.f32.mrf.mxu1  ;;  %7832 = vmatpush3.msra.mxu0 %v6717_v41  ;;  %v6706_v41 = vld [vmem:[%s11274_s5 + $0x20] sm:$0xff] }
 0x2ea   : > { %v3909_v11 = vadd.f32 %v3896_v39, %v3684_v4  ;;  %v4223_v46 = vpop.f32.mrf.mxu0  ;;  %7833 = vmatprep.subr.mxu0 %v6732_v47  ;;  %v6807_v47 = vld [vmem:[%s11274_s5 + $0x348] sm:$0xff] }
 0x2eb   : > { %v4353_v50 = vadd.f32 %v4223_v46, %v4128_v8  ;;  %v3898_v44 = vpop.f32.mrf.mxu1  ;;  %7834 = vmatpush3.msra.mxu0 %v6716_v13  ;;  %v11278_v8 = vmov 0.0   ;;  %v6708_v46 = vld [vmem:[%s11274_s5 + $0x30] sm:$0xff] }
 0x2ec   : > { %v3910_v3 = vadd.f32 %v3898_v44, %v3685_v31  ;;  %v4225_v54 = vpop.f32.mrf.mxu0  ;;  %7835 = vmatprep.subr.mxu0 %v6731_v55  ;;  %7041 = vmatprep.subr.mxu1 %v11278_v8  ;;  %v6723_v44 = vld [vmem:[%s11274_s5 + $0xa8] sm:$0xff]  ;;  %v6720_v13 = vld [vmem:[%s11274_s5 + $0x90] sm:$0xff] }
 0x2ed   : > { %v4354_v29 = vadd.f32 %v4225_v54, %v4129_v28  ;;  %v3900_v14 = vpop.f32.mrf.mxu1  ;;  %7836 = vmatpush3.msra.mxu0 %v6715_v5  ;;  %v6704_v5 = vld [vmem:[%s11274_s5 + $0x10] sm:$0xff] }
 0x2ee   : > { %v4227_v48 = vpop.f32.mrf.mxu0  ;;  %7812 = vmatmul.mubr.msk.bf16.vlgmr.msra.gmra.mxu1 %vm521_vm15, %v10138_v15  ;;  %7837 = vmatprep.subr.mxu0 %v6730_v30  ;;  %v6805_v30 = vld [vmem:[%s11274_s5 + $0x338] sm:$0xff] }
 0x2ef   : > { %v3901_v37 = vpop.f32.mrf.mxu1  ;;  %7838 = vmatpush3.msra.mxu0 %v6714_v17  ;;  %7042 = vmatpush1.msra.mxu1 %v6813_v53  ;;  %v6707_v48 = vld [vmem:[%s11274_s5 + $0x28] sm:$0xff]  ;;  %v10368_v53 = vld [vmem:[%s11274_s5 + $0x1f8] sm:$0xff] }
 0x2f0   : > { %v4228_v49 = vpop.f32.mrf.mxu0  ;;  %7839 = vmatprep.subr.mxu0 %v6729_v9  ;;  %7043 = vmatprep.subr.mxu1 %v11278_v8  ;;  %v6722_v37 = vld [vmem:[%s11274_s5 + $0xa0] sm:$0xff]  ;;  %v6719_v9 = vld [vmem:[%s11274_s5 + $0x88] sm:$0xff] }
 0x2f1   : > { %v4039_v7 = vpop.f32.mrf.mxu1  ;;  %7840 = vmatpush3.msra.mxu0 %v6713_v27  ;;  %v6703_v27 = vld [vmem:[%s11274_s5 + $0x8] sm:$0xff] }
 0x2f2   : > { %v10202_v26 = vadd.f32 %v4039_v7, %v3905_v51  ;;  %v4305_v15 = vpop.f32.mrf.mxu0  ;;  %7841 = vmatprep.subr.mxu0 %v6728_v43  ;;  %v6812_v51 = vld [vmem:[%s11274_s5 + $0x370] sm:$0xff]  ;;  %v6721_v7 = vld [vmem:[%s11274_s5 + $0x98] sm:$0xff] }
 0x2f3   : > { %v10204_v20 = vadd.f32 %v4305_v15, %v4132_v52  ;;  %v4041_v58 = vpop.f32.mrf.mxu1  ;;  %7842 = vmatpush3.msra.mxu0 %v6712_v38  ;;  %7044 = vmatpush1.msra.mxu1 %v6812_v51  ;;  %v6710_v52 = vld [vmem:[%s11274_s5 + $0x40] sm:$0xff]  ;;  %v6804_v43 = vld [vmem:[%s11274_s5 + $0x330] sm:$0xff]  ;;  %v10384_v51 = vld [vmem:[%s11274_s5 + $0x318] sm:$0xff] }
 0x2f4   : > { %v10212_v34 = vadd.f32 %v4041_v58, %v3906_v36  ;;  %v4307_v59 = vpop.f32.mrf.mxu0  ;;  %7843 = vmatprep.subr.mxu0 %v6727_v24  ;;  %v6725_v36 = vld [vmem:[%s11274_s5 + $0xb8] sm:$0xff]  ;;  %7045 = vmatprep.subr.mxu1 %v11278_v8  ;;  %v6806_v58 = vld [vmem:[%s11274_s5 + $0x340] sm:$0xff] }
 0x2f5   : > { %v10214_v62 = vadd.f32 %v4307_v59, %v4133_v56  ;;  %v4043_v33 = vpop.f32.mrf.mxu1  ;;  %7844 = vmatpush3.msra.mxu0 %v6711_v35  ;;  %7046 = vmatpush1.msra.mxu1 %v6811_v40 }
 0x2f6   : > { %v4309_v19 = vpop.f32.mrf.mxu0  ;;  %7845 = vmatprep.subr.mxu0 %v6726_v60  ;;  %7047 = vmatprep.subr.mxu1 %v11278_v8 }
 0x2f7   : > { %v4044_v21 = vpop.f32.mrf.mxu1  ;;  %7846 = vmatpush3.msra.mxu0 %v6710_v52  ;;  %7048 = vmatpush1.msra.mxu1 %v6810_v23 }
 0x2f8   : > { %v4310_v4 = vpop.f32.mrf.mxu0  ;;  %7847 = vmatprep.subr.mxu0 %v6725_v36  ;;  %7049 = vmatprep.subr.mxu1 %v11278_v8  ;;  %v10393_v36 = vld [vmem:[%s11274_s5 + $0x310] sm:$0xff] }
 0x2f9   : > { %v4121_v42 = vpop.f32.mrf.mxu1  ;;  %7848 = vmatpush3.msra.mxu0 %v6709_v16  ;;  %v10400_v16 = vld [vmem:[%s11274_s5 + $0x308] sm:$0xff] }
 0x2fa   : > { %v10235_v10 = vadd.f32 %v4121_v42, %v3909_v11  ;;  %v4448_v0 = vpop.f32.mrf.mxu0  ;;  %7849 = vmatprep.subr.mxu0 %v6724_v6 }
 0x2fb   : > { %v10237_v32 = vadd.f32 %v4448_v0, %v4353_v50  ;;  %v4123_v28 = vpop.f32.mrf.mxu1  ;;  %v6809_v50 = vld [vmem:[%s11274_s5 + $0x358] sm:$0xff]  ;;  %7850 = vmatpush3.msra.mxu0 %v6708_v46  ;;  %v10414_v46 = vld [vmem:[%s11274_s5 + $0x3e0] sm:$0xff] }
 0x2fc   : > { %v10248_v25 = vadd.f32 %v4123_v28, %v3910_v3  ;;  %v4450_v22 = vpop.f32.mrf.mxu0  ;;  %7050 = vmatpush1.msra.mxu1 %v6809_v50  ;;  %7851 = vmatprep.subr.mxu0 %v6723_v44  ;;  %v6803_v28 = vld [vmem:[%s11274_s5 + $0x328] sm:$0xff] }
 0x2fd   : > { %v10250_v12 = vadd.f32 %v4450_v22, %v4354_v29  ;;  %v4125_v61 = vpop.f32.mrf.mxu1  ;;  %7051 = vmatprep.subr.mxu1 %v11278_v8  ;;  %7852 = vmatpush3.msra.mxu0 %v6707_v48 }
 0x2fe   : > { %v4452_v18 = vpop.f32.mrf.mxu0  ;;  %7052 = vmatpush1.msra.mxu1 %v6808_v1  ;;  %7853 = vmatprep.subr.mxu0 %v6722_v37  ;;  %v10428_v1 = vld [vmem:[%s11274_s5 + $0x3d0] sm:$0xff] }
 0x2ff   : > { %v4126_v63 = vpop.f32.mrf.mxu1  ;;  %7053 = vmatprep.subr.mxu1 %v11278_v8  ;;  %7854 = vmatpush3.msra.mxu0 %v6706_v41  ;;  %v10435_v41 = vld [vmem:[%s11274_s5 + $0x3c8] sm:$0xff] }
 0x300   : > { %v4453_v56 = vpop.f32.mrf.mxu0  ;;  %7054 = vmatpush1.msra.mxu1 %v6807_v47  ;;  %7855 = vmatprep.subr.mxu0 %v6721_v7 }
 0x301   : > { %v4264_v45 = vpop.f32.mrf.mxu1  ;;  %7055 = vmatprep.subr.mxu1 %v11278_v8 }
 0x302   : > { %v10283_v57 = vadd.f32 %v4264_v45, %v10202_v26  ;;  %v4530_v39 = vpop.f32.mrf.mxu0  ;;  %7056 = vmatpush1.msra.mxu1 %v6806_v58  ;;  %v10407_v45 = vld [vmem:[%s11274_s5 + $0x300] sm:$0xff] }
 0x303   : > { %v10286_v31 = vadd.f32 %v4530_v39, %v10204_v20  ;;  %v4266_v11 = vpop.f32.mrf.mxu1  ;;  %v6705_v20 = vld [vmem:[%s11274_s5 + $0x18] sm:$0xff]  ;;  %7057 = vmatprep.subr.mxu1 %v11278_v8 }
 0x304   : > { %v10299_v3 = vadd.f32 %v4266_v11, %v10212_v34  ;;  %v4532_v54 = vpop.f32.mrf.mxu0  ;;  %7856 = vmatpush3.msra.mxu0 %v6705_v20  ;;  %7058 = vmatpush1.msra.mxu1 %v6805_v30  ;;  %v10442_v20 = vld [vmem:[%s11274_s5 + $0x3c0] sm:$0xff] }
 0x305   : > { %v10302_v29 = vadd.f32 %v4532_v54, %v10214_v62  ;;  %v4268_v14 = vpop.f32.mrf.mxu1  ;;  %7857 = vmatprep.subr.mxu0 %v6720_v13  ;;  %7059 = vmatprep.subr.mxu1 %v11278_v8 }
 0x306   : > { %v4534_v49 = vpop.f32.mrf.mxu0  ;;  %7858 = vmatpush3.msra.mxu0 %v6704_v5  ;;  %7060 = vmatpush1.msra.mxu1 %v6804_v43  ;;  %v10456_v5 = vld [vmem:[%s11274_s5 + $0x3b0] sm:$0xff]  ;;  %v10470_v43 = vld [vmem:[%s11274_s5 + $0x3a0] sm:$0xff] }
 0x307   : > { %v4269_v26 = vpop.f32.mrf.mxu1  ;;  %7859 = vmatprep.subr.mxu0 %v6719_v9  ;;  %7061 = vmatprep.subr.mxu1 %v11278_v8  ;;  %11289 = vst [vmem:[#allocation4_spill] sm:$0xff] %v10470_v43 }
 0x308   : > { %v4535_v15 = vpop.f32.mrf.mxu0  ;;  %7860 = vmatpush3.msra.mxu0 %v6703_v27  ;;  %7062 = vmatpush1.msra.mxu1 %v6803_v28  ;;  %v10477_v28 = vld [vmem:[%s11274_s5 + $0x398] sm:$0xff] }
 0x309   : > { %v4346_v55 = vpop.f32.mrf.mxu1  ;;  %7063 = vmatprep.subr.mxu1 %v11278_v8  ;;  %11290 = vst [vmem:[#allocation5_spill] sm:$0xff] %v10477_v28 }
 0x30a   : > { %v4359_v34 = vadd.f32 %v4346_v55, %v10235_v10  ;;  %v4704_v59 = vpop.f32.mrf.mxu0  ;;  %v6718_v10 = vld [vmem:[%s11274_s5 + $0x80] sm:$0xff] }
 0x30b   : > { %v4834_v62 = vadd.f32 %v4704_v59, %v10237_v32  ;;  %v4348_v33 = vpop.f32.mrf.mxu1  ;;  %7861 = vmatprep.subr.mxu0 %v6718_v10  ;;  %v6702_v32 = vld [vmem:[%s11274_s5] sm:$0xff]  ;;  %v10449_v59 = vld [vmem:[%s11274_s5 + $0x3b8] sm:$0xff] }
 0x30c   : > { %v4360_v19 = vadd.f32 %v4348_v33, %v10248_v25  ;;  %v4706_v17 = vpop.f32.mrf.mxu0  ;;  %7862 = vmatpush3.msra.mxu0 %v6702_v32  ;;  %v10375_v25 = vld [vmem:[%s11274_s5 + $0x320] sm:$0xff] }
 0x30d   : > { %v4835_v21 = vadd.f32 %v4706_v17, %v10250_v12  ;;  %v4350_v4 = vpop.f32.mrf.mxu1  ;;  %7866 = vmatprep.subr.mxu0 %v10368_v53  ;;  %7064 = vmatpush1.msra.mxu1 %v10375_v25  ;;  %v10463_v17 = vld [vmem:[%s11274_s5 + $0x3a8] sm:$0xff] }
 0x30e   : > { %v4708_v42 = vpop.f32.mrf.mxu0  ;;  %7065 = vmatprep.subr.mxu1 %v11278_v8  ;;  %11288 = vst [vmem:[#allocation3_spill] sm:$0xff] %v10463_v17 }
 0x30f   : > { %v4351_v0 = vpop.f32.mrf.mxu1  ;;  %7066 = vmatpush1.msra.mxu1 %v10384_v51 }
 0x310   : > { %v4709_v38 = vpop.f32.mrf.mxu0  ;;  %7067 = vmatprep.subr.mxu1 %v11278_v8 }
 0x311   : > { %v4489_v24 = vpop.f32.mrf.mxu1  ;;  %7068 = vmatpush1.msra.mxu1 %v10393_v36 }
 0x312   : > { %v4580_v22 = vadd.f32 %v4489_v24, %v10283_v57  ;;  %v4786_v12 = vpop.f32.mrf.mxu0  ;;  %7069 = vmatprep.subr.mxu1 %v11278_v8 }
 0x313   : > { %v4838_v61 = vadd.f32 %v4786_v12, %v10286_v31  ;;  %v4491_v35 = vpop.f32.mrf.mxu1  ;;  %7070 = vmatpush1.msra.mxu1 %v10400_v16 }
 0x314   : > { %v4581_v60 = vadd.f32 %v4491_v35, %v10299_v3  ;;  %v4788_v18 = vpop.f32.mrf.mxu0  ;;  %7071 = vmatprep.subr.mxu1 %v11278_v8  ;;  %v10491_v35 = vld [vmem:[%s11274_s5 + $0x388] sm:$0xff] }
 0x315   : > { %v4839_v52 = vadd.f32 %v4788_v18, %v10302_v29  ;;  %v4493_v40 = vpop.f32.mrf.mxu1  ;;  %7072 = vmatpush1.msra.mxu1 %v10407_v45  ;;  %v10421_v29 = vld [vmem:[%s11274_s5 + $0x3d8] sm:$0xff]  ;;  %11292 = vst [vmem:[#allocation7_spill] sm:$0xff] %v10491_v35 }
 0x316   : > { %v4790_v63 = vpop.f32.mrf.mxu0  ;;  %7079 = vmatprep.subr.mxu1 %v11278_v8 }
 0x317   : > { %v4494_v56 = vpop.f32.mrf.mxu1  ;;  %7080 = vmatpush2.msra.mxu1 %v10414_v46  ;;  %v10498_v63 = vld [vmem:[%s11274_s5 + $0x380] sm:$0xff] }
 0x318   : > { %v4791_v23 = vpop.f32.mrf.mxu0  ;;  %7081 = vmatprep.subr.mxu1 %v11278_v8  ;;  %11293 = vst [vmem:[#allocation8_spill] sm:$0xff] %v10498_v63 }
 0x319   : > { %v4571_v6 = vpop.f32.mrf.mxu1  ;;  %7082 = vmatpush2.msra.mxu1 %v10421_v29 }
 0x31a   : > { %v4584_v57 = vadd.f32 %v4571_v6, %v4359_v34  ;;  %v4932_v39 = vpop.f32.mrf.mxu0  ;;  %7083 = vmatprep.subr.mxu1 %v11278_v8 }
 0x31b   : > { %v5062_v31 = vadd.f32 %v4932_v39, %v4834_v62  ;;  %v4573_v11 = vpop.f32.mrf.mxu1  ;;  %7084 = vmatpush2.msra.mxu1 %v10428_v1 }
 0x31c   : > { %v4585_v50 = vadd.f32 %v4573_v11, %v4360_v19  ;;  %v4934_v44 = vpop.f32.mrf.mxu0  ;;  %7085 = vmatprep.subr.mxu1 %v11278_v8 }
 0x31d   : > { %v5063_v3 = vadd.f32 %v4934_v44, %v4835_v21  ;;  %v4575_v54 = vpop.f32.mrf.mxu1  ;;  %7086 = vmatpush2.msra.mxu1 %v10435_v41 }
 0x31e   : > { %v4936_v14 = vpop.f32.mrf.mxu0  ;;  %7087 = vmatprep.subr.mxu1 %v11278_v8 }
 0x31f   : > { %v4576_v48 = vpop.f32.mrf.mxu1  ;;  %7088 = vmatpush2.msra.mxu1 %v10442_v20 }
 0x320   : > { %v4937_v37 = vpop.f32.mrf.mxu0  ;;  %7089 = vmatprep.subr.mxu1 %v11278_v8 }
 0x321   : > { %v4745_v49 = vpop.f32.mrf.mxu1  ;;  %7090 = vmatpush2.msra.mxu1 %v10449_v59 }
 0x322   : > { %v4836_v47 = vadd.f32 %v4745_v49, %v4580_v22  ;;  %v5014_v7 = vpop.f32.mrf.mxu0  ;;  %7091 = vmatprep.subr.mxu1 %v11278_v8  ;;  %v10484_v22 = vld [vmem:[%s11274_s5 + $0x390] sm:$0xff] }
 0x323   : > { %v5066_v26 = vadd.f32 %v5014_v7, %v4838_v61  ;;  %v4747_v15 = vpop.f32.mrf.mxu1  ;;  %7092 = vmatpush2.msra.mxu1 %v10456_v5  ;;  %11291 = vst [vmem:[#allocation6_spill] sm:$0xff] %v10484_v22 }
 0x324   : > { %v4837_v58 = vadd.f32 %v4747_v15, %v4581_v60  ;;  %v5016_v13 = vpop.f32.mrf.mxu0  ;;  %7093 = vmatprep.subr.mxu1 %v11278_v8 }
 0x325   : > { %v5067_v55 = vadd.f32 %v5016_v13, %v4839_v52  ;;  %v4749_v34 = vpop.f32.mrf.mxu1  ;;  %7094 = vmatpush2.msra.mxu1 %v10463_v17 }
 0x326   : > { %v5018_v62 = vpop.f32.mrf.mxu0  ;;  %7095 = vmatprep.subr.mxu1 %v11278_v8 }
 0x327   : > { %v4750_v33 = vpop.f32.mrf.mxu1  ;;  %7096 = vmatpush2.msra.mxu1 %v10470_v43 }
 0x328   : > { %v5019_v30 = vpop.f32.mrf.mxu0  ;;  %7097 = vmatprep.subr.mxu1 %v11278_v8 }
 0x329   : > { %v4827_v19 = vpop.f32.mrf.mxu1  ;;  %7098 = vmatpush2.msra.mxu1 %v10477_v28 }
 0x32a   : > { %v4840_v9 = vadd.f32 %v4827_v19, %v4584_v57  ;;  %v5160_v21 = vpop.f32.mrf.mxu0  ;;  %7099 = vmatprep.subr.mxu1 %v11278_v8 }
 0x32b   : > { %v5290_v4 = vadd.f32 %v5160_v21, %v5062_v31  ;;  %v4829_v27 = vpop.f32.mrf.mxu1  ;;  %7100 = vmatpush2.msra.mxu1 %v10484_v22 }
 0x32c   : > { %v4841_v42 = vadd.f32 %v4829_v27, %v4585_v50  ;;  %v5162_v10 = vpop.f32.mrf.mxu0  ;;  %7101 = vmatprep.subr.mxu1 %v11278_v8 }
 0x32d   : > { %v5291_v0 = vadd.f32 %v5162_v10, %v5063_v3  ;;  %v4831_v32 = vpop.f32.mrf.mxu1  ;;  %7102 = vmatpush2.msra.mxu1 %v10491_v35 }
 0x32e   : > { %v5164_v38 = vpop.f32.mrf.mxu0  ;;  %7103 = vmatprep.subr.mxu1 %v11278_v8 }
 0x32f   : > { %v4832_v24 = vpop.f32.mrf.mxu1  ;;  %7104 = vmatpush2.msra.mxu1 %v10498_v63 }
 0x330   : > { %v5165_v12 = vpop.f32.mrf.mxu0  ;;  %7971 = vmatprep.subr.mxu1 %v10368_v53 }
 0x331   : > { %v4973_v61 = vpop.f32.mrf.mxu1 }
 0x332   : > { %v5064_v60 = vadd.f32 %v4973_v61, %v4836_v47  ;;  %v5242_v18 = vpop.f32.mrf.mxu0 }
 0x333   : > { %v5294_v52 = vadd.f32 %v5242_v18, %v5066_v26  ;;  %v4975_v40 = vpop.f32.mrf.mxu1 }
 0x334   : > { %v5065_v56 = vadd.f32 %v4975_v40, %v4837_v58  ;;  %v5244_v23 = vpop.f32.mrf.mxu0 }
 0x335   : > { %v5295_v6 = vadd.f32 %v5244_v23, %v5067_v55  ;;  %v4977_v57 = vpop.f32.mrf.mxu1 }
 0x336   : > { %v5246_v39 = vpop.f32.mrf.mxu0 }
 0x337   : > { %v4978_v31 = vpop.f32.mrf.mxu1 }
 0x338   : > { %v5247_v11 = vpop.f32.mrf.mxu0 }
 0x339   : > { %v5055_v50 = vpop.f32.mrf.mxu1 }
 0x33a   : > { %v5068_v44 = vadd.f32 %v5055_v50, %v4840_v9  ;;  %v5388_v3 = vpop.f32.mrf.mxu0 }
 0x33b   : > { %v10502_v54 = vadd.f32 %v5388_v3, %v5290_v4  ;;  %v5057_v14 = vpop.f32.mrf.mxu1 }
 0x33c   : > { %v5069_v48 = vadd.f32 %v5057_v14, %v4841_v42  ;;  %v5390_v37 = vpop.f32.mrf.mxu0 }
 0x33d   : > { %v10504_v49 = vadd.f32 %v5390_v37, %v5291_v0  ;;  %v5059_v47 = vpop.f32.mrf.mxu1 }
 0x33e   : > { %v5392_v7 = vpop.f32.mrf.mxu0 }
 0x33f   : > { %v5060_v26 = vpop.f32.mrf.mxu1 }
 0x340   : > { %v5393_v15 = vpop.f32.mrf.mxu0 }
 0x341   : > { %v5201_v58 = vpop.f32.mrf.mxu1 }
 0x342   : > { %v5292_v13 = vadd.f32 %v5201_v58, %v5064_v60  ;;  %v5470_v53 = vpop.f32.mrf.mxu0 }
 0x343   : > { %v5522_v55 = vadd.f32 %v5470_v53, %v5294_v52  ;;  %v5203_v34 = vpop.f32.mrf.mxu1 }
 0x344   : > { %v5293_v62 = vadd.f32 %v5203_v34, %v5065_v56  ;;  %v5472_v33 = vpop.f32.mrf.mxu0 }
 0x345   : > { %v5523_v30 = vadd.f32 %v5472_v33, %v5295_v6  ;;  %v5205_v19 = vpop.f32.mrf.mxu1 }
 0x346   : > { %v5474_v9 = vpop.f32.mrf.mxu0 }
 0x347   : > { %v5206_v21 = vpop.f32.mrf.mxu1 }
 0x348   : > { %v5475_v4 = vpop.f32.mrf.mxu0 }
 0x349   : > { %v5283_v27 = vpop.f32.mrf.mxu1 }
 0x34a   : > { %v5296_v42 = vadd.f32 %v5283_v27, %v5068_v44  ;;  %v10506_v10 = vpop.f32.mrf.mxu0 }
 0x34b   : > { %v5285_v0 = vpop.f32.mrf.mxu1 }
 0x34c   : > { %v5297_v32 = vadd.f32 %v5285_v0, %v5069_v48  ;;  %v10508_v38 = vpop.f32.mrf.mxu0 }
 0x34d   : > { %v5287_v24 = vpop.f32.mrf.mxu1 }
 0x34e   : > { %v5620_v12 = vpop.f32.mrf.mxu0 }
 0x34f   : > { %v5288_v61 = vpop.f32.mrf.mxu1 }
 0x350   : > { %v5621_v60 = vpop.f32.mrf.mxu0 }
 0x351   : > { %v5429_v18 = vpop.f32.mrf.mxu1 }
 0x352   : > { %v10510_v52 = vadd.f32 %v5429_v18, %v5292_v13  ;;  %v5698_v40 = vpop.f32.mrf.mxu0 }
 0x353   : > { %v10512_v56 = vadd.f32 %v5698_v40, %v5522_v55  ;;  %v5431_v23 = vpop.f32.mrf.mxu1 }
 0x354   : > { %v10514_v6 = vadd.f32 %v5431_v23, %v5293_v62  ;;  %v5700_v57 = vpop.f32.mrf.mxu0 }
 0x355   : > { %v10516_v39 = vadd.f32 %v5700_v57, %v5523_v30  ;;  %v5433_v31 = vpop.f32.mrf.mxu1 }
 0x356   : > { %v5702_v11 = vpop.f32.mrf.mxu0 }
 0x357   : > { %v5434_v50 = vpop.f32.mrf.mxu1 }
 0x358   : > { %v5703_v44 = vpop.f32.mrf.mxu0 }
 0x359   : > { %v5511_v3 = vpop.f32.mrf.mxu1 }
 0x35a   : > { %v10518_v14 = vadd.f32 %v5511_v3, %v5296_v42  ;;  %v5844_v48 = vpop.f32.mrf.mxu0 }
 0x35b   : > { %v5513_v37 = vpop.f32.mrf.mxu1 }
 0x35c   : > { %v10520_v47 = vadd.f32 %v5513_v37, %v5297_v32  ;;  %v5846_v7 = vpop.f32.mrf.mxu0 }
 0x35d   : > { %v5515_v26 = vpop.f32.mrf.mxu1 }
 0x35e   : > { %v5848_v15 = vpop.f32.mrf.mxu0 }
 0x35f   : > { %v5516_v58 = vpop.f32.mrf.mxu1 }
 0x360   : > { %v5849_v13 = vpop.f32.mrf.mxu0 }
 0x361   : > { %v10522_v53 = vpop.f32.mrf.mxu1 }
 0x362   : > { %v10524_v55 = vpop.f32.mrf.mxu0 }
 0x363   : > { %v10526_v34 = vpop.f32.mrf.mxu1 }
 0x364   : > { %v10528_v62 = vpop.f32.mrf.mxu0 }
 0x365   : > { %v5661_v33 = vpop.f32.mrf.mxu1 }
 0x366   : > { %v5930_v30 = vpop.f32.mrf.mxu0 }
 0x367   : > { %v5662_v19 = vpop.f32.mrf.mxu1 }
 0x368   : > { %v5931_v9 = vpop.f32.mrf.mxu0 }
 0x36a   : > { %v10530_v21 = vpop.f32.mrf.mxu1  ;;  %v6072_v4 = vpop.f32.mrf.mxu0 }
 0x36c   : > { %v10532_v27 = vpop.f32.mrf.mxu1  ;;  %v6074_v42 = vpop.f32.mrf.mxu0 }
 0x36e   : > { %v5743_v0 = vpop.f32.mrf.mxu1  ;;  %v6076_v32 = vpop.f32.mrf.mxu0 }
 0x36f   : > { %v5746_v0 = vadd.f32 %v10506_v10, %v10502_v54  ;;  %v5747_v32 = vadd.f32 %v10508_v38, %v10504_v49  ;;  %v10570_v10 = vld [vmem:[%s11274_s5 + $0x178] sm:$0xff] }
 0x370   : > { %v5744_v24 = vpop.f32.mrf.mxu1  ;;  %v6077_v12 = vpop.f32.mrf.mxu0 }
 0x372   : > { %v10534_v61 = vpop.f32.mrf.mxu1  ;;  %v10536_v60 = vpop.f32.mrf.mxu0 }
 0x374   : > { %v10538_v18 = vpop.f32.mrf.mxu1  ;;  %v10540_v40 = vpop.f32.mrf.mxu0 }
 0x376   : > { %v5889_v23 = vpop.f32.mrf.mxu1  ;;  %v6158_v57 = vpop.f32.mrf.mxu0 }
 0x377   : > { %v5974_v23 = vadd.f32 %v5844_v48, %v5746_v0  ;;  %v5975_v57 = vadd.f32 %v5846_v7, %v5747_v32  ;;  %v10586_v7 = vld [vmem:[%s11274_s5 + $0x170] sm:$0xff]  ;;  %v10611_v32 = vld [vmem:[%s11274_s5 + $0x160] sm:$0xff] }
 0x378   : > { %v5890_v31 = vpop.f32.mrf.mxu1  ;;  %v6159_v11 = vpop.f32.mrf.mxu0 }
 0x37a   : > { %v10542_v50 = vpop.f32.mrf.mxu1  ;;  %v6300_v44 = vpop.f32.mrf.mxu0 }
 0x37c   : > { %v10544_v3 = vpop.f32.mrf.mxu1  ;;  %v6302_v37 = vpop.f32.mrf.mxu0 }
 0x37e   : > { %v5971_v26 = vpop.f32.mrf.mxu1  ;;  %v6304_v15 = vpop.f32.mrf.mxu0 }
 0x37f   : > { %v6202_v26 = vadd.f32 %v6072_v4, %v5974_v23  ;;  %v6203_v15 = vadd.f32 %v6074_v42, %v5975_v57  ;;  %v10593_v4 = vld [vmem:[%s11274_s5 + $0x1e8] sm:$0xff]  ;;  %v10623_v23 = vld [vmem:[%s11274_s5 + $0x158] sm:$0xff]  ;;  %v5978_v57 = vadd.f32 %v10524_v55, %v10512_v56 }
 0x380   : > { %v5972_v58 = vpop.f32.mrf.mxu1  ;;  %v6305_v13 = vpop.f32.mrf.mxu0 }
 0x381   : > { %v6430_v13 = vadd.f32 %v6300_v44, %v6202_v26  ;;  %v6431_v8 = vadd.f32 %v6302_v37, %v6203_v15  ;;  %v10599_v44 = vld [vmem:[%s11274_s5 + $0x168] sm:$0xff]  ;;  %v10605_v37 = vld [vmem:[%s11274_s5 + $0x1e0] sm:$0xff]  ;;  %v10639_v15 = vld [vmem:[%s11274_s5 + $0x150] sm:$0xff]  ;;  %v6206_v56 = vadd.f32 %v10536_v60, %v5978_v57 }
 0x382   : > { %v10546_v33 = vpop.f32.mrf.mxu1  ;;  %v6382_v30 = vpop.f32.mrf.mxu0 }
 0x384   : > { %v10548_v19 = vpop.f32.mrf.mxu1  ;;  %v6384_v9 = vpop.f32.mrf.mxu0 }
 0x386   : > { %v6386_v24 = vpop.f32.mrf.mxu0  ;;  %v6117_v12 = vpop.f32.mrf.mxu1 }
 0x387   : > { %v10617_v24 = vld [vmem:[%s11274_s5 + $0x1d8] sm:$0xff] }
 0x388   : > { %v6387_v31 = vpop.f32.mrf.mxu0  ;;  %v6118_v11 = vpop.f32.mrf.mxu1 }
 0x389   : > { %v5979_v31 = vadd.f32 %v10528_v62, %v10516_v39  ;;  %v10633_v11 = vld [vmem:[%s11274_s5 + $0x1d0] sm:$0xff]  ;;  %v10647_v39 = vld [vmem:[%s11274_s5 + $0x1c8] sm:$0xff] }
 0x38a   : > { %v6528_v58 = vpop.f32.mrf.mxu0 }
 0x38b   : > { %v10554_v35 = vadd.f32 %v6528_v58, %v6430_v13  ;;  %v6207_v55 = vadd.f32 %v10540_v40, %v5979_v31  ;;  %v10653_v13 = vld [vmem:[%s11274_s5 + $0x148] sm:$0xff]  ;;  %v10659_v40 = vld [vmem:[%s11274_s5 + $0x1c0] sm:$0xff]  ;;  %v10683_v31 = vld [vmem:[%s11274_s5 + $0x138] sm:$0xff] }
 0x38c   : > { %v6530_v63 = vpop.f32.mrf.mxu0 }
 0x38d   : > { %v10556_v22 = vadd.f32 %v6530_v63, %v6431_v8  ;;  %v10578_v8 = vld [vmem:[%s11274_s5 + $0x1f0] sm:$0xff]  ;;  %v6435_v60 = vadd.f32 %v6384_v9, %v6207_v55  ;;  %v10675_v9 = vld [vmem:[%s11274_s5 + $0x1b8] sm:$0xff] }
 0x38e   : > { %v10565_v54 = vpop.f32.mrf.mxu1  ;;  %v6532_v49 = vpop.f32.mrf.mxu0 }
 0x38f   : > { %v7827_v38 = vpack.c.bf16 %v10556_v22, %v10554_v35  ;;  %6895 = vmatprep.mubr.f32.mxu0 %v10556_v22  ;;  %v6434_v49 = vadd.f32 %v6382_v30, %v6206_v56 }
 0x390   : > { %v10580_v63 = vpop.f32.mrf.mxu1  ;;  %v6533_v48 = vpop.f32.mrf.mxu0  ;;  %6896 = vmatmul.mubr.f32.vlgmr.msra.gmra.mxu0 %v10554_v35 }
 0x391   : > { %6698 = vst [vmem:[%s10563_s14] sm:$0xff] %v7827_v38  ;;  %7867 = vmatpush3.msra.mxu0 %v10570_v10 }
 0x392   : > { %7868 = vmatprep.subr.mxu0 %v10578_v8  ;;  %v6199_v42 = vpop.f32.mrf.mxu1 }
 0x393   : > { %7869 = vmatpush3.msra.mxu0 %v10586_v7  ;;  %v10665_v42 = vld [vmem:[%s11274_s5 + $0x140] sm:$0xff] }
 0x394   : > { %7870 = vmatprep.subr.mxu0 %v10593_v4  ;;  %v6200_v0 = vpop.f32.mrf.mxu1 }
 0x395   : > { %7871 = vmatpush3.msra.mxu0 %v10599_v44 }
 0x396   : > { %7872 = vmatprep.subr.mxu0 %v10605_v37  ;;  %v6341_v12 = vpop.f32.mrf.mxu1 }
 0x397   : > { %7873 = vmatpush3.msra.mxu0 %v10611_v32 }
 0x398   : > { %7874 = vmatprep.subr.mxu0 %v10617_v24  ;;  %v6343_v26 = vpop.f32.mrf.mxu1 }
 0x399   : > { %7875 = vmatpush3.msra.mxu0 %v10623_v23 }
 0x39a   : > { %7876 = vmatprep.subr.mxu0 %v10633_v11  ;;  %v6345_v62 = vpop.f32.mrf.mxu1  ;;  %v6610_v58 = vpop.f32.mrf.mxu0 }
 0x39b   : > { %7877 = vmatpush3.msra.mxu0 %v10639_v15  ;;  %v10667_v0 = vadd.f32 %v6610_v58, %v6434_v49  ;;  %v10691_v62 = vld [vmem:[%s11274_s5 + $0x1b0] sm:$0xff] }
 0x39c   : > { %7878 = vmatprep.subr.mxu0 %v10647_v39  ;;  %v6346_v38 = vpop.f32.mrf.mxu1  ;;  %v6612_v48 = vpop.f32.mrf.mxu0  ;;  %v10697_v49 = vld [vmem:[%s11274_s5 + $0x130] sm:$0xff] }
 0x39d   : > { %v10669_v30 = vadd.f32 %v6612_v48, %v6435_v60  ;;  %7879 = vmatpush3.msra.mxu0 %v10653_v13  ;;  %v5748_v38 = vadd.f32 %v10522_v53, %v10510_v52  ;;  %v5749_v48 = vadd.f32 %v10526_v34, %v10514_v6  ;;  %v10722_v53 = vld [vmem:[%s11274_s5 + $0x1a0] sm:$0xff] }
 0x39e   : > { %7880 = vmatprep.subr.mxu0 %v10659_v40  ;;  %v10678_v57 = vpop.f32.mrf.mxu1  ;;  %v6614_v56 = vpop.f32.mrf.mxu0 }
 0x39f   : > { %v7829_v55 = vpack.c.bf16 %v10669_v30, %v10667_v0  ;;  %7881 = vmatpush3.msra.mxu0 %v10665_v42  ;;  %v10708_v56 = vld [vmem:[%s11274_s5 + $0x1a8] sm:$0xff]  ;;  %v5976_v52 = vadd.f32 %v10534_v61, %v5748_v38  ;;  %v5977_v6 = vadd.f32 %v10538_v18, %v5749_v48  ;;  %v10736_v18 = vld [vmem:[%s11274_s5 + $0x198] sm:$0xff] }
 0x3a0   : > { %7882 = vmatprep.subr.mxu0 %v10675_v9  ;;  %v6425_v58 = vpop.f32.mrf.mxu1  ;;  %v6615_v60 = vpop.f32.mrf.mxu0  ;;  %v10742_v48 = vld [vmem:[%s11274_s5 + $0x118] sm:$0xff] }
 0x3a1   : > { %6700 = vst [vmem:[%s10563_s14 + $0x10] sm:$0xff] %v7829_v55  ;;  %7883 = vmatpush3.msra.mxu0 %v10683_v31  ;;  %v10714_v60 = vld [vmem:[%s11274_s5 + $0x128] sm:$0xff]  ;;  %v6204_v55 = vadd.f32 %v10546_v33, %v5976_v52  ;;  %v6205_v61 = vadd.f32 %v10548_v19, %v5977_v6  ;;  %v10748_v33 = vld [vmem:[%s11274_s5 + $0x190] sm:$0xff]  ;;  %v5752_v6 = vadd.f32 %v10530_v21, %v10518_v14 }
 0x3a2   : > { %7884 = vmatprep.subr.mxu0 %v10691_v62  ;;  %v6427_v28 = vpop.f32.mrf.mxu1  ;;  %v10754_v52 = vld [vmem:[%s11274_s5 + $0x110] sm:$0xff]  ;;  %v10772_v14 = vld [vmem:[%s11274_s5 + $0x108] sm:$0xff] }
 0x3a3   : > { %7885 = vmatpush3.msra.mxu0 %v10697_v49  ;;  %v10728_v28 = vld [vmem:[%s11274_s5 + $0x120] sm:$0xff]  ;;  %v6433_v43 = vadd.f32 %v6343_v26, %v6205_v61  ;;  %v10766_v61 = vld [vmem:[%s11274_s5 + $0x188] sm:$0xff] }
 0x3a4   : > { %7886 = vmatprep.subr.mxu0 %v10708_v56  ;;  %v6428_v34 = vpop.f32.mrf.mxu1 }
 0x3a5   : > { %7887 = vmatpush3.msra.mxu0 %v10714_v60  ;;  %v6432_v34 = vadd.f32 %v6341_v12, %v6204_v55  ;;  %v5753_v12 = vadd.f32 %v10532_v27, %v10520_v47  ;;  %v5980_v47 = vadd.f32 %v10542_v50, %v5752_v6  ;;  %v10781_v27 = vld [vmem:[%s11274_s5 + $0x180] sm:$0xff]  ;;  %v10802_v6 = vld [vmem:[%s11274_s5 + $0x278] sm:$0xff] }
 0x3a6   : > { %7888 = vmatprep.subr.mxu0 %v10722_v53  ;;  %v6569_v38 = vpop.f32.mrf.mxu1 }
 0x3a7   : > { %7889 = vmatpush3.msra.mxu0 %v10728_v28  ;;  %v10760_v26 = vadd.f32 %v6569_v38, %v6432_v34  ;;  %v10787_v38 = vld [vmem:[%s11274_s5 + $0x100] sm:$0xff]  ;;  %v6208_v50 = vadd.f32 %v10565_v54, %v5980_v47  ;;  %v10796_v34 = vld [vmem:[%s11274_s5 + $0x2f8] sm:$0xff] }
 0x3a8   : > { %7890 = vmatprep.subr.mxu0 %v10736_v18  ;;  %v6571_v19 = vpop.f32.mrf.mxu1 }
 0x3a9   : > { %v6661_v55 = vadd.f32 %v6571_v19, %v6433_v43  ;;  %7891 = vmatpush3.msra.mxu0 %v10742_v48  ;;  %v5981_v43 = vadd.f32 %v10544_v3, %v5753_v12  ;;  %v6436_v54 = vadd.f32 %v10678_v57, %v6208_v50 }
 0x3aa   : > { %7892 = vmatprep.subr.mxu0 %v10748_v33  ;;  %v6573_v17 = vpop.f32.mrf.mxu1 }
 0x3ab   : > { %v7828_v21 = vpack.c.bf16 %v6661_v55, %v10760_v26  ;;  %7893 = vmatpush3.msra.mxu0 %v10754_v52  ;;  %6965 = vmatprep.mubr.f32.mxu0 %v6661_v55  ;;  %v6209_v3 = vadd.f32 %v10580_v63, %v5981_v43  ;;  %v10809_v63 = vld [vmem:[%s11274_s5 + $0x2f0] sm:$0xff] }
 0x3ac   : > { %7894 = vmatprep.subr.mxu0 %v10766_v61  ;;  %v6574_v17 = vpop.f32.mrf.mxu1  ;;  %v10816_v43 = vld [vmem:[%s11274_s5 + $0x270] sm:$0xff] }
 0x3ad   : > { %6699 = vst [vmem:[%s10563_s14 + $0x8] sm:$0xff] %v7828_v21  ;;  %7895 = vmatpush3.msra.mxu0 %v10772_v14  ;;  %v6437_v12 = vadd.f32 %v6425_v58, %v6209_v3  ;;  %v10827_v21 = vld [vmem:[%s11274_s5 + $0x2e8] sm:$0xff] }
 0x3ae   : > { %7896 = vmatprep.subr.mxu0 %v10781_v27  ;;  %v6651_v19 = vpop.f32.mrf.mxu1  ;;  %v10833_v17 = vld [vmem:[%s11274_s5 + $0x268] sm:$0xff] }
 0x3af   : > { %7897 = vmatpush3.msra.mxu0 %v10787_v38  ;;  %v10818_v57 = vadd.f32 %v6651_v19, %v6436_v54  ;;  %v10843_v19 = vld [vmem:[%s11274_s5 + $0x2e0] sm:$0xff] }
 0x3b0   : > { %6966 = vmatmul.mubr.f32.vlgmr.msra.gmra.mxu0 %v10760_v26  ;;  %7901 = vmatprep.subr.mxu0 %v10796_v34  ;;  %v6653_v47 = vpop.f32.mrf.mxu1  ;;  %v10850_v54 = vld [vmem:[%s11274_s5 + $0x260] sm:$0xff] }
 0x3b1   : > { %v10820_v58 = vadd.f32 %v6653_v47, %v6437_v12  ;;  %7902 = vmatpush3.msra.mxu0 %v10802_v6  ;;  %7035 = vmatprep.mubr.f32.mxu0 %v10669_v30  ;;  %v7116_v47 = vmul.f32 %v6661_v55, %v6661_v55 }
 0x3b2   : > { %7903 = vmatprep.subr.mxu0 %v10809_v63  ;;  %v6655_v50 = vpop.f32.mrf.mxu1 }
 0x3b3   : > { %v7830_v3 = vpack.c.bf16 %v10820_v58, %v10818_v57  ;;  %7904 = vmatpush3.msra.mxu0 %v10816_v43  ;;  %7817 = vmatprep.mubr.msk.f32.mxu1 %vm6827_vm4, %v10820_v58  ;;  %v10860_v50 = vld [vmem:[%s11274_s5 + $0x2d8] sm:$0xff]  ;;  %v7120_v55 = vmul.f32 %v10820_v58, %v10820_v58  ;;  %v8106_v58 = vld [vmem:[%s11274_s5 + $0x370] sm:$0xff] }
 0x3b4   : > { %7905 = vmatprep.subr.mxu0 %v10827_v21  ;;  %7106 = vmatmul.mubr.f32.vlgmr.msra.gmra.mxu1 %v10818_v57  ;;  %v6656_v12 = vpop.f32.mrf.mxu1 }
 0x3b5   : > { %6701 = vst.msk [vmem:[%s10563_s14 + $0x18] sm:$0xff] %vm8273_vm13, %v7830_v3  ;;  %7906 = vmatpush3.msra.mxu0 %v10833_v17  ;;  %7972 = vmatpush3.msra.mxu1 %v10570_v10  ;;  %v10867_v12 = vld [vmem:[%s11274_s5 + $0x258] sm:$0xff]  ;;  %v10880_v10 = vld [vmem:[%s11274_s5 + $0x250] sm:$0xff] }
 0x3b6   : > { %7907 = vmatprep.subr.mxu0 %v10843_v19  ;;  %7973 = vmatprep.subr.mxu1 %v10578_v8  ;;  %v10887_v8 = vld [vmem:[%s11274_s5 + $0x2c8] sm:$0xff]  ;;  %v8107_v3 = vld [vmem:[%s11274_s5 + $0xd8] sm:$0xff] }
 0x3b7   : > { %7258 = vmatprep.mubr.f32.mxu1 %v7116_v47  ;;  %7908 = vmatpush3.msra.mxu0 %v10850_v54  ;;  %v8108_v47 = vld [vmem:[%s11274_s5 + $0x58] sm:$0xff] }
 0x3b8   : > { %7974 = vmatpush3.msra.mxu1 %v10586_v7  ;;  %7909 = vmatprep.subr.mxu0 %v10860_v50  ;;  %v10894_v7 = vld [vmem:[%s11274_s5 + $0x248] sm:$0xff] }
 0x3b9   : > { %7975 = vmatprep.subr.mxu1 %v10593_v4  ;;  %7910 = vmatpush3.msra.mxu0 %v10867_v12  ;;  %v10901_v4 = vld [vmem:[%s11274_s5 + $0x2c0] sm:$0xff] }
 0x3ba   : > { %7976 = vmatpush3.msra.mxu1 %v10599_v44  ;;  %7911 = vmatprep.subr.mxu0 %v10873_v2  ;;  %v10908_v44 = vld [vmem:[%s11274_s5 + $0x240] sm:$0xff] }
 0x3bb   : > { %7977 = vmatprep.subr.mxu1 %v10605_v37  ;;  %7912 = vmatpush3.msra.mxu0 %v10880_v10  ;;  %v10915_v37 = vld [vmem:[%s11274_s5 + $0x2b8] sm:$0xff] }
 0x3bc   : > { %7978 = vmatpush3.msra.mxu1 %v10611_v32  ;;  %7913 = vmatprep.subr.mxu0 %v10887_v8  ;;  %v10922_v32 = vld [vmem:[%s11274_s5 + $0x238] sm:$0xff] }
 0x3bd   : > { %7979 = vmatprep.subr.mxu1 %v10617_v24  ;;  %7914 = vmatpush3.msra.mxu0 %v10894_v7  ;;  %v10929_v24 = vld [vmem:[%s11274_s5 + $0x2b0] sm:$0xff] }
 0x3be   : > { %7980 = vmatpush3.msra.mxu1 %v10623_v23  ;;  %7915 = vmatprep.subr.mxu0 %v10901_v4  ;;  %v10936_v23 = vld [vmem:[%s11274_s5 + $0x230] sm:$0xff] }
 0x3bf   : > { %7981 = vmatprep.subr.mxu1 %v10633_v11  ;;  %7916 = vmatpush3.msra.mxu0 %v10908_v44  ;;  %v10943_v11 = vld [vmem:[%s11274_s5 + $0x2a8] sm:$0xff] }
 0x3c0   : > { %7982 = vmatpush3.msra.mxu1 %v10639_v15  ;;  %7917 = vmatprep.subr.mxu0 %v10915_v37  ;;  %v10950_v15 = vld [vmem:[%s11274_s5 + $0x228] sm:$0xff] }
 0x3c1   : > { %7983 = vmatprep.subr.mxu1 %v10647_v39  ;;  %7918 = vmatpush3.msra.mxu0 %v10922_v32  ;;  %v10957_v39 = vld [vmem:[%s11274_s5 + $0x2a0] sm:$0xff] }
 0x3c2   : > { %7984 = vmatpush3.msra.mxu1 %v10653_v13  ;;  %7919 = vmatprep.subr.mxu0 %v10929_v24  ;;  %v10964_v13 = vld [vmem:[%s11274_s5 + $0x220] sm:$0xff] }
 0x3c3   : > { %7985 = vmatprep.subr.mxu1 %v10659_v40  ;;  %7920 = vmatpush3.msra.mxu0 %v10936_v23  ;;  %v10971_v40 = vld [vmem:[%s11274_s5 + $0x298] sm:$0xff] }
 0x3c4   : > { %7986 = vmatpush3.msra.mxu1 %v10665_v42  ;;  %7921 = vmatprep.subr.mxu0 %v10943_v11  ;;  %v10978_v42 = vld [vmem:[%s11274_s5 + $0x218] sm:$0xff] }
 0x3c5   : > { %7987 = vmatprep.subr.mxu1 %v10675_v9  ;;  %7922 = vmatpush3.msra.mxu0 %v10950_v15  ;;  %v10985_v9 = vld [vmem:[%s11274_s5 + $0x290] sm:$0xff] }
 0x3c6   : > { %7988 = vmatpush3.msra.mxu1 %v10683_v31  ;;  %7923 = vmatprep.subr.mxu0 %v10957_v39  ;;  %v10992_v31 = vld [vmem:[%s11274_s5 + $0x210] sm:$0xff] }
 0x3c7   : > { %7989 = vmatprep.subr.mxu1 %v10691_v62  ;;  %7924 = vmatpush3.msra.mxu0 %v10964_v13  ;;  %v10999_v62 = vld [vmem:[%s11274_s5 + $0x288] sm:$0xff] }
 0x3c8   : > { %7990 = vmatpush3.msra.mxu1 %v10697_v49  ;;  %7925 = vmatprep.subr.mxu0 %v10971_v40  ;;  %v11006_v49 = vld [vmem:[%s11274_s5 + $0x208] sm:$0xff] }
 0x3c9   : > { %7991 = vmatprep.subr.mxu1 %v10708_v56  ;;  %7926 = vmatpush3.msra.mxu0 %v10978_v42  ;;  %v11013_v56 = vld [vmem:[%s11274_s5 + $0x280] sm:$0xff] }
 0x3ca   : > { %7992 = vmatpush3.msra.mxu1 %v10714_v60  ;;  %7927 = vmatprep.subr.mxu0 %v10985_v9  ;;  %v11020_v60 = vld [vmem:[%s11274_s5 + $0x200] sm:$0xff] }
 0x3cb   : > { %7993 = vmatprep.subr.mxu1 %v10722_v53  ;;  %7928 = vmatpush3.msra.mxu0 %v10992_v31  ;;  %v7114_v53 = vmul.f32 %v10556_v22, %v10556_v22  ;;  %v7115_v22 = vmul.f32 %v10760_v26, %v10760_v26  ;;  %v8102_v26 = vld [vmem:[%s11274_s5 + $0x68] sm:$0xff] }
 0x3cc   : > { %7994 = vmatpush3.msra.mxu1 %v10728_v28  ;;  %7929 = vmatprep.subr.mxu0 %v10999_v62  ;;  %v8097_v28 = vld [vmem:[%s11274_s5 + $0xf8] sm:$0xff] }
 0x3cd   : > { %7995 = vmatprep.subr.mxu1 %v10736_v18  ;;  %7930 = vmatpush3.msra.mxu0 %v11006_v49  ;;  %v8098_v18 = vld [vmem:[%s11274_s5 + $0x78] sm:$0xff] }
 0x3ce   : > { %7996 = vmatpush3.msra.mxu1 %v10742_v48  ;;  %7931 = vmatprep.subr.mxu0 %v11013_v56  ;;  %v8099_v48 = vld [vmem:[%s11274_s5 + $0xf0] sm:$0xff] }
 0x3cf   : > { %7997 = vmatprep.subr.mxu1 %v10748_v33  ;;  %7932 = vmatpush3.msra.mxu0 %v11020_v60  ;;  %v8100_v33 = vld [vmem:[%s11274_s5 + $0x70] sm:$0xff] }
 0x3d0   : > { %7998 = vmatpush3.msra.mxu1 %v10754_v52  ;;  %7036 = vmatmul.mubr.f32.vlgmr.msra.gmra.mxu0 %v10667_v0  ;;  %v8101_v52 = vld [vmem:[%s11274_s5 + $0xe8] sm:$0xff] }
 0x3d1   : > { %7936 = vmatprep.subr.mxu0 %v8097_v28  ;;  %7999 = vmatprep.subr.mxu1 %v10766_v61  ;;  %v11294_v61 = vmov 0.0   ;;  %v8110_v28 = vld [vmem:[%s11274_s5 + $0xd0] sm:$0xff] }
 0x3d2   : > { %7937 = vmatpush3.msra.mxu0 %v8098_v18  ;;  %7188 = vmatprep.mubr.f32.mxu0 %v7114_v53  ;;  %v8109_v53 = vld [vmem:[%s11274_s5 + $0x368] sm:$0xff]  ;;  %v8111_v18 = vld [vmem:[%s11274_s5 + $0x50] sm:$0xff] }
 0x3d3   : > { %8000 = vmatpush3.msra.mxu1 %v10772_v14  ;;  %7938 = vmatprep.subr.mxu0 %v8099_v48  ;;  %v8103_v14 = vld [vmem:[%s11274_s5 + $0x378] sm:$0xff]  ;;  %v8112_v48 = vld [vmem:[%s11274_s5 + $0x360] sm:$0xff] }
 0x3d4   : > { %8001 = vmatprep.subr.mxu1 %v10781_v27  ;;  %7939 = vmatpush3.msra.mxu0 %v8100_v33  ;;  %v8104_v27 = vld [vmem:[%s11274_s5 + $0xe0] sm:$0xff]  ;;  %v8114_v33 = vld [vmem:[%s11274_s5 + $0x48] sm:$0xff] }
 0x3d5   : > { %8002 = vmatpush3.msra.mxu1 %v10787_v38  ;;  %7940 = vmatprep.subr.mxu0 %v8101_v52  ;;  %v8105_v38 = vld [vmem:[%s11274_s5 + $0x60] sm:$0xff]  ;;  %v8115_v52 = vld [vmem:[%s11274_s5 + $0x358] sm:$0xff] }
 0x3d6   : > { %7259 = vmatmul.mubr.f32.vlgmr.msra.gmra.mxu1 %v7115_v22  ;;  %7334 = vmatprep.subr.mxu1 %v11294_v61  ;;  %v8113_v22 = vld [vmem:[%s11274_s5 + $0xc8] sm:$0xff] }
 0x3d7   : > { %7941 = vmatpush3.msra.mxu0 %v8102_v26  ;;  %7335 = vmatpush1.msra.mxu1 %v8103_v14  ;;  %v8117_v26 = vld [vmem:[%s11274_s5 + $0x40] sm:$0xff]  ;;  %v8118_v14 = vld [vmem:[%s11274_s5 + $0x350] sm:$0xff] }
 0x3d8   : > { %7818 = vmatprep.mubr.msk.f32.mxu1 %vm6827_vm4, %v7120_v55  ;;  %7942 = vmatprep.subr.mxu0 %v8104_v27  ;;  %v8116_v55 = vld [vmem:[%s11274_s5 + $0xc0] sm:$0xff]  ;;  %v8119_v27 = vld [vmem:[%s11274_s5 + $0xb8] sm:$0xff] }
 0x3d9   : > { %7336 = vmatprep.subr.mxu1 %v11294_v61  ;;  %7943 = vmatpush3.msra.mxu0 %v8105_v38  ;;  %v8120_v38 = vld [vmem:[%s11274_s5 + $0x38] sm:$0xff] }
 0x3da   : > { %7337 = vmatpush1.msra.mxu1 %v8106_v58  ;;  %7944 = vmatprep.subr.mxu0 %v8107_v3  ;;  %v8121_v58 = vld [vmem:[%s11274_s5 + $0x348] sm:$0xff]  ;;  %v8122_v3 = vld [vmem:[%s11274_s5 + $0xb0] sm:$0xff] }
 0x3db   : > { %7338 = vmatprep.subr.mxu1 %v11294_v61  ;;  %7945 = vmatpush3.msra.mxu0 %v8108_v47  ;;  %v8123_v47 = vld [vmem:[%s11274_s5 + $0x30] sm:$0xff] }
 0x3dc   : > { %7339 = vmatpush1.msra.mxu1 %v8109_v53  ;;  %7946 = vmatprep.subr.mxu0 %v8110_v28  ;;  %v8124_v53 = vld [vmem:[%s11274_s5 + $0x340] sm:$0xff]  ;;  %v8125_v28 = vld [vmem:[%s11274_s5 + $0xa8] sm:$0xff] }
 0x3dd   : > { %7340 = vmatprep.subr.mxu1 %v11294_v61  ;;  %7947 = vmatpush3.msra.mxu0 %v8111_v18  ;;  %v8126_v18 = vld [vmem:[%s11274_s5 + $0x28] sm:$0xff] }
 0x3de   : > { %7341 = vmatpush1.msra.mxu1 %v8112_v48  ;;  %7948 = vmatprep.subr.mxu0 %v8113_v22  ;;  %v8127_v48 = vld [vmem:[%s11274_s5 + $0x338] sm:$0xff]  ;;  %v8128_v22 = vld [vmem:[%s11274_s5 + $0xa0] sm:$0xff] }
 0x3df   : > { %7342 = vmatprep.subr.mxu1 %v11294_v61  ;;  %7949 = vmatpush3.msra.mxu0 %v8114_v33  ;;  %v8129_v33 = vld [vmem:[%s11274_s5 + $0x20] sm:$0xff] }
 0x3e0   : > { %7343 = vmatpush1.msra.mxu1 %v8115_v52  ;;  %7950 = vmatprep.subr.mxu0 %v8116_v55  ;;  %v8130_v52 = vld [vmem:[%s11274_s5 + $0x330] sm:$0xff]  ;;  %v8131_v55 = vld [vmem:[%s11274_s5 + $0x98] sm:$0xff] }
 0x3e1   : > { %7344 = vmatprep.subr.mxu1 %v11294_v61  ;;  %7951 = vmatpush3.msra.mxu0 %v8117_v26  ;;  %v8132_v26 = vld [vmem:[%s11274_s5 + $0x18] sm:$0xff] }
 0x3e2   : > { %7345 = vmatpush1.msra.mxu1 %v8118_v14  ;;  %7952 = vmatprep.subr.mxu0 %v8119_v27  ;;  %v8133_v14 = vld [vmem:[%s11274_s5 + $0x328] sm:$0xff]  ;;  %v8134_v27 = vld [vmem:[%s11274_s5 + $0x90] sm:$0xff] }
 0x3e3   : > { %7346 = vmatprep.subr.mxu1 %v11294_v61  ;;  %7953 = vmatpush3.msra.mxu0 %v8120_v38  ;;  %v8135_v38 = vld [vmem:[%s11274_s5 + $0x10] sm:$0xff] }
 0x3e4   : > { %7347 = vmatpush1.msra.mxu1 %v8121_v58  ;;  %7954 = vmatprep.subr.mxu0 %v8122_v3  ;;  %v8136_v58 = vld [vmem:[%s11274_s5 + $0x88] sm:$0xff] }
 0x3e5   : > { %7348 = vmatprep.subr.mxu1 %v11294_v61  ;;  %7955 = vmatpush3.msra.mxu0 %v8123_v47  ;;  %v8137_v3 = vld [vmem:[%s11274_s5 + $0x8] sm:$0xff]  ;;  %v7113_v47 = vmul.f32 %v10554_v35, %v10554_v35  ;;  %v7118_v35 = vmul.f32 %v10669_v30, %v10669_v30 }
 0x3e6   : > { %7349 = vmatpush1.msra.mxu1 %v8124_v53  ;;  %7956 = vmatprep.subr.mxu0 %v8125_v28  ;;  %v8139_v53 = vld [vmem:[%s11274_s5] sm:$0xff] }
 0x3e7   : > { %7350 = vmatprep.subr.mxu1 %v11294_v61  ;;  %7957 = vmatpush3.msra.mxu0 %v8126_v18 }
 0x3e8   : > { %7351 = vmatpush1.msra.mxu1 %v8127_v48  ;;  %7958 = vmatprep.subr.mxu0 %v8128_v22 }
 0x3e9   : > { %7352 = vmatprep.subr.mxu1 %v11294_v61  ;;  %7959 = vmatpush3.msra.mxu0 %v8129_v33 }
 0x3ea   : > { %7353 = vmatpush1.msra.mxu1 %v8130_v52  ;;  %7960 = vmatprep.subr.mxu0 %v8131_v55 }
 0x3eb   : > { %7354 = vmatprep.subr.mxu1 %v11294_v61  ;;  %7961 = vmatpush3.msra.mxu0 %v8132_v26 }
 0x3ec   : > { %7355 = vmatpush1.msra.mxu1 %v8133_v14  ;;  %7962 = vmatprep.subr.mxu0 %v8134_v27 }
 0x3ed   : > { %7356 = vmatprep.subr.mxu1 %v11294_v61  ;;  %7963 = vmatpush3.msra.mxu0 %v8135_v38 }
 0x3ee   : > { %7357 = vmatpush1.msra.mxu1 %v10375_v25  ;;  %7964 = vmatprep.subr.mxu0 %v8136_v58  ;;  %v8138_v25 = vld [vmem:[%s11274_s5 + $0x80] sm:$0xff] }
 0x3ef   : > { %7358 = vmatprep.subr.mxu1 %v11294_v61  ;;  %7965 = vmatpush3.msra.mxu0 %v8137_v3 }
 0x3f0   : > { %7359 = vmatpush1.msra.mxu1 %v10384_v51  ;;  %7966 = vmatprep.subr.mxu0 %v8138_v25  ;;  %v11295_v51 = vld [vmem:[#allocation3_spill] sm:$0xff] }
 0x3f1   : > { %7360 = vmatprep.subr.mxu1 %v11294_v61  ;;  %7967 = vmatpush3.msra.mxu0 %v8139_v53 }
 0x3f2   : > { %7361 = vmatpush1.msra.mxu1 %v10393_v36  ;;  %7189 = vmatmul.mubr.f32.vlgmr.msra.gmra.mxu0 %v7113_v47  ;;  %v11296_v36 = vld [vmem:[#allocation4_spill] sm:$0xff] }
 0x3f3   : > { %8006 = vmatprep.subr.mxu0 %v10796_v34  ;;  %7362 = vmatprep.subr.mxu1 %v11294_v61 }
 0x3f4   : > { %8007 = vmatpush3.msra.mxu0 %v10802_v6  ;;  %7328 = vmatprep.mubr.f32.mxu0 %v7118_v35 }
 0x3f5   : > { %7363 = vmatpush1.msra.mxu1 %v10400_v16  ;;  %8008 = vmatprep.subr.mxu0 %v10809_v63  ;;  %v11297_v16 = vld [vmem:[#allocation5_spill] sm:$0xff] }
 0x3f6   : > { %7364 = vmatprep.subr.mxu1 %v11294_v61  ;;  %8009 = vmatpush3.msra.mxu0 %v10816_v43 }
 0x3f7   : > { %7365 = vmatpush1.msra.mxu1 %v10407_v45  ;;  %8010 = vmatprep.subr.mxu0 %v10827_v21  ;;  %v11298_v45 = vld [vmem:[#allocation6_spill] sm:$0xff] }
 0x3f8   : > { %7372 = vmatprep.subr.mxu1 %v11294_v61  ;;  %8011 = vmatpush3.msra.mxu0 %v10833_v17 }
 0x3f9   : > { %7373 = vmatpush2.msra.mxu1 %v10414_v46  ;;  %8012 = vmatprep.subr.mxu0 %v10843_v19  ;;  %v11299_v46 = vld [vmem:[#allocation7_spill] sm:$0xff] }
 0x3fa   : > { %7374 = vmatprep.subr.mxu1 %v11294_v61  ;;  %8013 = vmatpush3.msra.mxu0 %v10850_v54 }
 0x3fb   : > { %7375 = vmatpush2.msra.mxu1 %v10421_v29  ;;  %8014 = vmatprep.subr.mxu0 %v10860_v50  ;;  %v7119_v29 = vmul.f32 %v10818_v57, %v10818_v57 }
 0x3fc   : > { %7376 = vmatprep.subr.mxu1 %v11294_v61  ;;  %8015 = vmatpush3.msra.mxu0 %v10867_v12 }
 0x3fd   : > { %7377 = vmatpush2.msra.mxu1 %v10428_v1  ;;  %8016 = vmatprep.subr.mxu0 %v10873_v2  ;;  %v7117_v1 = vmul.f32 %v10667_v0, %v10667_v0 }
 0x3fe   : > { %7378 = vmatprep.subr.mxu1 %v11294_v61  ;;  %8017 = vmatpush3.msra.mxu0 %v10880_v10 }
 0x3ff   : > { %7379 = vmatpush2.msra.mxu1 %v10435_v41  ;;  %8018 = vmatprep.subr.mxu0 %v10887_v8  ;;  %v11300_v41 = vld [vmem:[#allocation8_spill] sm:$0xff] }
 0x400   : > { %7380 = vmatprep.subr.mxu1 %v11294_v61  ;;  %8019 = vmatpush3.msra.mxu0 %v10894_v7 }
 0x401   : > { %7381 = vmatpush2.msra.mxu1 %v10442_v20  ;;  %8020 = vmatprep.subr.mxu0 %v10901_v4 }
 0x402   : > { %7382 = vmatprep.subr.mxu1 %v11294_v61  ;;  %8021 = vmatpush3.msra.mxu0 %v10908_v44 }
 0x403   : > { %7383 = vmatpush2.msra.mxu1 %v10449_v59  ;;  %8022 = vmatprep.subr.mxu0 %v10915_v37 }
 0x404   : > { %7384 = vmatprep.subr.mxu1 %v11294_v61  ;;  %8023 = vmatpush3.msra.mxu0 %v10922_v32 }
 0x405   : > { %7385 = vmatpush2.msra.mxu1 %v10456_v5  ;;  %8024 = vmatprep.subr.mxu0 %v10929_v24 }
 0x406   : > { %7386 = vmatprep.subr.mxu1 %v11294_v61  ;;  %8025 = vmatpush3.msra.mxu0 %v10936_v23 }
 0x407   : > { %7387 = vmatpush2.msra.mxu1 %v11295_v51  ;;  %8026 = vmatprep.subr.mxu0 %v10943_v11 }
 0x408   : > { %7388 = vmatprep.subr.mxu1 %v11294_v61  ;;  %8027 = vmatpush3.msra.mxu0 %v10950_v15 }
 0x409   : > { %7389 = vmatpush2.msra.mxu1 %v11296_v36  ;;  %8028 = vmatprep.subr.mxu0 %v10957_v39 }
 0x40a   : > { %7390 = vmatprep.subr.mxu1 %v11294_v61  ;;  %8029 = vmatpush3.msra.mxu0 %v10964_v13 }
 0x40b   : > { %7391 = vmatpush2.msra.mxu1 %v11297_v16  ;;  %8030 = vmatprep.subr.mxu0 %v10971_v40 }
 0x40c   : > { %7392 = vmatprep.subr.mxu1 %v11294_v61  ;;  %8031 = vmatpush3.msra.mxu0 %v10978_v42 }
 0x40d   : > { %7393 = vmatpush2.msra.mxu1 %v11298_v45  ;;  %8032 = vmatprep.subr.mxu0 %v10985_v9 }
 0x40e   : > { %7394 = vmatprep.subr.mxu1 %v11294_v61  ;;  %8033 = vmatpush3.msra.mxu0 %v10992_v31 }
 0x40f   : > { %7395 = vmatpush2.msra.mxu1 %v11299_v46  ;;  %8034 = vmatprep.subr.mxu0 %v10999_v62 }
 0x410   : > { %7396 = vmatprep.subr.mxu1 %v11294_v61  ;;  %8035 = vmatpush3.msra.mxu0 %v11006_v49 }
 0x411   : > { %7397 = vmatpush2.msra.mxu1 %v11300_v41  ;;  %8036 = vmatprep.subr.mxu0 %v11013_v56 }
 0x412   : > { %7399 = vmatmul.mubr.f32.vlgmr.msra.gmra.mxu1 %v7119_v29  ;;  %8037 = vmatpush3.msra.mxu0 %v11020_v60 }
 0x413   : > { %7329 = vmatmul.mubr.f32.vlgmr.msra.gmra.mxu0 %v7117_v1 }
 0x450   : > { %v7863_v5 = vpop.f32.mrf.mxu0 }
 0x452   : > { %v7864_v30 = vpop.f32.mrf.mxu0 }
 0x453   : > { %v7865_v57 = vadd.f32 %v7864_v30, %v7863_v5 }
 0x470   : > { %v7898_v34 = vpop.f32.mrf.mxu0 }
 0x472   : > { %v7899_v6 = vpop.f32.mrf.mxu0 }
 0x473   : > { %v7900_v63 = vadd.f32 %v7899_v6, %v7898_v34 }
 0x474   : > { %v7107_v20 = vpop.f32.mrf.mxu1 }
 0x475   : > { %v6968_v0 = vadd.f32 %v7900_v63, %v7865_v57 }
 0x476   : > { %v7109_v59 = vpop.f32.mrf.mxu1 }
 0x490   : > { %v7933_v43 = vpop.f32.mrf.mxu0 }
 0x492   : > { %v7934_v21 = vpop.f32.mrf.mxu0 }
 0x493   : > { %v7935_v17 = vadd.f32 %v7934_v21, %v7933_v43 }
 0x495   : > { %v7038_v19 = vadd.f32 %v7935_v17, %v6968_v0 }
 0x496   : > { %v8003_v12 = vpop.f32.mrf.mxu1 }
 0x497   : > { %v7108_v54 = vadd.f32 %v7107_v20, %v7038_v19 }
 0x498   : > { %v8004_v10 = vpop.f32.mrf.mxu1 }
 0x499   : > { %7112 = vst.msk [vmem:[%s322_s12] sm:$0xff] %vm3253_vm12, %v7108_v54  ;;  %v8005_v44 = vadd.f32 %v8004_v10, %v8003_v12 }
 0x4b2   : > { %v7968_v50 = vpop.f32.mrf.mxu0 }
 0x4b4   : > { %v7969_v2 = vpop.f32.mrf.mxu0 }
 0x4b5   : > { %v7970_v8 = vadd.f32 %v7969_v2, %v7968_v50 }
 0x4b7   : > { %v7261_v24 = vadd.f32 %v8005_v44, %v7970_v8 }
 0x4d2   : > { %v7400_v7 = vpop.f32.mrf.mxu1 }
 0x4d3   : > { %v8038_v4 = vpop.f32.mrf.mxu0 }
 0x4d4   : > { %v7402_v37 = vpop.f32.mrf.mxu1 }
 0x4d5   : > { %v8039_v32 = vpop.f32.mrf.mxu0 }
 0x4d6   : > { %v8040_v23 = vadd.f32 %v8039_v32, %v8038_v4 }
 0x4d8   : > { %v7331_v11 = vadd.f32 %v8040_v23, %v7261_v24 }
 0x4da   : > { %v7401_v15 = vadd.f32 %v7400_v7, %v7331_v11 }
 0x4dc   : > { %7404 = vst.msk [vmem:[%s326_s16] sm:$0xff] %vm3253_vm12, %v7401_v15 }
 0x4dd PF: > { %s19_s27 = sadd.s32 1, %s8152_s27  }
 0x4de   : > { %p16_p4 = scmp.ge.s32.totalorder %s19_s27, 4  }
 0x4e0   :  { %18 = sbr.rel (!%p16_p4) target bundleno = 1 (0x1), region = 124 }

</bundles_post_ra>
